<compile_context>
chip_gen: v6e
topology: v6e:2x2x1
jax: 0.10.0
libtpu: 0.0.40
codegen_flags: <defaults>
</compile_context>

<pallas_src>
import jax
import jax.numpy as jnp
from jax.experimental import pallas as pl
from jax.experimental.pallas import tpu as pltpu


def _fused_mlp_kernel(x_ref, w_ref, b_ref, o_ref):
    # x_ref: (B*C*H, W) f32   rows = (b, c, h) collapsed, lanes = w
    # w_ref: (N, C*H, W) bf16 expanded weight: w-value at (even h, even w), zero elsewhere
    # b_ref: (1, N)     f32
    # o_ref: (B, N)     f32
    B, N = o_ref.shape
    R, W = x_ref.shape
    rows_per_batch = R // B  # C*H

    xv = x_ref[...]  # read x once

    # 2x2 max pool, kept "uncompacted":
    #  row-pair max: compare each row with the next row (wrap rows land at odd h -> zero weight).
    x_down = jnp.concatenate([xv[1:, :], xv[:1, :]], axis=0)
    hmax = jnp.maximum(xv, x_down)                     # valid at even rows
    #  col-pair max: compare each lane with the next lane (wrap lane lands at odd w -> zero weight).
    h_right = jnp.concatenate([hmax[:, 1:], hmax[:, :1]], axis=1)
    pmax = jnp.maximum(hmax, h_right)                  # pooled value at (even row, even lane)

    # Per-batch views of the pooled slab.  Static slices at sublane multiples of 8 -> free views.
    pm_slabs = [pmax[b * rows_per_batch:(b + 1) * rows_per_batch, :] for b in range(B)]

    # Linear + bias + ReLU.  The expanded weight is zero except at (even row, even lane),
    # so multiply-and-reduce over the whole slab equals the flatten->Linear contraction.
    cols = []
    for n in range(N):
        wn = w_ref[n].astype(jnp.float32)              # load + cast ONCE per neuron (hoisted)
        col = []
        for b in range(B):
            s = jnp.sum(pm_slabs[b] * wn, axis=1, keepdims=True)   # (C*H, 1)  lane reduce
            col.append(jnp.sum(s, axis=0, keepdims=True))          # (1, 1)    sublane reduce
        cols.append(jnp.concatenate(col, axis=0))                  # (B, 1)
    acc = jnp.concatenate(cols, axis=1)                            # (B, N)
    o_ref[...] = jnp.maximum(acc + b_ref[...], 0.0).astype(o_ref.dtype)


def prepare_expanded_weight(w, C, Hp, Wp, dtype=jnp.bfloat16):
    """One-time weight prep (init-time): fold max-pool's even-row/even-lane selection and
    the PyTorch .view(B, -1) flatten order into the Linear weight."""
    K, N = w.shape
    assert K == C * Hp * Wp
    w3 = w.T.reshape(N, C, Hp, Wp)                       # w3[n, c, hp, wp] = w[c*Hp*Wp+hp*Wp+wp, n]
    wexp = jnp.zeros((N, C, 2 * Hp, 2 * Wp), w.dtype)
    wexp = wexp.at[:, :, 0::2, 0::2].set(w3)             # nonzero only at even (h, w)
    return wexp.reshape(N, C * 2 * Hp, 2 * Wp).astype(dtype)


@jax.jit
def mlp_forward(x, w_expanded, bias):
    """MaxPool2d(2,2) -> flatten -> Linear -> ReLU, as one fused Pallas kernel."""
    B, C, H, W = x.shape
    N = w_expanded.shape[0]
    xr = x.reshape(B * C * H, W)  # free view: collapses leading contiguous dims only
    return pl.pallas_call(
        _fused_mlp_kernel,
        out_shape=jax.ShapeDtypeStruct((B, N), x.dtype),
        grid=(1,),
        in_specs=[
            pl.BlockSpec((B * C * H, W), lambda i: (0, 0)),
            pl.BlockSpec((N, C * H, W), lambda i: (0, 0, 0)),
            pl.BlockSpec((1, N), lambda i: (0, 0)),
        ],
        out_specs=pl.BlockSpec((B, N), lambda i: (0, 0)),
        compiler_params=pltpu.CompilerParams(
            dimension_semantics=("arbitrary",),
            vmem_limit_bytes=32 * 1024 * 1024,
        ),
    )(xr, w_expanded, bias)


if __name__ == "__main__":
    key = jax.random.PRNGKey(0)
    kx, kw, kb = jax.random.split(key, 3)

    # Linear(in_features=19200) forces C*(H/2)*(W/2) == 19200; use C=3, H=W=160, B=2.
    B, C, H, W = 2, 3, 160, 160
    Hp, Wp = H // 2, W // 2
    in_features, out_features = C * Hp * Wp, 2
    assert in_features == 19200

    x = jax.random.normal(kx, (B, C, H, W), dtype=jnp.float32)

    # Deterministic init, mimicking nn.Linear's U(-1/sqrt(fan_in), 1/sqrt(fan_in)).
    bound = 1.0 / (in_features ** 0.5)
    w = jax.random.uniform(kw, (in_features, out_features), jnp.float32, -bound, bound)
    bias = jax.random.uniform(kb, (1, out_features), jnp.float32, -bound, bound)

    # Init-time layout prep of the Linear weight (analogous to storing it transposed).
    w_expanded = prepare_expanded_weight(w, C, Hp, Wp, dtype=jnp.bfloat16)

    out = jax.block_until_ready(mlp_forward(x, w_expanded, bias))

    # Pure-JAX reference (uses the original f32 weight).
    pooled_ref = jnp.max(x.reshape(B, C, Hp, 2, Wp, 2), axis=(3, 5))
    ref = jnp.maximum(pooled_ref.reshape(B, -1) @ w + bias, 0.0)
    assert out.shape == (B, out_features)
    assert jnp.allclose(out, ref, rtol=1e-2, atol=1e-2), (out, ref)

    # TODO(synk): the PyTorch forward's print(x.size()) debug statements are intentionally omitted.
    print("KERNEL_OK")
</pallas_src>

<mosaic_0001>
module attributes {stable_mosaic.version = 11 : i64} {
  func.func @_fused_mlp_kernel(%arg0: i32, %arg1: memref<960x160xf32, #tpu.memory_space<vmem>>, %arg2: memref<2x480x160xbf16, #tpu.memory_space<vmem>>, %arg3: memref<1x2xf32, #tpu.memory_space<vmem>>, %arg4: memref<2x2xf32, #tpu.memory_space<vmem>>) attributes {dimension_semantics = [#tpu.dimension_semantics<arbitrary>], iteration_bounds = array<i64: 1>, scalar_prefetch = 0 : i64, scratch_operands = 0 : i64, tpu.core_type = #tpu.core_type<tc>, window_params = [{pipeline_mode = #tpu.pipeline_mode<synchronous>, transform_indices = @transform_0, window_bounds = array<i64: 960, 160>}, {pipeline_mode = #tpu.pipeline_mode<synchronous>, transform_indices = @transform_1, window_bounds = array<i64: 2, 480, 160>}, {pipeline_mode = #tpu.pipeline_mode<synchronous>, transform_indices = @transform_2, window_bounds = array<i64: 1, 2>}, {pipeline_mode = #tpu.pipeline_mode<synchronous>, transform_indices = @transform_3, window_bounds = array<i64: 2, 2>}]} {
    %c0 = arith.constant 0 : index
    %c0_0 = arith.constant 0 : index
    %0 = vector.load %arg1[%c0, %c0_0] : memref<960x160xf32, #tpu.memory_space<vmem>>, vector<960x160xf32>
    %1 = vector.extract_strided_slice %0 {offsets = [1, 0], sizes = [959, 160], strides = [1, 1]} : vector<960x160xf32> to vector<959x160xf32>
    %2 = vector.extract_strided_slice %0 {offsets = [0, 0], sizes = [1, 160], strides = [1, 1]} : vector<960x160xf32> to vector<1x160xf32>
    %3 = tpu.concatenate %1, %2 in 0 : vector<959x160xf32>, vector<1x160xf32> -> vector<960x160xf32>
    %4 = arith.maximumf %0, %3 : vector<960x160xf32>
    %5 = vector.extract_strided_slice %4 {offsets = [0, 1], sizes = [960, 159], strides = [1, 1]} : vector<960x160xf32> to vector<960x159xf32>
    %6 = vector.extract_strided_slice %4 {offsets = [0, 0], sizes = [960, 1], strides = [1, 1]} : vector<960x160xf32> to vector<960x1xf32>
    %7 = tpu.concatenate %5, %6 in 1 : vector<960x159xf32>, vector<960x1xf32> -> vector<960x160xf32>
    %8 = arith.maximumf %4, %7 : vector<960x160xf32>
    %9 = vector.extract_strided_slice %8 {offsets = [0, 0], sizes = [480, 160], strides = [1, 1]} : vector<960x160xf32> to vector<480x160xf32>
    %10 = vector.extract_strided_slice %8 {offsets = [480, 0], sizes = [480, 160], strides = [1, 1]} : vector<960x160xf32> to vector<480x160xf32>
    %c0_1 = arith.constant 0 : index
    %c0_2 = arith.constant 0 : index
    %c0_3 = arith.constant 0 : index
    %11 = vector.load %arg2[%c0_1, %c0_2, %c0_3] : memref<2x480x160xbf16, #tpu.memory_space<vmem>>, vector<1x480x160xbf16>
    %12 = vector.shape_cast %11 : vector<1x480x160xbf16> to vector<480x160xbf16>
    %13 = arith.extf %12 : vector<480x160xbf16> to vector<480x160xf32>
    %14 = arith.mulf %9, %13 : vector<480x160xf32>
    %cst = arith.constant dense<0.000000e+00> : vector<480xf32>
    %15 = vector.multi_reduction <add>, %14, %cst [1] : vector<480x160xf32> to vector<480xf32>
    %16 = vector.shape_cast %15 : vector<480xf32> to vector<480x1xf32>
    %cst_4 = arith.constant dense<0.000000e+00> : vector<1xf32>
    %17 = vector.multi_reduction <add>, %16, %cst_4 [0] : vector<480x1xf32> to vector<1xf32>
    %18 = vector.shape_cast %17 : vector<1xf32> to vector<1x1xf32>
    %19 = arith.mulf %10, %13 : vector<480x160xf32>
    %cst_5 = arith.constant dense<0.000000e+00> : vector<480xf32>
    %20 = vector.multi_reduction <add>, %19, %cst_5 [1] : vector<480x160xf32> to vector<480xf32>
    %21 = vector.shape_cast %20 : vector<480xf32> to vector<480x1xf32>
    %cst_6 = arith.constant dense<0.000000e+00> : vector<1xf32>
    %22 = vector.multi_reduction <add>, %21, %cst_6 [0] : vector<480x1xf32> to vector<1xf32>
    %23 = vector.shape_cast %22 : vector<1xf32> to vector<1x1xf32>
    %24 = tpu.concatenate %18, %23 in 0 : vector<1x1xf32>, vector<1x1xf32> -> vector<2x1xf32>
    %c1 = arith.constant 1 : index
    %c0_7 = arith.constant 0 : index
    %c0_8 = arith.constant 0 : index
    %25 = vector.load %arg2[%c1, %c0_7, %c0_8] : memref<2x480x160xbf16, #tpu.memory_space<vmem>>, vector<1x480x160xbf16>
    %26 = vector.shape_cast %25 : vector<1x480x160xbf16> to vector<480x160xbf16>
    %27 = arith.extf %26 : vector<480x160xbf16> to vector<480x160xf32>
    %28 = arith.mulf %9, %27 : vector<480x160xf32>
    %cst_9 = arith.constant dense<0.000000e+00> : vector<480xf32>
    %29 = vector.multi_reduction <add>, %28, %cst_9 [1] : vector<480x160xf32> to vector<480xf32>
    %30 = vector.shape_cast %29 : vector<480xf32> to vector<480x1xf32>
    %cst_10 = arith.constant dense<0.000000e+00> : vector<1xf32>
    %31 = vector.multi_reduction <add>, %30, %cst_10 [0] : vector<480x1xf32> to vector<1xf32>
    %32 = vector.shape_cast %31 : vector<1xf32> to vector<1x1xf32>
    %33 = arith.mulf %10, %27 : vector<480x160xf32>
    %cst_11 = arith.constant dense<0.000000e+00> : vector<480xf32>
    %34 = vector.multi_reduction <add>, %33, %cst_11 [1] : vector<480x160xf32> to vector<480xf32>
    %35 = vector.shape_cast %34 : vector<480xf32> to vector<480x1xf32>
    %cst_12 = arith.constant dense<0.000000e+00> : vector<1xf32>
    %36 = vector.multi_reduction <add>, %35, %cst_12 [0] : vector<480x1xf32> to vector<1xf32>
    %37 = vector.shape_cast %36 : vector<1xf32> to vector<1x1xf32>
    %38 = tpu.concatenate %32, %37 in 0 : vector<1x1xf32>, vector<1x1xf32> -> vector<2x1xf32>
    %39 = tpu.concatenate %24, %38 in 1 : vector<2x1xf32>, vector<2x1xf32> -> vector<2x2xf32>
    %c0_13 = arith.constant 0 : index
    %c0_14 = arith.constant 0 : index
    %40 = vector.load %arg3[%c0_13, %c0_14] : memref<1x2xf32, #tpu.memory_space<vmem>>, vector<1x2xf32>
    %41 = vector.broadcast %40 : vector<1x2xf32> to vector<2x2xf32>
    %42 = arith.addf %39, %41 : vector<2x2xf32>
    %cst_15 = arith.constant 0.000000e+00 : f32
    %43 = vector.broadcast %cst_15 : f32 to vector<2x2xf32>
    %44 = arith.maximumf %42, %43 : vector<2x2xf32>
    %c0_16 = arith.constant 0 : index
    %c0_17 = arith.constant 0 : index
    %45 = vector.load %arg4[%c0_16, %c0_17] : memref<2x2xf32, #tpu.memory_space<vmem>>, vector<2x2xf32>
    tpu.vector_store %arg4[%c0_16, %c0_17], %44 {strides = array<i32>} : memref<2x2xf32, #tpu.memory_space<vmem>>, vector<2x2xf32>,
    return
  }
  func.func @transform_0(%arg0: i32) -> (i32, i32) {
    %c0_i32 = arith.constant 0 : i32
    %c0_i32_0 = arith.constant 0 : i32
    %c0_i32_1 = arith.constant 0 : i32
    return %c0_i32, %c0_i32_0 : i32, i32
  }
  func.func @transform_1(%arg0: i32) -> (i32, i32, i32) {
    %c0_i32 = arith.constant 0 : i32
    %c0_i32_0 = arith.constant 0 : i32
    %c0_i32_1 = arith.constant 0 : i32
    %c0_i32_2 = arith.constant 0 : i32
    return %c0_i32, %c0_i32_0, %c0_i32_1 : i32, i32, i32
  }
  func.func @transform_2(%arg0: i32) -> (i32, i32) {
    %c0_i32 = arith.constant 0 : i32
    %c0_i32_0 = arith.constant 0 : i32
    %c0_i32_1 = arith.constant 0 : i32
    return %c0_i32, %c0_i32_0 : i32, i32
  }
  func.func @transform_3(%arg0: i32) -> (i32, i32) {
    %c0_i32 = arith.constant 0 : i32
    %c0_i32_0 = arith.constant 0 : i32
    %c0_i32_1 = arith.constant 0 : i32
    return %c0_i32, %c0_i32_0 : i32, i32
  }
}

</mosaic_0001>

<bundles_post_ra>
// kernel: mlp_forward.1
= control target key start
LH: loop header
LB: loop body
LE: loop exit
PB: predicated region body
PF: predicated region fallthrough
CT: control target
= control target key end

     0   :  { %8 = vsyncpa [#allocation3], 0  ;;  %s12537_s0 = inlined_call_operand.hbm [shape: f32[960,160], index: 0, kind: input, shape index: {}]   ;;  %s12538_s1 = inlined_call_operand.vmem [shape: bf16[2,480,160], index: 1, kind: input, shape index: {}]   ;;  %s12539_s2 = inlined_call_operand.vmem [shape: f32[1,2], index: 2, kind: input, shape index: {}]   ;;  %s12540_s3 = inlined_call_operand.hbm [shape: f32[2,2], index: 3, kind: output, shape index: {}]  }
   0x1   :  { %9 = vsyncpa [#allocation4], 0  ;;  %s5581_s12 = smov [#allocation2]  }
   0x2   :  { %s15_s13 = sshll.u32 %s5581_s12, 4  ;;  %s16_s13 = int_to_ptr.vmem [resolvable:$true] %s15_s13 }
   0x3   :  { %s5545_s14 = scalar_lea.vmem %s16_s13, 30720  ;;  %p5550_p1 = scmp.lt.s32.totalorder %s16_s13, %s16_s13 }
   0x4   :  { %p5546_p0 = scmp.ne.s32.totalorder %s16_s13, %s5545_s14  ;;  %p5551_p2 = scmp.lt.s32.totalorder %s5545_s14, %s5545_s14 }
   0x6   :  { %p5552_p3 = por %p5551_p2, %p5550_p1 }
   0x8   :  { %p5553_p4 = pnand %p5552_p3, %p5546_p0 }
   0xa   :  { %5556 = shalt.err (!%p5553_p4)
}
   0xb   :  { %s5582_s15 = smov 256   ;;  %s5583_s16 = smov 16  }
   0xc   :  { %21 = dma.hbm_to_vmem [thread:$0]  %s12537_s0, 30720, %s16_s13, [#allocation3], %s5582_s15, %s5582_s15, %s5583_s16  }
   0xd   :  { %5577 = dma.done.wait [#allocation3], 30720  }
   0xe   :  { %5578 = vsyncadd [#allocation3], 4294936576  ;;  %v31_v0 = vld [vmem:[#allocation2 + $0x10] sm:$0xff]  ;;  %v33_v1 = vld [vmem:[#allocation2 + $0x20] sm:$0xff]  ;;  %vm509_vm0 = vcmask 1046528   ;;  %s5584_s0 = smov 127  }
   0xf   :  { %v5611_v2 = vld [vmem:[#allocation2] sm:$0xff]  ;;  %v511_v3 = vrot.slane %v31_v0, 1  ;;  %v516_v4 = vrot.slane %v33_v1, 1  ;;  %v32_v6 = vld [vmem:[#allocation2 + $0x18] sm:$0xff]  ;;  %v34_v7 = vld [vmem:[#allocation2 + $0x28] sm:$0xff]  ;;  %s5585_s19 = smov 31  }
  0x10   :  { %v12541_v5 = vrot.slane %v5611_v2, 1  ;;  %v5614_v8 = vld [vmem:[#allocation2 + $0x8] sm:$0xff]  ;;  %v514_v9 = vrot.slane %v32_v6, 1  ;;  %v518_v10 = vrot.slane %v34_v7, 1  ;;  %v36_v12 = vld [vmem:[#allocation2 + $0x38] sm:$0xff]  ;;  %v35_v13 = vld [vmem:[#allocation2 + $0x30] sm:$0xff] }
  0x11   :  { %v12542_v11 = vrot.slane %v5614_v8, 1  ;;  %v517_v14 = vsel %vm509_vm0, %v511_v3, %v516_v4  ;;  %v522_v16 = vrot.slane %v36_v12, 1  ;;  %v520_v17 = vrot.slane %v35_v13, 1  ;;  %v38_v22 = vld [vmem:[#allocation2 + $0x48] sm:$0xff]  ;;  %v37_v23 = vld [vmem:[#allocation2 + $0x40] sm:$0xff]  ;;  %v40_v30 = vld [vmem:[#allocation2 + $0x58] sm:$0xff] }
  0x12   :  { %v512_v15 = vsel %vm509_vm0, %v12541_v5, %v511_v3  ;;  %v5621_v18 = vmax.f32 %v31_v0, %v517_v14  ;;  %v519_v20 = vsel %vm509_vm0, %v514_v9, %v518_v10  ;;  %v526_v28 = vrot.slane %v38_v22, 1  ;;  %v39_v31 = vld [vmem:[#allocation2 + $0x50] sm:$0xff]  ;;  %v42_v38 = vld [vmem:[#allocation2 + $0x68] sm:$0xff]  ;;  %v41_v39 = vld [vmem:[#allocation2 + $0x60] sm:$0xff]  ;;  %s5587_s24 = smov [#allocation5]  }
  0x13   :  { %v5624_v19 = vmax.f32 %v5611_v2, %v512_v15  ;;  %v515_v21 = vsel %vm509_vm0, %v12542_v11, %v514_v9  ;;  %v5634_v24 = vmax.f32 %v32_v6, %v519_v20  ;;  %v523_v26 = vsel %vm509_vm0, %v518_v10, %v522_v16  ;;  %v44_v46 = vld [vmem:[#allocation2 + $0x78] sm:$0xff]  ;;  %v43_v47 = vld [vmem:[#allocation2 + $0x70] sm:$0xff]  ;;  %v46_v54 = vld [vmem:[#allocation2 + $0x88] sm:$0xff] }
  0x14   :  { %1716 = vrot.lane.b32.xlu1 %v5621_v18, %s5584_s0  ;;  %v5637_v25 = vmax.f32 %v5614_v8, %v515_v21  ;;  %v521_v27 = vsel %vm509_vm0, %v516_v4, %v520_v17  ;;  %v524_v29 = vrot.slane %v37_v23, 1  ;;  %v5645_v32 = vmax.f32 %v34_v7, %v523_v26  ;;  %v45_v55 = vld [vmem:[#allocation2 + $0x80] sm:$0xff]  ;;  %v48_v62 = vld [vmem:[#allocation2 + $0x98] sm:$0xff]  ;;  %v47_v63 = vld [vmem:[#allocation2 + $0x90] sm:$0xff] }
  0x15   :  { %1712 = vrot.lane.b32.xlu0 %v5624_v19, %s5584_s0  ;;  %13430 = vst [vmem:[#allocation8_spill] sm:$0xff] %v5634_v24  ;;  %v5647_v33 = vmax.f32 %v33_v1, %v521_v27  ;;  %v527_v34 = vsel %vm509_vm0, %v522_v16, %v526_v28  ;;  %v530_v36 = vrot.slane %v40_v30, 1  ;;  %v528_v37 = vrot.slane %v39_v31, 1  ;;  %v50_v9 = vld [vmem:[#allocation2 + $0xa8] sm:$0xff]  ;;  %v49_v10 = vld [vmem:[#allocation2 + $0xa0] sm:$0xff]  ;;  %v52_v20 = vld [vmem:[#allocation2 + $0xb8] sm:$0xff] }
  0x16   :  { %13431 = vst [vmem:[#allocation9_spill] sm:$0xff] %v5637_v25  ;;  %13432 = vst [vmem:[#allocation10_spill] sm:$0xff] %v5645_v32  ;;  %v525_v35 = vsel %vm509_vm0, %v520_v17, %v524_v29  ;;  %v5655_v40 = vmax.f32 %v36_v12, %v527_v34  ;;  %v534_v44 = vrot.slane %v42_v38, 1  ;;  %v532_v45 = vrot.slane %v41_v39, 1  ;;  %v51_v21 = vld [vmem:[#allocation2 + $0xb0] sm:$0xff]  ;;  %v77_v11 = vld [vmem:[#allocation2 + $0x180] sm:$0xff] }
  0x17   :  { %v5657_v41 = vmax.f32 %v35_v13, %v525_v35  ;;  %v531_v42 = vsel %vm509_vm0, %v526_v28, %v530_v36  ;;  %v529_v43 = vsel %vm509_vm0, %v524_v29, %v528_v37  ;;  %v538_v52 = vrot.slane %v44_v46, 1 }
  0x18   :  { %1718 = vrot.lane.b32.xlu1 %v5634_v24, %s5584_s0  ;;  %13433 = vst [vmem:[#allocation11_spill] sm:$0xff] %v5655_v40  ;;  %v5665_v48 = vmax.f32 %v38_v22, %v531_v42  ;;  %v5667_v49 = vmax.f32 %v37_v23, %v529_v43  ;;  %v535_v50 = vsel %vm509_vm0, %v530_v36, %v534_v44  ;;  %v536_v53 = vrot.slane %v43_v47, 1  ;;  %v56_v42 = vld [vmem:[#allocation2 + $0xd8] sm:$0xff]  ;;  %v55_v43 = vld [vmem:[#allocation2 + $0xd0] sm:$0xff]  ;;  %v102_v24 = vld [vmem:[#allocation2 + $0x248] sm:$0xff] }
  0x19   :  { %1714 = vrot.lane.b32.xlu0 %v5637_v25, %s5584_s0  ;;  %v533_v51 = vsel %vm509_vm0, %v528_v37, %v532_v45  ;;  %v5675_v56 = vmax.f32 %v40_v30, %v535_v50  ;;  %v539_v58 = vsel %vm509_vm0, %v534_v44, %v538_v52  ;;  %v542_v60 = vrot.slane %v46_v54, 1  ;;  %v54_v30 = vld [vmem:[#allocation2 + $0xc8] sm:$0xff] }
  0x1a   :  { %13434 = vst [vmem:[#allocation12_spill] sm:$0xff] %v5665_v48  ;;  %v5677_v57 = vmax.f32 %v39_v31, %v533_v51  ;;  %v537_v59 = vsel %vm509_vm0, %v532_v45, %v536_v53  ;;  %v540_v61 = vrot.slane %v45_v55, 1  ;;  %v5685_v0 = vmax.f32 %v42_v38, %v539_v58  ;;  %v53_v31 = vld [vmem:[#allocation2 + $0xc0] sm:$0xff] }
  0x1b   :  { %13435 = vst [vmem:[#allocation13_spill] sm:$0xff] %v5675_v56  ;;  %v5687_v1 = vmax.f32 %v41_v39, %v537_v59  ;;  %v543_v3 = vsel %vm509_vm0, %v538_v52, %v542_v60  ;;  %v546_v6 = vrot.slane %v48_v62, 1  ;;  %v544_v7 = vrot.slane %v47_v63, 1  ;;  %v58_v52 = vld [vmem:[#allocation2 + $0xe8] sm:$0xff] }
  0x1c   :  { %1722 = vrot.lane.b32.xlu1 %v5645_v32, %s5584_s0  ;;  %13436 = vst [vmem:[#allocation14_spill] sm:$0xff] %v5685_v0  ;;  %v541_v4 = vsel %vm509_vm0, %v536_v53, %v540_v61  ;;  %v5695_v12 = vmax.f32 %v44_v46, %v543_v3  ;;  %v550_v16 = vrot.slane %v50_v9, 1  ;;  %v548_v17 = vrot.slane %v49_v10, 1  ;;  %v57_v53 = vld [vmem:[#allocation2 + $0xe0] sm:$0xff]  ;;  %v100_v32 = vld [vmem:[#allocation2 + $0x238] sm:$0xff] }
  0x1d   :  { %1720 = vrot.lane.b32.xlu0 %v5647_v33, %s5584_s0  ;;  %v5697_v13 = vmax.f32 %v43_v47, %v541_v4  ;;  %v547_v14 = vsel %vm509_vm0, %v542_v60, %v546_v6  ;;  %v545_v15 = vsel %vm509_vm0, %v540_v61, %v544_v7  ;;  %v554_v28 = vrot.slane %v52_v20, 1 }
  0x1e   :  { %13437 = vst [vmem:[#allocation15_spill] sm:$0xff] %v5695_v12  ;;  %v5705_v22 = vmax.f32 %v46_v54, %v547_v14  ;;  %v5707_v23 = vmax.f32 %v45_v55, %v545_v15  ;;  %v551_v26 = vsel %vm509_vm0, %v546_v6, %v550_v16  ;;  %v549_v27 = vsel %vm509_vm0, %v544_v7, %v548_v17  ;;  %v62_v14 = vld [vmem:[#allocation2 + $0x108] sm:$0xff]  ;;  %v61_v15 = vld [vmem:[#allocation2 + $0x100] sm:$0xff] }
  0x1f   :  { %v552_v29 = vrot.slane %v51_v21, 1  ;;  %v5715_v34 = vmax.f32 %v48_v62, %v551_v26  ;;  %v5717_v35 = vmax.f32 %v47_v63, %v549_v27  ;;  %v555_v36 = vsel %vm509_vm0, %v550_v16, %v554_v28  ;;  %v60_v62 = vld [vmem:[#allocation2 + $0xf8] sm:$0xff]  ;;  %v59_v63 = vld [vmem:[#allocation2 + $0xf0] sm:$0xff] }
  0x20   :  { %1726 = vrot.lane.b32.xlu1 %v5655_v40, %s5584_s0  ;;  %13438 = vst [vmem:[#allocation16_spill] sm:$0xff] %v5705_v22  ;;  %13439 = vst [vmem:[#allocation17_spill] sm:$0xff] %v5707_v23  ;;  %v558_v38 = vrot.slane %v54_v30, 1  ;;  %v556_v39 = vrot.slane %v53_v31, 1  ;;  %v5725_v44 = vmax.f32 %v50_v9, %v555_v36  ;;  %v562_v50 = vrot.slane %v56_v42, 1  ;;  %v99_v40 = vld [vmem:[#allocation2 + $0x230] sm:$0xff] }
  0x21   :  { %1724 = vrot.lane.b32.xlu0 %v5657_v41, %s5584_s0  ;;  %13440 = vst [vmem:[#allocation18_spill] sm:$0xff] %v5715_v34  ;;  %13441 = vst [vmem:[#allocation19_spill] sm:$0xff] %v5717_v35  ;;  %v553_v37 = vsel %vm509_vm0, %v548_v17, %v552_v29  ;;  %v560_v51 = vrot.slane %v55_v43, 1  ;;  %v566_v60 = vrot.slane %v58_v52, 1  ;;  %v564_v61 = vrot.slane %v57_v53, 1 }
  0x22   :  { %13442 = vst [vmem:[#allocation20_spill] sm:$0xff] %v5725_v44  ;;  %v5727_v45 = vmax.f32 %v49_v10, %v553_v37  ;;  %v559_v46 = vsel %vm509_vm0, %v554_v28, %v558_v38  ;;  %v557_v47 = vsel %vm509_vm0, %v552_v29, %v556_v39  ;;  %v563_v58 = vsel %vm509_vm0, %v558_v38, %v562_v50  ;;  %v64_v28 = vld [vmem:[#allocation2 + $0x118] sm:$0xff]  ;;  %v63_v29 = vld [vmem:[#allocation2 + $0x110] sm:$0xff] }
  0x23   :  { %v5735_v54 = vmax.f32 %v52_v20, %v559_v46  ;;  %v5737_v55 = vmax.f32 %v51_v21, %v557_v47  ;;  %v561_v59 = vsel %vm509_vm0, %v556_v39, %v560_v51  ;;  %v5745_v3 = vmax.f32 %v54_v30, %v563_v58  ;;  %v68_v58 = vld [vmem:[#allocation2 + $0x138] sm:$0xff] }
  0x24   :  { %1730 = vrot.lane.b32.xlu1 %v5665_v48, %s5584_s0  ;;  %13443 = vst [vmem:[#allocation21_spill] sm:$0xff] %v5727_v45  ;;  %v5747_v4 = vmax.f32 %v53_v31, %v561_v59  ;;  %v567_v6 = vsel %vm509_vm0, %v562_v50, %v566_v60  ;;  %v565_v7 = vsel %vm509_vm0, %v560_v51, %v564_v61  ;;  %v570_v9 = vrot.slane %v60_v62, 1  ;;  %v67_v59 = vld [vmem:[#allocation2 + $0x130] sm:$0xff]  ;;  %v97_v48 = vld [vmem:[#allocation2 + $0x220] sm:$0xff] }
  0x25   :  { %1728 = vrot.lane.b32.xlu0 %v5667_v49, %s5584_s0  ;;  %13444 = vst [vmem:[#allocation22_spill] sm:$0xff] %v5735_v54  ;;  %13445 = vst [vmem:[#allocation23_spill] sm:$0xff] %v5737_v55  ;;  %v568_v10 = vrot.slane %v59_v63, 1  ;;  %v5755_v16 = vmax.f32 %v56_v42, %v567_v6  ;;  %v5757_v17 = vmax.f32 %v55_v43, %v565_v7  ;;  %v574_v26 = vrot.slane %v62_v14, 1  ;;  %v66_v42 = vld [vmem:[#allocation2 + $0x128] sm:$0xff]  ;;  %v65_v43 = vld [vmem:[#allocation2 + $0x120] sm:$0xff] }
  0x26   :  { %13446 = vst [vmem:[#allocation24_spill] sm:$0xff] %v5745_v3  ;;  %13447 = vst [vmem:[#allocation25_spill] sm:$0xff] %v5747_v4  ;;  %v571_v20 = vsel %vm509_vm0, %v566_v60, %v570_v9  ;;  %v572_v27 = vrot.slane %v61_v15, 1  ;;  %v578_v38 = vrot.slane %v64_v28, 1  ;;  %v576_v39 = vrot.slane %v63_v29, 1 }
  0x27   :  { %13448 = vst [vmem:[#allocation26_spill] sm:$0xff] %v5755_v16  ;;  %13449 = vst [vmem:[#allocation27_spill] sm:$0xff] %v5757_v17  ;;  %v569_v21 = vsel %vm509_vm0, %v564_v61, %v568_v10  ;;  %v5765_v30 = vmax.f32 %v58_v52, %v571_v20  ;;  %v575_v36 = vsel %vm509_vm0, %v570_v9, %v574_v26  ;;  %v582_v52 = vrot.slane %v66_v42, 1  ;;  %v70_v9 = vld [vmem:[#allocation2 + $0x148] sm:$0xff] }
  0x28   :  { %1734 = vrot.lane.b32.xlu1 %v5675_v56, %s5584_s0  ;;  %v5767_v31 = vmax.f32 %v57_v53, %v569_v21  ;;  %v573_v37 = vsel %vm509_vm0, %v568_v10, %v572_v27  ;;  %v5775_v46 = vmax.f32 %v60_v62, %v575_v36  ;;  %v579_v50 = vsel %vm509_vm0, %v574_v26, %v578_v38  ;;  %v69_v10 = vld [vmem:[#allocation2 + $0x140] sm:$0xff]  ;;  %v72_v36 = vld [vmem:[#allocation2 + $0x158] sm:$0xff] }
  0x29   :  { %1732 = vrot.lane.b32.xlu0 %v5677_v57, %s5584_s0  ;;  %13450 = vst [vmem:[#allocation28_spill] sm:$0xff] %v5765_v30  ;;  %v5777_v47 = vmax.f32 %v59_v63, %v573_v37  ;;  %v577_v51 = vsel %vm509_vm0, %v572_v27, %v576_v39  ;;  %v580_v53 = vrot.slane %v65_v43, 1  ;;  %v5785_v60 = vmax.f32 %v62_v14, %v579_v50  ;;  %v71_v37 = vld [vmem:[#allocation2 + $0x150] sm:$0xff] }
  0x2a   :  { %13451 = vst [vmem:[#allocation29_spill] sm:$0xff] %v5775_v46  ;;  %v5787_v61 = vmax.f32 %v61_v15, %v577_v51  ;;  %v583_v62 = vsel %vm509_vm0, %v578_v38, %v582_v52  ;;  %v586_v6 = vrot.slane %v68_v58, 1  ;;  %v584_v7 = vrot.slane %v67_v59, 1 }
  0x2b   :  { %13452 = vst [vmem:[#allocation30_spill] sm:$0xff] %v5785_v60  ;;  %v581_v63 = vsel %vm509_vm0, %v576_v39, %v580_v53  ;;  %v5795_v20 = vmax.f32 %v64_v28, %v583_v62  ;;  %v590_v26 = vrot.slane %v70_v9, 1  ;;  %v588_v27 = vrot.slane %v69_v10, 1 }
  0x2c   :  { %1738 = vrot.lane.b32.xlu1 %v5685_v0, %s5584_s0  ;;  %v5797_v14 = vmax.f32 %v63_v29, %v581_v63  ;;  %v587_v15 = vsel %vm509_vm0, %v582_v52, %v586_v6  ;;  %v585_v21 = vsel %vm509_vm0, %v580_v53, %v584_v7  ;;  %v594_v50 = vrot.slane %v72_v36, 1  ;;  %v74_v52 = vld [vmem:[#allocation2 + $0x168] sm:$0xff]  ;;  %v73_v53 = vld [vmem:[#allocation2 + $0x160] sm:$0xff] }
  0x2d   :  { %1736 = vrot.lane.b32.xlu0 %v5687_v1, %s5584_s0  ;;  %13453 = vst [vmem:[#allocation31_spill] sm:$0xff] %v5795_v20  ;;  %v5805_v38 = vmax.f32 %v66_v42, %v587_v15  ;;  %v5807_v28 = vmax.f32 %v65_v43, %v585_v21  ;;  %v591_v29 = vsel %vm509_vm0, %v586_v6, %v590_v26  ;;  %v592_v51 = vrot.slane %v71_v37, 1  ;;  %v76_v15 = vld [vmem:[#allocation2 + $0x178] sm:$0xff]  ;;  %v75_v21 = vld [vmem:[#allocation2 + $0x170] sm:$0xff] }
  0x2e   :  { %v589_v39 = vsel %vm509_vm0, %v584_v7, %v588_v27  ;;  %v5815_v62 = vmax.f32 %v68_v58, %v591_v29  ;;  %v595_v43 = vsel %vm509_vm0, %v590_v26, %v594_v50  ;;  %v598_v6 = vrot.slane %v74_v52, 1 }
  0x2f   :  { %13454 = vst [vmem:[#allocation32_spill] sm:$0xff] %v5805_v38  ;;  %v5817_v42 = vmax.f32 %v67_v59, %v589_v39  ;;  %v593_v63 = vsel %vm509_vm0, %v588_v27, %v592_v51  ;;  %v596_v7 = vrot.slane %v73_v53, 1  ;;  %v5825_v5 = vmax.f32 %v70_v9, %v595_v43  ;;  %v78_v39 = vld [vmem:[#allocation2 + $0x188] sm:$0xff] }
  0x30   :  { %1742 = vrot.lane.b32.xlu1 %v5695_v12, %s5584_s0  ;;  %13455 = vst [vmem:[#allocation33_spill] sm:$0xff] %v5815_v62  ;;  %v5827_v58 = vmax.f32 %v69_v10, %v593_v63  ;;  %v599_v59 = vsel %vm509_vm0, %v594_v50, %v598_v6  ;;  %v602_v29 = vrot.slane %v76_v15, 1  ;;  %v600_v27 = vrot.slane %v75_v21, 1  ;;  %v80_v63 = vld [vmem:[#allocation2 + $0x198] sm:$0xff]  ;;  %v98_v12 = vld [vmem:[#allocation2 + $0x228] sm:$0xff] }
  0x31   :  { %1740 = vrot.lane.b32.xlu0 %v5697_v13, %s5584_s0  ;;  %13456 = vst [vmem:[#allocation34_spill] sm:$0xff] %v5825_v5  ;;  %v597_v26 = vsel %vm509_vm0, %v592_v51, %v596_v7  ;;  %v606_v43 = vrot.slane %v78_v39, 1  ;;  %v604_v51 = vrot.slane %v77_v11, 1  ;;  %vm2192_vm1 = vcmask 1039360  }
  0x32   :  { %v5837_v9 = vmax.f32 %v71_v37, %v597_v26  ;;  %v603_v10 = vsel %vm509_vm0, %v598_v6, %v602_v29  ;;  %v601_v50 = vsel %vm509_vm0, %v596_v7, %v600_v27  ;;  %v82_v26 = vld [vmem:[#allocation2 + $0x1a8] sm:$0xff]  ;;  %vm2913_vm2 = vcmask 252928  }
  0x33   :  { %v607_v37 = vsel %vm509_vm0, %v602_v29, %v606_v43  ;;  %v605_v6 = vsel %vm509_vm0, %v600_v27, %v604_v51  ;;  %vm3574_vm3 = vcmask 261120   ;;  %vm4305_vm4 = vcmask 1040384  }
  0x34   :  { %1746 = vrot.lane.b32.xlu1 %v5705_v22, %s5584_s0  ;;  %v96_v22 = vld [vmem:[#allocation2 + $0x218] sm:$0xff]  ;;  %vm5343_vm5 = vcmask 7168   ;;  %vm5354_vm6 = vcmask 9216  }
  0x35   :  { %1744 = vrot.lane.b32.xlu0 %v5707_v23, %s5584_s0 }
  0x38   :  { %1750 = vrot.lane.b32.xlu1 %v5715_v34, %s5584_s0  ;;  %v95_v34 = vld [vmem:[#allocation2 + $0x210] sm:$0xff] }
  0x39   :  { %1748 = vrot.lane.b32.xlu0 %v5717_v35, %s5584_s0 }
  0x3c   :  { %1754 = vrot.lane.b32.xlu1 %v5725_v44, %s5584_s0  ;;  %v93_v44 = vld [vmem:[#allocation2 + $0x200] sm:$0xff] }
  0x3d   :  { %1752 = vrot.lane.b32.xlu0 %v5727_v45, %s5584_s0 }
  0x40   :  { %1758 = vrot.lane.b32.xlu1 %v5735_v54, %s5584_s0 }
  0x41   :  { %1756 = vrot.lane.b32.xlu0 %v5737_v55, %s5584_s0 }
  0x44   :  { %1762 = vrot.lane.b32.xlu1 %v5745_v3, %s5584_s0  ;;  %v89_v3 = vld [vmem:[#allocation2 + $0x1e0] sm:$0xff] }
  0x45   :  { %1760 = vrot.lane.b32.xlu0 %v5747_v4, %s5584_s0 }
  0x48   :  { %1766 = vrot.lane.b32.xlu1 %v5755_v16, %s5584_s0  ;;  %v91_v16 = vld [vmem:[#allocation2 + $0x1f0] sm:$0xff] }
  0x49   :  { %1764 = vrot.lane.b32.xlu0 %v5757_v17, %s5584_s0 }
  0x4c   :  { %1770 = vrot.lane.b32.xlu1 %v5765_v30, %s5584_s0  ;;  %v85_v30 = vld [vmem:[#allocation2 + $0x1c0] sm:$0xff] }
  0x4d   :  { %1768 = vrot.lane.b32.xlu0 %v5767_v31, %s5584_s0 }
  0x50   :  { %1774 = vrot.lane.b32.xlu1 %v5775_v46, %s5584_s0  ;;  %v87_v46 = vld [vmem:[#allocation2 + $0x1d0] sm:$0xff] }
  0x51   :  { %1772 = vrot.lane.b32.xlu0 %v5777_v47, %s5584_s0 }
  0x54   :  { %1778 = vrot.lane.b32.xlu1 %v5785_v60, %s5584_s0  ;;  %v81_v60 = vld [vmem:[#allocation2 + $0x1a0] sm:$0xff] }
  0x55   :  { %1776 = vrot.lane.b32.xlu0 %v5787_v61, %s5584_s0  ;;  %v612_v27 = vrot.slane %v81_v60, 1 }
  0x58   :  { %1782 = vrot.lane.b32.xlu1 %v5795_v20, %s5584_s0  ;;  %v83_v20 = vld [vmem:[#allocation2 + $0x1b0] sm:$0xff] }
  0x59   :  { %1780 = vrot.lane.b32.xlu0 %v5797_v14, %s5584_s0 }
  0x5c   :  { %1786 = vrot.lane.b32.xlu1 %v5805_v38, %s5584_s0  ;;  %v5835_v38 = vmax.f32 %v72_v36, %v599_v59  ;;  %v5847_v36 = vmax.f32 %v73_v53, %v601_v50  ;;  %v610_v59 = vrot.slane %v80_v63, 1  ;;  %v84_v50 = vld [vmem:[#allocation2 + $0x1b8] sm:$0xff] }
  0x5d   :  { %1784 = vrot.lane.b32.xlu0 %v5807_v28, %s5584_s0 }
  0x5e   :  { %13457 = vst [vmem:[#allocation35_spill] sm:$0xff] %v5835_v38  ;;  %13459 = vst [vmem:[#allocation37_spill] sm:$0xff] %v5847_v36  ;;  %v611_v53 = vsel %vm509_vm0, %v606_v43, %v610_v59 }
  0x60   :  { %1790 = vrot.lane.b32.xlu1 %v5815_v62, %s5584_s0  ;;  %v79_v62 = vld [vmem:[#allocation2 + $0x190] sm:$0xff] }
  0x61   :  { %1788 = vrot.lane.b32.xlu0 %v5817_v42, %s5584_s0  ;;  %v608_v7 = vrot.slane %v79_v62, 1 }
  0x63   :  { %v609_v29 = vsel %vm509_vm0, %v604_v51, %v608_v7  ;;  %v613_v43 = vsel %vm509_vm0, %v608_v7, %v612_v27  ;;  %v616_v51 = vrot.slane %v83_v20, 1  ;;  %v620_v7 = vrot.slane %v85_v30, 1 }
  0x64   :  { %1794 = vrot.lane.b32.xlu1 %v5825_v5, %s5584_s0  ;;  %v5845_v5 = vmax.f32 %v74_v52, %v603_v10  ;;  %v5857_v52 = vmax.f32 %v75_v21, %v605_v6  ;;  %v614_v10 = vrot.slane %v82_v26, 1  ;;  %v86_v6 = vld [vmem:[#allocation2 + $0x1c8] sm:$0xff] }
  0x65   :  { %1792 = vrot.lane.b32.xlu0 %v5827_v58, %s5584_s0 }
  0x66   :  { %13458 = vst [vmem:[#allocation36_spill] sm:$0xff] %v5845_v5  ;;  %13461 = vst [vmem:[#allocation39_spill] sm:$0xff] %v5857_v52  ;;  %v615_v21 = vsel %vm509_vm0, %v610_v59, %v614_v10  ;;  %v617_v59 = vsel %vm509_vm0, %v612_v27, %v616_v51  ;;  %v624_v27 = vrot.slane %v87_v46, 1 }
  0x68   :  { %1798 = vrot.lane.b32.xlu1 %v5835_v38, %s5584_s0  ;;  %v5855_v38 = vmax.f32 %v76_v15, %v607_v37  ;;  %v5867_v15 = vmax.f32 %v77_v11, %v609_v29  ;;  %v618_v37 = vrot.slane %v84_v50, 1  ;;  %v88_v29 = vld [vmem:[#allocation2 + $0x1d8] sm:$0xff] }
  0x69   :  { %1796 = vrot.lane.b32.xlu0 %v5837_v9, %s5584_s0 }
  0x6a   :  { %13460 = vst [vmem:[#allocation38_spill] sm:$0xff] %v5855_v38  ;;  %13463 = vst [vmem:[#allocation41_spill] sm:$0xff] %v5867_v15  ;;  %v619_v11 = vsel %vm509_vm0, %v614_v10, %v618_v37  ;;  %v621_v10 = vsel %vm509_vm0, %v616_v51, %v620_v7  ;;  %v628_v51 = vrot.slane %v89_v3, 1 }
  0x6c   :  { %1802 = vrot.lane.b32.xlu1 %v5845_v5, %s5584_s0  ;;  %v5865_v5 = vmax.f32 %v78_v39, %v611_v53  ;;  %v5877_v39 = vmax.f32 %v79_v62, %v613_v43  ;;  %v622_v53 = vrot.slane %v86_v6, 1  ;;  %v90_v43 = vld [vmem:[#allocation2 + $0x1e8] sm:$0xff] }
  0x6d   :  { %1800 = vrot.lane.b32.xlu0 %v5847_v36, %s5584_s0  ;;  %v110_v36 = vld [vmem:[#allocation2 + $0x288] sm:$0xff] }
  0x6e   :  { %13462 = vst [vmem:[#allocation40_spill] sm:$0xff] %v5865_v5  ;;  %13465 = vst [vmem:[#allocation43_spill] sm:$0xff] %v5877_v39  ;;  %v623_v62 = vsel %vm509_vm0, %v618_v37, %v622_v53  ;;  %v625_v37 = vsel %vm509_vm0, %v620_v7, %v624_v27  ;;  %v632_v7 = vrot.slane %v91_v16, 1 }
  0x70   :  { %1806 = vrot.lane.b32.xlu1 %v5855_v38, %s5584_s0  ;;  %v5875_v38 = vmax.f32 %v80_v63, %v615_v21  ;;  %v5887_v63 = vmax.f32 %v81_v60, %v617_v59  ;;  %v626_v21 = vrot.slane %v88_v29, 1  ;;  %v92_v59 = vld [vmem:[#allocation2 + $0x1f8] sm:$0xff] }
  0x71   :  { %1804 = vrot.lane.b32.xlu0 %v5857_v52, %s5584_s0  ;;  %v109_v52 = vld [vmem:[#allocation2 + $0x280] sm:$0xff] }
  0x72   :  { %13464 = vst [vmem:[#allocation42_spill] sm:$0xff] %v5875_v38  ;;  %13467 = vst [vmem:[#allocation45_spill] sm:$0xff] %v5887_v63  ;;  %v627_v60 = vsel %vm509_vm0, %v622_v53, %v626_v21  ;;  %v629_v53 = vsel %vm509_vm0, %v624_v27, %v628_v51  ;;  %v636_v27 = vrot.slane %v93_v44, 1 }
  0x74   :  { %1810 = vrot.lane.b32.xlu1 %v5865_v5, %s5584_s0  ;;  %v5885_v5 = vmax.f32 %v82_v26, %v619_v11  ;;  %v5897_v26 = vmax.f32 %v83_v20, %v621_v10  ;;  %v630_v11 = vrot.slane %v90_v43, 1  ;;  %v94_v10 = vld [vmem:[#allocation2 + $0x208] sm:$0xff] }
  0x75   :  { %1808 = vrot.lane.b32.xlu0 %v5867_v15, %s5584_s0  ;;  %v108_v15 = vld [vmem:[#allocation2 + $0x278] sm:$0xff] }
  0x76   :  { %13466 = vst [vmem:[#allocation44_spill] sm:$0xff] %v5885_v5  ;;  %13469 = vst [vmem:[#allocation47_spill] sm:$0xff] %v5897_v26  ;;  %v631_v20 = vsel %vm509_vm0, %v626_v21, %v630_v11  ;;  %v633_v21 = vsel %vm509_vm0, %v628_v51, %v632_v7  ;;  %v637_v51 = vsel %vm509_vm0, %v632_v7, %v636_v27 }
  0x78   :  { %1814 = vrot.lane.b32.xlu1 %v5875_v38, %s5584_s0  ;;  %v5895_v38 = vmax.f32 %v84_v50, %v623_v62  ;;  %v5907_v50 = vmax.f32 %v85_v30, %v625_v37  ;;  %v634_v62 = vrot.slane %v92_v59, 1 }
  0x79   :  { %1812 = vrot.lane.b32.xlu0 %v5877_v39, %s5584_s0  ;;  %v107_v39 = vld [vmem:[#allocation2 + $0x270] sm:$0xff] }
  0x7a   :  { %13468 = vst [vmem:[#allocation46_spill] sm:$0xff] %v5895_v38  ;;  %13471 = vst [vmem:[#allocation49_spill] sm:$0xff] %v5907_v50  ;;  %v635_v30 = vsel %vm509_vm0, %v630_v11, %v634_v62 }
  0x7c   :  { %1818 = vrot.lane.b32.xlu1 %v5885_v5, %s5584_s0  ;;  %v5905_v5 = vmax.f32 %v86_v6, %v627_v60  ;;  %v5917_v6 = vmax.f32 %v87_v46, %v629_v53  ;;  %v638_v60 = vrot.slane %v94_v10, 1  ;;  %v5929_v46 = vmax.f32 %v90_v43, %v635_v30 }
  0x7d   :  { %1816 = vrot.lane.b32.xlu0 %v5887_v63, %s5584_s0  ;;  %v640_v53 = vrot.slane %v95_v34, 1  ;;  %v5945_v43 = vmax.f32 %v91_v16, %v637_v51  ;;  %v646_v30 = vrot.slane %v98_v12, 1  ;;  %v648_v51 = vrot.slane %v99_v40, 1  ;;  %v106_v63 = vld [vmem:[#allocation2 + $0x268] sm:$0xff] }
  0x7e   :  { %13470 = vst [vmem:[#allocation48_spill] sm:$0xff] %v5905_v5  ;;  %13473 = vst [vmem:[#allocation51_spill] sm:$0xff] %v5917_v6  ;;  %v639_v11 = vsel %vm509_vm0, %v634_v62, %v638_v60 }
  0x7f   :  { %13474 = vst [vmem:[#allocation52_spill] sm:$0xff] %v5929_v46  ;;  %13479 = vst [vmem:[#allocation57_spill] sm:$0xff] %v5945_v43  ;;  %v641_v7 = vsel %vm509_vm0, %v636_v27, %v640_v53 }
  0x80   :  { %1822 = vrot.lane.b32.xlu1 %v5895_v38, %s5584_s0  ;;  %v5915_v38 = vmax.f32 %v88_v29, %v631_v20  ;;  %v5931_v29 = vmax.f32 %v89_v3, %v633_v21  ;;  %v642_v20 = vrot.slane %v96_v22, 1  ;;  %v5943_v3 = vmax.f32 %v92_v59, %v639_v11 }
  0x81   :  { %1820 = vrot.lane.b32.xlu0 %v5897_v26, %s5584_s0  ;;  %v644_v21 = vrot.slane %v97_v48, 1  ;;  %v5959_v59 = vmax.f32 %v93_v44, %v641_v7  ;;  %v650_v11 = vrot.slane %v100_v32, 1  ;;  %v105_v26 = vld [vmem:[#allocation2 + $0x260] sm:$0xff] }
  0x82   :  { %13472 = vst [vmem:[#allocation50_spill] sm:$0xff] %v5915_v38  ;;  %13475 = vst [vmem:[#allocation53_spill] sm:$0xff] %v5931_v29  ;;  %v643_v62 = vsel %vm509_vm0, %v638_v60, %v642_v20  ;;  %v647_v60 = vsel %vm509_vm0, %v642_v20, %v646_v30 }
  0x83   :  { %13478 = vst [vmem:[#allocation56_spill] sm:$0xff] %v5943_v3  ;;  %v5957_v16 = vmax.f32 %v94_v10, %v643_v62  ;;  %13482 = vst [vmem:[#allocation60_spill] sm:$0xff] %v5959_v59  ;;  %v645_v27 = vsel %vm509_vm0, %v640_v53, %v644_v21  ;;  %v5971_v44 = vmax.f32 %v96_v22, %v647_v60  ;;  %v654_v62 = vrot.slane %v102_v24, 1 }
  0x84   :  { %1826 = vrot.lane.b32.xlu1 %v5905_v5, %s5584_s0  ;;  %v5973_v10 = vmax.f32 %v95_v34, %v645_v27  ;;  %v651_v20 = vsel %vm509_vm0, %v646_v30, %v650_v11  ;;  %v649_v53 = vsel %vm509_vm0, %v644_v21, %v648_v51 }
  0x85   :  { %1824 = vrot.lane.b32.xlu0 %v5907_v50, %s5584_s0  ;;  %13481 = vst [vmem:[#allocation59_spill] sm:$0xff] %v5957_v16  ;;  %13484 = vst [vmem:[#allocation62_spill] sm:$0xff] %v5971_v44  ;;  %v104_v50 = vld [vmem:[#allocation2 + $0x258] sm:$0xff]  ;;  %v5985_v22 = vmax.f32 %v98_v12, %v651_v20  ;;  %v5987_v34 = vmax.f32 %v97_v48, %v649_v53  ;;  %v655_v30 = vsel %vm509_vm0, %v650_v11, %v654_v62 }
  0x86   :  { %v5921_v37 = vpop.permute.xlu1 %1716  ;;  %13485 = vst [vmem:[#allocation63_spill] sm:$0xff] %v5973_v10  ;;  %v658_v60 = vrot.slane %v104_v50, 1  ;;  %v5999_v48 = vmax.f32 %v100_v32, %v655_v30  ;;  %v662_v20 = vrot.slane %v106_v63, 1  ;;  %v660_v53 = vrot.slane %v105_v26, 1 }
  0x87   :  { %v5923_v54 = vpop.permute.xlu0 %1712  ;;  %13487 = vst [vmem:[#allocation65_spill] sm:$0xff] %v5985_v22  ;;  %13488 = vst [vmem:[#allocation66_spill] sm:$0xff] %v5987_v34  ;;  %v666_v30 = vrot.slane %v108_v15, 1 }
  0x88   :  { %1830 = vrot.lane.b32.xlu1 %v5915_v38, %s5584_s0  ;;  %13490 = vst [vmem:[#allocation68_spill] sm:$0xff] %v5999_v48  ;;  %v659_v11 = vsel %vm509_vm0, %v654_v62, %v658_v60  ;;  %v663_v62 = vsel %vm509_vm0, %v658_v60, %v662_v20 }
  0x89   :  { %1828 = vrot.lane.b32.xlu0 %v5917_v6, %s5584_s0  ;;  %v103_v6 = vld [vmem:[#allocation2 + $0x250] sm:$0xff]  ;;  %v6013_v32 = vmax.f32 %v102_v24, %v659_v11  ;;  %v6027_v24 = vmax.f32 %v104_v50, %v663_v62  ;;  %v667_v60 = vsel %vm509_vm0, %v662_v20, %v666_v30  ;;  %v670_v11 = vrot.slane %v110_v36, 1 }
  0x8a   :  { %v5935_v5 = vpop.permute.xlu1 %1718  ;;  %v656_v27 = vrot.slane %v103_v6, 1  ;;  %v6041_v50 = vmax.f32 %v106_v63, %v667_v60 }
  0x8b   :  { %13476 = vst [vmem:[#allocation54_spill] sm:$0xff] %v5935_v5  ;;  %v5937_v0 = vpop.permute.xlu0 %1714  ;;  %13493 = vst [vmem:[#allocation71_spill] sm:$0xff] %v6013_v32  ;;  %v671_v20 = vsel %vm509_vm0, %v666_v30, %v670_v11 }
  0x8c   :  { %13477 = vst [vmem:[#allocation55_spill] sm:$0xff] %v5937_v0  ;;  %1834 = vrot.lane.b32.xlu1 %v5929_v46, %s5584_s0  ;;  %13497 = vst [vmem:[#allocation75_spill] sm:$0xff] %v6027_v24  ;;  %v6055_v63 = vmax.f32 %v108_v15, %v671_v20 }
  0x8d   :  { %1832 = vrot.lane.b32.xlu0 %v5931_v29, %s5584_s0  ;;  %v101_v29 = vld [vmem:[#allocation2 + $0x240] sm:$0xff]  ;;  %13501 = vst [vmem:[#allocation79_spill] sm:$0xff] %v6041_v50 }
  0x8e   :  { %v5949_v38 = vpop.permute.xlu1 %1722  ;;  %v652_v7 = vrot.slane %v101_v29, 1  ;;  %13505 = vst [vmem:[#allocation83_spill] sm:$0xff] %v6055_v63 }
  0x8f   :  { %13480 = vst [vmem:[#allocation58_spill] sm:$0xff] %v5949_v38  ;;  %v5951_v56 = vpop.permute.xlu0 %1720 }
  0x90   :  { %1838 = vrot.lane.b32.xlu1 %v5943_v3, %s5584_s0  ;;  %v653_v21 = vsel %vm509_vm0, %v648_v51, %v652_v7  ;;  %v657_v51 = vsel %vm509_vm0, %v652_v7, %v656_v27  ;;  %v661_v7 = vsel %vm509_vm0, %v656_v27, %v660_v53 }
  0x91   :  { %1836 = vrot.lane.b32.xlu0 %v5945_v43, %s5584_s0  ;;  %v6001_v12 = vmax.f32 %v99_v40, %v653_v21  ;;  %v6015_v40 = vmax.f32 %v101_v29, %v657_v51  ;;  %v664_v21 = vrot.slane %v107_v39, 1  ;;  %v6029_v29 = vmax.f32 %v103_v6, %v661_v7 }
  0x92   :  { %v5963_v46 = vpop.permute.xlu1 %1726  ;;  %v668_v51 = vrot.slane %v109_v52, 1 }
  0x93   :  { %13483 = vst [vmem:[#allocation61_spill] sm:$0xff] %v5963_v46  ;;  %v5965_v25 = vpop.permute.xlu0 %1724  ;;  %13491 = vst [vmem:[#allocation69_spill] sm:$0xff] %v6001_v12  ;;  %v665_v27 = vsel %vm509_vm0, %v660_v53, %v664_v21 }
  0x94   :  { %1842 = vrot.lane.b32.xlu1 %v5957_v16, %s5584_s0  ;;  %13494 = vst [vmem:[#allocation72_spill] sm:$0xff] %v6015_v40  ;;  %13498 = vst [vmem:[#allocation76_spill] sm:$0xff] %v6029_v29  ;;  %v6043_v6 = vmax.f32 %v105_v26, %v665_v27  ;;  %v669_v53 = vsel %vm509_vm0, %v664_v21, %v668_v51 }
  0x95   :  { %1840 = vrot.lane.b32.xlu0 %v5959_v59, %s5584_s0  ;;  %v6057_v26 = vmax.f32 %v107_v39, %v669_v53 }
  0x96   :  { %v5977_v3 = vpop.permute.xlu1 %1730  ;;  %13502 = vst [vmem:[#allocation80_spill] sm:$0xff] %v6043_v6 }
  0x97   :  { %13486 = vst [vmem:[#allocation64_spill] sm:$0xff] %v5977_v3  ;;  %v5979_v43 = vpop.permute.xlu0 %1728  ;;  %13506 = vst [vmem:[#allocation84_spill] sm:$0xff] %v6057_v26 }
  0x98   :  { %1846 = vrot.lane.b32.xlu1 %v5971_v44, %s5584_s0 }
  0x99   :  { %1844 = vrot.lane.b32.xlu0 %v5973_v10, %s5584_s0 }
  0x9a   :  { %v5991_v16 = vpop.permute.xlu1 %1734 }
  0x9b   :  { %13489 = vst [vmem:[#allocation67_spill] sm:$0xff] %v5991_v16  ;;  %v5993_v59 = vpop.permute.xlu0 %1732 }
  0x9c   :  { %1850 = vrot.lane.b32.xlu1 %v5985_v22, %s5584_s0 }
  0x9d   :  { %1848 = vrot.lane.b32.xlu0 %v5987_v34, %s5584_s0 }
  0x9e   :  { %v6005_v44 = vpop.permute.xlu1 %1738 }
  0x9f   :  { %13492 = vst [vmem:[#allocation70_spill] sm:$0xff] %v6005_v44  ;;  %v6007_v10 = vpop.permute.xlu0 %1736 }
  0xa0   :  { %1854 = vrot.lane.b32.xlu1 %v5999_v48, %s5584_s0 }
  0xa1   :  { %1852 = vrot.lane.b32.xlu0 %v6001_v12, %s5584_s0 }
  0xa2   :  { %v6019_v22 = vpop.permute.xlu1 %1742 }
  0xa3   :  { %13495 = vst [vmem:[#allocation73_spill] sm:$0xff] %v6019_v22  ;;  %v6021_v34 = vpop.permute.xlu0 %1740  ;;  %v111_v22 = vld [vmem:[#allocation2 + $0x290] sm:$0xff] }
  0xa4   :  { %13496 = vst [vmem:[#allocation74_spill] sm:$0xff] %v6021_v34  ;;  %1858 = vrot.lane.b32.xlu1 %v6013_v32, %s5584_s0  ;;  %v112_v34 = vld [vmem:[#allocation2 + $0x298] sm:$0xff]  ;;  %v672_v7 = vrot.slane %v111_v22, 1 }
  0xa5   :  { %1856 = vrot.lane.b32.xlu0 %v6015_v40, %s5584_s0  ;;  %v674_v62 = vrot.slane %v112_v34, 1 }
  0xa6   :  { %v6033_v48 = vpop.permute.xlu1 %1746  ;;  %v673_v21 = vsel %vm509_vm0, %v668_v51, %v672_v7 }
  0xa7   :  { %13499 = vst [vmem:[#allocation77_spill] sm:$0xff] %v6033_v48  ;;  %v6035_v12 = vpop.permute.xlu0 %1744  ;;  %v113_v48 = vld [vmem:[#allocation2 + $0x2a0] sm:$0xff]  ;;  %v675_v30 = vsel %vm509_vm0, %v670_v11, %v674_v62  ;;  %v6071_v39 = vmax.f32 %v109_v52, %v673_v21 }
  0xa8   :  { %13500 = vst [vmem:[#allocation78_spill] sm:$0xff] %v6035_v12  ;;  %1862 = vrot.lane.b32.xlu1 %v6027_v24, %s5584_s0  ;;  %v114_v12 = vld [vmem:[#allocation2 + $0x2a8] sm:$0xff]  ;;  %v676_v27 = vrot.slane %v113_v48, 1  ;;  %v6069_v15 = vmax.f32 %v110_v36, %v675_v30 }
  0xa9   :  { %1860 = vrot.lane.b32.xlu0 %v6029_v29, %s5584_s0  ;;  %v678_v60 = vrot.slane %v114_v12, 1  ;;  %13510 = vst [vmem:[#allocation88_spill] sm:$0xff] %v6071_v39 }
  0xaa   :  { %v6047_v32 = vpop.permute.xlu1 %1750  ;;  %13509 = vst [vmem:[#allocation87_spill] sm:$0xff] %v6069_v15  ;;  %v677_v51 = vsel %vm509_vm0, %v672_v7, %v676_v27 }
  0xab   :  { %13503 = vst [vmem:[#allocation81_spill] sm:$0xff] %v6047_v32  ;;  %v6049_v40 = vpop.permute.xlu0 %1748  ;;  %v115_v32 = vld [vmem:[#allocation2 + $0x2b0] sm:$0xff]  ;;  %v679_v11 = vsel %vm509_vm0, %v674_v62, %v678_v60  ;;  %v6085_v52 = vmax.f32 %v111_v22, %v677_v51 }
  0xac   :  { %13504 = vst [vmem:[#allocation82_spill] sm:$0xff] %v6049_v40  ;;  %1866 = vrot.lane.b32.xlu1 %v6041_v50, %s5584_s0  ;;  %v116_v40 = vld [vmem:[#allocation2 + $0x2b8] sm:$0xff]  ;;  %v680_v53 = vrot.slane %v115_v32, 1  ;;  %v6083_v36 = vmax.f32 %v112_v34, %v679_v11 }
  0xad   :  { %1864 = vrot.lane.b32.xlu0 %v6043_v6, %s5584_s0  ;;  %v682_v20 = vrot.slane %v116_v40, 1  ;;  %13514 = vst [vmem:[#allocation92_spill] sm:$0xff] %v6085_v52 }
  0xae   :  { %v6061_v24 = vpop.permute.xlu1 %1754  ;;  %13513 = vst [vmem:[#allocation91_spill] sm:$0xff] %v6083_v36  ;;  %v681_v7 = vsel %vm509_vm0, %v676_v27, %v680_v53 }
  0xaf   :  { %13507 = vst [vmem:[#allocation85_spill] sm:$0xff] %v6061_v24  ;;  %v6063_v29 = vpop.permute.xlu0 %1752  ;;  %v117_v24 = vld [vmem:[#allocation2 + $0x2c0] sm:$0xff]  ;;  %v683_v62 = vsel %vm509_vm0, %v678_v60, %v682_v20  ;;  %v6099_v34 = vmax.f32 %v113_v48, %v681_v7 }
  0xb0   :  { %13508 = vst [vmem:[#allocation86_spill] sm:$0xff] %v6063_v29  ;;  %1870 = vrot.lane.b32.xlu1 %v6055_v63, %s5584_s0  ;;  %v118_v29 = vld [vmem:[#allocation2 + $0x2c8] sm:$0xff]  ;;  %v684_v21 = vrot.slane %v117_v24, 1  ;;  %v6097_v22 = vmax.f32 %v114_v12, %v683_v62 }
  0xb1   :  { %1868 = vrot.lane.b32.xlu0 %v6057_v26, %s5584_s0  ;;  %v686_v30 = vrot.slane %v118_v29, 1  ;;  %13518 = vst [vmem:[#allocation96_spill] sm:$0xff] %v6099_v34 }
  0xb2   :  { %v6075_v50 = vpop.permute.xlu1 %1758  ;;  %13517 = vst [vmem:[#allocation95_spill] sm:$0xff] %v6097_v22  ;;  %v685_v27 = vsel %vm509_vm0, %v680_v53, %v684_v21 }
  0xb3   :  { %13511 = vst [vmem:[#allocation89_spill] sm:$0xff] %v6075_v50  ;;  %v6077_v6 = vpop.permute.xlu0 %1756  ;;  %v119_v50 = vld [vmem:[#allocation2 + $0x2d0] sm:$0xff]  ;;  %v687_v60 = vsel %vm509_vm0, %v682_v20, %v686_v30  ;;  %v6113_v12 = vmax.f32 %v115_v32, %v685_v27 }
  0xb4   :  { %13512 = vst [vmem:[#allocation90_spill] sm:$0xff] %v6077_v6  ;;  %1874 = vrot.lane.b32.xlu1 %v6069_v15, %s5584_s0  ;;  %v120_v6 = vld [vmem:[#allocation2 + $0x2d8] sm:$0xff]  ;;  %v688_v51 = vrot.slane %v119_v50, 1  ;;  %v6111_v48 = vmax.f32 %v116_v40, %v687_v60 }
  0xb5   :  { %1872 = vrot.lane.b32.xlu0 %v6071_v39, %s5584_s0  ;;  %v690_v11 = vrot.slane %v120_v6, 1  ;;  %13522 = vst [vmem:[#allocation100_spill] sm:$0xff] %v6113_v12 }
  0xb6   :  { %v6089_v63 = vpop.permute.xlu1 %1762  ;;  %13521 = vst [vmem:[#allocation99_spill] sm:$0xff] %v6111_v48  ;;  %v689_v53 = vsel %vm509_vm0, %v684_v21, %v688_v51 }
  0xb7   :  { %13515 = vst [vmem:[#allocation93_spill] sm:$0xff] %v6089_v63  ;;  %v6091_v26 = vpop.permute.xlu0 %1760  ;;  %v121_v63 = vld [vmem:[#allocation2 + $0x2e0] sm:$0xff]  ;;  %v691_v20 = vsel %vm509_vm0, %v686_v30, %v690_v11  ;;  %v6127_v40 = vmax.f32 %v117_v24, %v689_v53 }
  0xb8   :  { %13516 = vst [vmem:[#allocation94_spill] sm:$0xff] %v6091_v26  ;;  %1878 = vrot.lane.b32.xlu1 %v6083_v36, %s5584_s0  ;;  %v122_v26 = vld [vmem:[#allocation2 + $0x2e8] sm:$0xff]  ;;  %v692_v7 = vrot.slane %v121_v63, 1  ;;  %v6125_v32 = vmax.f32 %v118_v29, %v691_v20 }
  0xb9   :  { %1876 = vrot.lane.b32.xlu0 %v6085_v52, %s5584_s0  ;;  %v694_v62 = vrot.slane %v122_v26, 1  ;;  %13526 = vst [vmem:[#allocation104_spill] sm:$0xff] %v6127_v40 }
  0xba   :  { %v6103_v15 = vpop.permute.xlu1 %1766  ;;  %13525 = vst [vmem:[#allocation103_spill] sm:$0xff] %v6125_v32  ;;  %v693_v21 = vsel %vm509_vm0, %v688_v51, %v692_v7 }
  0xbb   :  { %13519 = vst [vmem:[#allocation97_spill] sm:$0xff] %v6103_v15  ;;  %v6105_v39 = vpop.permute.xlu0 %1764  ;;  %v123_v15 = vld [vmem:[#allocation2 + $0x2f0] sm:$0xff]  ;;  %v695_v30 = vsel %vm509_vm0, %v690_v11, %v694_v62  ;;  %v6141_v29 = vmax.f32 %v119_v50, %v693_v21 }
  0xbc   :  { %13520 = vst [vmem:[#allocation98_spill] sm:$0xff] %v6105_v39  ;;  %1882 = vrot.lane.b32.xlu1 %v6097_v22, %s5584_s0  ;;  %v124_v39 = vld [vmem:[#allocation2 + $0x2f8] sm:$0xff]  ;;  %v696_v27 = vrot.slane %v123_v15, 1  ;;  %v6139_v24 = vmax.f32 %v120_v6, %v695_v30 }
  0xbd   :  { %1880 = vrot.lane.b32.xlu0 %v6099_v34, %s5584_s0  ;;  %v698_v60 = vrot.slane %v124_v39, 1  ;;  %13530 = vst [vmem:[#allocation108_spill] sm:$0xff] %v6141_v29 }
  0xbe   :  { %v6117_v36 = vpop.permute.xlu1 %1770  ;;  %13529 = vst [vmem:[#allocation107_spill] sm:$0xff] %v6139_v24  ;;  %v697_v51 = vsel %vm509_vm0, %v692_v7, %v696_v27 }
  0xbf   :  { %13523 = vst [vmem:[#allocation101_spill] sm:$0xff] %v6117_v36  ;;  %v6119_v52 = vpop.permute.xlu0 %1768  ;;  %v125_v36 = vld [vmem:[#allocation2 + $0x300] sm:$0xff]  ;;  %v699_v11 = vsel %vm509_vm0, %v694_v62, %v698_v60  ;;  %v6155_v6 = vmax.f32 %v121_v63, %v697_v51 }
  0xc0   :  { %13524 = vst [vmem:[#allocation102_spill] sm:$0xff] %v6119_v52  ;;  %1886 = vrot.lane.b32.xlu1 %v6111_v48, %s5584_s0  ;;  %v126_v52 = vld [vmem:[#allocation2 + $0x308] sm:$0xff]  ;;  %v700_v53 = vrot.slane %v125_v36, 1  ;;  %v6153_v50 = vmax.f32 %v122_v26, %v699_v11 }
  0xc1   :  { %1884 = vrot.lane.b32.xlu0 %v6113_v12, %s5584_s0  ;;  %v702_v20 = vrot.slane %v126_v52, 1  ;;  %13534 = vst [vmem:[#allocation112_spill] sm:$0xff] %v6155_v6 }
  0xc2   :  { %v6131_v22 = vpop.permute.xlu1 %1774  ;;  %13533 = vst [vmem:[#allocation111_spill] sm:$0xff] %v6153_v50  ;;  %v701_v7 = vsel %vm509_vm0, %v696_v27, %v700_v53 }
  0xc3   :  { %13527 = vst [vmem:[#allocation105_spill] sm:$0xff] %v6131_v22  ;;  %v6133_v34 = vpop.permute.xlu0 %1772  ;;  %v127_v22 = vld [vmem:[#allocation2 + $0x310] sm:$0xff]  ;;  %v703_v62 = vsel %vm509_vm0, %v698_v60, %v702_v20  ;;  %v6169_v26 = vmax.f32 %v123_v15, %v701_v7 }
  0xc4   :  { %13528 = vst [vmem:[#allocation106_spill] sm:$0xff] %v6133_v34  ;;  %1890 = vrot.lane.b32.xlu1 %v6125_v32, %s5584_s0  ;;  %v128_v34 = vld [vmem:[#allocation2 + $0x318] sm:$0xff]  ;;  %v704_v21 = vrot.slane %v127_v22, 1  ;;  %v6167_v63 = vmax.f32 %v124_v39, %v703_v62 }
  0xc5   :  { %1888 = vrot.lane.b32.xlu0 %v6127_v40, %s5584_s0  ;;  %v706_v30 = vrot.slane %v128_v34, 1  ;;  %13538 = vst [vmem:[#allocation116_spill] sm:$0xff] %v6169_v26 }
  0xc6   :  { %v6145_v48 = vpop.permute.xlu1 %1778  ;;  %13537 = vst [vmem:[#allocation115_spill] sm:$0xff] %v6167_v63  ;;  %v705_v27 = vsel %vm509_vm0, %v700_v53, %v704_v21 }
  0xc7   :  { %13531 = vst [vmem:[#allocation109_spill] sm:$0xff] %v6145_v48  ;;  %v6147_v12 = vpop.permute.xlu0 %1776  ;;  %v129_v48 = vld [vmem:[#allocation2 + $0x320] sm:$0xff]  ;;  %v707_v60 = vsel %vm509_vm0, %v702_v20, %v706_v30  ;;  %v6183_v39 = vmax.f32 %v125_v36, %v705_v27 }
  0xc8   :  { %13532 = vst [vmem:[#allocation110_spill] sm:$0xff] %v6147_v12  ;;  %1894 = vrot.lane.b32.xlu1 %v6139_v24, %s5584_s0  ;;  %v130_v12 = vld [vmem:[#allocation2 + $0x328] sm:$0xff]  ;;  %v708_v51 = vrot.slane %v129_v48, 1  ;;  %v6181_v15 = vmax.f32 %v126_v52, %v707_v60 }
  0xc9   :  { %1892 = vrot.lane.b32.xlu0 %v6141_v29, %s5584_s0  ;;  %v710_v11 = vrot.slane %v130_v12, 1  ;;  %13542 = vst [vmem:[#allocation120_spill] sm:$0xff] %v6183_v39 }
  0xca   :  { %v6159_v32 = vpop.permute.xlu1 %1782  ;;  %13541 = vst [vmem:[#allocation119_spill] sm:$0xff] %v6181_v15  ;;  %v709_v53 = vsel %vm509_vm0, %v704_v21, %v708_v51 }
  0xcb   :  { %13535 = vst [vmem:[#allocation113_spill] sm:$0xff] %v6159_v32  ;;  %v6161_v40 = vpop.permute.xlu0 %1780  ;;  %v131_v32 = vld [vmem:[#allocation2 + $0x330] sm:$0xff]  ;;  %v711_v20 = vsel %vm509_vm0, %v706_v30, %v710_v11  ;;  %v6197_v52 = vmax.f32 %v127_v22, %v709_v53 }
  0xcc   :  { %13536 = vst [vmem:[#allocation114_spill] sm:$0xff] %v6161_v40  ;;  %1898 = vrot.lane.b32.xlu1 %v6153_v50, %s5584_s0  ;;  %v132_v40 = vld [vmem:[#allocation2 + $0x338] sm:$0xff]  ;;  %v712_v7 = vrot.slane %v131_v32, 1  ;;  %v6195_v36 = vmax.f32 %v128_v34, %v711_v20 }
  0xcd   :  { %1896 = vrot.lane.b32.xlu0 %v6155_v6, %s5584_s0  ;;  %v714_v62 = vrot.slane %v132_v40, 1  ;;  %13546 = vst [vmem:[#allocation124_spill] sm:$0xff] %v6197_v52 }
  0xce   :  { %v6173_v24 = vpop.permute.xlu1 %1786  ;;  %13545 = vst [vmem:[#allocation123_spill] sm:$0xff] %v6195_v36  ;;  %v713_v21 = vsel %vm509_vm0, %v708_v51, %v712_v7 }
  0xcf   :  { %13539 = vst [vmem:[#allocation117_spill] sm:$0xff] %v6173_v24  ;;  %v6175_v29 = vpop.permute.xlu0 %1784  ;;  %v133_v24 = vld [vmem:[#allocation2 + $0x340] sm:$0xff]  ;;  %v715_v30 = vsel %vm509_vm0, %v710_v11, %v714_v62  ;;  %v6211_v34 = vmax.f32 %v129_v48, %v713_v21 }
  0xd0   :  { %13540 = vst [vmem:[#allocation118_spill] sm:$0xff] %v6175_v29  ;;  %1902 = vrot.lane.b32.xlu1 %v6167_v63, %s5584_s0  ;;  %v134_v29 = vld [vmem:[#allocation2 + $0x348] sm:$0xff]  ;;  %v716_v27 = vrot.slane %v133_v24, 1  ;;  %v6209_v22 = vmax.f32 %v130_v12, %v715_v30 }
  0xd1   :  { %1900 = vrot.lane.b32.xlu0 %v6169_v26, %s5584_s0  ;;  %v718_v60 = vrot.slane %v134_v29, 1  ;;  %13550 = vst [vmem:[#allocation128_spill] sm:$0xff] %v6211_v34 }
  0xd2   :  { %v6187_v50 = vpop.permute.xlu1 %1790  ;;  %13549 = vst [vmem:[#allocation127_spill] sm:$0xff] %v6209_v22  ;;  %v717_v51 = vsel %vm509_vm0, %v712_v7, %v716_v27 }
  0xd3   :  { %13543 = vst [vmem:[#allocation121_spill] sm:$0xff] %v6187_v50  ;;  %v6189_v6 = vpop.permute.xlu0 %1788  ;;  %v135_v50 = vld [vmem:[#allocation2 + $0x350] sm:$0xff]  ;;  %v719_v11 = vsel %vm509_vm0, %v714_v62, %v718_v60  ;;  %v6225_v12 = vmax.f32 %v131_v32, %v717_v51 }
  0xd4   :  { %13544 = vst [vmem:[#allocation122_spill] sm:$0xff] %v6189_v6  ;;  %1906 = vrot.lane.b32.xlu1 %v6181_v15, %s5584_s0  ;;  %v136_v6 = vld [vmem:[#allocation2 + $0x358] sm:$0xff]  ;;  %v720_v53 = vrot.slane %v135_v50, 1  ;;  %v6223_v48 = vmax.f32 %v132_v40, %v719_v11 }
  0xd5   :  { %1904 = vrot.lane.b32.xlu0 %v6183_v39, %s5584_s0  ;;  %v722_v20 = vrot.slane %v136_v6, 1  ;;  %13554 = vst [vmem:[#allocation132_spill] sm:$0xff] %v6225_v12 }
  0xd6   :  { %v6201_v63 = vpop.permute.xlu1 %1794  ;;  %13553 = vst [vmem:[#allocation131_spill] sm:$0xff] %v6223_v48  ;;  %v721_v7 = vsel %vm509_vm0, %v716_v27, %v720_v53 }
  0xd7   :  { %13547 = vst [vmem:[#allocation125_spill] sm:$0xff] %v6201_v63  ;;  %v6203_v26 = vpop.permute.xlu0 %1792  ;;  %v137_v63 = vld [vmem:[#allocation2 + $0x360] sm:$0xff]  ;;  %v723_v62 = vsel %vm509_vm0, %v718_v60, %v722_v20  ;;  %v6239_v40 = vmax.f32 %v133_v24, %v721_v7 }
  0xd8   :  { %13548 = vst [vmem:[#allocation126_spill] sm:$0xff] %v6203_v26  ;;  %1910 = vrot.lane.b32.xlu1 %v6195_v36, %s5584_s0  ;;  %v138_v26 = vld [vmem:[#allocation2 + $0x368] sm:$0xff]  ;;  %v724_v21 = vrot.slane %v137_v63, 1  ;;  %v6237_v32 = vmax.f32 %v134_v29, %v723_v62 }
  0xd9   :  { %1908 = vrot.lane.b32.xlu0 %v6197_v52, %s5584_s0  ;;  %v726_v30 = vrot.slane %v138_v26, 1  ;;  %13558 = vst [vmem:[#allocation136_spill] sm:$0xff] %v6239_v40 }
  0xda   :  { %v6215_v15 = vpop.permute.xlu1 %1798  ;;  %13557 = vst [vmem:[#allocation135_spill] sm:$0xff] %v6237_v32  ;;  %v725_v27 = vsel %vm509_vm0, %v720_v53, %v724_v21 }
  0xdb   :  { %13551 = vst [vmem:[#allocation129_spill] sm:$0xff] %v6215_v15  ;;  %v6217_v39 = vpop.permute.xlu0 %1796  ;;  %v139_v15 = vld [vmem:[#allocation2 + $0x370] sm:$0xff]  ;;  %v727_v60 = vsel %vm509_vm0, %v722_v20, %v726_v30  ;;  %v6253_v29 = vmax.f32 %v135_v50, %v725_v27 }
  0xdc   :  { %13552 = vst [vmem:[#allocation130_spill] sm:$0xff] %v6217_v39  ;;  %1914 = vrot.lane.b32.xlu1 %v6209_v22, %s5584_s0  ;;  %v140_v39 = vld [vmem:[#allocation2 + $0x378] sm:$0xff]  ;;  %v728_v51 = vrot.slane %v139_v15, 1  ;;  %v6251_v24 = vmax.f32 %v136_v6, %v727_v60 }
  0xdd   :  { %1912 = vrot.lane.b32.xlu0 %v6211_v34, %s5584_s0  ;;  %v730_v11 = vrot.slane %v140_v39, 1  ;;  %13562 = vst [vmem:[#allocation140_spill] sm:$0xff] %v6253_v29 }
  0xde   :  { %v6229_v36 = vpop.permute.xlu1 %1802  ;;  %13561 = vst [vmem:[#allocation139_spill] sm:$0xff] %v6251_v24  ;;  %v729_v53 = vsel %vm509_vm0, %v724_v21, %v728_v51 }
  0xdf   :  { %13555 = vst [vmem:[#allocation133_spill] sm:$0xff] %v6229_v36  ;;  %v6231_v52 = vpop.permute.xlu0 %1800  ;;  %v141_v36 = vld [vmem:[#allocation2 + $0x380] sm:$0xff]  ;;  %v731_v20 = vsel %vm509_vm0, %v726_v30, %v730_v11  ;;  %v6267_v6 = vmax.f32 %v137_v63, %v729_v53 }
  0xe0   :  { %13556 = vst [vmem:[#allocation134_spill] sm:$0xff] %v6231_v52  ;;  %1918 = vrot.lane.b32.xlu1 %v6223_v48, %s5584_s0  ;;  %v142_v52 = vld [vmem:[#allocation2 + $0x388] sm:$0xff]  ;;  %v732_v7 = vrot.slane %v141_v36, 1  ;;  %v6265_v50 = vmax.f32 %v138_v26, %v731_v20 }
  0xe1   :  { %1916 = vrot.lane.b32.xlu0 %v6225_v12, %s5584_s0  ;;  %v734_v62 = vrot.slane %v142_v52, 1  ;;  %13566 = vst [vmem:[#allocation144_spill] sm:$0xff] %v6267_v6 }
  0xe2   :  { %v6243_v22 = vpop.permute.xlu1 %1806  ;;  %13565 = vst [vmem:[#allocation143_spill] sm:$0xff] %v6265_v50  ;;  %v733_v21 = vsel %vm509_vm0, %v728_v51, %v732_v7 }
  0xe3   :  { %13559 = vst [vmem:[#allocation137_spill] sm:$0xff] %v6243_v22  ;;  %v6245_v34 = vpop.permute.xlu0 %1804  ;;  %v143_v22 = vld [vmem:[#allocation2 + $0x390] sm:$0xff]  ;;  %v735_v30 = vsel %vm509_vm0, %v730_v11, %v734_v62  ;;  %v6281_v26 = vmax.f32 %v139_v15, %v733_v21 }
  0xe4   :  { %13560 = vst [vmem:[#allocation138_spill] sm:$0xff] %v6245_v34  ;;  %1922 = vrot.lane.b32.xlu1 %v6237_v32, %s5584_s0  ;;  %v144_v34 = vld [vmem:[#allocation2 + $0x398] sm:$0xff]  ;;  %v736_v27 = vrot.slane %v143_v22, 1  ;;  %v6279_v63 = vmax.f32 %v140_v39, %v735_v30 }
  0xe5   :  { %1920 = vrot.lane.b32.xlu0 %v6239_v40, %s5584_s0  ;;  %v738_v60 = vrot.slane %v144_v34, 1  ;;  %13570 = vst [vmem:[#allocation148_spill] sm:$0xff] %v6281_v26 }
  0xe6   :  { %v6257_v48 = vpop.permute.xlu1 %1810  ;;  %13569 = vst [vmem:[#allocation147_spill] sm:$0xff] %v6279_v63  ;;  %v737_v51 = vsel %vm509_vm0, %v732_v7, %v736_v27 }
  0xe7   :  { %13563 = vst [vmem:[#allocation141_spill] sm:$0xff] %v6257_v48  ;;  %v6259_v12 = vpop.permute.xlu0 %1808  ;;  %v145_v48 = vld [vmem:[#allocation2 + $0x3a0] sm:$0xff]  ;;  %v739_v11 = vsel %vm509_vm0, %v734_v62, %v738_v60  ;;  %v6295_v39 = vmax.f32 %v141_v36, %v737_v51 }
  0xe8   :  { %13564 = vst [vmem:[#allocation142_spill] sm:$0xff] %v6259_v12  ;;  %1926 = vrot.lane.b32.xlu1 %v6251_v24, %s5584_s0  ;;  %v146_v12 = vld [vmem:[#allocation2 + $0x3a8] sm:$0xff]  ;;  %v740_v53 = vrot.slane %v145_v48, 1  ;;  %v6293_v15 = vmax.f32 %v142_v52, %v739_v11 }
  0xe9   :  { %1924 = vrot.lane.b32.xlu0 %v6253_v29, %s5584_s0  ;;  %v742_v20 = vrot.slane %v146_v12, 1  ;;  %13574 = vst [vmem:[#allocation152_spill] sm:$0xff] %v6295_v39 }
  0xea   :  { %v6271_v32 = vpop.permute.xlu1 %1814  ;;  %13573 = vst [vmem:[#allocation151_spill] sm:$0xff] %v6293_v15  ;;  %v741_v7 = vsel %vm509_vm0, %v736_v27, %v740_v53 }
  0xeb   :  { %13567 = vst [vmem:[#allocation145_spill] sm:$0xff] %v6271_v32  ;;  %v6273_v40 = vpop.permute.xlu0 %1812  ;;  %v147_v32 = vld [vmem:[#allocation2 + $0x3b0] sm:$0xff]  ;;  %v743_v62 = vsel %vm509_vm0, %v738_v60, %v742_v20  ;;  %v6309_v52 = vmax.f32 %v143_v22, %v741_v7 }
  0xec   :  { %13568 = vst [vmem:[#allocation146_spill] sm:$0xff] %v6273_v40  ;;  %1930 = vrot.lane.b32.xlu1 %v6265_v50, %s5584_s0  ;;  %v148_v40 = vld [vmem:[#allocation2 + $0x3b8] sm:$0xff]  ;;  %v744_v21 = vrot.slane %v147_v32, 1  ;;  %v6307_v36 = vmax.f32 %v144_v34, %v743_v62 }
  0xed   :  { %1928 = vrot.lane.b32.xlu0 %v6267_v6, %s5584_s0  ;;  %v746_v30 = vrot.slane %v148_v40, 1  ;;  %13578 = vst [vmem:[#allocation156_spill] sm:$0xff] %v6309_v52 }
  0xee   :  { %v6285_v24 = vpop.permute.xlu1 %1818  ;;  %13577 = vst [vmem:[#allocation155_spill] sm:$0xff] %v6307_v36  ;;  %v745_v27 = vsel %vm509_vm0, %v740_v53, %v744_v21 }
  0xef   :  { %13571 = vst [vmem:[#allocation149_spill] sm:$0xff] %v6285_v24  ;;  %v6287_v29 = vpop.permute.xlu0 %1816  ;;  %v149_v24 = vld [vmem:[#allocation2 + $0x3c0] sm:$0xff]  ;;  %v747_v60 = vsel %vm509_vm0, %v742_v20, %v746_v30  ;;  %v6323_v34 = vmax.f32 %v145_v48, %v745_v27 }
  0xf0   :  { %13572 = vst [vmem:[#allocation150_spill] sm:$0xff] %v6287_v29  ;;  %1934 = vrot.lane.b32.xlu1 %v6279_v63, %s5584_s0  ;;  %v150_v29 = vld [vmem:[#allocation2 + $0x3c8] sm:$0xff]  ;;  %v748_v51 = vrot.slane %v149_v24, 1  ;;  %v6321_v22 = vmax.f32 %v146_v12, %v747_v60 }
  0xf1   :  { %1932 = vrot.lane.b32.xlu0 %v6281_v26, %s5584_s0  ;;  %v750_v11 = vrot.slane %v150_v29, 1  ;;  %13582 = vst [vmem:[#allocation160_spill] sm:$0xff] %v6323_v34 }
  0xf2   :  { %v6299_v50 = vpop.permute.xlu1 %1822  ;;  %13581 = vst [vmem:[#allocation159_spill] sm:$0xff] %v6321_v22  ;;  %v749_v53 = vsel %vm509_vm0, %v744_v21, %v748_v51 }
  0xf3   :  { %13575 = vst [vmem:[#allocation153_spill] sm:$0xff] %v6299_v50  ;;  %v6301_v6 = vpop.permute.xlu0 %1820  ;;  %v151_v50 = vld [vmem:[#allocation2 + $0x3d0] sm:$0xff]  ;;  %v751_v20 = vsel %vm509_vm0, %v746_v30, %v750_v11  ;;  %v6337_v12 = vmax.f32 %v147_v32, %v749_v53 }
  0xf4   :  { %13576 = vst [vmem:[#allocation154_spill] sm:$0xff] %v6301_v6  ;;  %1938 = vrot.lane.b32.xlu1 %v6293_v15, %s5584_s0  ;;  %v152_v6 = vld [vmem:[#allocation2 + $0x3d8] sm:$0xff]  ;;  %v752_v7 = vrot.slane %v151_v50, 1  ;;  %v6335_v48 = vmax.f32 %v148_v40, %v751_v20 }
  0xf5   :  { %1936 = vrot.lane.b32.xlu0 %v6295_v39, %s5584_s0  ;;  %v754_v62 = vrot.slane %v152_v6, 1  ;;  %13586 = vst [vmem:[#allocation164_spill] sm:$0xff] %v6337_v12 }
  0xf6   :  { %v6313_v63 = vpop.permute.xlu1 %1826  ;;  %13585 = vst [vmem:[#allocation163_spill] sm:$0xff] %v6335_v48  ;;  %v753_v21 = vsel %vm509_vm0, %v748_v51, %v752_v7 }
  0xf7   :  { %13579 = vst [vmem:[#allocation157_spill] sm:$0xff] %v6313_v63  ;;  %v6315_v26 = vpop.permute.xlu0 %1824  ;;  %v153_v63 = vld [vmem:[#allocation2 + $0x3e0] sm:$0xff]  ;;  %v755_v30 = vsel %vm509_vm0, %v750_v11, %v754_v62  ;;  %v6351_v40 = vmax.f32 %v149_v24, %v753_v21 }
  0xf8   :  { %13580 = vst [vmem:[#allocation158_spill] sm:$0xff] %v6315_v26  ;;  %1942 = vrot.lane.b32.xlu1 %v6307_v36, %s5584_s0  ;;  %v154_v26 = vld [vmem:[#allocation2 + $0x3e8] sm:$0xff]  ;;  %v756_v27 = vrot.slane %v153_v63, 1  ;;  %v6349_v32 = vmax.f32 %v150_v29, %v755_v30 }
  0xf9   :  { %1940 = vrot.lane.b32.xlu0 %v6309_v52, %s5584_s0  ;;  %v758_v60 = vrot.slane %v154_v26, 1  ;;  %13590 = vst [vmem:[#allocation168_spill] sm:$0xff] %v6351_v40 }
  0xfa   :  { %v6327_v15 = vpop.permute.xlu1 %1830  ;;  %13589 = vst [vmem:[#allocation167_spill] sm:$0xff] %v6349_v32  ;;  %v757_v51 = vsel %vm509_vm0, %v752_v7, %v756_v27 }
  0xfb   :  { %13583 = vst [vmem:[#allocation161_spill] sm:$0xff] %v6327_v15  ;;  %v6329_v39 = vpop.permute.xlu0 %1828  ;;  %v155_v15 = vld [vmem:[#allocation2 + $0x3f0] sm:$0xff]  ;;  %v759_v11 = vsel %vm509_vm0, %v754_v62, %v758_v60  ;;  %v6365_v29 = vmax.f32 %v151_v50, %v757_v51 }
  0xfc   :  { %13584 = vst [vmem:[#allocation162_spill] sm:$0xff] %v6329_v39  ;;  %1946 = vrot.lane.b32.xlu1 %v6321_v22, %s5584_s0  ;;  %v156_v39 = vld [vmem:[#allocation2 + $0x3f8] sm:$0xff]  ;;  %v760_v53 = vrot.slane %v155_v15, 1  ;;  %v6363_v24 = vmax.f32 %v152_v6, %v759_v11 }
  0xfd   :  { %1944 = vrot.lane.b32.xlu0 %v6323_v34, %s5584_s0  ;;  %v762_v20 = vrot.slane %v156_v39, 1  ;;  %13594 = vst [vmem:[#allocation172_spill] sm:$0xff] %v6365_v29 }
  0xfe   :  { %v6341_v36 = vpop.permute.xlu1 %1834  ;;  %13593 = vst [vmem:[#allocation171_spill] sm:$0xff] %v6363_v24  ;;  %v761_v7 = vsel %vm509_vm0, %v756_v27, %v760_v53 }
  0xff   :  { %13587 = vst [vmem:[#allocation165_spill] sm:$0xff] %v6341_v36  ;;  %v6343_v52 = vpop.permute.xlu0 %1832  ;;  %v157_v36 = vld [vmem:[#allocation2 + $0x400] sm:$0xff]  ;;  %v763_v62 = vsel %vm509_vm0, %v758_v60, %v762_v20  ;;  %v6379_v6 = vmax.f32 %v153_v63, %v761_v7 }
 0x100   :  { %13588 = vst [vmem:[#allocation166_spill] sm:$0xff] %v6343_v52  ;;  %1950 = vrot.lane.b32.xlu1 %v6335_v48, %s5584_s0  ;;  %v158_v52 = vld [vmem:[#allocation2 + $0x408] sm:$0xff]  ;;  %v764_v21 = vrot.slane %v157_v36, 1  ;;  %v6377_v50 = vmax.f32 %v154_v26, %v763_v62 }
 0x101   :  { %1948 = vrot.lane.b32.xlu0 %v6337_v12, %s5584_s0  ;;  %v766_v30 = vrot.slane %v158_v52, 1  ;;  %13598 = vst [vmem:[#allocation176_spill] sm:$0xff] %v6379_v6 }
 0x102   :  { %v6355_v22 = vpop.permute.xlu1 %1838  ;;  %13597 = vst [vmem:[#allocation175_spill] sm:$0xff] %v6377_v50  ;;  %v765_v27 = vsel %vm509_vm0, %v760_v53, %v764_v21 }
 0x103   :  { %13591 = vst [vmem:[#allocation169_spill] sm:$0xff] %v6355_v22  ;;  %v6357_v34 = vpop.permute.xlu0 %1836  ;;  %v159_v22 = vld [vmem:[#allocation2 + $0x410] sm:$0xff]  ;;  %v767_v60 = vsel %vm509_vm0, %v762_v20, %v766_v30  ;;  %v6393_v26 = vmax.f32 %v155_v15, %v765_v27 }
 0x104   :  { %13592 = vst [vmem:[#allocation170_spill] sm:$0xff] %v6357_v34  ;;  %1954 = vrot.lane.b32.xlu1 %v6349_v32, %s5584_s0  ;;  %v160_v34 = vld [vmem:[#allocation2 + $0x418] sm:$0xff]  ;;  %v768_v51 = vrot.slane %v159_v22, 1  ;;  %v6391_v63 = vmax.f32 %v156_v39, %v767_v60 }
 0x105   :  { %1952 = vrot.lane.b32.xlu0 %v6351_v40, %s5584_s0  ;;  %v770_v11 = vrot.slane %v160_v34, 1  ;;  %13602 = vst [vmem:[#allocation180_spill] sm:$0xff] %v6393_v26 }
 0x106   :  { %v6369_v48 = vpop.permute.xlu1 %1842  ;;  %13601 = vst [vmem:[#allocation179_spill] sm:$0xff] %v6391_v63  ;;  %v769_v53 = vsel %vm509_vm0, %v764_v21, %v768_v51 }
 0x107   :  { %13595 = vst [vmem:[#allocation173_spill] sm:$0xff] %v6369_v48  ;;  %v6371_v12 = vpop.permute.xlu0 %1840  ;;  %v161_v48 = vld [vmem:[#allocation2 + $0x420] sm:$0xff]  ;;  %v771_v20 = vsel %vm509_vm0, %v766_v30, %v770_v11  ;;  %v6407_v39 = vmax.f32 %v157_v36, %v769_v53 }
 0x108   :  { %13596 = vst [vmem:[#allocation174_spill] sm:$0xff] %v6371_v12  ;;  %1958 = vrot.lane.b32.xlu1 %v6363_v24, %s5584_s0  ;;  %v162_v12 = vld [vmem:[#allocation2 + $0x428] sm:$0xff]  ;;  %v772_v7 = vrot.slane %v161_v48, 1  ;;  %v6405_v15 = vmax.f32 %v158_v52, %v771_v20 }
 0x109   :  { %1956 = vrot.lane.b32.xlu0 %v6365_v29, %s5584_s0  ;;  %v774_v62 = vrot.slane %v162_v12, 1  ;;  %13606 = vst [vmem:[#allocation184_spill] sm:$0xff] %v6407_v39 }
 0x10a   :  { %v6383_v32 = vpop.permute.xlu1 %1846  ;;  %13605 = vst [vmem:[#allocation183_spill] sm:$0xff] %v6405_v15  ;;  %v773_v21 = vsel %vm509_vm0, %v768_v51, %v772_v7 }
 0x10b   :  { %13599 = vst [vmem:[#allocation177_spill] sm:$0xff] %v6383_v32  ;;  %v6385_v40 = vpop.permute.xlu0 %1844  ;;  %v163_v32 = vld [vmem:[#allocation2 + $0x430] sm:$0xff]  ;;  %v775_v30 = vsel %vm509_vm0, %v770_v11, %v774_v62  ;;  %v6421_v52 = vmax.f32 %v159_v22, %v773_v21 }
 0x10c   :  { %13600 = vst [vmem:[#allocation178_spill] sm:$0xff] %v6385_v40  ;;  %1962 = vrot.lane.b32.xlu1 %v6377_v50, %s5584_s0  ;;  %v164_v40 = vld [vmem:[#allocation2 + $0x438] sm:$0xff]  ;;  %v776_v27 = vrot.slane %v163_v32, 1  ;;  %v6419_v36 = vmax.f32 %v160_v34, %v775_v30 }
 0x10d   :  { %1960 = vrot.lane.b32.xlu0 %v6379_v6, %s5584_s0  ;;  %v778_v60 = vrot.slane %v164_v40, 1  ;;  %13610 = vst [vmem:[#allocation188_spill] sm:$0xff] %v6421_v52 }
 0x10e   :  { %v6397_v24 = vpop.permute.xlu1 %1850  ;;  %13609 = vst [vmem:[#allocation187_spill] sm:$0xff] %v6419_v36  ;;  %v777_v51 = vsel %vm509_vm0, %v772_v7, %v776_v27 }
 0x10f   :  { %13603 = vst [vmem:[#allocation181_spill] sm:$0xff] %v6397_v24  ;;  %v6399_v29 = vpop.permute.xlu0 %1848  ;;  %v165_v24 = vld [vmem:[#allocation2 + $0x440] sm:$0xff]  ;;  %v779_v11 = vsel %vm509_vm0, %v774_v62, %v778_v60  ;;  %v6435_v34 = vmax.f32 %v161_v48, %v777_v51 }
 0x110   :  { %13604 = vst [vmem:[#allocation182_spill] sm:$0xff] %v6399_v29  ;;  %1966 = vrot.lane.b32.xlu1 %v6391_v63, %s5584_s0  ;;  %v166_v29 = vld [vmem:[#allocation2 + $0x448] sm:$0xff]  ;;  %v780_v53 = vrot.slane %v165_v24, 1  ;;  %v6433_v22 = vmax.f32 %v162_v12, %v779_v11 }
 0x111   :  { %1964 = vrot.lane.b32.xlu0 %v6393_v26, %s5584_s0  ;;  %v782_v20 = vrot.slane %v166_v29, 1  ;;  %13614 = vst [vmem:[#allocation192_spill] sm:$0xff] %v6435_v34 }
 0x112   :  { %v6411_v50 = vpop.permute.xlu1 %1854  ;;  %13613 = vst [vmem:[#allocation191_spill] sm:$0xff] %v6433_v22  ;;  %v781_v7 = vsel %vm509_vm0, %v776_v27, %v780_v53 }
 0x113   :  { %13607 = vst [vmem:[#allocation185_spill] sm:$0xff] %v6411_v50  ;;  %v6413_v6 = vpop.permute.xlu0 %1852  ;;  %v167_v50 = vld [vmem:[#allocation2 + $0x450] sm:$0xff]  ;;  %v783_v62 = vsel %vm509_vm0, %v778_v60, %v782_v20  ;;  %v6449_v12 = vmax.f32 %v163_v32, %v781_v7 }
 0x114   :  { %13608 = vst [vmem:[#allocation186_spill] sm:$0xff] %v6413_v6  ;;  %1970 = vrot.lane.b32.xlu1 %v6405_v15, %s5584_s0  ;;  %v168_v6 = vld [vmem:[#allocation2 + $0x458] sm:$0xff]  ;;  %v784_v21 = vrot.slane %v167_v50, 1  ;;  %v6447_v48 = vmax.f32 %v164_v40, %v783_v62 }
 0x115   :  { %1968 = vrot.lane.b32.xlu0 %v6407_v39, %s5584_s0  ;;  %v786_v30 = vrot.slane %v168_v6, 1  ;;  %13618 = vst [vmem:[#allocation196_spill] sm:$0xff] %v6449_v12 }
 0x116   :  { %v6425_v63 = vpop.permute.xlu1 %1858  ;;  %13617 = vst [vmem:[#allocation195_spill] sm:$0xff] %v6447_v48  ;;  %v785_v27 = vsel %vm509_vm0, %v780_v53, %v784_v21 }
 0x117   :  { %13611 = vst [vmem:[#allocation189_spill] sm:$0xff] %v6425_v63  ;;  %v6427_v26 = vpop.permute.xlu0 %1856  ;;  %v169_v63 = vld [vmem:[#allocation2 + $0x460] sm:$0xff]  ;;  %v787_v60 = vsel %vm509_vm0, %v782_v20, %v786_v30  ;;  %v6463_v40 = vmax.f32 %v165_v24, %v785_v27 }
 0x118   :  { %13612 = vst [vmem:[#allocation190_spill] sm:$0xff] %v6427_v26  ;;  %1974 = vrot.lane.b32.xlu1 %v6419_v36, %s5584_s0  ;;  %v170_v26 = vld [vmem:[#allocation2 + $0x468] sm:$0xff]  ;;  %v788_v51 = vrot.slane %v169_v63, 1  ;;  %v6461_v32 = vmax.f32 %v166_v29, %v787_v60 }
 0x119   :  { %1972 = vrot.lane.b32.xlu0 %v6421_v52, %s5584_s0  ;;  %v790_v11 = vrot.slane %v170_v26, 1  ;;  %13622 = vst [vmem:[#allocation200_spill] sm:$0xff] %v6463_v40 }
 0x11a   :  { %v6439_v15 = vpop.permute.xlu1 %1862  ;;  %13621 = vst [vmem:[#allocation199_spill] sm:$0xff] %v6461_v32  ;;  %v789_v53 = vsel %vm509_vm0, %v784_v21, %v788_v51 }
 0x11b   :  { %13615 = vst [vmem:[#allocation193_spill] sm:$0xff] %v6439_v15  ;;  %v6441_v39 = vpop.permute.xlu0 %1860  ;;  %v171_v15 = vld [vmem:[#allocation2 + $0x470] sm:$0xff]  ;;  %v791_v20 = vsel %vm509_vm0, %v786_v30, %v790_v11  ;;  %v6477_v29 = vmax.f32 %v167_v50, %v789_v53 }
 0x11c   :  { %13616 = vst [vmem:[#allocation194_spill] sm:$0xff] %v6441_v39  ;;  %1978 = vrot.lane.b32.xlu1 %v6433_v22, %s5584_s0  ;;  %v172_v39 = vld [vmem:[#allocation2 + $0x478] sm:$0xff]  ;;  %v792_v7 = vrot.slane %v171_v15, 1  ;;  %v6475_v24 = vmax.f32 %v168_v6, %v791_v20 }
 0x11d   :  { %1976 = vrot.lane.b32.xlu0 %v6435_v34, %s5584_s0  ;;  %v794_v62 = vrot.slane %v172_v39, 1  ;;  %13626 = vst [vmem:[#allocation204_spill] sm:$0xff] %v6477_v29 }
 0x11e   :  { %v6453_v36 = vpop.permute.xlu1 %1866  ;;  %13625 = vst [vmem:[#allocation203_spill] sm:$0xff] %v6475_v24  ;;  %v793_v21 = vsel %vm509_vm0, %v788_v51, %v792_v7 }
 0x11f   :  { %13619 = vst [vmem:[#allocation197_spill] sm:$0xff] %v6453_v36  ;;  %v6455_v52 = vpop.permute.xlu0 %1864  ;;  %v173_v36 = vld [vmem:[#allocation2 + $0x480] sm:$0xff]  ;;  %v795_v30 = vsel %vm509_vm0, %v790_v11, %v794_v62  ;;  %v6491_v6 = vmax.f32 %v169_v63, %v793_v21 }
 0x120   :  { %13620 = vst [vmem:[#allocation198_spill] sm:$0xff] %v6455_v52  ;;  %1982 = vrot.lane.b32.xlu1 %v6447_v48, %s5584_s0  ;;  %v174_v52 = vld [vmem:[#allocation2 + $0x488] sm:$0xff]  ;;  %v796_v27 = vrot.slane %v173_v36, 1  ;;  %v6489_v50 = vmax.f32 %v170_v26, %v795_v30 }
 0x121   :  { %1980 = vrot.lane.b32.xlu0 %v6449_v12, %s5584_s0  ;;  %v798_v60 = vrot.slane %v174_v52, 1  ;;  %13630 = vst [vmem:[#allocation208_spill] sm:$0xff] %v6491_v6 }
 0x122   :  { %v6467_v22 = vpop.permute.xlu1 %1870  ;;  %13629 = vst [vmem:[#allocation207_spill] sm:$0xff] %v6489_v50  ;;  %v797_v51 = vsel %vm509_vm0, %v792_v7, %v796_v27 }
 0x123   :  { %13623 = vst [vmem:[#allocation201_spill] sm:$0xff] %v6467_v22  ;;  %v6469_v34 = vpop.permute.xlu0 %1868  ;;  %v175_v22 = vld [vmem:[#allocation2 + $0x490] sm:$0xff]  ;;  %v799_v11 = vsel %vm509_vm0, %v794_v62, %v798_v60  ;;  %v6505_v26 = vmax.f32 %v171_v15, %v797_v51 }
 0x124   :  { %13624 = vst [vmem:[#allocation202_spill] sm:$0xff] %v6469_v34  ;;  %1986 = vrot.lane.b32.xlu1 %v6461_v32, %s5584_s0  ;;  %v176_v34 = vld [vmem:[#allocation2 + $0x498] sm:$0xff]  ;;  %v800_v53 = vrot.slane %v175_v22, 1  ;;  %v6503_v63 = vmax.f32 %v172_v39, %v799_v11 }
 0x125   :  { %1984 = vrot.lane.b32.xlu0 %v6463_v40, %s5584_s0  ;;  %v802_v20 = vrot.slane %v176_v34, 1  ;;  %13634 = vst [vmem:[#allocation212_spill] sm:$0xff] %v6505_v26 }
 0x126   :  { %v6481_v48 = vpop.permute.xlu1 %1874  ;;  %13633 = vst [vmem:[#allocation211_spill] sm:$0xff] %v6503_v63  ;;  %v801_v7 = vsel %vm509_vm0, %v796_v27, %v800_v53 }
 0x127   :  { %13627 = vst [vmem:[#allocation205_spill] sm:$0xff] %v6481_v48  ;;  %v6483_v12 = vpop.permute.xlu0 %1872  ;;  %v177_v48 = vld [vmem:[#allocation2 + $0x4a0] sm:$0xff]  ;;  %v803_v62 = vsel %vm509_vm0, %v798_v60, %v802_v20  ;;  %v6519_v39 = vmax.f32 %v173_v36, %v801_v7 }
 0x128   :  { %13628 = vst [vmem:[#allocation206_spill] sm:$0xff] %v6483_v12  ;;  %1990 = vrot.lane.b32.xlu1 %v6475_v24, %s5584_s0  ;;  %v178_v12 = vld [vmem:[#allocation2 + $0x4a8] sm:$0xff]  ;;  %v804_v21 = vrot.slane %v177_v48, 1  ;;  %v6517_v15 = vmax.f32 %v174_v52, %v803_v62 }
 0x129   :  { %1988 = vrot.lane.b32.xlu0 %v6477_v29, %s5584_s0  ;;  %v806_v30 = vrot.slane %v178_v12, 1  ;;  %13638 = vst [vmem:[#allocation216_spill] sm:$0xff] %v6519_v39 }
 0x12a   :  { %v6495_v32 = vpop.permute.xlu1 %1878  ;;  %13637 = vst [vmem:[#allocation215_spill] sm:$0xff] %v6517_v15  ;;  %v805_v27 = vsel %vm509_vm0, %v800_v53, %v804_v21 }
 0x12b   :  { %13631 = vst [vmem:[#allocation209_spill] sm:$0xff] %v6495_v32  ;;  %v6497_v40 = vpop.permute.xlu0 %1876  ;;  %v179_v32 = vld [vmem:[#allocation2 + $0x4b0] sm:$0xff]  ;;  %v807_v60 = vsel %vm509_vm0, %v802_v20, %v806_v30  ;;  %v6533_v52 = vmax.f32 %v175_v22, %v805_v27 }
 0x12c   :  { %13632 = vst [vmem:[#allocation210_spill] sm:$0xff] %v6497_v40  ;;  %1994 = vrot.lane.b32.xlu1 %v6489_v50, %s5584_s0  ;;  %v180_v40 = vld [vmem:[#allocation2 + $0x4b8] sm:$0xff]  ;;  %v808_v51 = vrot.slane %v179_v32, 1  ;;  %v6531_v36 = vmax.f32 %v176_v34, %v807_v60 }
 0x12d   :  { %1992 = vrot.lane.b32.xlu0 %v6491_v6, %s5584_s0  ;;  %v810_v11 = vrot.slane %v180_v40, 1  ;;  %13642 = vst [vmem:[#allocation220_spill] sm:$0xff] %v6533_v52 }
 0x12e   :  { %v6509_v24 = vpop.permute.xlu1 %1882  ;;  %13641 = vst [vmem:[#allocation219_spill] sm:$0xff] %v6531_v36  ;;  %v809_v53 = vsel %vm509_vm0, %v804_v21, %v808_v51 }
 0x12f   :  { %13635 = vst [vmem:[#allocation213_spill] sm:$0xff] %v6509_v24  ;;  %v6511_v29 = vpop.permute.xlu0 %1880  ;;  %v181_v24 = vld [vmem:[#allocation2 + $0x4c0] sm:$0xff]  ;;  %v811_v20 = vsel %vm509_vm0, %v806_v30, %v810_v11  ;;  %v6547_v34 = vmax.f32 %v177_v48, %v809_v53 }
 0x130   :  { %13636 = vst [vmem:[#allocation214_spill] sm:$0xff] %v6511_v29  ;;  %1998 = vrot.lane.b32.xlu1 %v6503_v63, %s5584_s0  ;;  %v182_v29 = vld [vmem:[#allocation2 + $0x4c8] sm:$0xff]  ;;  %v812_v7 = vrot.slane %v181_v24, 1  ;;  %v6545_v22 = vmax.f32 %v178_v12, %v811_v20 }
 0x131   :  { %1996 = vrot.lane.b32.xlu0 %v6505_v26, %s5584_s0  ;;  %v814_v62 = vrot.slane %v182_v29, 1  ;;  %13646 = vst [vmem:[#allocation224_spill] sm:$0xff] %v6547_v34 }
 0x132   :  { %v6523_v50 = vpop.permute.xlu1 %1886  ;;  %13645 = vst [vmem:[#allocation223_spill] sm:$0xff] %v6545_v22  ;;  %v813_v21 = vsel %vm509_vm0, %v808_v51, %v812_v7 }
 0x133   :  { %13639 = vst [vmem:[#allocation217_spill] sm:$0xff] %v6523_v50  ;;  %v6525_v6 = vpop.permute.xlu0 %1884  ;;  %v183_v50 = vld [vmem:[#allocation2 + $0x4d0] sm:$0xff]  ;;  %v815_v30 = vsel %vm509_vm0, %v810_v11, %v814_v62  ;;  %v6561_v12 = vmax.f32 %v179_v32, %v813_v21 }
 0x134   :  { %13640 = vst [vmem:[#allocation218_spill] sm:$0xff] %v6525_v6  ;;  %2002 = vrot.lane.b32.xlu1 %v6517_v15, %s5584_s0  ;;  %v184_v6 = vld [vmem:[#allocation2 + $0x4d8] sm:$0xff]  ;;  %v816_v27 = vrot.slane %v183_v50, 1  ;;  %v6559_v48 = vmax.f32 %v180_v40, %v815_v30 }
 0x135   :  { %2000 = vrot.lane.b32.xlu0 %v6519_v39, %s5584_s0  ;;  %v818_v60 = vrot.slane %v184_v6, 1  ;;  %13650 = vst [vmem:[#allocation228_spill] sm:$0xff] %v6561_v12 }
 0x136   :  { %v6537_v63 = vpop.permute.xlu1 %1890  ;;  %13649 = vst [vmem:[#allocation227_spill] sm:$0xff] %v6559_v48  ;;  %v817_v51 = vsel %vm509_vm0, %v812_v7, %v816_v27 }
 0x137   :  { %13643 = vst [vmem:[#allocation221_spill] sm:$0xff] %v6537_v63  ;;  %v6539_v26 = vpop.permute.xlu0 %1888  ;;  %v185_v63 = vld [vmem:[#allocation2 + $0x4e0] sm:$0xff]  ;;  %v819_v11 = vsel %vm509_vm0, %v814_v62, %v818_v60  ;;  %v6575_v40 = vmax.f32 %v181_v24, %v817_v51 }
 0x138   :  { %13644 = vst [vmem:[#allocation222_spill] sm:$0xff] %v6539_v26  ;;  %2006 = vrot.lane.b32.xlu1 %v6531_v36, %s5584_s0  ;;  %v186_v26 = vld [vmem:[#allocation2 + $0x4e8] sm:$0xff]  ;;  %v820_v53 = vrot.slane %v185_v63, 1  ;;  %v6573_v32 = vmax.f32 %v182_v29, %v819_v11 }
 0x139   :  { %2004 = vrot.lane.b32.xlu0 %v6533_v52, %s5584_s0  ;;  %v822_v20 = vrot.slane %v186_v26, 1  ;;  %13654 = vst [vmem:[#allocation232_spill] sm:$0xff] %v6575_v40 }
 0x13a   :  { %v6551_v15 = vpop.permute.xlu1 %1894  ;;  %13653 = vst [vmem:[#allocation231_spill] sm:$0xff] %v6573_v32  ;;  %v821_v7 = vsel %vm509_vm0, %v816_v27, %v820_v53 }
 0x13b   :  { %13647 = vst [vmem:[#allocation225_spill] sm:$0xff] %v6551_v15  ;;  %v6553_v39 = vpop.permute.xlu0 %1892  ;;  %v187_v15 = vld [vmem:[#allocation2 + $0x4f0] sm:$0xff]  ;;  %v823_v62 = vsel %vm509_vm0, %v818_v60, %v822_v20  ;;  %v6589_v29 = vmax.f32 %v183_v50, %v821_v7 }
 0x13c   :  { %13648 = vst [vmem:[#allocation226_spill] sm:$0xff] %v6553_v39  ;;  %2010 = vrot.lane.b32.xlu1 %v6545_v22, %s5584_s0  ;;  %v188_v39 = vld [vmem:[#allocation2 + $0x4f8] sm:$0xff]  ;;  %v824_v21 = vrot.slane %v187_v15, 1  ;;  %v6587_v24 = vmax.f32 %v184_v6, %v823_v62 }
 0x13d   :  { %2008 = vrot.lane.b32.xlu0 %v6547_v34, %s5584_s0  ;;  %v826_v30 = vrot.slane %v188_v39, 1  ;;  %13658 = vst [vmem:[#allocation236_spill] sm:$0xff] %v6589_v29 }
 0x13e   :  { %v6565_v36 = vpop.permute.xlu1 %1898  ;;  %13657 = vst [vmem:[#allocation235_spill] sm:$0xff] %v6587_v24  ;;  %v825_v27 = vsel %vm509_vm0, %v820_v53, %v824_v21 }
 0x13f   :  { %13651 = vst [vmem:[#allocation229_spill] sm:$0xff] %v6565_v36  ;;  %v6567_v52 = vpop.permute.xlu0 %1896  ;;  %v189_v36 = vld [vmem:[#allocation2 + $0x500] sm:$0xff]  ;;  %v827_v60 = vsel %vm509_vm0, %v822_v20, %v826_v30  ;;  %v6603_v6 = vmax.f32 %v185_v63, %v825_v27 }
 0x140   :  { %13652 = vst [vmem:[#allocation230_spill] sm:$0xff] %v6567_v52  ;;  %2014 = vrot.lane.b32.xlu1 %v6559_v48, %s5584_s0  ;;  %v190_v52 = vld [vmem:[#allocation2 + $0x508] sm:$0xff]  ;;  %v828_v51 = vrot.slane %v189_v36, 1  ;;  %v6601_v50 = vmax.f32 %v186_v26, %v827_v60 }
 0x141   :  { %2012 = vrot.lane.b32.xlu0 %v6561_v12, %s5584_s0  ;;  %v830_v11 = vrot.slane %v190_v52, 1  ;;  %13662 = vst [vmem:[#allocation240_spill] sm:$0xff] %v6603_v6 }
 0x142   :  { %v6579_v22 = vpop.permute.xlu1 %1902  ;;  %13661 = vst [vmem:[#allocation239_spill] sm:$0xff] %v6601_v50  ;;  %v829_v53 = vsel %vm509_vm0, %v824_v21, %v828_v51 }
 0x143   :  { %13655 = vst [vmem:[#allocation233_spill] sm:$0xff] %v6579_v22  ;;  %v6581_v34 = vpop.permute.xlu0 %1900  ;;  %v191_v22 = vld [vmem:[#allocation2 + $0x510] sm:$0xff]  ;;  %v831_v20 = vsel %vm509_vm0, %v826_v30, %v830_v11  ;;  %v6617_v26 = vmax.f32 %v187_v15, %v829_v53 }
 0x144   :  { %13656 = vst [vmem:[#allocation234_spill] sm:$0xff] %v6581_v34  ;;  %2018 = vrot.lane.b32.xlu1 %v6573_v32, %s5584_s0  ;;  %v192_v34 = vld [vmem:[#allocation2 + $0x518] sm:$0xff]  ;;  %v832_v7 = vrot.slane %v191_v22, 1  ;;  %v6615_v63 = vmax.f32 %v188_v39, %v831_v20 }
 0x145   :  { %2016 = vrot.lane.b32.xlu0 %v6575_v40, %s5584_s0  ;;  %v834_v62 = vrot.slane %v192_v34, 1  ;;  %13666 = vst [vmem:[#allocation244_spill] sm:$0xff] %v6617_v26 }
 0x146   :  { %v6593_v48 = vpop.permute.xlu1 %1906  ;;  %13665 = vst [vmem:[#allocation243_spill] sm:$0xff] %v6615_v63  ;;  %v833_v21 = vsel %vm509_vm0, %v828_v51, %v832_v7 }
 0x147   :  { %13659 = vst [vmem:[#allocation237_spill] sm:$0xff] %v6593_v48  ;;  %v6595_v12 = vpop.permute.xlu0 %1904  ;;  %v193_v48 = vld [vmem:[#allocation2 + $0x520] sm:$0xff]  ;;  %v835_v30 = vsel %vm509_vm0, %v830_v11, %v834_v62  ;;  %v6631_v39 = vmax.f32 %v189_v36, %v833_v21 }
 0x148   :  { %13660 = vst [vmem:[#allocation238_spill] sm:$0xff] %v6595_v12  ;;  %2022 = vrot.lane.b32.xlu1 %v6587_v24, %s5584_s0  ;;  %v194_v12 = vld [vmem:[#allocation2 + $0x528] sm:$0xff]  ;;  %v836_v27 = vrot.slane %v193_v48, 1  ;;  %v6629_v15 = vmax.f32 %v190_v52, %v835_v30 }
 0x149   :  { %2020 = vrot.lane.b32.xlu0 %v6589_v29, %s5584_s0  ;;  %v838_v60 = vrot.slane %v194_v12, 1  ;;  %13670 = vst [vmem:[#allocation248_spill] sm:$0xff] %v6631_v39 }
 0x14a   :  { %v6607_v32 = vpop.permute.xlu1 %1910  ;;  %13669 = vst [vmem:[#allocation247_spill] sm:$0xff] %v6629_v15  ;;  %v837_v51 = vsel %vm509_vm0, %v832_v7, %v836_v27 }
 0x14b   :  { %13663 = vst [vmem:[#allocation241_spill] sm:$0xff] %v6607_v32  ;;  %v6609_v40 = vpop.permute.xlu0 %1908  ;;  %v195_v32 = vld [vmem:[#allocation2 + $0x530] sm:$0xff]  ;;  %v839_v11 = vsel %vm509_vm0, %v834_v62, %v838_v60  ;;  %v6645_v52 = vmax.f32 %v191_v22, %v837_v51 }
 0x14c   :  { %13664 = vst [vmem:[#allocation242_spill] sm:$0xff] %v6609_v40  ;;  %2026 = vrot.lane.b32.xlu1 %v6601_v50, %s5584_s0  ;;  %v196_v40 = vld [vmem:[#allocation2 + $0x538] sm:$0xff]  ;;  %v840_v53 = vrot.slane %v195_v32, 1  ;;  %v6643_v36 = vmax.f32 %v192_v34, %v839_v11 }
 0x14d   :  { %2024 = vrot.lane.b32.xlu0 %v6603_v6, %s5584_s0  ;;  %v842_v20 = vrot.slane %v196_v40, 1  ;;  %13674 = vst [vmem:[#allocation252_spill] sm:$0xff] %v6645_v52 }
 0x14e   :  { %v6621_v24 = vpop.permute.xlu1 %1914  ;;  %13673 = vst [vmem:[#allocation251_spill] sm:$0xff] %v6643_v36  ;;  %v841_v7 = vsel %vm509_vm0, %v836_v27, %v840_v53 }
 0x14f   :  { %13667 = vst [vmem:[#allocation245_spill] sm:$0xff] %v6621_v24  ;;  %v6623_v29 = vpop.permute.xlu0 %1912  ;;  %v197_v24 = vld [vmem:[#allocation2 + $0x540] sm:$0xff]  ;;  %v843_v62 = vsel %vm509_vm0, %v838_v60, %v842_v20  ;;  %v6659_v34 = vmax.f32 %v193_v48, %v841_v7 }
 0x150   :  { %13668 = vst [vmem:[#allocation246_spill] sm:$0xff] %v6623_v29  ;;  %2030 = vrot.lane.b32.xlu1 %v6615_v63, %s5584_s0  ;;  %v198_v29 = vld [vmem:[#allocation2 + $0x548] sm:$0xff]  ;;  %v844_v21 = vrot.slane %v197_v24, 1  ;;  %v6657_v22 = vmax.f32 %v194_v12, %v843_v62 }
 0x151   :  { %2028 = vrot.lane.b32.xlu0 %v6617_v26, %s5584_s0  ;;  %v846_v30 = vrot.slane %v198_v29, 1  ;;  %13678 = vst [vmem:[#allocation256_spill] sm:$0xff] %v6659_v34 }
 0x152   :  { %v6635_v50 = vpop.permute.xlu1 %1918  ;;  %13677 = vst [vmem:[#allocation255_spill] sm:$0xff] %v6657_v22  ;;  %v845_v27 = vsel %vm509_vm0, %v840_v53, %v844_v21 }
 0x153   :  { %13671 = vst [vmem:[#allocation249_spill] sm:$0xff] %v6635_v50  ;;  %v6637_v6 = vpop.permute.xlu0 %1916  ;;  %v199_v50 = vld [vmem:[#allocation2 + $0x550] sm:$0xff]  ;;  %v847_v60 = vsel %vm509_vm0, %v842_v20, %v846_v30  ;;  %v6673_v12 = vmax.f32 %v195_v32, %v845_v27 }
 0x154   :  { %13672 = vst [vmem:[#allocation250_spill] sm:$0xff] %v6637_v6  ;;  %2034 = vrot.lane.b32.xlu1 %v6629_v15, %s5584_s0  ;;  %v200_v6 = vld [vmem:[#allocation2 + $0x558] sm:$0xff]  ;;  %v848_v51 = vrot.slane %v199_v50, 1  ;;  %v6671_v48 = vmax.f32 %v196_v40, %v847_v60 }
 0x155   :  { %2032 = vrot.lane.b32.xlu0 %v6631_v39, %s5584_s0  ;;  %v850_v11 = vrot.slane %v200_v6, 1  ;;  %13682 = vst [vmem:[#allocation260_spill] sm:$0xff] %v6673_v12 }
 0x156   :  { %v6649_v63 = vpop.permute.xlu1 %1922  ;;  %13681 = vst [vmem:[#allocation259_spill] sm:$0xff] %v6671_v48  ;;  %v849_v53 = vsel %vm509_vm0, %v844_v21, %v848_v51 }
 0x157   :  { %13675 = vst [vmem:[#allocation253_spill] sm:$0xff] %v6649_v63  ;;  %v6651_v26 = vpop.permute.xlu0 %1920  ;;  %v201_v63 = vld [vmem:[#allocation2 + $0x560] sm:$0xff]  ;;  %v851_v20 = vsel %vm509_vm0, %v846_v30, %v850_v11  ;;  %v6687_v40 = vmax.f32 %v197_v24, %v849_v53 }
 0x158   :  { %13676 = vst [vmem:[#allocation254_spill] sm:$0xff] %v6651_v26  ;;  %2038 = vrot.lane.b32.xlu1 %v6643_v36, %s5584_s0  ;;  %v202_v26 = vld [vmem:[#allocation2 + $0x568] sm:$0xff]  ;;  %v852_v7 = vrot.slane %v201_v63, 1  ;;  %v6685_v32 = vmax.f32 %v198_v29, %v851_v20 }
 0x159   :  { %2036 = vrot.lane.b32.xlu0 %v6645_v52, %s5584_s0  ;;  %v854_v62 = vrot.slane %v202_v26, 1  ;;  %13686 = vst [vmem:[#allocation264_spill] sm:$0xff] %v6687_v40 }
 0x15a   :  { %v6663_v15 = vpop.permute.xlu1 %1926  ;;  %13685 = vst [vmem:[#allocation263_spill] sm:$0xff] %v6685_v32  ;;  %v853_v21 = vsel %vm509_vm0, %v848_v51, %v852_v7 }
 0x15b   :  { %13679 = vst [vmem:[#allocation257_spill] sm:$0xff] %v6663_v15  ;;  %v6665_v39 = vpop.permute.xlu0 %1924  ;;  %v203_v15 = vld [vmem:[#allocation2 + $0x570] sm:$0xff]  ;;  %v855_v30 = vsel %vm509_vm0, %v850_v11, %v854_v62  ;;  %v6701_v29 = vmax.f32 %v199_v50, %v853_v21 }
 0x15c   :  { %13680 = vst [vmem:[#allocation258_spill] sm:$0xff] %v6665_v39  ;;  %2042 = vrot.lane.b32.xlu1 %v6657_v22, %s5584_s0  ;;  %v204_v39 = vld [vmem:[#allocation2 + $0x578] sm:$0xff]  ;;  %v856_v27 = vrot.slane %v203_v15, 1  ;;  %v6699_v24 = vmax.f32 %v200_v6, %v855_v30 }
 0x15d   :  { %2040 = vrot.lane.b32.xlu0 %v6659_v34, %s5584_s0  ;;  %v858_v60 = vrot.slane %v204_v39, 1  ;;  %13690 = vst [vmem:[#allocation268_spill] sm:$0xff] %v6701_v29 }
 0x15e   :  { %v6677_v36 = vpop.permute.xlu1 %1930  ;;  %13689 = vst [vmem:[#allocation267_spill] sm:$0xff] %v6699_v24  ;;  %v857_v51 = vsel %vm509_vm0, %v852_v7, %v856_v27 }
 0x15f   :  { %13683 = vst [vmem:[#allocation261_spill] sm:$0xff] %v6677_v36  ;;  %v6679_v52 = vpop.permute.xlu0 %1928  ;;  %v205_v36 = vld [vmem:[#allocation2 + $0x580] sm:$0xff]  ;;  %v859_v11 = vsel %vm509_vm0, %v854_v62, %v858_v60  ;;  %v6715_v6 = vmax.f32 %v201_v63, %v857_v51 }
 0x160   :  { %13684 = vst [vmem:[#allocation262_spill] sm:$0xff] %v6679_v52  ;;  %2046 = vrot.lane.b32.xlu1 %v6671_v48, %s5584_s0  ;;  %v206_v52 = vld [vmem:[#allocation2 + $0x588] sm:$0xff]  ;;  %v860_v53 = vrot.slane %v205_v36, 1  ;;  %v6713_v50 = vmax.f32 %v202_v26, %v859_v11 }
 0x161   :  { %2044 = vrot.lane.b32.xlu0 %v6673_v12, %s5584_s0  ;;  %v862_v20 = vrot.slane %v206_v52, 1  ;;  %13694 = vst [vmem:[#allocation272_spill] sm:$0xff] %v6715_v6 }
 0x162   :  { %v6691_v22 = vpop.permute.xlu1 %1934  ;;  %13693 = vst [vmem:[#allocation271_spill] sm:$0xff] %v6713_v50  ;;  %v861_v7 = vsel %vm509_vm0, %v856_v27, %v860_v53 }
 0x163   :  { %13687 = vst [vmem:[#allocation265_spill] sm:$0xff] %v6691_v22  ;;  %v6693_v34 = vpop.permute.xlu0 %1932  ;;  %v207_v22 = vld [vmem:[#allocation2 + $0x590] sm:$0xff]  ;;  %v863_v62 = vsel %vm509_vm0, %v858_v60, %v862_v20  ;;  %v6729_v26 = vmax.f32 %v203_v15, %v861_v7 }
 0x164   :  { %13688 = vst [vmem:[#allocation266_spill] sm:$0xff] %v6693_v34  ;;  %2050 = vrot.lane.b32.xlu1 %v6685_v32, %s5584_s0  ;;  %v208_v34 = vld [vmem:[#allocation2 + $0x598] sm:$0xff]  ;;  %v864_v21 = vrot.slane %v207_v22, 1  ;;  %v6727_v63 = vmax.f32 %v204_v39, %v863_v62 }
 0x165   :  { %2048 = vrot.lane.b32.xlu0 %v6687_v40, %s5584_s0  ;;  %v866_v30 = vrot.slane %v208_v34, 1  ;;  %13698 = vst [vmem:[#allocation276_spill] sm:$0xff] %v6729_v26 }
 0x166   :  { %v6705_v48 = vpop.permute.xlu1 %1938  ;;  %13697 = vst [vmem:[#allocation275_spill] sm:$0xff] %v6727_v63  ;;  %v865_v27 = vsel %vm509_vm0, %v860_v53, %v864_v21 }
 0x167   :  { %13691 = vst [vmem:[#allocation269_spill] sm:$0xff] %v6705_v48  ;;  %v6707_v12 = vpop.permute.xlu0 %1936  ;;  %v209_v48 = vld [vmem:[#allocation2 + $0x5a0] sm:$0xff]  ;;  %v867_v60 = vsel %vm509_vm0, %v862_v20, %v866_v30  ;;  %v6743_v39 = vmax.f32 %v205_v36, %v865_v27 }
 0x168   :  { %13692 = vst [vmem:[#allocation270_spill] sm:$0xff] %v6707_v12  ;;  %2054 = vrot.lane.b32.xlu1 %v6699_v24, %s5584_s0  ;;  %v210_v12 = vld [vmem:[#allocation2 + $0x5a8] sm:$0xff]  ;;  %v868_v51 = vrot.slane %v209_v48, 1  ;;  %v6741_v15 = vmax.f32 %v206_v52, %v867_v60 }
 0x169   :  { %2052 = vrot.lane.b32.xlu0 %v6701_v29, %s5584_s0  ;;  %v870_v11 = vrot.slane %v210_v12, 1  ;;  %13702 = vst [vmem:[#allocation280_spill] sm:$0xff] %v6743_v39 }
 0x16a   :  { %v6719_v32 = vpop.permute.xlu1 %1942  ;;  %13701 = vst [vmem:[#allocation279_spill] sm:$0xff] %v6741_v15  ;;  %v869_v53 = vsel %vm509_vm0, %v864_v21, %v868_v51 }
 0x16b   :  { %13695 = vst [vmem:[#allocation273_spill] sm:$0xff] %v6719_v32  ;;  %v6721_v40 = vpop.permute.xlu0 %1940  ;;  %v211_v32 = vld [vmem:[#allocation2 + $0x5b0] sm:$0xff]  ;;  %v871_v20 = vsel %vm509_vm0, %v866_v30, %v870_v11  ;;  %v6757_v52 = vmax.f32 %v207_v22, %v869_v53 }
 0x16c   :  { %13696 = vst [vmem:[#allocation274_spill] sm:$0xff] %v6721_v40  ;;  %2058 = vrot.lane.b32.xlu1 %v6713_v50, %s5584_s0  ;;  %v212_v40 = vld [vmem:[#allocation2 + $0x5b8] sm:$0xff]  ;;  %v872_v7 = vrot.slane %v211_v32, 1  ;;  %v6755_v36 = vmax.f32 %v208_v34, %v871_v20 }
 0x16d   :  { %2056 = vrot.lane.b32.xlu0 %v6715_v6, %s5584_s0  ;;  %v874_v62 = vrot.slane %v212_v40, 1  ;;  %13706 = vst [vmem:[#allocation284_spill] sm:$0xff] %v6757_v52 }
 0x16e   :  { %v6733_v24 = vpop.permute.xlu1 %1946  ;;  %13705 = vst [vmem:[#allocation283_spill] sm:$0xff] %v6755_v36  ;;  %v873_v21 = vsel %vm509_vm0, %v868_v51, %v872_v7 }
 0x16f   :  { %13699 = vst [vmem:[#allocation277_spill] sm:$0xff] %v6733_v24  ;;  %v6735_v29 = vpop.permute.xlu0 %1944  ;;  %v213_v24 = vld [vmem:[#allocation2 + $0x5c0] sm:$0xff]  ;;  %v875_v30 = vsel %vm509_vm0, %v870_v11, %v874_v62  ;;  %v6771_v34 = vmax.f32 %v209_v48, %v873_v21 }
 0x170   :  { %13700 = vst [vmem:[#allocation278_spill] sm:$0xff] %v6735_v29  ;;  %2062 = vrot.lane.b32.xlu1 %v6727_v63, %s5584_s0  ;;  %v214_v29 = vld [vmem:[#allocation2 + $0x5c8] sm:$0xff]  ;;  %v876_v27 = vrot.slane %v213_v24, 1  ;;  %v6769_v22 = vmax.f32 %v210_v12, %v875_v30 }
 0x171   :  { %2060 = vrot.lane.b32.xlu0 %v6729_v26, %s5584_s0  ;;  %v878_v60 = vrot.slane %v214_v29, 1  ;;  %13710 = vst [vmem:[#allocation288_spill] sm:$0xff] %v6771_v34 }
 0x172   :  { %v6747_v50 = vpop.permute.xlu1 %1950  ;;  %13709 = vst [vmem:[#allocation287_spill] sm:$0xff] %v6769_v22  ;;  %v877_v51 = vsel %vm509_vm0, %v872_v7, %v876_v27 }
 0x173   :  { %13703 = vst [vmem:[#allocation281_spill] sm:$0xff] %v6747_v50  ;;  %v6749_v6 = vpop.permute.xlu0 %1948  ;;  %v215_v50 = vld [vmem:[#allocation2 + $0x5d0] sm:$0xff]  ;;  %v879_v11 = vsel %vm509_vm0, %v874_v62, %v878_v60  ;;  %v6785_v12 = vmax.f32 %v211_v32, %v877_v51 }
 0x174   :  { %13704 = vst [vmem:[#allocation282_spill] sm:$0xff] %v6749_v6  ;;  %2066 = vrot.lane.b32.xlu1 %v6741_v15, %s5584_s0  ;;  %v216_v6 = vld [vmem:[#allocation2 + $0x5d8] sm:$0xff]  ;;  %v880_v53 = vrot.slane %v215_v50, 1  ;;  %v6783_v48 = vmax.f32 %v212_v40, %v879_v11 }
 0x175   :  { %2064 = vrot.lane.b32.xlu0 %v6743_v39, %s5584_s0  ;;  %v882_v20 = vrot.slane %v216_v6, 1  ;;  %13714 = vst [vmem:[#allocation292_spill] sm:$0xff] %v6785_v12 }
 0x176   :  { %v6761_v63 = vpop.permute.xlu1 %1954  ;;  %13713 = vst [vmem:[#allocation291_spill] sm:$0xff] %v6783_v48  ;;  %v881_v7 = vsel %vm509_vm0, %v876_v27, %v880_v53 }
 0x177   :  { %13707 = vst [vmem:[#allocation285_spill] sm:$0xff] %v6761_v63  ;;  %v6763_v26 = vpop.permute.xlu0 %1952  ;;  %v217_v63 = vld [vmem:[#allocation2 + $0x5e0] sm:$0xff]  ;;  %v883_v62 = vsel %vm509_vm0, %v878_v60, %v882_v20  ;;  %v6799_v40 = vmax.f32 %v213_v24, %v881_v7 }
 0x178   :  { %13708 = vst [vmem:[#allocation286_spill] sm:$0xff] %v6763_v26  ;;  %2070 = vrot.lane.b32.xlu1 %v6755_v36, %s5584_s0  ;;  %v218_v26 = vld [vmem:[#allocation2 + $0x5e8] sm:$0xff]  ;;  %v884_v21 = vrot.slane %v217_v63, 1  ;;  %v6797_v32 = vmax.f32 %v214_v29, %v883_v62 }
 0x179   :  { %2068 = vrot.lane.b32.xlu0 %v6757_v52, %s5584_s0  ;;  %v886_v30 = vrot.slane %v218_v26, 1  ;;  %13718 = vst [vmem:[#allocation296_spill] sm:$0xff] %v6799_v40 }
 0x17a   :  { %v6775_v15 = vpop.permute.xlu1 %1958  ;;  %13717 = vst [vmem:[#allocation295_spill] sm:$0xff] %v6797_v32  ;;  %v885_v27 = vsel %vm509_vm0, %v880_v53, %v884_v21 }
 0x17b   :  { %13711 = vst [vmem:[#allocation289_spill] sm:$0xff] %v6775_v15  ;;  %v6777_v39 = vpop.permute.xlu0 %1956  ;;  %v219_v15 = vld [vmem:[#allocation2 + $0x5f0] sm:$0xff]  ;;  %v887_v60 = vsel %vm509_vm0, %v882_v20, %v886_v30  ;;  %v6813_v29 = vmax.f32 %v215_v50, %v885_v27 }
 0x17c   :  { %13712 = vst [vmem:[#allocation290_spill] sm:$0xff] %v6777_v39  ;;  %2074 = vrot.lane.b32.xlu1 %v6769_v22, %s5584_s0  ;;  %v220_v39 = vld [vmem:[#allocation2 + $0x5f8] sm:$0xff]  ;;  %v888_v51 = vrot.slane %v219_v15, 1  ;;  %v6811_v24 = vmax.f32 %v216_v6, %v887_v60 }
 0x17d   :  { %2072 = vrot.lane.b32.xlu0 %v6771_v34, %s5584_s0  ;;  %v890_v11 = vrot.slane %v220_v39, 1  ;;  %13722 = vst [vmem:[#allocation300_spill] sm:$0xff] %v6813_v29 }
 0x17e   :  { %v6789_v36 = vpop.permute.xlu1 %1962  ;;  %13721 = vst [vmem:[#allocation299_spill] sm:$0xff] %v6811_v24  ;;  %v889_v53 = vsel %vm509_vm0, %v884_v21, %v888_v51 }
 0x17f   :  { %13715 = vst [vmem:[#allocation293_spill] sm:$0xff] %v6789_v36  ;;  %v6791_v52 = vpop.permute.xlu0 %1960  ;;  %v221_v36 = vld [vmem:[#allocation2 + $0x600] sm:$0xff]  ;;  %v891_v20 = vsel %vm509_vm0, %v886_v30, %v890_v11  ;;  %v6827_v6 = vmax.f32 %v217_v63, %v889_v53 }
 0x180   :  { %13716 = vst [vmem:[#allocation294_spill] sm:$0xff] %v6791_v52  ;;  %2078 = vrot.lane.b32.xlu1 %v6783_v48, %s5584_s0  ;;  %v222_v52 = vld [vmem:[#allocation2 + $0x608] sm:$0xff]  ;;  %v892_v7 = vrot.slane %v221_v36, 1  ;;  %v6825_v50 = vmax.f32 %v218_v26, %v891_v20 }
 0x181   :  { %2076 = vrot.lane.b32.xlu0 %v6785_v12, %s5584_s0  ;;  %v894_v62 = vrot.slane %v222_v52, 1  ;;  %13726 = vst [vmem:[#allocation304_spill] sm:$0xff] %v6827_v6 }
 0x182   :  { %v6803_v22 = vpop.permute.xlu1 %1966  ;;  %13725 = vst [vmem:[#allocation303_spill] sm:$0xff] %v6825_v50  ;;  %v893_v21 = vsel %vm509_vm0, %v888_v51, %v892_v7 }
 0x183   :  { %13719 = vst [vmem:[#allocation297_spill] sm:$0xff] %v6803_v22  ;;  %v6805_v34 = vpop.permute.xlu0 %1964  ;;  %v223_v22 = vld [vmem:[#allocation2 + $0x610] sm:$0xff]  ;;  %v895_v30 = vsel %vm509_vm0, %v890_v11, %v894_v62  ;;  %v6841_v26 = vmax.f32 %v219_v15, %v893_v21 }
 0x184   :  { %13720 = vst [vmem:[#allocation298_spill] sm:$0xff] %v6805_v34  ;;  %2082 = vrot.lane.b32.xlu1 %v6797_v32, %s5584_s0  ;;  %v224_v34 = vld [vmem:[#allocation2 + $0x618] sm:$0xff]  ;;  %v896_v27 = vrot.slane %v223_v22, 1  ;;  %v6839_v63 = vmax.f32 %v220_v39, %v895_v30 }
 0x185   :  { %2080 = vrot.lane.b32.xlu0 %v6799_v40, %s5584_s0  ;;  %v898_v60 = vrot.slane %v224_v34, 1  ;;  %13730 = vst [vmem:[#allocation308_spill] sm:$0xff] %v6841_v26 }
 0x186   :  { %v6817_v48 = vpop.permute.xlu1 %1970  ;;  %13729 = vst [vmem:[#allocation307_spill] sm:$0xff] %v6839_v63  ;;  %v897_v51 = vsel %vm509_vm0, %v892_v7, %v896_v27 }
 0x187   :  { %13723 = vst [vmem:[#allocation301_spill] sm:$0xff] %v6817_v48  ;;  %v6819_v12 = vpop.permute.xlu0 %1968  ;;  %v225_v48 = vld [vmem:[#allocation2 + $0x620] sm:$0xff]  ;;  %v899_v11 = vsel %vm509_vm0, %v894_v62, %v898_v60  ;;  %v6855_v39 = vmax.f32 %v221_v36, %v897_v51 }
 0x188   :  { %13724 = vst [vmem:[#allocation302_spill] sm:$0xff] %v6819_v12  ;;  %2086 = vrot.lane.b32.xlu1 %v6811_v24, %s5584_s0  ;;  %v226_v12 = vld [vmem:[#allocation2 + $0x628] sm:$0xff]  ;;  %v900_v53 = vrot.slane %v225_v48, 1  ;;  %v6853_v15 = vmax.f32 %v222_v52, %v899_v11 }
 0x189   :  { %2084 = vrot.lane.b32.xlu0 %v6813_v29, %s5584_s0  ;;  %v902_v20 = vrot.slane %v226_v12, 1  ;;  %13734 = vst [vmem:[#allocation312_spill] sm:$0xff] %v6855_v39 }
 0x18a   :  { %v6831_v32 = vpop.permute.xlu1 %1974  ;;  %13733 = vst [vmem:[#allocation311_spill] sm:$0xff] %v6853_v15  ;;  %v901_v7 = vsel %vm509_vm0, %v896_v27, %v900_v53 }
 0x18b   :  { %13727 = vst [vmem:[#allocation305_spill] sm:$0xff] %v6831_v32  ;;  %v6833_v40 = vpop.permute.xlu0 %1972  ;;  %v227_v32 = vld [vmem:[#allocation2 + $0x630] sm:$0xff]  ;;  %v903_v62 = vsel %vm509_vm0, %v898_v60, %v902_v20  ;;  %v6869_v52 = vmax.f32 %v223_v22, %v901_v7 }
 0x18c   :  { %13728 = vst [vmem:[#allocation306_spill] sm:$0xff] %v6833_v40  ;;  %2090 = vrot.lane.b32.xlu1 %v6825_v50, %s5584_s0  ;;  %v228_v40 = vld [vmem:[#allocation2 + $0x638] sm:$0xff]  ;;  %v904_v21 = vrot.slane %v227_v32, 1  ;;  %v6867_v36 = vmax.f32 %v224_v34, %v903_v62 }
 0x18d   :  { %2088 = vrot.lane.b32.xlu0 %v6827_v6, %s5584_s0  ;;  %v906_v30 = vrot.slane %v228_v40, 1  ;;  %13738 = vst [vmem:[#allocation316_spill] sm:$0xff] %v6869_v52 }
 0x18e   :  { %v6845_v24 = vpop.permute.xlu1 %1978  ;;  %13737 = vst [vmem:[#allocation315_spill] sm:$0xff] %v6867_v36  ;;  %v905_v27 = vsel %vm509_vm0, %v900_v53, %v904_v21 }
 0x18f   :  { %13731 = vst [vmem:[#allocation309_spill] sm:$0xff] %v6845_v24  ;;  %v6847_v29 = vpop.permute.xlu0 %1976  ;;  %v229_v24 = vld [vmem:[#allocation2 + $0x640] sm:$0xff]  ;;  %v907_v60 = vsel %vm509_vm0, %v902_v20, %v906_v30  ;;  %v6883_v34 = vmax.f32 %v225_v48, %v905_v27 }
 0x190   :  { %13732 = vst [vmem:[#allocation310_spill] sm:$0xff] %v6847_v29  ;;  %2094 = vrot.lane.b32.xlu1 %v6839_v63, %s5584_s0  ;;  %v230_v29 = vld [vmem:[#allocation2 + $0x648] sm:$0xff]  ;;  %v908_v51 = vrot.slane %v229_v24, 1  ;;  %v6881_v22 = vmax.f32 %v226_v12, %v907_v60 }
 0x191   :  { %2092 = vrot.lane.b32.xlu0 %v6841_v26, %s5584_s0  ;;  %v910_v11 = vrot.slane %v230_v29, 1  ;;  %13742 = vst [vmem:[#allocation320_spill] sm:$0xff] %v6883_v34 }
 0x192   :  { %v6859_v50 = vpop.permute.xlu1 %1982  ;;  %13741 = vst [vmem:[#allocation319_spill] sm:$0xff] %v6881_v22  ;;  %v909_v53 = vsel %vm509_vm0, %v904_v21, %v908_v51 }
 0x193   :  { %13735 = vst [vmem:[#allocation313_spill] sm:$0xff] %v6859_v50  ;;  %v6861_v6 = vpop.permute.xlu0 %1980  ;;  %v231_v50 = vld [vmem:[#allocation2 + $0x650] sm:$0xff]  ;;  %v911_v20 = vsel %vm509_vm0, %v906_v30, %v910_v11  ;;  %v6897_v12 = vmax.f32 %v227_v32, %v909_v53 }
 0x194   :  { %13736 = vst [vmem:[#allocation314_spill] sm:$0xff] %v6861_v6  ;;  %2098 = vrot.lane.b32.xlu1 %v6853_v15, %s5584_s0  ;;  %v232_v6 = vld [vmem:[#allocation2 + $0x658] sm:$0xff]  ;;  %v912_v7 = vrot.slane %v231_v50, 1  ;;  %v6895_v48 = vmax.f32 %v228_v40, %v911_v20 }
 0x195   :  { %2096 = vrot.lane.b32.xlu0 %v6855_v39, %s5584_s0  ;;  %v914_v62 = vrot.slane %v232_v6, 1  ;;  %13746 = vst [vmem:[#allocation324_spill] sm:$0xff] %v6897_v12 }
 0x196   :  { %v6873_v63 = vpop.permute.xlu1 %1986  ;;  %13745 = vst [vmem:[#allocation323_spill] sm:$0xff] %v6895_v48  ;;  %v913_v21 = vsel %vm509_vm0, %v908_v51, %v912_v7 }
 0x197   :  { %13739 = vst [vmem:[#allocation317_spill] sm:$0xff] %v6873_v63  ;;  %v6875_v26 = vpop.permute.xlu0 %1984  ;;  %v233_v63 = vld [vmem:[#allocation2 + $0x660] sm:$0xff]  ;;  %v915_v30 = vsel %vm509_vm0, %v910_v11, %v914_v62  ;;  %v6911_v40 = vmax.f32 %v229_v24, %v913_v21 }
 0x198   :  { %13740 = vst [vmem:[#allocation318_spill] sm:$0xff] %v6875_v26  ;;  %2102 = vrot.lane.b32.xlu1 %v6867_v36, %s5584_s0  ;;  %v234_v26 = vld [vmem:[#allocation2 + $0x668] sm:$0xff]  ;;  %v916_v27 = vrot.slane %v233_v63, 1  ;;  %v6909_v32 = vmax.f32 %v230_v29, %v915_v30 }
 0x199   :  { %2100 = vrot.lane.b32.xlu0 %v6869_v52, %s5584_s0  ;;  %v918_v60 = vrot.slane %v234_v26, 1  ;;  %13750 = vst [vmem:[#allocation328_spill] sm:$0xff] %v6911_v40 }
 0x19a   :  { %v6887_v15 = vpop.permute.xlu1 %1990  ;;  %13749 = vst [vmem:[#allocation327_spill] sm:$0xff] %v6909_v32  ;;  %v917_v51 = vsel %vm509_vm0, %v912_v7, %v916_v27 }
 0x19b   :  { %13743 = vst [vmem:[#allocation321_spill] sm:$0xff] %v6887_v15  ;;  %v6889_v39 = vpop.permute.xlu0 %1988  ;;  %v235_v15 = vld [vmem:[#allocation2 + $0x670] sm:$0xff]  ;;  %v919_v11 = vsel %vm509_vm0, %v914_v62, %v918_v60  ;;  %v6925_v29 = vmax.f32 %v231_v50, %v917_v51 }
 0x19c   :  { %13744 = vst [vmem:[#allocation322_spill] sm:$0xff] %v6889_v39  ;;  %2106 = vrot.lane.b32.xlu1 %v6881_v22, %s5584_s0  ;;  %v236_v39 = vld [vmem:[#allocation2 + $0x678] sm:$0xff]  ;;  %v920_v53 = vrot.slane %v235_v15, 1  ;;  %v6923_v24 = vmax.f32 %v232_v6, %v919_v11 }
 0x19d   :  { %2104 = vrot.lane.b32.xlu0 %v6883_v34, %s5584_s0  ;;  %v922_v20 = vrot.slane %v236_v39, 1  ;;  %13754 = vst [vmem:[#allocation332_spill] sm:$0xff] %v6925_v29 }
 0x19e   :  { %v6901_v36 = vpop.permute.xlu1 %1994  ;;  %13753 = vst [vmem:[#allocation331_spill] sm:$0xff] %v6923_v24  ;;  %v921_v7 = vsel %vm509_vm0, %v916_v27, %v920_v53 }
 0x19f   :  { %13747 = vst [vmem:[#allocation325_spill] sm:$0xff] %v6901_v36  ;;  %v6903_v52 = vpop.permute.xlu0 %1992  ;;  %v237_v36 = vld [vmem:[#allocation2 + $0x680] sm:$0xff]  ;;  %v923_v62 = vsel %vm509_vm0, %v918_v60, %v922_v20  ;;  %v6939_v6 = vmax.f32 %v233_v63, %v921_v7 }
 0x1a0   :  { %13748 = vst [vmem:[#allocation326_spill] sm:$0xff] %v6903_v52  ;;  %2110 = vrot.lane.b32.xlu1 %v6895_v48, %s5584_s0  ;;  %v238_v52 = vld [vmem:[#allocation2 + $0x688] sm:$0xff]  ;;  %v924_v21 = vrot.slane %v237_v36, 1  ;;  %v6937_v50 = vmax.f32 %v234_v26, %v923_v62 }
 0x1a1   :  { %2108 = vrot.lane.b32.xlu0 %v6897_v12, %s5584_s0  ;;  %v926_v30 = vrot.slane %v238_v52, 1  ;;  %13758 = vst [vmem:[#allocation336_spill] sm:$0xff] %v6939_v6 }
 0x1a2   :  { %v6915_v22 = vpop.permute.xlu1 %1998  ;;  %13757 = vst [vmem:[#allocation335_spill] sm:$0xff] %v6937_v50  ;;  %v925_v27 = vsel %vm509_vm0, %v920_v53, %v924_v21 }
 0x1a3   :  { %13751 = vst [vmem:[#allocation329_spill] sm:$0xff] %v6915_v22  ;;  %v6917_v34 = vpop.permute.xlu0 %1996  ;;  %v239_v22 = vld [vmem:[#allocation2 + $0x690] sm:$0xff]  ;;  %v927_v60 = vsel %vm509_vm0, %v922_v20, %v926_v30  ;;  %v6953_v26 = vmax.f32 %v235_v15, %v925_v27 }
 0x1a4   :  { %13752 = vst [vmem:[#allocation330_spill] sm:$0xff] %v6917_v34  ;;  %2114 = vrot.lane.b32.xlu1 %v6909_v32, %s5584_s0  ;;  %v240_v34 = vld [vmem:[#allocation2 + $0x698] sm:$0xff]  ;;  %v928_v51 = vrot.slane %v239_v22, 1  ;;  %v6951_v63 = vmax.f32 %v236_v39, %v927_v60 }
 0x1a5   :  { %2112 = vrot.lane.b32.xlu0 %v6911_v40, %s5584_s0  ;;  %v930_v11 = vrot.slane %v240_v34, 1  ;;  %13762 = vst [vmem:[#allocation340_spill] sm:$0xff] %v6953_v26 }
 0x1a6   :  { %v6929_v48 = vpop.permute.xlu1 %2002  ;;  %13761 = vst [vmem:[#allocation339_spill] sm:$0xff] %v6951_v63  ;;  %v929_v53 = vsel %vm509_vm0, %v924_v21, %v928_v51 }
 0x1a7   :  { %13755 = vst [vmem:[#allocation333_spill] sm:$0xff] %v6929_v48  ;;  %v6931_v12 = vpop.permute.xlu0 %2000  ;;  %v241_v48 = vld [vmem:[#allocation2 + $0x6a0] sm:$0xff]  ;;  %v931_v20 = vsel %vm509_vm0, %v926_v30, %v930_v11  ;;  %v6967_v39 = vmax.f32 %v237_v36, %v929_v53 }
 0x1a8   :  { %13756 = vst [vmem:[#allocation334_spill] sm:$0xff] %v6931_v12  ;;  %2118 = vrot.lane.b32.xlu1 %v6923_v24, %s5584_s0  ;;  %v242_v12 = vld [vmem:[#allocation2 + $0x6a8] sm:$0xff]  ;;  %v932_v7 = vrot.slane %v241_v48, 1  ;;  %v6965_v15 = vmax.f32 %v238_v52, %v931_v20 }
 0x1a9   :  { %2116 = vrot.lane.b32.xlu0 %v6925_v29, %s5584_s0  ;;  %v934_v62 = vrot.slane %v242_v12, 1  ;;  %13766 = vst [vmem:[#allocation344_spill] sm:$0xff] %v6967_v39 }
 0x1aa   :  { %v6943_v32 = vpop.permute.xlu1 %2006  ;;  %13765 = vst [vmem:[#allocation343_spill] sm:$0xff] %v6965_v15  ;;  %v933_v21 = vsel %vm509_vm0, %v928_v51, %v932_v7 }
 0x1ab   :  { %13759 = vst [vmem:[#allocation337_spill] sm:$0xff] %v6943_v32  ;;  %v6945_v40 = vpop.permute.xlu0 %2004  ;;  %v243_v32 = vld [vmem:[#allocation2 + $0x6b0] sm:$0xff]  ;;  %v935_v30 = vsel %vm509_vm0, %v930_v11, %v934_v62  ;;  %v6981_v52 = vmax.f32 %v239_v22, %v933_v21 }
 0x1ac   :  { %13760 = vst [vmem:[#allocation338_spill] sm:$0xff] %v6945_v40  ;;  %2122 = vrot.lane.b32.xlu1 %v6937_v50, %s5584_s0  ;;  %v244_v40 = vld [vmem:[#allocation2 + $0x6b8] sm:$0xff]  ;;  %v936_v27 = vrot.slane %v243_v32, 1  ;;  %v6979_v36 = vmax.f32 %v240_v34, %v935_v30 }
 0x1ad   :  { %2120 = vrot.lane.b32.xlu0 %v6939_v6, %s5584_s0  ;;  %v938_v60 = vrot.slane %v244_v40, 1  ;;  %13770 = vst [vmem:[#allocation348_spill] sm:$0xff] %v6981_v52 }
 0x1ae   :  { %v6957_v24 = vpop.permute.xlu1 %2010  ;;  %13769 = vst [vmem:[#allocation347_spill] sm:$0xff] %v6979_v36  ;;  %v937_v51 = vsel %vm509_vm0, %v932_v7, %v936_v27 }
 0x1af   :  { %13763 = vst [vmem:[#allocation341_spill] sm:$0xff] %v6957_v24  ;;  %v6959_v29 = vpop.permute.xlu0 %2008  ;;  %v245_v24 = vld [vmem:[#allocation2 + $0x6c0] sm:$0xff]  ;;  %v939_v11 = vsel %vm509_vm0, %v934_v62, %v938_v60  ;;  %v6995_v34 = vmax.f32 %v241_v48, %v937_v51 }
 0x1b0   :  { %13764 = vst [vmem:[#allocation342_spill] sm:$0xff] %v6959_v29  ;;  %2126 = vrot.lane.b32.xlu1 %v6951_v63, %s5584_s0  ;;  %v246_v29 = vld [vmem:[#allocation2 + $0x6c8] sm:$0xff]  ;;  %v940_v53 = vrot.slane %v245_v24, 1  ;;  %v6993_v22 = vmax.f32 %v242_v12, %v939_v11 }
 0x1b1   :  { %2124 = vrot.lane.b32.xlu0 %v6953_v26, %s5584_s0  ;;  %v942_v20 = vrot.slane %v246_v29, 1  ;;  %13774 = vst [vmem:[#allocation352_spill] sm:$0xff] %v6995_v34 }
 0x1b2   :  { %v6971_v50 = vpop.permute.xlu1 %2014  ;;  %13773 = vst [vmem:[#allocation351_spill] sm:$0xff] %v6993_v22  ;;  %v941_v7 = vsel %vm509_vm0, %v936_v27, %v940_v53 }
 0x1b3   :  { %13767 = vst [vmem:[#allocation345_spill] sm:$0xff] %v6971_v50  ;;  %v6973_v6 = vpop.permute.xlu0 %2012  ;;  %v247_v50 = vld [vmem:[#allocation2 + $0x6d0] sm:$0xff]  ;;  %v943_v62 = vsel %vm509_vm0, %v938_v60, %v942_v20  ;;  %v7009_v12 = vmax.f32 %v243_v32, %v941_v7 }
 0x1b4   :  { %13768 = vst [vmem:[#allocation346_spill] sm:$0xff] %v6973_v6  ;;  %2130 = vrot.lane.b32.xlu1 %v6965_v15, %s5584_s0  ;;  %v248_v6 = vld [vmem:[#allocation2 + $0x6d8] sm:$0xff]  ;;  %v944_v21 = vrot.slane %v247_v50, 1  ;;  %v7007_v48 = vmax.f32 %v244_v40, %v943_v62 }
 0x1b5   :  { %2128 = vrot.lane.b32.xlu0 %v6967_v39, %s5584_s0  ;;  %v946_v30 = vrot.slane %v248_v6, 1  ;;  %13778 = vst [vmem:[#allocation356_spill] sm:$0xff] %v7009_v12 }
 0x1b6   :  { %v6985_v63 = vpop.permute.xlu1 %2018  ;;  %13777 = vst [vmem:[#allocation355_spill] sm:$0xff] %v7007_v48  ;;  %v945_v27 = vsel %vm509_vm0, %v940_v53, %v944_v21 }
 0x1b7   :  { %13771 = vst [vmem:[#allocation349_spill] sm:$0xff] %v6985_v63  ;;  %v6987_v26 = vpop.permute.xlu0 %2016  ;;  %v249_v63 = vld [vmem:[#allocation2 + $0x6e0] sm:$0xff]  ;;  %v947_v60 = vsel %vm509_vm0, %v942_v20, %v946_v30  ;;  %v7023_v40 = vmax.f32 %v245_v24, %v945_v27 }
 0x1b8   :  { %13772 = vst [vmem:[#allocation350_spill] sm:$0xff] %v6987_v26  ;;  %2134 = vrot.lane.b32.xlu1 %v6979_v36, %s5584_s0  ;;  %v250_v26 = vld [vmem:[#allocation2 + $0x6e8] sm:$0xff]  ;;  %v948_v51 = vrot.slane %v249_v63, 1  ;;  %v7021_v32 = vmax.f32 %v246_v29, %v947_v60 }
 0x1b9   :  { %2132 = vrot.lane.b32.xlu0 %v6981_v52, %s5584_s0  ;;  %v950_v11 = vrot.slane %v250_v26, 1  ;;  %13782 = vst [vmem:[#allocation360_spill] sm:$0xff] %v7023_v40 }
 0x1ba   :  { %v6999_v15 = vpop.permute.xlu1 %2022  ;;  %13781 = vst [vmem:[#allocation359_spill] sm:$0xff] %v7021_v32  ;;  %v949_v53 = vsel %vm509_vm0, %v944_v21, %v948_v51 }
 0x1bb   :  { %13775 = vst [vmem:[#allocation353_spill] sm:$0xff] %v6999_v15  ;;  %v7001_v39 = vpop.permute.xlu0 %2020  ;;  %v251_v15 = vld [vmem:[#allocation2 + $0x6f0] sm:$0xff]  ;;  %v951_v20 = vsel %vm509_vm0, %v946_v30, %v950_v11  ;;  %v7037_v29 = vmax.f32 %v247_v50, %v949_v53 }
 0x1bc   :  { %13776 = vst [vmem:[#allocation354_spill] sm:$0xff] %v7001_v39  ;;  %2138 = vrot.lane.b32.xlu1 %v6993_v22, %s5584_s0  ;;  %v252_v39 = vld [vmem:[#allocation2 + $0x6f8] sm:$0xff]  ;;  %v952_v7 = vrot.slane %v251_v15, 1  ;;  %v7035_v24 = vmax.f32 %v248_v6, %v951_v20 }
 0x1bd   :  { %2136 = vrot.lane.b32.xlu0 %v6995_v34, %s5584_s0  ;;  %v954_v62 = vrot.slane %v252_v39, 1  ;;  %13786 = vst [vmem:[#allocation364_spill] sm:$0xff] %v7037_v29 }
 0x1be   :  { %v7013_v36 = vpop.permute.xlu1 %2026  ;;  %13785 = vst [vmem:[#allocation363_spill] sm:$0xff] %v7035_v24  ;;  %v953_v21 = vsel %vm509_vm0, %v948_v51, %v952_v7 }
 0x1bf   :  { %13779 = vst [vmem:[#allocation357_spill] sm:$0xff] %v7013_v36  ;;  %v7015_v52 = vpop.permute.xlu0 %2024  ;;  %v253_v36 = vld [vmem:[#allocation2 + $0x700] sm:$0xff]  ;;  %v955_v30 = vsel %vm509_vm0, %v950_v11, %v954_v62  ;;  %v7051_v6 = vmax.f32 %v249_v63, %v953_v21 }
 0x1c0   :  { %13780 = vst [vmem:[#allocation358_spill] sm:$0xff] %v7015_v52  ;;  %2142 = vrot.lane.b32.xlu1 %v7007_v48, %s5584_s0  ;;  %v254_v52 = vld [vmem:[#allocation2 + $0x708] sm:$0xff]  ;;  %v956_v27 = vrot.slane %v253_v36, 1  ;;  %v7049_v50 = vmax.f32 %v250_v26, %v955_v30 }
 0x1c1   :  { %2140 = vrot.lane.b32.xlu0 %v7009_v12, %s5584_s0  ;;  %v958_v60 = vrot.slane %v254_v52, 1  ;;  %13790 = vst [vmem:[#allocation368_spill] sm:$0xff] %v7051_v6 }
 0x1c2   :  { %v7027_v22 = vpop.permute.xlu1 %2030  ;;  %13789 = vst [vmem:[#allocation367_spill] sm:$0xff] %v7049_v50  ;;  %v957_v51 = vsel %vm509_vm0, %v952_v7, %v956_v27 }
 0x1c3   :  { %13783 = vst [vmem:[#allocation361_spill] sm:$0xff] %v7027_v22  ;;  %v7029_v34 = vpop.permute.xlu0 %2028  ;;  %v255_v22 = vld [vmem:[#allocation2 + $0x710] sm:$0xff]  ;;  %v959_v11 = vsel %vm509_vm0, %v954_v62, %v958_v60  ;;  %v7065_v26 = vmax.f32 %v251_v15, %v957_v51 }
 0x1c4   :  { %13784 = vst [vmem:[#allocation362_spill] sm:$0xff] %v7029_v34  ;;  %2146 = vrot.lane.b32.xlu1 %v7021_v32, %s5584_s0  ;;  %v256_v34 = vld [vmem:[#allocation2 + $0x718] sm:$0xff]  ;;  %v960_v53 = vrot.slane %v255_v22, 1  ;;  %v7063_v63 = vmax.f32 %v252_v39, %v959_v11 }
 0x1c5   :  { %2144 = vrot.lane.b32.xlu0 %v7023_v40, %s5584_s0  ;;  %v962_v20 = vrot.slane %v256_v34, 1  ;;  %13794 = vst [vmem:[#allocation372_spill] sm:$0xff] %v7065_v26 }
 0x1c6   :  { %v7041_v48 = vpop.permute.xlu1 %2034  ;;  %13793 = vst [vmem:[#allocation371_spill] sm:$0xff] %v7063_v63  ;;  %v961_v7 = vsel %vm509_vm0, %v956_v27, %v960_v53 }
 0x1c7   :  { %13787 = vst [vmem:[#allocation365_spill] sm:$0xff] %v7041_v48  ;;  %v7043_v12 = vpop.permute.xlu0 %2032  ;;  %v257_v48 = vld [vmem:[#allocation2 + $0x720] sm:$0xff]  ;;  %v963_v62 = vsel %vm509_vm0, %v958_v60, %v962_v20  ;;  %v7079_v39 = vmax.f32 %v253_v36, %v961_v7 }
 0x1c8   :  { %13788 = vst [vmem:[#allocation366_spill] sm:$0xff] %v7043_v12  ;;  %2150 = vrot.lane.b32.xlu1 %v7035_v24, %s5584_s0  ;;  %v258_v12 = vld [vmem:[#allocation2 + $0x728] sm:$0xff]  ;;  %v964_v21 = vrot.slane %v257_v48, 1  ;;  %v7077_v15 = vmax.f32 %v254_v52, %v963_v62 }
 0x1c9   :  { %2148 = vrot.lane.b32.xlu0 %v7037_v29, %s5584_s0  ;;  %v966_v30 = vrot.slane %v258_v12, 1  ;;  %13798 = vst [vmem:[#allocation376_spill] sm:$0xff] %v7079_v39 }
 0x1ca   :  { %v7055_v32 = vpop.permute.xlu1 %2038  ;;  %13797 = vst [vmem:[#allocation375_spill] sm:$0xff] %v7077_v15  ;;  %v965_v27 = vsel %vm509_vm0, %v960_v53, %v964_v21 }
 0x1cb   :  { %13791 = vst [vmem:[#allocation369_spill] sm:$0xff] %v7055_v32  ;;  %v7057_v40 = vpop.permute.xlu0 %2036  ;;  %v259_v32 = vld [vmem:[#allocation2 + $0x730] sm:$0xff]  ;;  %v967_v60 = vsel %vm509_vm0, %v962_v20, %v966_v30  ;;  %v7093_v52 = vmax.f32 %v255_v22, %v965_v27 }
 0x1cc   :  { %13792 = vst [vmem:[#allocation370_spill] sm:$0xff] %v7057_v40  ;;  %2154 = vrot.lane.b32.xlu1 %v7049_v50, %s5584_s0  ;;  %v260_v40 = vld [vmem:[#allocation2 + $0x738] sm:$0xff]  ;;  %v968_v51 = vrot.slane %v259_v32, 1  ;;  %v7091_v36 = vmax.f32 %v256_v34, %v967_v60 }
 0x1cd   :  { %2152 = vrot.lane.b32.xlu0 %v7051_v6, %s5584_s0  ;;  %v970_v11 = vrot.slane %v260_v40, 1  ;;  %13802 = vst [vmem:[#allocation380_spill] sm:$0xff] %v7093_v52 }
 0x1ce   :  { %v7069_v24 = vpop.permute.xlu1 %2042  ;;  %13801 = vst [vmem:[#allocation379_spill] sm:$0xff] %v7091_v36  ;;  %v969_v53 = vsel %vm509_vm0, %v964_v21, %v968_v51 }
 0x1cf   :  { %13795 = vst [vmem:[#allocation373_spill] sm:$0xff] %v7069_v24  ;;  %v7071_v29 = vpop.permute.xlu0 %2040  ;;  %v261_v24 = vld [vmem:[#allocation2 + $0x740] sm:$0xff]  ;;  %v971_v20 = vsel %vm509_vm0, %v966_v30, %v970_v11  ;;  %v7107_v34 = vmax.f32 %v257_v48, %v969_v53 }
 0x1d0   :  { %13796 = vst [vmem:[#allocation374_spill] sm:$0xff] %v7071_v29  ;;  %2158 = vrot.lane.b32.xlu1 %v7063_v63, %s5584_s0  ;;  %v262_v29 = vld [vmem:[#allocation2 + $0x748] sm:$0xff]  ;;  %v972_v7 = vrot.slane %v261_v24, 1  ;;  %v7105_v22 = vmax.f32 %v258_v12, %v971_v20 }
 0x1d1   :  { %2156 = vrot.lane.b32.xlu0 %v7065_v26, %s5584_s0  ;;  %v974_v62 = vrot.slane %v262_v29, 1  ;;  %13806 = vst [vmem:[#allocation384_spill] sm:$0xff] %v7107_v34 }
 0x1d2   :  { %v7083_v50 = vpop.permute.xlu1 %2046  ;;  %13805 = vst [vmem:[#allocation383_spill] sm:$0xff] %v7105_v22  ;;  %v973_v21 = vsel %vm509_vm0, %v968_v51, %v972_v7 }
 0x1d3   :  { %13799 = vst [vmem:[#allocation377_spill] sm:$0xff] %v7083_v50  ;;  %v7085_v6 = vpop.permute.xlu0 %2044  ;;  %v263_v50 = vld [vmem:[#allocation2 + $0x750] sm:$0xff]  ;;  %v975_v30 = vsel %vm509_vm0, %v970_v11, %v974_v62  ;;  %v7121_v12 = vmax.f32 %v259_v32, %v973_v21 }
 0x1d4   :  { %13800 = vst [vmem:[#allocation378_spill] sm:$0xff] %v7085_v6  ;;  %2162 = vrot.lane.b32.xlu1 %v7077_v15, %s5584_s0  ;;  %v264_v6 = vld [vmem:[#allocation2 + $0x758] sm:$0xff]  ;;  %v976_v27 = vrot.slane %v263_v50, 1  ;;  %v7119_v48 = vmax.f32 %v260_v40, %v975_v30 }
 0x1d5   :  { %2160 = vrot.lane.b32.xlu0 %v7079_v39, %s5584_s0  ;;  %v978_v60 = vrot.slane %v264_v6, 1  ;;  %13810 = vst [vmem:[#allocation388_spill] sm:$0xff] %v7121_v12 }
 0x1d6   :  { %v7097_v63 = vpop.permute.xlu1 %2050  ;;  %13809 = vst [vmem:[#allocation387_spill] sm:$0xff] %v7119_v48  ;;  %v977_v51 = vsel %vm509_vm0, %v972_v7, %v976_v27 }
 0x1d7   :  { %13803 = vst [vmem:[#allocation381_spill] sm:$0xff] %v7097_v63  ;;  %v7099_v26 = vpop.permute.xlu0 %2048  ;;  %v265_v63 = vld [vmem:[#allocation2 + $0x760] sm:$0xff]  ;;  %v979_v11 = vsel %vm509_vm0, %v974_v62, %v978_v60  ;;  %v7135_v40 = vmax.f32 %v261_v24, %v977_v51 }
 0x1d8   :  { %13804 = vst [vmem:[#allocation382_spill] sm:$0xff] %v7099_v26  ;;  %2166 = vrot.lane.b32.xlu1 %v7091_v36, %s5584_s0  ;;  %v266_v26 = vld [vmem:[#allocation2 + $0x768] sm:$0xff]  ;;  %v980_v53 = vrot.slane %v265_v63, 1  ;;  %v7133_v32 = vmax.f32 %v262_v29, %v979_v11 }
 0x1d9   :  { %2164 = vrot.lane.b32.xlu0 %v7093_v52, %s5584_s0  ;;  %v982_v20 = vrot.slane %v266_v26, 1  ;;  %13814 = vst [vmem:[#allocation392_spill] sm:$0xff] %v7135_v40 }
 0x1da   :  { %v7111_v15 = vpop.permute.xlu1 %2054  ;;  %13813 = vst [vmem:[#allocation391_spill] sm:$0xff] %v7133_v32  ;;  %v981_v7 = vsel %vm509_vm0, %v976_v27, %v980_v53 }
 0x1db   :  { %13807 = vst [vmem:[#allocation385_spill] sm:$0xff] %v7111_v15  ;;  %v7113_v39 = vpop.permute.xlu0 %2052  ;;  %v267_v15 = vld [vmem:[#allocation2 + $0x770] sm:$0xff]  ;;  %v983_v62 = vsel %vm509_vm0, %v978_v60, %v982_v20  ;;  %v7149_v24 = vmax.f32 %v263_v50, %v981_v7  ;;  %v13823_v50 = vrot.slane %v5614_v8, 1 }
 0x1dc   :  { %13808 = vst [vmem:[#allocation386_spill] sm:$0xff] %v7113_v39  ;;  %2170 = vrot.lane.b32.xlu1 %v7105_v22, %s5584_s0  ;;  %v268_v39 = vld [vmem:[#allocation2 + $0x778] sm:$0xff]  ;;  %v984_v21 = vrot.slane %v267_v15, 1  ;;  %v7147_v29 = vmax.f32 %v264_v6, %v983_v62 }
 0x1dd   :  { %2168 = vrot.lane.b32.xlu0 %v7107_v34, %s5584_s0  ;;  %v986_v30 = vrot.slane %v268_v39, 1  ;;  %13818 = vst [vmem:[#allocation396_spill] sm:$0xff] %v7149_v24 }
 0x1de   :  { %v7125_v36 = vpop.permute.xlu1 %2058  ;;  %13817 = vst [vmem:[#allocation395_spill] sm:$0xff] %v7147_v29  ;;  %v985_v27 = vsel %vm509_vm0, %v980_v53, %v984_v21  ;;  %v13824_v53 = vrot.slane %v5611_v2, 1 }
 0x1df   :  { %13811 = vst [vmem:[#allocation389_spill] sm:$0xff] %v7125_v36  ;;  %v7127_v52 = vpop.permute.xlu0 %2056  ;;  %v987_v60 = vsel %vm509_vm0, %v982_v20, %v986_v30  ;;  %v7163_v6 = vmax.f32 %v265_v63, %v985_v27  ;;  %v1231_v20 = vsel %vm509_vm0, %v986_v30, %v13823_v50  ;;  %v7396_v36 = vld [vmem:[%s12538_s1 + $0x80] sm:$0xff] }
 0x1e0   :  { %13812 = vst [vmem:[#allocation390_spill] sm:$0xff] %v7127_v52  ;;  %2174 = vrot.lane.b32.xlu1 %v7119_v48, %s5584_s0  ;;  %v1230_v62 = vsel %vm509_vm0, %v984_v21, %v13824_v53  ;;  %v7179_v63 = vmax.f32 %v268_v39, %v1231_v20  ;;  %v7377_v52 = vld [vmem:[%s12538_s1 + $0x250] sm:$0xff]  ;;  %13873 = vst [vmem:[#allocation449_spill] sm:$0xff] %v7396_v36  ;;  %v7512_v36 = vld [vmem:[%s12538_s1 + $0xc0] sm:$0xff] }
 0x1e1   :  { %2172 = vrot.lane.b32.xlu0 %v7121_v12, %s5584_s0  ;;  %13822 = vst [vmem:[#allocation400_spill] sm:$0xff] %v7163_v6  ;;  %13870 = vst [vmem:[#allocation446_spill] sm:$0xff] %v7377_v52  ;;  %v7493_v52 = vld [vmem:[%s12538_s1 + $0x290] sm:$0xff] }
 0x1e2   :  { %v7139_v22 = vpop.permute.xlu1 %2062  ;;  %13827 = vst [vmem:[#allocation403_spill] sm:$0xff] %v7179_v63  ;;  %13886 = vst [vmem:[#allocation462_spill] sm:$0xff] %v7493_v52  ;;  %v7577_v52 = vld [vmem:[%s12538_s1 + $0xd8] sm:$0xff] }
 0x1e3   :  { %13815 = vst [vmem:[#allocation393_spill] sm:$0xff] %v7139_v22  ;;  %v7141_v34 = vpop.permute.xlu0 %2060  ;;  %v7443_v22 = vld [vmem:[%s12538_s1 + $0x278] sm:$0xff]  ;;  %13889 = vst [vmem:[#allocation465_spill] sm:$0xff] %v7512_v36  ;;  %v7596_v36 = vld [vmem:[%s12538_s1 + $0xe0] sm:$0xff] }
 0x1e4   :  { %13816 = vst [vmem:[#allocation394_spill] sm:$0xff] %v7141_v34  ;;  %2178 = vrot.lane.b32.xlu1 %v7133_v32, %s5584_s0  ;;  %v7161_v32 = vmax.f32 %v266_v26, %v987_v60  ;;  %v7181_v26 = vmax.f32 %v267_v15, %v1230_v62  ;;  %v7372_v34 = vld [vmem:[%s12538_s1 + $0x70] sm:$0xff]  ;;  %13900 = vst [vmem:[#allocation476_spill] sm:$0xff] %v7577_v52  ;;  %v2196_v52 = vsel %vm2192_vm1, %v5965_v25, %v5963_v46 }
 0x1e5   :  { %2176 = vrot.lane.b32.xlu0 %v7135_v40, %s5584_s0  ;;  %v7259_v40 = vld [vmem:[%s12538_s1 + $0x200] sm:$0xff]  ;;  %13869 = vst [vmem:[#allocation445_spill] sm:$0xff] %v7372_v34  ;;  %v7498_v34 = vld [vmem:[%s12538_s1 + $0xb8] sm:$0xff]  ;;  %13903 = vst [vmem:[#allocation479_spill] sm:$0xff] %v7596_v36  ;;  %v2197_v46 = vsel %vm2192_vm1, %v5979_v43, %v5977_v3 }
 0x1e6   :  { %v7153_v11 = vpop.permute.xlu1 %2066  ;;  %13821 = vst [vmem:[#allocation399_spill] sm:$0xff] %v7161_v32  ;;  %13828 = vst [vmem:[#allocation404_spill] sm:$0xff] %v7181_v26  ;;  %v7683_v36 = vld [vmem:[%s12538_s1 + $0x2e8] sm:$0xff] }
 0x1e7   :  { %13819 = vst [vmem:[#allocation397_spill] sm:$0xff] %v7153_v11  ;;  %v7155_v51 = vpop.permute.xlu0 %2064  ;;  %13846 = vst [vmem:[#allocation422_spill] sm:$0xff] %v7259_v40 }
 0x1e8   :  { %13820 = vst [vmem:[#allocation398_spill] sm:$0xff] %v7155_v51  ;;  %2182 = vrot.lane.b32.xlu1 %v7147_v29, %s5584_s0  ;;  %v7244_v29 = vld [vmem:[%s12538_s1 + $0x18] sm:$0xff]  ;;  %v7344_v51 = vld [vmem:[%s12538_s1 + $0x60] sm:$0xff]  ;;  %13887 = vst [vmem:[#allocation463_spill] sm:$0xff] %v7498_v34 }
 0x1e9   :  { %2180 = vrot.lane.b32.xlu0 %v7149_v24, %s5584_s0  ;;  %13843 = vst [vmem:[#allocation419_spill] sm:$0xff] %v7244_v29  ;;  %13863 = vst [vmem:[#allocation439_spill] sm:$0xff] %v7344_v51 }
 0x1ea   :  { %v7171_v7 = vpop.permute.xlu1 %2070  ;;  %13913 = vst [vmem:[#allocation489_spill] sm:$0xff] %v7683_v36 }
 0x1eb   :  { %13825 = vst [vmem:[#allocation401_spill] sm:$0xff] %v7171_v7  ;;  %v7173_v48 = vpop.permute.xlu0 %2068  ;;  %v7339_v7 = vld [vmem:[%s12538_s1 + $0x238] sm:$0xff] }
 0x1ec   :  { %13826 = vst [vmem:[#allocation402_spill] sm:$0xff] %v7173_v48  ;;  %2186 = vrot.lane.b32.xlu1 %v7161_v32, %s5584_s0  ;;  %v7239_v32 = vld [vmem:[%s12538_s1 + $0x1f0] sm:$0xff]  ;;  %v7334_v48 = vld [vmem:[%s12538_s1 + $0x58] sm:$0xff]  ;;  %13862 = vst [vmem:[#allocation438_spill] sm:$0xff] %v7339_v7 }
 0x1ed   :  { %2184 = vrot.lane.b32.xlu0 %v7163_v6, %s5584_s0  ;;  %13842 = vst [vmem:[#allocation418_spill] sm:$0xff] %v7239_v32  ;;  %v7249_v6 = vld [vmem:[%s12538_s1 + $0x1f8] sm:$0xff]  ;;  %13861 = vst [vmem:[#allocation437_spill] sm:$0xff] %v7334_v48 }
 0x1ee   :  { %v7183_v8 = vpop.permute.xlu1 %2074  ;;  %13844 = vst [vmem:[#allocation420_spill] sm:$0xff] %v7249_v6 }
 0x1ef   :  { %13829 = vst [vmem:[#allocation405_spill] sm:$0xff] %v7183_v8  ;;  %v7185_v30 = vpop.permute.xlu0 %2072 }
 0x1f0   :  { %13830 = vst [vmem:[#allocation406_spill] sm:$0xff] %v7185_v30  ;;  %2190 = vrot.lane.b32.xlu1 %v7179_v63, %s5584_s0  ;;  %v7234_v63 = vld [vmem:[%s12538_s1 + $0x10] sm:$0xff]  ;;  %v7349_v30 = vld [vmem:[%s12538_s1 + $0x240] sm:$0xff] }
 0x1f1   :  { %2188 = vrot.lane.b32.xlu0 %v7181_v26, %s5584_s0  ;;  %13841 = vst [vmem:[#allocation417_spill] sm:$0xff] %v7234_v63  ;;  %v7254_v26 = vld [vmem:[%s12538_s1 + $0x20] sm:$0xff]  ;;  %13864 = vst [vmem:[#allocation440_spill] sm:$0xff] %v7349_v30  ;;  %v7480_v30 = vld [vmem:[%s12538_s1 + $0xb0] sm:$0xff] }
 0x1f2   :  { %v7191_v2 = vpop.permute.xlu1 %2078  ;;  %13845 = vst [vmem:[#allocation421_spill] sm:$0xff] %v7254_v26  ;;  %13885 = vst [vmem:[#allocation461_spill] sm:$0xff] %v7480_v30  ;;  %v7582_v30 = vld [vmem:[%s12538_s1 + $0x2b8] sm:$0xff] }
 0x1f3   :  { %13831 = vst [vmem:[#allocation407_spill] sm:$0xff] %v7191_v2  ;;  %v7193_v21 = vpop.permute.xlu0 %2076  ;;  %v7327_v2 = vld [vmem:[%s12538_s1 + $0x230] sm:$0xff]  ;;  %13901 = vst [vmem:[#allocation477_spill] sm:$0xff] %v7582_v30 }
 0x1f4   :  { %13832 = vst [vmem:[#allocation408_spill] sm:$0xff] %v7193_v21  ;;  %2555 = vrot.lane.b32.xlu1 %v5621_v18, %s5585_s19  ;;  %v7322_v21 = vld [vmem:[%s12538_s1 + $0x50] sm:$0xff]  ;;  %13860 = vst [vmem:[#allocation436_spill] sm:$0xff] %v7327_v2  ;;  %v7527_v2 = vld [vmem:[%s12538_s1] sm:$0xff] }
 0x1f5   :  { %2553 = vrot.lane.b32.xlu0 %v5624_v19, %s5585_s19  ;;  %13859 = vst [vmem:[#allocation435_spill] sm:$0xff] %v7322_v21  ;;  %13892 = vst [vmem:[#allocation468_spill] sm:$0xff] %v7527_v2 }
 0x1f6   :  { %v7199_v15 = vpop.permute.xlu1 %2082 }
 0x1f7   :  { %13833 = vst [vmem:[#allocation409_spill] sm:$0xff] %v7199_v15  ;;  %v7201_v39 = vpop.permute.xlu0 %2080  ;;  %v7317_v15 = vld [vmem:[%s12538_s1 + $0x228] sm:$0xff] }
 0x1f8   :  { %13834 = vst [vmem:[#allocation410_spill] sm:$0xff] %v7201_v39  ;;  %2559 = vrot.lane.b32.xlu1 %v5657_v41, %s5585_s19  ;;  %v7312_v39 = vld [vmem:[%s12538_s1 + $0x48] sm:$0xff]  ;;  %13858 = vst [vmem:[#allocation434_spill] sm:$0xff] %v7317_v15  ;;  %v7503_v15 = vld [vmem:[%s12538_s1 + $0x298] sm:$0xff] }
 0x1f9   :  { %2557 = vrot.lane.b32.xlu0 %v5647_v33, %s5585_s19  ;;  %13857 = vst [vmem:[#allocation433_spill] sm:$0xff] %v7312_v39  ;;  %v7456_v39 = vld [vmem:[%s12538_s1 + $0xa0] sm:$0xff]  ;;  %13888 = vst [vmem:[#allocation464_spill] sm:$0xff] %v7503_v15 }
 0x1fa   :  { %v7207_v60 = vpop.permute.xlu1 %2086  ;;  %13882 = vst [vmem:[#allocation458_spill] sm:$0xff] %v7456_v39  ;;  %v7601_v15 = vld [vmem:[%s12538_s1 + $0x2c0] sm:$0xff] }
 0x1fb   :  { %13835 = vst [vmem:[#allocation411_spill] sm:$0xff] %v7207_v60  ;;  %v7209_v27 = vpop.permute.xlu0 %2084  ;;  %v7303_v60 = vld [vmem:[%s12538_s1 + $0x220] sm:$0xff]  ;;  %13904 = vst [vmem:[#allocation480_spill] sm:$0xff] %v7601_v15  ;;  %v7678_v15 = vld [vmem:[%s12538_s1 + $0x108] sm:$0xff] }
 0x1fc   :  { %13836 = vst [vmem:[#allocation412_spill] sm:$0xff] %v7209_v27  ;;  %2563 = vrot.lane.b32.xlu1 %v5677_v57, %s5585_s19  ;;  %v7298_v27 = vld [vmem:[%s12538_s1 + $0x40] sm:$0xff]  ;;  %13856 = vst [vmem:[#allocation432_spill] sm:$0xff] %v7303_v60  ;;  %v7433_v60 = vld [vmem:[%s12538_s1 + $0x270] sm:$0xff] }
 0x1fd   :  { %2561 = vrot.lane.b32.xlu0 %v5667_v49, %s5585_s19  ;;  %13855 = vst [vmem:[#allocation431_spill] sm:$0xff] %v7298_v27  ;;  %13878 = vst [vmem:[#allocation454_spill] sm:$0xff] %v7433_v60  ;;  %v7438_v27 = vld [vmem:[%s12538_s1 + $0x98] sm:$0xff]  ;;  %v7550_v60 = vld [vmem:[%s12538_s1 + $0x2b0] sm:$0xff] }
 0x1fe   :  { %v7215_v50 = vpop.permute.xlu1 %2090  ;;  %13879 = vst [vmem:[#allocation455_spill] sm:$0xff] %v7438_v27  ;;  %13897 = vst [vmem:[#allocation473_spill] sm:$0xff] %v7550_v60  ;;  %v2193_v60 = vsel %vm2192_vm1, %v5923_v54, %v5937_v0  ;;  %v7637_v0 = vld [vmem:[%s12538_s1 + $0x2d0] sm:$0xff] }
 0x1ff   :  { %13837 = vst [vmem:[#allocation413_spill] sm:$0xff] %v7215_v50  ;;  %v7217_v20 = vpop.permute.xlu0 %2088  ;;  %v7293_v50 = vld [vmem:[%s12538_s1 + $0x218] sm:$0xff]  ;;  %13912 = vst [vmem:[#allocation488_spill] sm:$0xff] %v7678_v15 }
 0x200   :  { %13838 = vst [vmem:[#allocation414_spill] sm:$0xff] %v7217_v20  ;;  %2567 = vrot.lane.b32.xlu1 %v5697_v13, %s5585_s19  ;;  %v7278_v20 = vld [vmem:[%s12538_s1 + $0x30] sm:$0xff]  ;;  %13854 = vst [vmem:[#allocation430_spill] sm:$0xff] %v7293_v50  ;;  %v7461_v50 = vld [vmem:[%s12538_s1 + $0x280] sm:$0xff] }
 0x201   :  { %2565 = vrot.lane.b32.xlu0 %v5687_v1, %s5585_s19  ;;  %13851 = vst [vmem:[#allocation427_spill] sm:$0xff] %v7278_v20  ;;  %13883 = vst [vmem:[#allocation459_spill] sm:$0xff] %v7461_v50  ;;  %v7564_v50 = vld [vmem:[%s12538_s1 + $0x8] sm:$0xff] }
 0x202   :  { %v7223_v53 = vpop.permute.xlu1 %2094  ;;  %13899 = vst [vmem:[#allocation475_spill] sm:$0xff] %v7564_v50 }
 0x203   :  { %13839 = vst [vmem:[#allocation415_spill] sm:$0xff] %v7223_v53  ;;  %v7225_v62 = vpop.permute.xlu0 %2092  ;;  %v7273_v53 = vld [vmem:[%s12538_s1 + $0x208] sm:$0xff] }
 0x204   :  { %13840 = vst [vmem:[#allocation416_spill] sm:$0xff] %v7225_v62  ;;  %2571 = vrot.lane.b32.xlu1 %v5717_v35, %s5585_s19  ;;  %v7268_v62 = vld [vmem:[%s12538_s1 + $0x28] sm:$0xff]  ;;  %13850 = vst [vmem:[#allocation426_spill] sm:$0xff] %v7273_v53  ;;  %v7386_v35 = vld [vmem:[%s12538_s1 + $0x78] sm:$0xff] }
 0x205   :  { %2569 = vrot.lane.b32.xlu0 %v5707_v23, %s5585_s19  ;;  %13849 = vst [vmem:[#allocation425_spill] sm:$0xff] %v7268_v62  ;;  %13871 = vst [vmem:[#allocation447_spill] sm:$0xff] %v7386_v35  ;;  %v7391_v23 = vld [vmem:[%s12538_s1 + $0x258] sm:$0xff]  ;;  %v7414_v53 = vld [vmem:[%s12538_s1 + $0x88] sm:$0xff] }
 0x206   :  { %v7261_v24 = vpop.permute.xlu1 %2098  ;;  %13872 = vst [vmem:[#allocation448_spill] sm:$0xff] %v7391_v23  ;;  %13875 = vst [vmem:[#allocation451_spill] sm:$0xff] %v7414_v53  ;;  %v7517_v23 = vld [vmem:[%s12538_s1 + $0x2a0] sm:$0xff]  ;;  %v7540_v35 = vld [vmem:[%s12538_s1 + $0x2a8] sm:$0xff] }
 0x207   :  { %13847 = vst [vmem:[#allocation423_spill] sm:$0xff] %v7261_v24  ;;  %v7263_v12 = vpop.permute.xlu0 %2096  ;;  %v7283_v24 = vld [vmem:[%s12538_s1 + $0x210] sm:$0xff]  ;;  %13890 = vst [vmem:[#allocation466_spill] sm:$0xff] %v7517_v23  ;;  %v7587_v53 = vld [vmem:[%s12538_s1 + $0x1e8] sm:$0xff]  ;;  %v2194_v23 = vsel %vm2192_vm1, %v5921_v37, %v5935_v5  ;;  %v2195_v37 = vsel %vm2192_vm1, %v5951_v56, %v5949_v38  ;;  %v3034_v38 = vmax.f32 %v5624_v19, %v2193_v60 }
 0x208   :  { %13848 = vst [vmem:[#allocation424_spill] sm:$0xff] %v7263_v12  ;;  %13852 = vst [vmem:[#allocation428_spill] sm:$0xff] %v7283_v24  ;;  %v7288_v12 = vld [vmem:[%s12538_s1 + $0x38] sm:$0xff]  ;;  %2575 = vrot.lane.b32.xlu1 %v5737_v55, %s5585_s19  ;;  %v7362_v55 = vld [vmem:[%s12538_s1 + $0x68] sm:$0xff]  ;;  %v3036_v54 = vmax.f32 %v5621_v18, %v2194_v23  ;;  %v3038_v19 = vmax.f32 %v5647_v33, %v2195_v37  ;;  %v3040_v37 = vmax.f32 %v5657_v41, %v2196_v52 }
 0x209   :  { %13853 = vst [vmem:[#allocation429_spill] sm:$0xff] %v7288_v12  ;;  %2573 = vrot.lane.b32.xlu0 %v5727_v45, %s5585_s19  ;;  %13867 = vst [vmem:[#allocation443_spill] sm:$0xff] %v7362_v55  ;;  %v7367_v45 = vld [vmem:[%s12538_s1 + $0x248] sm:$0xff]  ;;  %v7642_v5 = vld [vmem:[%s12538_s1 + $0xf8] sm:$0xff]  ;;  %v2198_v60 = vsel %vm2192_vm1, %v5993_v59, %v5991_v16 }
 0x20a   :  { %v7351_v8 = vpop.permute.xlu1 %2102  ;;  %13868 = vst [vmem:[#allocation444_spill] sm:$0xff] %v7367_v45  ;;  %13895 = vst [vmem:[#allocation471_spill] sm:$0xff] %v7540_v35  ;;  %v7545_v45 = vld [vmem:[%s12538_s1 + $0xd0] sm:$0xff]  ;;  %v7667_v56 = vld [vmem:[%s12538_s1 + $0x2e0] sm:$0xff] }
 0x20b   :  { %13865 = vst [vmem:[#allocation441_spill] sm:$0xff] %v7351_v8  ;;  %v7353_v11 = vpop.permute.xlu0 %2100  ;;  %v7424_v8 = vld [vmem:[%s12538_s1 + $0x90] sm:$0xff]  ;;  %13896 = vst [vmem:[#allocation472_spill] sm:$0xff] %v7545_v45  ;;  %v7621_v45 = vld [vmem:[%s12538_s1 + $0x2c8] sm:$0xff] }
 0x20c   :  { %13866 = vst [vmem:[#allocation442_spill] sm:$0xff] %v7353_v11  ;;  %v7401_v11 = vld [vmem:[%s12538_s1 + $0x260] sm:$0xff]  ;;  %2579 = vrot.lane.b32.xlu1 %v5757_v17, %s5585_s19  ;;  %v7419_v17 = vld [vmem:[%s12538_s1 + $0x268] sm:$0xff]  ;;  %13877 = vst [vmem:[#allocation453_spill] sm:$0xff] %v7424_v8 }
 0x20d   :  { %13874 = vst [vmem:[#allocation450_spill] sm:$0xff] %v7401_v11  ;;  %2577 = vrot.lane.b32.xlu0 %v5747_v4, %s5585_s19  ;;  %13876 = vst [vmem:[#allocation452_spill] sm:$0xff] %v7419_v17  ;;  %v7466_v4 = vld [vmem:[%s12538_s1 + $0xa8] sm:$0xff]  ;;  %v7626_v35 = vld [vmem:[%s12538_s1 + $0xf0] sm:$0xff] }
 0x20e   :  { %v7445_v24 = vpop.permute.xlu1 %2106  ;;  %13884 = vst [vmem:[#allocation460_spill] sm:$0xff] %v7466_v4  ;;  %13902 = vst [vmem:[#allocation478_spill] sm:$0xff] %v7587_v53  ;;  %v7717_v33 = vld [vmem:[%s12538_s1 + $0x2f0] sm:$0xff]  ;;  %v7723_v23 = vld [vmem:[%s12538_s1 + $0x118] sm:$0xff] }
 0x20f   :  { %13880 = vst [vmem:[#allocation456_spill] sm:$0xff] %v7445_v24  ;;  %v7447_v20 = vpop.permute.xlu0 %2104  ;;  %v7475_v24 = vld [vmem:[%s12538_s1 + $0x288] sm:$0xff]  ;;  %13908 = vst [vmem:[#allocation484_spill] sm:$0xff] %v7626_v35  ;;  %v7728_v41 = vld [vmem:[%s12538_s1 + $0x2f8] sm:$0xff] }
 0x210   :  { %13881 = vst [vmem:[#allocation457_spill] sm:$0xff] %v7447_v20  ;;  %2583 = vrot.lane.b32.xlu1 %v5777_v47, %s5585_s19  ;;  %v7522_v20 = vld [vmem:[%s12538_s1 + $0xc8] sm:$0xff]  ;;  %13909 = vst [vmem:[#allocation485_spill] sm:$0xff] %v7642_v5 }
 0x211   :  { %2581 = vrot.lane.b32.xlu0 %v5767_v31, %s5585_s19  ;;  %13891 = vst [vmem:[#allocation467_spill] sm:$0xff] %v7522_v20  ;;  %13911 = vst [vmem:[#allocation487_spill] sm:$0xff] %v7667_v56 }
 0x212   :  { %v7529_v11 = vpop.permute.xlu1 %2110  ;;  %13917 = vst [vmem:[#allocation493_spill] sm:$0xff] %v7717_v33  ;;  %13918 = vst [vmem:[#allocation494_spill] sm:$0xff] %v7723_v23 }
 0x213   :  { %13893 = vst [vmem:[#allocation469_spill] sm:$0xff] %v7529_v11  ;;  %v7531_v21 = vpop.permute.xlu0 %2108  ;;  %v7559_v11 = vld [vmem:[%s12538_s1 + $0x1e0] sm:$0xff]  ;;  %13919 = vst [vmem:[#allocation495_spill] sm:$0xff] %v7728_v41 }
 0x214   :  { %13894 = vst [vmem:[#allocation470_spill] sm:$0xff] %v7531_v21  ;;  %13898 = vst [vmem:[#allocation474_spill] sm:$0xff] %v7559_v11  ;;  %2587 = vrot.lane.b32.xlu1 %v5797_v14, %s5585_s19  ;;  %v7606_v21 = vld [vmem:[%s12538_s1 + $0xe8] sm:$0xff]  ;;  %v13926_v3 = vunpack.c.l.bf16 %v7559_v11  ;;  %v13991_v11 = vld [vmem:[#allocation23_spill] sm:$0xff] }
 0x215   :  { %2585 = vrot.lane.b32.xlu0 %v5787_v61, %s5585_s19  ;;  %13905 = vst [vmem:[#allocation481_spill] sm:$0xff] %v7606_v21  ;;  %v7696_v21 = vld [vmem:[%s12538_s1 + $0x110] sm:$0xff] }
 0x216   :  { %v7608_v17 = vpop.permute.xlu1 %2114  ;;  %13916 = vst [vmem:[#allocation492_spill] sm:$0xff] %v7696_v21  ;;  %v7744_v16 = vmul.f32 %v13926_v3, %v3034_v38  ;;  %v13928_v21 = vunpack.c.l.bf16 %v7234_v63  ;;  %v13932_v3 = vunpack.c.l.bf16 %v7587_v53  ;;  %v13937_v63 = vld [vmem:[#allocation74_spill] sm:$0xff] }
 0x217   :  { %13906 = vst [vmem:[#allocation482_spill] sm:$0xff] %v7608_v17  ;;  %v7610_v8 = vpop.permute.xlu0 %2112  ;;  %v7662_v17 = vld [vmem:[%s12538_s1 + $0x100] sm:$0xff] }
 0x218   :  { %13907 = vst [vmem:[#allocation483_spill] sm:$0xff] %v7610_v8  ;;  %2591 = vrot.lane.b32.xlu1 %v5817_v42, %s5585_s19  ;;  %v7657_v8 = vld [vmem:[%s12538_s1 + $0x2d8] sm:$0xff]  ;;  %13910 = vst [vmem:[#allocation486_spill] sm:$0xff] %v7662_v17  ;;  %v7748_v36 = vmul.f32 %v13928_v21, %v3038_v19  ;;  %v7766_v21 = vmul.f32 %v13932_v3, %v3036_v54 }
 0x219   :  { %2589 = vrot.lane.b32.xlu0 %v5807_v28, %s5585_s19  ;;  %13927 = vst [vmem:[#allocation500_spill] sm:$0xff] %v7744_v16  ;;  %v13972_v16 = vld [vmem:[#allocation427_spill] sm:$0xff] }
 0x21a   :  { %v7685_v30 = vpop.permute.xlu1 %2118  ;;  %13929 = vst [vmem:[#allocation501_spill] sm:$0xff] %v7748_v36  ;;  %13933 = vst [vmem:[#allocation504_spill] sm:$0xff] %v7766_v21  ;;  %v7799_v36 = vld [vmem:[%s12538_s1 + $0x308] sm:$0xff]  ;;  %v7863_v21 = vld [vmem:[%s12538_s1 + $0x318] sm:$0xff] }
 0x21b   :  { %13914 = vst [vmem:[#allocation490_spill] sm:$0xff] %v7685_v30  ;;  %v7687_v18 = vpop.permute.xlu0 %2116  ;;  %v13922_v30 = vunpack.c.l.bf16 %v7527_v2  ;;  %v2199_v2 = vsel %vm2192_vm1, %v6007_v10, %v6005_v44  ;;  %v3044_v10 = vmax.f32 %v5677_v57, %v2198_v60  ;;  %v7794_v60 = vld [vmem:[%s12538_s1 + $0x128] sm:$0xff]  ;;  %13945 = vst [vmem:[#allocation506_spill] sm:$0xff] %v7799_v36  ;;  %v7810_v57 = vld [vmem:[%s12538_s1 + $0x130] sm:$0xff] }
 0x21c   :  { %13915 = vst [vmem:[#allocation491_spill] sm:$0xff] %v7687_v18  ;;  %2595 = vrot.lane.b32.xlu1 %v5837_v9, %s5585_s19  ;;  %v13924_v18 = vunpack.c.l.bf16 %v7564_v50 }
 0x21d   :  { %2593 = vrot.lane.b32.xlu0 %v5827_v58, %s5585_s19  ;;  %v7736_v43 = vmul.f32 %v13922_v30, %v3034_v38  ;;  %v7757_v30 = vld [vmem:[%s12538_s1 + $0x120] sm:$0xff] }
 0x21e   :  { %v7730_v59 = vpop.permute.xlu1 %2122  ;;  %v7740_v25 = vmul.f32 %v13924_v18, %v3036_v54  ;;  %13930 = vst [vmem:[#allocation502_spill] sm:$0xff] %v7757_v30  ;;  %v7762_v38 = vld [vmem:[%s12538_s1 + $0x300] sm:$0xff]  ;;  %v13936_v18 = vld [vmem:[#allocation73_spill] sm:$0xff]  ;;  %v13940_v54 = vunpack.c.l.bf16 %v7244_v29 }
 0x21f   :  { %13920 = vst [vmem:[#allocation496_spill] sm:$0xff] %v7730_v59  ;;  %v7732_v52 = vpop.permute.xlu0 %2120  ;;  %13923 = vst [vmem:[#allocation498_spill] sm:$0xff] %v7736_v43  ;;  %v3042_v59 = vmax.f32 %v5667_v49, %v2197_v46  ;;  %v13934_v49 = vunpack.c.l.bf16 %v7239_v32  ;;  %v2200_v50 = vsel %vm2192_vm1, %v13937_v63, %v13936_v18  ;;  %v13939_v43 = vld [vmem:[#allocation37_spill] sm:$0xff] }
 0x220   :  { %13921 = vst [vmem:[#allocation497_spill] sm:$0xff] %v7732_v52  ;;  %13925 = vst [vmem:[#allocation499_spill] sm:$0xff] %v7740_v25  ;;  %v13938_v25 = vld [vmem:[#allocation39_spill] sm:$0xff]  ;;  %v7783_v3 = vmul.f32 %v13940_v54, %v3040_v37  ;;  %v3046_v54 = vmax.f32 %v5687_v1, %v2199_v2  ;;  %v13946_v29 = vld [vmem:[#allocation77_spill] sm:$0xff]  ;;  %v13953_v2 = vunpack.c.l.bf16 %v7259_v40  ;;  %v13973_v40 = vunpack.c.l.bf16 %v13972_v16 }
 0x221   :  { %13931 = vst [vmem:[#allocation503_spill] sm:$0xff] %v7762_v38  ;;  %v7770_v46 = vmul.f32 %v13934_v49, %v3038_v19  ;;  %2599 = vrot.lane.b32.xlu1 %v13938_v25, %s5585_s19  ;;  %2597 = vrot.lane.b32.xlu0 %v13939_v43, %s5585_s19  ;;  %v13942_v19 = vunpack.c.l.bf16 %v7249_v6  ;;  %13944 = vst [vmem:[#allocation37_spill] sm:$0xff] %v7794_v60  ;;  %v13955_v63 = vld [vmem:[#allocation81_spill] sm:$0xff] }
 0x222   :  { %13941 = vst [vmem:[#allocation74_spill] sm:$0xff] %v7783_v3  ;;  %v13947_v3 = vld [vmem:[#allocation78_spill] sm:$0xff]  ;;  %v7812_v52 = vpop.permute.xlu1 %2126  ;;  %v7867_v6 = vmul.f32 %v13973_v40, %v3046_v54  ;;  %v7883_v18 = vld [vmem:[%s12538_s1 + $0x328] sm:$0xff] }
 0x223   :  { %13935 = vst [vmem:[#allocation505_spill] sm:$0xff] %v7770_v46  ;;  %v7787_v49 = vmul.f32 %v13942_v19, %v3040_v37  ;;  %v2201_v37 = vsel %vm2192_vm1, %v13947_v3, %v13946_v29  ;;  %13948 = vst [vmem:[#allocation78_spill] sm:$0xff] %v7810_v57  ;;  %v13951_v46 = vunpack.c.l.bf16 %v7254_v26  ;;  %v7822_v3 = vmul.f32 %v13953_v2, %v3042_v59  ;;  %v13956_v29 = vld [vmem:[#allocation82_spill] sm:$0xff]  ;;  %v13969_v2 = vld [vmem:[#allocation89_spill] sm:$0xff] }
 0x224   :  { %13949 = vst [vmem:[#allocation507_spill] sm:$0xff] %v7812_v52  ;;  %v3048_v19 = vmax.f32 %v5697_v13, %v2200_v50  ;;  %v2202_v44 = vsel %vm2192_vm1, %v13956_v29, %v13955_v63  ;;  %v7831_v52 = vld [vmem:[%s12538_s1 + $0x310] sm:$0xff]  ;;  %v7845_v29 = vld [vmem:[%s12538_s1 + $0x138] sm:$0xff]  ;;  %13980 = vst [vmem:[#allocation512_spill] sm:$0xff] %v7883_v18 }
 0x225   :  { %13943 = vst [vmem:[#allocation39_spill] sm:$0xff] %v7787_v49  ;;  %v7814_v49 = vpop.permute.xlu0 %2124  ;;  %v7818_v1 = vmul.f32 %v13951_v46, %v3042_v59  ;;  %13954 = vst [vmem:[#allocation510_spill] sm:$0xff] %v7822_v3  ;;  %v13960_v46 = vld [vmem:[#allocation85_spill] sm:$0xff]  ;;  %v13963_v50 = vld [vmem:[#allocation43_spill] sm:$0xff] }
 0x226   :  { %13950 = vst [vmem:[#allocation508_spill] sm:$0xff] %v7814_v49  ;;  %13957 = vst [vmem:[#allocation82_spill] sm:$0xff] %v7831_v52  ;;  %v13958_v49 = vunpack.c.l.bf16 %v7268_v62  ;;  %2603 = vrot.lane.b32.xlu1 %v13963_v50, %s5585_s19  ;;  %v13964_v62 = vld [vmem:[#allocation41_spill] sm:$0xff]  ;;  %v13970_v63 = vld [vmem:[#allocation90_spill] sm:$0xff]  ;;  %v7885_v40 = vpop.permute.xlu1 %2130 }
 0x227   :  { %13952 = vst [vmem:[#allocation509_spill] sm:$0xff] %v7818_v1  ;;  %v13961_v1 = vld [vmem:[#allocation86_spill] sm:$0xff]  ;;  %2601 = vrot.lane.b32.xlu0 %v13964_v62, %s5585_s19  ;;  %v2204_v13 = vsel %vm2192_vm1, %v13970_v63, %v13969_v2  ;;  %13971 = vst [vmem:[#allocation41_spill] sm:$0xff] %v7863_v21  ;;  %v7878_v63 = vld [vmem:[%s12538_s1 + $0x320] sm:$0xff] }
 0x228   :  { %v7835_v26 = vmul.f32 %v13958_v49, %v3044_v10  ;;  %v2203_v59 = vsel %vm2192_vm1, %v13961_v1, %v13960_v46  ;;  %13962 = vst [vmem:[#allocation86_spill] sm:$0xff] %v7845_v29  ;;  %v13965_v49 = vld [vmem:[#allocation426_spill] sm:$0xff]  ;;  %v13968_v1 = vld [vmem:[#allocation17_spill] sm:$0xff]  ;;  %13981 = vst [vmem:[#allocation513_spill] sm:$0xff] %v7885_v40  ;;  %v3056_v40 = vmax.f32 %v13991_v11, %v2204_v13 }
 0x229   :  { %v3050_v46 = vmax.f32 %v13968_v1, %v2201_v37  ;;  %13974 = vst [vmem:[#allocation17_spill] sm:$0xff] %v7867_v6  ;;  %v13978_v37 = vld [vmem:[#allocation19_spill] sm:$0xff]  ;;  %v7887_v16 = vpop.permute.xlu0 %2128  ;;  %v13987_v6 = vld [vmem:[#allocation94_spill] sm:$0xff]  ;;  %v13992_v52 = vld [vmem:[#allocation97_spill] sm:$0xff] }
 0x22a   :  { %13959 = vst [vmem:[#allocation511_spill] sm:$0xff] %v7835_v26  ;;  %v13966_v26 = vunpack.c.l.bf16 %v13965_v49  ;;  %v13975_v49 = vld [vmem:[#allocation428_spill] sm:$0xff]  ;;  %v3052_v1 = vmax.f32 %v13978_v37, %v2202_v44  ;;  %13979 = vst [vmem:[#allocation19_spill] sm:$0xff] %v7878_v63  ;;  %v13985_v44 = vld [vmem:[#allocation21_spill] sm:$0xff]  ;;  %v7948_v18 = vpop.permute.xlu1 %2134 }
 0x22b   :  { %13982 = vst [vmem:[#allocation514_spill] sm:$0xff] %v7887_v16  ;;  %v3054_v37 = vmax.f32 %v13985_v44, %v2203_v59  ;;  %v13993_v16 = vld [vmem:[#allocation98_spill] sm:$0xff]  ;;  %v13996_v44 = vld [vmem:[#allocation45_spill] sm:$0xff]  ;;  %v14000_v13 = vld [vmem:[#allocation432_spill] sm:$0xff] }
 0x22c   :  { %v7853_v3 = vmul.f32 %v13966_v26, %v3044_v10  ;;  %v13976_v26 = vunpack.c.l.bf16 %v13975_v49  ;;  %v13988_v49 = vld [vmem:[#allocation430_spill] sm:$0xff]  ;;  %2605 = vrot.lane.b32.xlu0 %v13996_v44, %s5585_s19  ;;  %v14001_v2 = vunpack.c.l.bf16 %v14000_v13  ;;  %v14010_v13 = vld [vmem:[#allocation25_spill] sm:$0xff] }
 0x22d   :  { %v13989_v32 = vunpack.c.l.bf16 %v13988_v49  ;;  %v7910_v59 = vld [vmem:[%s12538_s1 + $0x330] sm:$0xff] }
 0x22e   :  { %13967 = vst [vmem:[#allocation43_spill] sm:$0xff] %v7853_v3  ;;  %v7871_v10 = vmul.f32 %v13976_v26, %v3046_v54  ;;  %v13983_v54 = vunpack.c.l.bf16 %v7288_v12  ;;  %v13986_v3 = vld [vmem:[#allocation93_spill] sm:$0xff]  ;;  %v2206_v12 = vsel %vm2192_vm1, %v13993_v16, %v13992_v52  ;;  %13994 = vst [vmem:[#allocation94_spill] sm:$0xff] %v7910_v59  ;;  %v7922_v16 = vmul.f32 %v14001_v2, %v3050_v46 }
 0x22f   :  { %v7900_v53 = vmul.f32 %v13989_v32, %v3048_v19  ;;  %v13997_v32 = vld [vmem:[#allocation431_spill] sm:$0xff]  ;;  %v14004_v52 = vld [vmem:[#allocation433_spill] sm:$0xff] }
 0x230   :  { %13977 = vst [vmem:[#allocation90_spill] sm:$0xff] %v7871_v10  ;;  %v7891_v26 = vmul.f32 %v13983_v54, %v3048_v19  ;;  %v2205_v10 = vsel %vm2192_vm1, %v13987_v6, %v13986_v3  ;;  %v13995_v6 = vld [vmem:[#allocation47_spill] sm:$0xff]  ;;  %v13998_v19 = vunpack.c.l.bf16 %v13997_v32  ;;  %14002 = vst [vmem:[#allocation98_spill] sm:$0xff] %v7922_v16  ;;  %v14007_v32 = vld [vmem:[#allocation434_spill] sm:$0xff] }
 0x231   :  { %13990 = vst [vmem:[#allocation21_spill] sm:$0xff] %v7900_v53  ;;  %2607 = vrot.lane.b32.xlu1 %v13995_v6, %s5585_s19  ;;  %v7929_v3 = vld [vmem:[%s12538_s1 + $0x338] sm:$0xff]  ;;  %v14005_v53 = vunpack.c.l.bf16 %v14004_v52  ;;  %v14011_v2 = vld [vmem:[#allocation101_spill] sm:$0xff]  ;;  %v7950_v52 = vpop.permute.xlu0 %2132 }
 0x232   :  { %13984 = vst [vmem:[#allocation515_spill] sm:$0xff] %v7891_v26  ;;  %v7918_v11 = vmul.f32 %v13998_v19, %v3050_v46  ;;  %14003 = vst [vmem:[#allocation47_spill] sm:$0xff] %v7929_v3  ;;  %v14008_v19 = vunpack.c.l.bf16 %v14007_v32  ;;  %v3058_v46 = vmax.f32 %v14010_v13, %v2205_v10  ;;  %v14012_v16 = vld [vmem:[#allocation102_spill] sm:$0xff]  ;;  %v7946_v26 = vld [vmem:[%s12538_s1 + $0x340] sm:$0xff] }
 0x233   :  { %v7933_v49 = vmul.f32 %v14005_v53, %v3052_v1  ;;  %v2207_v54 = vsel %vm2192_vm1, %v14012_v16, %v14011_v2  ;;  %14013 = vst [vmem:[#allocation25_spill] sm:$0xff] %v7946_v26  ;;  %14014 = vst [vmem:[#allocation102_spill] sm:$0xff] %v7948_v18  ;;  %v14016_v53 = vld [vmem:[#allocation435_spill] sm:$0xff]  ;;  %v14020_v10 = vld [vmem:[#allocation105_spill] sm:$0xff]  ;;  %v14025_v18 = vunpack.c.l.bf16 %v7334_v48 }
 0x234   :  { %13999 = vst [vmem:[#allocation23_spill] sm:$0xff] %v7918_v11  ;;  %v7937_v11 = vmul.f32 %v14008_v19, %v3052_v1  ;;  %14015 = vst [vmem:[#allocation517_spill] sm:$0xff] %v7950_v52  ;;  %v14019_v1 = vld [vmem:[#allocation27_spill] sm:$0xff]  ;;  %v14021_v13 = vld [vmem:[#allocation106_spill] sm:$0xff]  ;;  %v3062_v16 = vmax.f32 %v5767_v31, %v2207_v54 }
 0x235   :  { %14006 = vst [vmem:[#allocation45_spill] sm:$0xff] %v7933_v49  ;;  %v14017_v49 = vunpack.c.l.bf16 %v14016_v53  ;;  %v3060_v19 = vmax.f32 %v14019_v1, %v2206_v12  ;;  %v14022_v2 = vld [vmem:[#allocation436_spill] sm:$0xff]  ;;  %v7967_v29 = vmul.f32 %v14025_v18, %v3056_v40  ;;  %v14027_v52 = vld [vmem:[#allocation109_spill] sm:$0xff]  ;;  %v14028_v53 = vld [vmem:[#allocation110_spill] sm:$0xff]  ;;  %v14032_v18 = vunpack.c.l.bf16 %v7339_v7 }
 0x236   :  { %14009 = vst [vmem:[#allocation516_spill] sm:$0xff] %v7937_v11  ;;  %v2208_v11 = vsel %vm2192_vm1, %v14021_v13, %v14020_v10  ;;  %v14023_v63 = vunpack.c.l.bf16 %v14022_v2  ;;  %v7976_v1 = vld [vmem:[%s12538_s1 + $0x348] sm:$0xff]  ;;  %v14030_v13 = vld [vmem:[#allocation51_spill] sm:$0xff]  ;;  %v14035_v48 = vld [vmem:[#allocation114_spill] sm:$0xff] }
 0x237   :  { %v7954_v32 = vmul.f32 %v14017_v49, %v3054_v37  ;;  %14026 = vst [vmem:[#allocation106_spill] sm:$0xff] %v7967_v29  ;;  %v2209_v49 = vsel %vm2192_vm1, %v14028_v53, %v14027_v52  ;;  %14029 = vst [vmem:[#allocation110_spill] sm:$0xff] %v7976_v1  ;;  %2611 = vrot.lane.b32.xlu1 %v14030_v13, %s5585_s19  ;;  %v14034_v53 = vld [vmem:[#allocation113_spill] sm:$0xff]  ;;  %v14037_v52 = vunpack.c.l.bf16 %v7344_v51  ;;  %v14039_v10 = vld [vmem:[#allocation440_spill] sm:$0xff]  ;;  %v8015_v51 = vpop.permute.xlu0 %2136 }
 0x238   :  { %v7963_v21 = vmul.f32 %v14023_v63, %v3054_v37  ;;  %v14031_v63 = vld [vmem:[#allocation49_spill] sm:$0xff]  ;;  %v7984_v37 = vmul.f32 %v14032_v18, %v3056_v40  ;;  %v2210_v12 = vsel %vm2192_vm1, %v14035_v48, %v14034_v53  ;;  %v14040_v40 = vunpack.c.l.bf16 %v14039_v10  ;;  %v8011_v29 = vld [vmem:[%s12538_s1 + $0x358] sm:$0xff]  ;;  %v8013_v53 = vpop.permute.xlu1 %2138  ;;  %14046 = vst [vmem:[#allocation521_spill] sm:$0xff] %v8015_v51 }
 0x239   :  { %14018 = vst [vmem:[#allocation518_spill] sm:$0xff] %v7954_v32  ;;  %2609 = vrot.lane.b32.xlu0 %v14031_v63, %s5585_s19  ;;  %v7994_v32 = vld [vmem:[%s12538_s1 + $0x350] sm:$0xff]  ;;  %v3064_v31 = vmax.f32 %v5777_v47, %v2208_v11  ;;  %14045 = vst [vmem:[#allocation520_spill] sm:$0xff] %v8013_v53  ;;  %v3066_v11 = vmax.f32 %v5787_v61, %v2209_v49  ;;  %v3068_v53 = vmax.f32 %v5797_v14, %v2210_v12 }
 0x23a   :  { %14024 = vst [vmem:[#allocation27_spill] sm:$0xff] %v7963_v21  ;;  %14033 = vst [vmem:[#allocation51_spill] sm:$0xff] %v7984_v37  ;;  %v7998_v21 = vmul.f32 %v14037_v52, %v3058_v46  ;;  %v8002_v18 = vmul.f32 %v14040_v40, %v3058_v46  ;;  %v14042_v54 = vld [vmem:[#allocation117_spill] sm:$0xff]  ;;  %v14043_v37 = vld [vmem:[#allocation118_spill] sm:$0xff]  ;;  %v14047_v52 = vunpack.c.l.bf16 %v7362_v55 }
 0x23b   :  { %14036 = vst [vmem:[#allocation49_spill] sm:$0xff] %v7994_v32  ;;  %v2211_v48 = vsel %vm2192_vm1, %v14043_v37, %v14042_v54  ;;  %14044 = vst [vmem:[#allocation118_spill] sm:$0xff] %v8011_v29  ;;  %v14049_v46 = vld [vmem:[#allocation444_spill] sm:$0xff]  ;;  %v14053_v51 = vld [vmem:[#allocation121_spill] sm:$0xff] }
 0x23c   :  { %14038 = vst [vmem:[#allocation114_spill] sm:$0xff] %v7998_v21  ;;  %14041 = vst [vmem:[#allocation519_spill] sm:$0xff] %v8002_v18  ;;  %v8019_v21 = vmul.f32 %v14047_v52, %v3060_v19  ;;  %v14050_v40 = vunpack.c.l.bf16 %v14049_v46  ;;  %v8030_v54 = vld [vmem:[%s12538_s1 + $0x360] sm:$0xff]  ;;  %v14054_v18 = vld [vmem:[#allocation122_spill] sm:$0xff] }
 0x23d   :  { %14052 = vst [vmem:[#allocation524_spill] sm:$0xff] %v8030_v54  ;;  %v2212_v52 = vsel %vm2192_vm1, %v14054_v18, %v14053_v51  ;;  %v14055_v55 = vld [vmem:[#allocation125_spill] sm:$0xff]  ;;  %v14062_v14 = vld [vmem:[#allocation446_spill] sm:$0xff]  ;;  %v3070_v18 = vmax.f32 %v5807_v28, %v2211_v48 }
 0x23e   :  { %14048 = vst [vmem:[#allocation522_spill] sm:$0xff] %v8019_v21  ;;  %v8023_v47 = vmul.f32 %v14050_v40, %v3060_v19  ;;  %v14056_v21 = vld [vmem:[#allocation126_spill] sm:$0xff]  ;;  %v14057_v61 = vld [vmem:[#allocation57_spill] sm:$0xff]  ;;  %v14063_v12 = vunpack.c.l.bf16 %v14062_v14 }
 0x23f   :  { %v2213_v19 = vsel %vm2192_vm1, %v14056_v21, %v14055_v55  ;;  %2615 = vrot.lane.b32.xlu1 %v14057_v61, %s5585_s19  ;;  %v14058_v49 = vld [vmem:[#allocation53_spill] sm:$0xff]  ;;  %v14066_v55 = vld [vmem:[#allocation447_spill] sm:$0xff]  ;;  %v8076_v21 = vpop.permute.xlu1 %2142  ;;  %v14084_v54 = vld [vmem:[#allocation450_spill] sm:$0xff] }
 0x240   :  { %14051 = vst [vmem:[#allocation523_spill] sm:$0xff] %v8023_v47  ;;  %2613 = vrot.lane.b32.xlu0 %v14058_v49, %s5585_s19  ;;  %v14059_v37 = vld [vmem:[#allocation445_spill] sm:$0xff]  ;;  %v8050_v10 = vmul.f32 %v14063_v12, %v3062_v16  ;;  %v14067_v51 = vunpack.c.l.bf16 %v14066_v55  ;;  %14075 = vst [vmem:[#allocation526_spill] sm:$0xff] %v8076_v21  ;;  %v8078_v55 = vpop.permute.xlu0 %2140  ;;  %v14085_v21 = vunpack.c.l.bf16 %v14084_v54 }
 0x241   :  { %v14060_v47 = vunpack.c.l.bf16 %v14059_v37  ;;  %v8057_v40 = vld [vmem:[%s12538_s1 + $0x368] sm:$0xff]  ;;  %v8074_v48 = vld [vmem:[%s12538_s1 + $0x370] sm:$0xff]  ;;  %14076 = vst [vmem:[#allocation527_spill] sm:$0xff] %v8078_v55  ;;  %v14087_v55 = vld [vmem:[#allocation451_spill] sm:$0xff] }
 0x242   :  { %14064 = vst [vmem:[#allocation126_spill] sm:$0xff] %v8050_v10  ;;  %14065 = vst [vmem:[#allocation57_spill] sm:$0xff] %v8057_v40  ;;  %v8061_v7 = vmul.f32 %v14067_v51, %v3064_v31  ;;  %v14069_v37 = vld [vmem:[#allocation448_spill] sm:$0xff]  ;;  %v14072_v14 = vld [vmem:[#allocation129_spill] sm:$0xff]  ;;  %v3072_v51 = vmax.f32 %v5817_v42, %v2212_v52  ;;  %v8094_v29 = vmul.f32 %v14085_v21, %v3066_v11  ;;  %v14088_v42 = vunpack.c.l.bf16 %v14087_v55 }
 0x243   :  { %v8046_v46 = vmul.f32 %v14060_v47, %v3062_v16  ;;  %v14070_v47 = vunpack.c.l.bf16 %v14069_v37  ;;  %v14073_v16 = vld [vmem:[#allocation130_spill] sm:$0xff]  ;;  %v14081_v10 = vld [vmem:[#allocation449_spill] sm:$0xff] }
 0x244   :  { %14068 = vst [vmem:[#allocation53_spill] sm:$0xff] %v8061_v7  ;;  %v2214_v12 = vsel %vm2192_vm1, %v14073_v16, %v14072_v14  ;;  %14074 = vst [vmem:[#allocation130_spill] sm:$0xff] %v8074_v48  ;;  %v14078_v7 = vld [vmem:[#allocation134_spill] sm:$0xff]  ;;  %v14079_v16 = vld [vmem:[#allocation137_spill] sm:$0xff]  ;;  %v14082_v37 = vunpack.c.l.bf16 %v14081_v10  ;;  %v8098_v52 = vmul.f32 %v14088_v42, %v3068_v53 }
 0x245   :  { %14061 = vst [vmem:[#allocation122_spill] sm:$0xff] %v8046_v46  ;;  %v8065_v46 = vmul.f32 %v14070_v47, %v3064_v31  ;;  %v3074_v31 = vmax.f32 %v5827_v58, %v2213_v19  ;;  %v14077_v47 = vld [vmem:[#allocation133_spill] sm:$0xff]  ;;  %v14080_v14 = vld [vmem:[#allocation138_spill] sm:$0xff]  ;;  %v14091_v19 = vld [vmem:[#allocation60_spill] sm:$0xff]  ;;  %v3076_v21 = vmax.f32 %v5837_v9, %v2214_v12  ;;  %v8128_v9 = vpop.permute.xlu1 %2146  ;;  %v8130_v12 = vpop.permute.xlu0 %2144 }
 0x246   :  { %v2216_v28 = vsel %vm2192_vm1, %v14080_v14, %v14079_v16  ;;  %v8090_v2 = vmul.f32 %v14082_v37, %v3066_v11  ;;  %14086 = vst [vmem:[#allocation138_spill] sm:$0xff] %v8094_v29  ;;  %14089 = vst [vmem:[#allocation450_spill] sm:$0xff] %v8098_v52  ;;  %2617 = vrot.lane.b32.xlu0 %v14091_v19, %s5585_s19  ;;  %v14092_v14 = vld [vmem:[#allocation452_spill] sm:$0xff]  ;;  %v8118_v58 = vld [vmem:[%s12538_s1 + $0x378] sm:$0xff] }
 0x247   :  { %14071 = vst [vmem:[#allocation525_spill] sm:$0xff] %v8065_v46  ;;  %v2215_v46 = vsel %vm2192_vm1, %v14078_v7, %v14077_v47  ;;  %v14090_v7 = vld [vmem:[#allocation63_spill] sm:$0xff]  ;;  %v14093_v10 = vunpack.c.l.bf16 %v14092_v14  ;;  %14098 = vst [vmem:[#allocation452_spill] sm:$0xff] %v8118_v58  ;;  %v3080_v52 = vmax.f32 %v13938_v25, %v2216_v28  ;;  %v14099_v16 = vld [vmem:[#allocation141_spill] sm:$0xff]  ;;  %v14110_v25 = vunpack.c.l.bf16 %v7443_v22 }
 0x248   :  { %14083 = vst [vmem:[#allocation134_spill] sm:$0xff] %v8090_v2  ;;  %2619 = vrot.lane.b32.xlu1 %v14090_v7, %s5585_s19  ;;  %v14095_v2 = vld [vmem:[#allocation453_spill] sm:$0xff]  ;;  %v3078_v55 = vmax.f32 %v13939_v43, %v2215_v46  ;;  %v14105_v42 = vld [vmem:[#allocation454_spill] sm:$0xff]  ;;  %v14108_v43 = vunpack.c.l.bf16 %v7438_v27 }
 0x249   :  { %v8107_v37 = vmul.f32 %v14093_v10, %v3068_v53  ;;  %v14096_v47 = vunpack.c.l.bf16 %v14095_v2  ;;  %v14100_v10 = vld [vmem:[#allocation142_spill] sm:$0xff]  ;;  %v14101_v2 = vld [vmem:[#allocation145_spill] sm:$0xff]  ;;  %v8142_v28 = vmul.f32 %v14110_v25, %v3072_v51 }
 0x24a   :  { %v2217_v53 = vsel %vm2192_vm1, %v14100_v10, %v14099_v16  ;;  %14103 = vst [vmem:[#allocation142_spill] sm:$0xff] %v8128_v9  ;;  %v8138_v46 = vmul.f32 %v14108_v43, %v3072_v51  ;;  %v14112_v10 = vunpack.c.l.bf16 %v7456_v39  ;;  %v14120_v27 = vld [vmem:[#allocation154_spill] sm:$0xff]  ;;  %v14121_v51 = vld [vmem:[#allocation69_spill] sm:$0xff] }
 0x24b   :  { %14094 = vst [vmem:[#allocation63_spill] sm:$0xff] %v8107_v37  ;;  %v8111_v11 = vmul.f32 %v14096_v47, %v3070_v18  ;;  %v14102_v47 = vld [vmem:[#allocation146_spill] sm:$0xff]  ;;  %v14106_v37 = vunpack.c.l.bf16 %v14105_v42  ;;  %14111 = vst [vmem:[#allocation530_spill] sm:$0xff] %v8142_v28  ;;  %v14125_v39 = vld [vmem:[#allocation157_spill] sm:$0xff] }
 0x24c   :  { %14104 = vst [vmem:[#allocation146_spill] sm:$0xff] %v8130_v12  ;;  %14109 = vst [vmem:[#allocation529_spill] sm:$0xff] %v8138_v46  ;;  %v8146_v16 = vmul.f32 %v14112_v10, %v3074_v31  ;;  %v14117_v12 = vld [vmem:[#allocation149_spill] sm:$0xff]  ;;  %v14118_v42 = vld [vmem:[#allocation150_spill] sm:$0xff]  ;;  %2623 = vrot.lane.b32.xlu1 %v14121_v51, %s5585_s19  ;;  %v14123_v10 = vunpack.c.l.bf16 %v7466_v4 }
 0x24d   :  { %14097 = vst [vmem:[#allocation60_spill] sm:$0xff] %v8111_v11  ;;  %v2218_v11 = vsel %vm2192_vm1, %v14102_v47, %v14101_v2  ;;  %v8134_v29 = vmul.f32 %v14106_v37, %v3070_v18  ;;  %v14114_v47 = vld [vmem:[#allocation459_spill] sm:$0xff]  ;;  %v2219_v18 = vsel %vm2192_vm1, %v14118_v42, %v14117_v12  ;;  %v14119_v37 = vld [vmem:[#allocation153_spill] sm:$0xff]  ;;  %v14122_v25 = vld [vmem:[#allocation66_spill] sm:$0xff]  ;;  %v14128_v12 = vunpack.c.l.bf16 %v7475_v24 }
 0x24e   :  { %14113 = vst [vmem:[#allocation531_spill] sm:$0xff] %v8146_v16  ;;  %v14115_v9 = vunpack.c.l.bf16 %v14114_v47  ;;  %v2220_v43 = vsel %vm2192_vm1, %v14120_v27, %v14119_v37  ;;  %2621 = vrot.lane.b32.xlu0 %v14122_v25, %s5585_s19  ;;  %v3084_v42 = vmax.f32 %v13963_v50, %v2218_v11  ;;  %v14126_v16 = vld [vmem:[#allocation158_spill] sm:$0xff]  ;;  %v8175_v46 = vld [vmem:[%s12538_s1 + $0x380] sm:$0xff]  ;;  %v14130_v4 = vld [vmem:[#allocation461_spill] sm:$0xff]  ;;  %v14136_v11 = vunpack.c.l.bf16 %v7498_v34 }
 0x24f   :  { %14107 = vst [vmem:[#allocation528_spill] sm:$0xff] %v8134_v29  ;;  %v2221_v27 = vsel %vm2192_vm1, %v14126_v16, %v14125_v39  ;;  %14127 = vst [vmem:[#allocation154_spill] sm:$0xff] %v8175_v46  ;;  %v8179_v37 = vmul.f32 %v14128_v12, %v3076_v21  ;;  %v8193_v39 = vpop.permute.xlu1 %2150  ;;  %v3086_v28 = vmax.f32 %v13996_v44, %v2219_v18  ;;  %v14140_v12 = vld [vmem:[#allocation161_spill] sm:$0xff]  ;;  %v14149_v18 = vld [vmem:[#allocation76_spill] sm:$0xff] }
 0x250   :  { %v8150_v2 = vmul.f32 %v14115_v9, %v3074_v31  ;;  %v8165_v31 = vmul.f32 %v14123_v10, %v3076_v21  ;;  %v3082_v9 = vmax.f32 %v13964_v62, %v2217_v53  ;;  %v14131_v10 = vunpack.c.l.bf16 %v14130_v4  ;;  %v14133_v62 = vld [vmem:[#allocation462_spill] sm:$0xff]  ;;  %14138 = vst [vmem:[#allocation532_spill] sm:$0xff] %v8193_v39  ;;  %v14147_v39 = vld [vmem:[#allocation169_spill] sm:$0xff]  ;;  %2627 = vrot.lane.b32.xlu1 %v14149_v18, %s5585_s19 }
 0x251   :  { %14129 = vst [vmem:[#allocation69_spill] sm:$0xff] %v8179_v37  ;;  %v14134_v53 = vunpack.c.l.bf16 %v14133_v62  ;;  %v8191_v16 = vmul.f32 %v14136_v11, %v3080_v52  ;;  %v3088_v21 = vmax.f32 %v13995_v6, %v2220_v43  ;;  %v14141_v4 = vld [vmem:[#allocation162_spill] sm:$0xff]  ;;  %v14151_v43 = vld [vmem:[#allocation465_spill] sm:$0xff] }
 0x252   :  { %14116 = vst [vmem:[#allocation459_spill] sm:$0xff] %v8150_v2  ;;  %14124 = vst [vmem:[#allocation150_spill] sm:$0xff] %v8165_v31  ;;  %v8183_v31 = vmul.f32 %v14131_v10, %v3078_v55  ;;  %v8195_v2 = vpop.permute.xlu0 %2148  ;;  %v2222_v10 = vsel %vm2192_vm1, %v14141_v4, %v14140_v12  ;;  %v14143_v37 = vld [vmem:[#allocation166_spill] sm:$0xff]  ;;  %v14150_v4 = vld [vmem:[#allocation72_spill] sm:$0xff] }
 0x253   :  { %v8187_v50 = vmul.f32 %v14134_v53, %v3078_v55  ;;  %14137 = vst [vmem:[#allocation462_spill] sm:$0xff] %v8191_v16  ;;  %14139 = vst [vmem:[#allocation533_spill] sm:$0xff] %v8195_v2  ;;  %v14144_v53 = vld [vmem:[#allocation464_spill] sm:$0xff]  ;;  %v3090_v16 = vmax.f32 %v14031_v63, %v2221_v27  ;;  %v14148_v2 = vld [vmem:[#allocation170_spill] sm:$0xff]  ;;  %2625 = vrot.lane.b32.xlu0 %v14150_v4, %s5585_s19  ;;  %v14157_v63 = vunpack.c.l.bf16 %v7522_v20 }
 0x254   :  { %14132 = vst [vmem:[#allocation66_spill] sm:$0xff] %v8183_v31  ;;  %v14142_v31 = vld [vmem:[#allocation165_spill] sm:$0xff]  ;;  %v14145_v34 = vunpack.c.l.bf16 %v14144_v53  ;;  %v2224_v44 = vsel %vm2192_vm1, %v14148_v2, %v14147_v39  ;;  %v14159_v2 = vld [vmem:[#allocation471_spill] sm:$0xff] }
 0x255   :  { %14135 = vst [vmem:[#allocation158_spill] sm:$0xff] %v8187_v50  ;;  %v2223_v55 = vsel %vm2192_vm1, %v14143_v37, %v14142_v31  ;;  %v14152_v37 = vunpack.c.l.bf16 %v14151_v43  ;;  %v8228_v27 = vmul.f32 %v14157_v63, %v3084_v42  ;;  %v14160_v6 = vunpack.c.l.bf16 %v14159_v2  ;;  %v14165_v20 = vld [vmem:[#allocation177_spill] sm:$0xff]  ;;  %v14166_v63 = vld [vmem:[#allocation178_spill] sm:$0xff] }
 0x256   :  { %v8207_v11 = vmul.f32 %v14145_v34, %v3080_v52  ;;  %v14154_v34 = vld [vmem:[#allocation466_spill] sm:$0xff]  ;;  %v3094_v43 = vmax.f32 %v14058_v49, %v2223_v55  ;;  %v14172_v29 = vld [vmem:[#allocation473_spill] sm:$0xff]  ;;  %v14174_v49 = vld [vmem:[#allocation476_spill] sm:$0xff] }
 0x257   :  { %v8220_v31 = vmul.f32 %v14152_v37, %v3082_v9  ;;  %v14155_v52 = vunpack.c.l.bf16 %v14154_v34  ;;  %14158 = vst [vmem:[#allocation170_spill] sm:$0xff] %v8228_v27  ;;  %v8232_v39 = vmul.f32 %v14160_v6, %v3084_v42  ;;  %v3092_v37 = vmax.f32 %v14030_v13, %v2222_v10  ;;  %v8249_v42 = vpop.permute.xlu0 %2152  ;;  %v14169_v6 = vld [vmem:[#allocation472_spill] sm:$0xff] }
 0x258   :  { %14146 = vst [vmem:[#allocation162_spill] sm:$0xff] %v8207_v11  ;;  %v8237_v11 = vld [vmem:[%s12538_s1 + $0x388] sm:$0xff]  ;;  %v2226_v27 = vsel %vm2192_vm1, %v14166_v63, %v14165_v20  ;;  %14168 = vst [vmem:[#allocation178_spill] sm:$0xff] %v8249_v42  ;;  %v14173_v13 = vunpack.c.l.bf16 %v14172_v29  ;;  %v14175_v55 = vunpack.c.l.bf16 %v14174_v49  ;;  %v14190_v49 = vld [vmem:[#allocation186_spill] sm:$0xff] }
 0x259   :  { %14153 = vst [vmem:[#allocation166_spill] sm:$0xff] %v8220_v31  ;;  %v8224_v12 = vmul.f32 %v14155_v52, %v3082_v9  ;;  %14161 = vst [vmem:[#allocation76_spill] sm:$0xff] %v8232_v39  ;;  %v14163_v31 = vld [vmem:[#allocation173_spill] sm:$0xff]  ;;  %v14164_v9 = vld [vmem:[#allocation174_spill] sm:$0xff]  ;;  %v14170_v39 = vunpack.c.l.bf16 %v14169_v6 }
 0x25a   :  { %14162 = vst [vmem:[#allocation72_spill] sm:$0xff] %v8237_v11  ;;  %v2225_v52 = vsel %vm2192_vm1, %v14164_v9, %v14163_v31  ;;  %v8257_v10 = vmul.f32 %v14173_v13, %v3086_v28  ;;  %v8261_v2 = vmul.f32 %v14175_v55, %v3088_v21  ;;  %v3096_v9 = vmax.f32 %v14057_v61, %v2224_v44  ;;  %v14177_v31 = vld [vmem:[#allocation477_spill] sm:$0xff]  ;;  %v14183_v6 = vld [vmem:[#allocation182_spill] sm:$0xff]  ;;  %v14184_v13 = vld [vmem:[#allocation84_spill] sm:$0xff] }
 0x25b   :  { %14156 = vst [vmem:[#allocation464_spill] sm:$0xff] %v8224_v12  ;;  %v8247_v12 = vpop.permute.xlu1 %2154  ;;  %v8253_v50 = vmul.f32 %v14170_v39, %v3086_v28  ;;  %v14178_v63 = vunpack.c.l.bf16 %v14177_v31  ;;  %v14182_v39 = vld [vmem:[#allocation181_spill] sm:$0xff]  ;;  %2631 = vrot.lane.b32.xlu1 %v14184_v13, %s5585_s19  ;;  %v14185_v55 = vld [vmem:[#allocation80_spill] sm:$0xff] }
 0x25c   :  { %14167 = vst [vmem:[#allocation174_spill] sm:$0xff] %v8247_v12  ;;  %14176 = vst [vmem:[#allocation473_spill] sm:$0xff] %v8261_v2  ;;  %v14179_v12 = vld [vmem:[#allocation479_spill] sm:$0xff]  ;;  %2629 = vrot.lane.b32.xlu0 %v14185_v55, %s5585_s19  ;;  %v14186_v61 = vld [vmem:[#allocation480_spill] sm:$0xff] }
 0x25d   :  { %14171 = vst [vmem:[#allocation534_spill] sm:$0xff] %v8253_v50  ;;  %v8266_v20 = vmul.f32 %v14178_v63, %v3088_v21  ;;  %v14180_v42 = vunpack.c.l.bf16 %v14179_v12  ;;  %v2227_v50 = vsel %vm2192_vm1, %v14183_v6, %v14182_v39  ;;  %v14187_v44 = vunpack.c.l.bf16 %v14186_v61  ;;  %v14189_v12 = vld [vmem:[#allocation185_spill] sm:$0xff] }
 0x25e   :  { %v3098_v63 = vmax.f32 %v14091_v19, %v2225_v52  ;;  %v2228_v6 = vsel %vm2192_vm1, %v14190_v49, %v14189_v12  ;;  %v8292_v28 = vld [vmem:[%s12538_s1 + $0x390] sm:$0xff]  ;;  %v14197_v19 = vunpack.c.l.bf16 %v7626_v35 }
 0x25f   :  { %v8270_v34 = vmul.f32 %v14180_v42, %v3090_v16  ;;  %v8282_v21 = vmul.f32 %v14187_v44, %v3090_v16  ;;  %v3100_v42 = vmax.f32 %v14090_v7, %v2226_v27  ;;  %14191 = vst [vmem:[#allocation84_spill] sm:$0xff] %v8292_v28  ;;  %v14195_v16 = vunpack.c.l.bf16 %v7621_v45  ;;  %v14199_v27 = vld [vmem:[#allocation189_spill] sm:$0xff]  ;;  %v14200_v52 = vld [vmem:[#allocation190_spill] sm:$0xff]  ;;  %v8309_v12 = vpop.permute.xlu1 %2158 }
 0x260   :  { %v8304_v7 = vmul.f32 %v14197_v19, %v3094_v43  ;;  %v2229_v49 = vsel %vm2192_vm1, %v14200_v52, %v14199_v27  ;;  %14201 = vst [vmem:[#allocation190_spill] sm:$0xff] %v8309_v12  ;;  %v14206_v19 = vld [vmem:[#allocation193_spill] sm:$0xff]  ;;  %v14207_v35 = vld [vmem:[#allocation194_spill] sm:$0xff]  ;;  %v14208_v52 = vunpack.c.l.bf16 %v7657_v8 }
 0x261   :  { %14181 = vst [vmem:[#allocation477_spill] sm:$0xff] %v8270_v34  ;;  %14188 = vst [vmem:[#allocation182_spill] sm:$0xff] %v8282_v21  ;;  %v14192_v34 = vld [vmem:[#allocation481_spill] sm:$0xff]  ;;  %v8300_v44 = vmul.f32 %v14195_v16, %v3092_v37  ;;  %v8311_v21 = vpop.permute.xlu0 %2156  ;;  %v3102_v16 = vmax.f32 %v14122_v25, %v2227_v50  ;;  %v14212_v25 = vld [vmem:[#allocation88_spill] sm:$0xff] }
 0x262   :  { %v14193_v2 = vunpack.c.l.bf16 %v14192_v34  ;;  %14198 = vst [vmem:[#allocation186_spill] sm:$0xff] %v8304_v7  ;;  %14202 = vst [vmem:[#allocation535_spill] sm:$0xff] %v8311_v21  ;;  %v14203_v34 = vunpack.c.l.bf16 %v7637_v0  ;;  %v2230_v7 = vsel %vm2192_vm1, %v14207_v35, %v14206_v19  ;;  %v8327_v27 = vmul.f32 %v14208_v52, %v3096_v9  ;;  %v14209_v12 = vld [vmem:[#allocation197_spill] sm:$0xff]  ;;  %2633 = vrot.lane.b32.xlu0 %v14212_v25, %s5585_s19 }
 0x263   :  { %14196 = vst [vmem:[#allocation480_spill] sm:$0xff] %v8300_v44  ;;  %v3104_v21 = vmax.f32 %v14121_v51, %v2228_v6  ;;  %v14210_v44 = vld [vmem:[#allocation198_spill] sm:$0xff]  ;;  %v14213_v35 = vunpack.c.l.bf16 %v7662_v17  ;;  %v14217_v51 = vunpack.c.l.bf16 %v7678_v15  ;;  %v14220_v17 = vld [vmem:[#allocation201_spill] sm:$0xff] }
 0x264   :  { %v8296_v39 = vmul.f32 %v14193_v2, %v3092_v37  ;;  %v8315_v2 = vmul.f32 %v14203_v34, %v3094_v43  ;;  %v2231_v43 = vsel %vm2192_vm1, %v14210_v44, %v14209_v12  ;;  %v3106_v44 = vmax.f32 %v14150_v4, %v2229_v49  ;;  %v8354_v34 = vld [vmem:[%s12538_s1 + $0x398] sm:$0xff]  ;;  %v14224_v15 = vld [vmem:[#allocation209_spill] sm:$0xff]  ;;  %v8366_v4 = vpop.permute.xlu1 %2162 }
 0x265   :  { %v8340_v50 = vmul.f32 %v14213_v35, %v3098_v63  ;;  %v8348_v6 = vmul.f32 %v14217_v51, %v3100_v42  ;;  %14219 = vst [vmem:[#allocation88_spill] sm:$0xff] %v8354_v34  ;;  %v14221_v35 = vld [vmem:[#allocation202_spill] sm:$0xff]  ;;  %v8368_v49 = vpop.permute.xlu0 %2160  ;;  %v14228_v12 = vld [vmem:[#allocation489_spill] sm:$0xff] }
 0x266   :  { %14194 = vst [vmem:[#allocation80_spill] sm:$0xff] %v8296_v39  ;;  %v14204_v39 = vunpack.c.l.bf16 %v7642_v5  ;;  %v3108_v5 = vmax.f32 %v14149_v18, %v2230_v7  ;;  %v14225_v51 = vld [vmem:[#allocation210_spill] sm:$0xff]  ;;  %14226 = vst [vmem:[#allocation202_spill] sm:$0xff] %v8366_v4  ;;  %v14230_v18 = vld [vmem:[#allocation492_spill] sm:$0xff] }
 0x267   :  { %14214 = vst [vmem:[#allocation194_spill] sm:$0xff] %v8340_v50  ;;  %v2232_v50 = vsel %vm2192_vm1, %v14221_v35, %v14220_v17  ;;  %v14231_v7 = vunpack.c.l.bf16 %v14230_v18  ;;  %v3110_v35 = vmax.f32 %v14185_v55, %v2231_v43  ;;  %v14233_v17 = vld [vmem:[#allocation213_spill] sm:$0xff]  ;;  %v14240_v55 = vld [vmem:[#allocation100_spill] sm:$0xff] }
 0x268   :  { %v8319_v37 = vmul.f32 %v14204_v39, %v3096_v9  ;;  %v14211_v39 = vld [vmem:[#allocation92_spill] sm:$0xff]  ;;  %v14215_v9 = vunpack.c.l.bf16 %v7667_v56 }
 0x269   :  { %2635 = vrot.lane.b32.xlu1 %v14211_v39, %s5585_s19  ;;  %14218 = vst [vmem:[#allocation92_spill] sm:$0xff] %v8348_v6  ;;  %v2234_v6 = vsel %vm2192_vm1, %v14225_v51, %v14224_v15  ;;  %v8376_v56 = vmul.f32 %v14231_v7, %v3102_v16  ;;  %v14235_v51 = vunpack.c.l.bf16 %v7717_v33  ;;  %v14241_v43 = vld [vmem:[#allocation96_spill] sm:$0xff]  ;;  %v14247_v7 = vunpack.c.l.bf16 %v7757_v30 }
 0x26a   :  { %14205 = vst [vmem:[#allocation536_spill] sm:$0xff] %v8319_v37  ;;  %v8344_v52 = vmul.f32 %v14215_v9, %v3098_v63  ;;  %v14222_v37 = vld [vmem:[#allocation205_spill] sm:$0xff]  ;;  %v14223_v63 = vld [vmem:[#allocation206_spill] sm:$0xff]  ;;  %2637 = vrot.lane.b32.xlu0 %v14241_v43, %s5585_s19 }
 0x26b   :  { %v2233_v9 = vsel %vm2192_vm1, %v14223_v63, %v14222_v37  ;;  %14227 = vst [vmem:[#allocation206_spill] sm:$0xff] %v8368_v49  ;;  %14232 = vst [vmem:[#allocation210_spill] sm:$0xff] %v8376_v56  ;;  %v14234_v63 = vld [vmem:[#allocation214_spill] sm:$0xff]  ;;  %v8384_v15 = vmul.f32 %v14235_v51, %v3102_v16  ;;  %v14236_v49 = vunpack.c.l.bf16 %v7723_v23  ;;  %v3112_v51 = vmax.f32 %v14184_v13, %v2232_v50  ;;  %v8429_v50 = vpop.permute.xlu1 %2166 }
 0x26c   :  { %14216 = vst [vmem:[#allocation198_spill] sm:$0xff] %v8344_v52  ;;  %v14229_v52 = vunpack.c.l.bf16 %v14228_v12  ;;  %v2235_v37 = vsel %vm2192_vm1, %v14234_v63, %v14233_v17  ;;  %v14242_v63 = vunpack.c.l.bf16 %v7728_v41  ;;  %v8407_v23 = vmax.f32 %v14211_v39, %v2234_v6  ;;  %14254 = vst [vmem:[#allocation542_spill] sm:$0xff] %v8429_v50  ;;  %v8431_v6 = vpop.permute.xlu0 %2164  ;;  %v14269_v56 = vld [vmem:[#allocation230_spill] sm:$0xff] }
 0x26d   :  { %v8388_v4 = vmul.f32 %v14236_v49, %v3104_v21  ;;  %2639 = vrot.lane.b32.xlu1 %v14240_v55, %s5585_s19  ;;  %v8404_v49 = vmax.f32 %v14212_v25, %v2233_v9  ;;  %v14251_v13 = vunpack.c.l.bf16 %v7794_v60  ;;  %v8427_v39 = vmax.f32 %v14241_v43, %v2235_v37  ;;  %14255 = vst [vmem:[#allocation543_spill] sm:$0xff] %v8431_v6  ;;  %v14264_v37 = vld [vmem:[#allocation221_spill] sm:$0xff]  ;;  %v14265_v43 = vld [vmem:[#allocation222_spill] sm:$0xff] }
 0x26e   :  { %v8372_v19 = vmul.f32 %v14229_v52, %v3100_v42  ;;  %v14238_v42 = vld [vmem:[#allocation217_spill] sm:$0xff]  ;;  %v14239_v52 = vld [vmem:[#allocation218_spill] sm:$0xff]  ;;  %v8400_v16 = vmul.f32 %v14242_v63, %v3104_v21  ;;  %14245 = vst [vmem:[#allocation96_spill] sm:$0xff] %v8407_v23  ;;  %v14249_v21 = vunpack.c.l.bf16 %v7762_v38  ;;  %v14256_v9 = vunpack.c.l.bf16 %v7799_v36 }
 0x26f   :  { %14237 = vst [vmem:[#allocation214_spill] sm:$0xff] %v8388_v4  ;;  %v2236_v18 = vsel %vm2192_vm1, %v14239_v52, %v14238_v42  ;;  %14244 = vst [vmem:[#allocation100_spill] sm:$0xff] %v8404_v49  ;;  %v8412_v52 = vld [vmem:[%s12538_s1 + $0x3a0] sm:$0xff]  ;;  %v8416_v4 = vmul.f32 %v14247_v7, %v3106_v44  ;;  %v8424_v25 = vmul.f32 %v14251_v13, %v3108_v5  ;;  %v14258_v7 = vunpack.c.l.bf16 %v7810_v57  ;;  %v14266_v6 = vld [vmem:[#allocation225_spill] sm:$0xff] }
 0x270   :  { %14243 = vst [vmem:[#allocation218_spill] sm:$0xff] %v8400_v16  ;;  %14246 = vst [vmem:[#allocation537_spill] sm:$0xff] %v8412_v52  ;;  %v8420_v63 = vmul.f32 %v14249_v21, %v3106_v44  ;;  %v8435_v30 = vmul.f32 %v14256_v9, %v3108_v5  ;;  %v14260_v44 = vld [vmem:[#allocation82_spill] sm:$0xff]  ;;  %v8446_v13 = vmax.f32 %v14240_v55, %v2236_v18  ;;  %v14268_v9 = vld [vmem:[#allocation229_spill] sm:$0xff] }
 0x271   :  { %14248 = vst [vmem:[#allocation538_spill] sm:$0xff] %v8416_v4  ;;  %14252 = vst [vmem:[#allocation540_spill] sm:$0xff] %v8424_v25  ;;  %v8439_v4 = vmul.f32 %v14258_v7, %v3110_v35  ;;  %v14261_v21 = vunpack.c.l.bf16 %v14260_v44  ;;  %v2237_v50 = vsel %vm2192_vm1, %v14265_v43, %v14264_v37  ;;  %v14267_v25 = vld [vmem:[#allocation226_spill] sm:$0xff]  ;;  %v2239_v7 = vsel %vm2192_vm1, %v14269_v56, %v14268_v9  ;;  %v14271_v18 = vld [vmem:[#allocation104_spill] sm:$0xff] }
 0x272   :  { %14250 = vst [vmem:[#allocation539_spill] sm:$0xff] %v8420_v63  ;;  %14253 = vst [vmem:[#allocation541_spill] sm:$0xff] %v8427_v39  ;;  %v2238_v5 = vsel %vm2192_vm1, %v14267_v25, %v14266_v6  ;;  %2641 = vrot.lane.b32.xlu0 %v14271_v18, %s5585_s19  ;;  %v14272_v55 = vld [vmem:[#allocation86_spill] sm:$0xff]  ;;  %v14275_v43 = vld [vmem:[#allocation41_spill] sm:$0xff] }
 0x273   :  { %14257 = vst [vmem:[#allocation544_spill] sm:$0xff] %v8435_v30  ;;  %14259 = vst [vmem:[#allocation545_spill] sm:$0xff] %v8439_v4  ;;  %v8443_v60 = vmul.f32 %v14261_v21, %v3110_v35  ;;  %v14270_v35 = vld [vmem:[#allocation108_spill] sm:$0xff]  ;;  %v14273_v21 = vunpack.c.l.bf16 %v14272_v55  ;;  %v14276_v44 = vunpack.c.l.bf16 %v14275_v43  ;;  %v14278_v25 = vld [vmem:[#allocation19_spill] sm:$0xff] }
 0x274   :  { %14263 = vst [vmem:[#allocation547_spill] sm:$0xff] %v8446_v13  ;;  %2643 = vrot.lane.b32.xlu1 %v14270_v35, %s5585_s19  ;;  %v14279_v38 = vunpack.c.l.bf16 %v14278_v25  ;;  %v14281_v57 = vld [vmem:[#allocation512_spill] sm:$0xff]  ;;  %v14290_v25 = vld [vmem:[#allocation238_spill] sm:$0xff]  ;;  %v14320_v6 = vld [vmem:[#allocation269_spill] sm:$0xff] }
 0x275   :  { %14262 = vst [vmem:[#allocation546_spill] sm:$0xff] %v8443_v60  ;;  %v8464_v4 = vmul.f32 %v14273_v21, %v3112_v51  ;;  %v8468_v36 = vmul.f32 %v14276_v44, %v3112_v51  ;;  %v14282_v9 = vunpack.c.l.bf16 %v14281_v57  ;;  %v8483_v55 = vld [vmem:[%s12538_s1 + $0x3a8] sm:$0xff]  ;;  %v14285_v21 = vunpack.c.l.bf16 %v7910_v59  ;;  %v14323_v60 = vld [vmem:[#allocation274_spill] sm:$0xff] }
 0x276   :  { %v8473_v56 = vmul.f32 %v14279_v38, %v8404_v49  ;;  %14284 = vst [vmem:[#allocation104_spill] sm:$0xff] %v8483_v55  ;;  %v14287_v44 = vld [vmem:[#allocation233_spill] sm:$0xff]  ;;  %v8509_v59 = vmax.f32 %v14271_v18, %v2237_v50  ;;  %v14326_v42 = vld [vmem:[#allocation128_spill] sm:$0xff]  ;;  %v14333_v63 = vld [vmem:[#allocation278_spill] sm:$0xff] }
 0x277   :  { %14274 = vst [vmem:[#allocation222_spill] sm:$0xff] %v8464_v4  ;;  %14277 = vst [vmem:[#allocation226_spill] sm:$0xff] %v8468_v36  ;;  %v8478_v37 = vmul.f32 %v14282_v9, %v8407_v23  ;;  %v8488_v51 = vmul.f32 %v14285_v21, %v8427_v39  ;;  %v14288_v4 = vld [vmem:[#allocation234_spill] sm:$0xff]  ;;  %v14289_v49 = vld [vmem:[#allocation237_spill] sm:$0xff]  ;;  %v14295_v21 = vunpack.c.l.bf16 %v7929_v3 }
 0x278   :  { %14280 = vst [vmem:[#allocation230_spill] sm:$0xff] %v8473_v56  ;;  %v2240_v38 = vsel %vm2192_vm1, %v14288_v4, %v14287_v44  ;;  %v2241_v57 = vsel %vm2192_vm1, %v14290_v25, %v14289_v49  ;;  %v14291_v9 = vld [vmem:[#allocation241_spill] sm:$0xff]  ;;  %v14292_v23 = vld [vmem:[#allocation242_spill] sm:$0xff]  ;;  %v8501_v56 = vpop.permute.xlu0 %2168  ;;  %14297 = vst [vmem:[#allocation549_spill] sm:$0xff] %v8509_v59  ;;  %v8512_v4 = vmax.f32 %v14270_v35, %v2238_v5 }
 0x279   :  { %14283 = vst [vmem:[#allocation108_spill] sm:$0xff] %v8478_v37  ;;  %14286 = vst [vmem:[#allocation548_spill] sm:$0xff] %v8488_v51  ;;  %v2242_v43 = vsel %vm2192_vm1, %v14292_v23, %v14291_v9  ;;  %v8499_v37 = vpop.permute.xlu1 %2170  ;;  %v8506_v39 = vmul.f32 %v14295_v21, %v8446_v13  ;;  %v14299_v25 = vld [vmem:[#allocation112_spill] sm:$0xff]  ;;  %v14301_v51 = vld [vmem:[#allocation245_spill] sm:$0xff] }
 0x27a   :  { %14293 = vst [vmem:[#allocation234_spill] sm:$0xff] %v8499_v37  ;;  %14294 = vst [vmem:[#allocation238_spill] sm:$0xff] %v8501_v56  ;;  %v8515_v49 = vmax.f32 %v14299_v25, %v2239_v7  ;;  %v14302_v23 = vld [vmem:[#allocation246_spill] sm:$0xff]  ;;  %v14303_v9 = vld [vmem:[#allocation249_spill] sm:$0xff]  ;;  %2645 = vrot.lane.b32.xlu0 %v14299_v25, %s5585_s19 }
 0x27b   :  { %14296 = vst [vmem:[#allocation242_spill] sm:$0xff] %v8506_v39  ;;  %14298 = vst [vmem:[#allocation550_spill] sm:$0xff] %v8512_v4  ;;  %v2243_v37 = vsel %vm2192_vm1, %v14302_v23, %v14301_v51  ;;  %v14304_v56 = vld [vmem:[#allocation250_spill] sm:$0xff]  ;;  %v14305_v3 = vld [vmem:[#allocation253_spill] sm:$0xff] }
 0x27c   :  { %14300 = vst [vmem:[#allocation112_spill] sm:$0xff] %v8515_v49  ;;  %v2244_v44 = vsel %vm2192_vm1, %v14304_v56, %v14303_v9  ;;  %v14306_v21 = vld [vmem:[#allocation254_spill] sm:$0xff]  ;;  %v14307_v5 = vld [vmem:[#allocation116_spill] sm:$0xff]  ;;  %v14313_v51 = vld [vmem:[#allocation257_spill] sm:$0xff]  ;;  %v8562_v17 = vpop.permute.xlu0 %2172  ;;  %v8565_v33 = vmax.f32 %v14326_v42, %v2243_v37 }
 0x27d   :  { %v2245_v13 = vsel %vm2192_vm1, %v14306_v21, %v14305_v3  ;;  %2647 = vrot.lane.b32.xlu1 %v14307_v5, %s5585_s19  ;;  %v8532_v7 = vmax.f32 %v14307_v5, %v2240_v38  ;;  %v14309_v35 = vld [vmem:[#allocation120_spill] sm:$0xff]  ;;  %v14314_v9 = vld [vmem:[#allocation258_spill] sm:$0xff]  ;;  %v14316_v3 = vld [vmem:[#allocation261_spill] sm:$0xff] }
 0x27e   :  { %v8535_v18 = vmax.f32 %v14309_v35, %v2241_v57  ;;  %v14311_v23 = vld [vmem:[#allocation124_spill] sm:$0xff]  ;;  %v2246_v21 = vsel %vm2192_vm1, %v14314_v9, %v14313_v51  ;;  %v8546_v50 = vld [vmem:[%s12538_s1 + $0x3b0] sm:$0xff]  ;;  %v8560_v51 = vpop.permute.xlu1 %2174  ;;  %14327 = vst [vmem:[#allocation258_spill] sm:$0xff] %v8565_v33  ;;  %2649 = vrot.lane.b32.xlu0 %v14309_v35, %s5585_s19 }
 0x27f   :  { %14308 = vst [vmem:[#allocation246_spill] sm:$0xff] %v8532_v7  ;;  %v8538_v56 = vmax.f32 %v14311_v23, %v2242_v43  ;;  %14315 = vst [vmem:[#allocation116_spill] sm:$0xff] %v8546_v50  ;;  %v14317_v25 = vld [vmem:[#allocation262_spill] sm:$0xff]  ;;  %v14318_v5 = vld [vmem:[#allocation265_spill] sm:$0xff] }
 0x280   :  { %14310 = vst [vmem:[#allocation250_spill] sm:$0xff] %v8535_v18  ;;  %v2247_v38 = vsel %vm2192_vm1, %v14317_v25, %v14316_v3  ;;  %v14319_v39 = vld [vmem:[#allocation266_spill] sm:$0xff]  ;;  %v14322_v36 = vld [vmem:[#allocation273_spill] sm:$0xff]  ;;  %14324 = vst [vmem:[#allocation120_spill] sm:$0xff] %v8560_v51  ;;  %v8626_v12 = vpop.permute.xlu0 %2176 }
 0x281   :  { %14312 = vst [vmem:[#allocation254_spill] sm:$0xff] %v8538_v56  ;;  %v2248_v57 = vsel %vm2192_vm1, %v14319_v39, %v14318_v5  ;;  %v14321_v43 = vld [vmem:[#allocation270_spill] sm:$0xff]  ;;  %v2250_v9 = vsel %vm2192_vm1, %v14323_v60, %v14322_v36  ;;  %14325 = vst [vmem:[#allocation124_spill] sm:$0xff] %v8562_v17  ;;  %v14328_v25 = vld [vmem:[#allocation132_spill] sm:$0xff]  ;;  %v14334_v60 = vunpack.c.l.bf16 %v7946_v26  ;;  %v14336_v17 = vunpack.c.l.bf16 %v7976_v1  ;;  %2651 = vrot.lane.b32.xlu1 %v14311_v23, %s5585_s19 }
 0x282   :  { %v2249_v41 = vsel %vm2192_vm1, %v14321_v43, %v14320_v6  ;;  %v8568_v3 = vmax.f32 %v14328_v25, %v2244_v44  ;;  %v14330_v30 = vld [vmem:[#allocation136_spill] sm:$0xff]  ;;  %v14332_v5 = vld [vmem:[#allocation277_spill] sm:$0xff]  ;;  %v14350_v23 = vld [vmem:[#allocation118_spill] sm:$0xff]  ;;  %14359 = vst [vmem:[#allocation551_spill] sm:$0xff] %v8626_v12  ;;  %v14368_v12 = vunpack.c.l.bf16 %v8237_v11  ;;  %2653 = vrot.lane.b32.xlu0 %v14326_v42, %s5585_s19 }
 0x283   :  { %v8571_v39 = vmax.f32 %v14330_v30, %v2245_v13  ;;  %v2251_v43 = vsel %vm2192_vm1, %v14333_v63, %v14332_v5  ;;  %v8579_v6 = vmul.f32 %v14334_v60, %v8509_v59  ;;  %v8584_v37 = vmul.f32 %v14336_v17, %v8512_v4  ;;  %v14338_v51 = vld [vmem:[#allocation140_spill] sm:$0xff]  ;;  %v8686_v42 = vld [vmem:[%s12538_s1 + $0x3b8] sm:$0xff] }
 0x284   :  { %14329 = vst [vmem:[#allocation262_spill] sm:$0xff] %v8568_v3  ;;  %v8587_v44 = vmax.f32 %v14338_v51, %v2246_v21  ;;  %v14340_v63 = vld [vmem:[#allocation144_spill] sm:$0xff]  ;;  %v14348_v13 = vunpack.c.l.bf16 %v7994_v32  ;;  %v14351_v35 = vunpack.c.l.bf16 %v14350_v23  ;;  %14382 = vst [vmem:[#allocation559_spill] sm:$0xff] %v8686_v42  ;;  %v14399_v23 = vld [vmem:[#allocation305_spill] sm:$0xff] }
 0x285   :  { %14331 = vst [vmem:[#allocation266_spill] sm:$0xff] %v8571_v39  ;;  %14335 = vst [vmem:[#allocation270_spill] sm:$0xff] %v8579_v6  ;;  %v8595_v26 = vmax.f32 %v14340_v63, %v2247_v38  ;;  %v14342_v60 = vld [vmem:[#allocation148_spill] sm:$0xff]  ;;  %2655 = vrot.lane.b32.xlu1 %v14328_v25, %s5585_s19  ;;  %v14380_v25 = vunpack.c.l.bf16 %v8483_v55 }
 0x286   :  { %14337 = vst [vmem:[#allocation274_spill] sm:$0xff] %v8584_v37  ;;  %14339 = vst [vmem:[#allocation128_spill] sm:$0xff] %v8587_v44  ;;  %v8598_v59 = vmax.f32 %v14342_v60, %v2248_v57  ;;  %v14344_v1 = vld [vmem:[#allocation152_spill] sm:$0xff]  ;;  %v8609_v5 = vmul.f32 %v14348_v13, %v8515_v49  ;;  %v8614_v36 = vmul.f32 %v14351_v35, %v8532_v7  ;;  %v14360_v13 = vunpack.c.l.bf16 %v8057_v40  ;;  %v14371_v40 = vld [vmem:[#allocation282_spill] sm:$0xff] }
 0x287   :  { %14341 = vst [vmem:[#allocation132_spill] sm:$0xff] %v8595_v26  ;;  %v8601_v17 = vmax.f32 %v14344_v1, %v2249_v41  ;;  %v14346_v4 = vld [vmem:[#allocation156_spill] sm:$0xff]  ;;  %v14362_v35 = vunpack.c.l.bf16 %v8074_v48  ;;  %v14373_v48 = vld [vmem:[#allocation286_spill] sm:$0xff]  ;;  %2657 = vrot.lane.b32.xlu0 %v14330_v30, %s5585_s19 }
 0x288   :  { %14343 = vst [vmem:[#allocation136_spill] sm:$0xff] %v8598_v59  ;;  %v8604_v21 = vmax.f32 %v14346_v4, %v2250_v9  ;;  %14349 = vst [vmem:[#allocation144_spill] sm:$0xff] %v8609_v5  ;;  %v14353_v38 = vld [vmem:[#allocation524_spill] sm:$0xff]  ;;  %v8624_v9 = vpop.permute.xlu1 %2178  ;;  %v8631_v49 = vmul.f32 %v14360_v13, %v8538_v56  ;;  %v8651_v13 = vmul.f32 %v14368_v12, %v8587_v44  ;;  %v14370_v56 = vld [vmem:[#allocation281_spill] sm:$0xff]  ;;  %v14376_v12 = vunpack.c.l.bf16 %v8354_v34 }
 0x289   :  { %14345 = vst [vmem:[#allocation278_spill] sm:$0xff] %v8601_v17  ;;  %14352 = vst [vmem:[#allocation148_spill] sm:$0xff] %v8614_v36  ;;  %v14354_v57 = vunpack.c.l.bf16 %v14353_v38  ;;  %v14356_v41 = vld [vmem:[#allocation160_spill] sm:$0xff]  ;;  %v8636_v7 = vmul.f32 %v14362_v35, %v8565_v33  ;;  %v2252_v35 = vsel %vm2192_vm1, %v14371_v40, %v14370_v56  ;;  %v14372_v33 = vld [vmem:[#allocation285_spill] sm:$0xff]  ;;  %v14378_v40 = vunpack.c.l.bf16 %v8412_v52  ;;  %2659 = vrot.lane.b32.xlu1 %v14338_v51, %s5585_s19 }
 0x28a   :  { %14347 = vst [vmem:[#allocation140_spill] sm:$0xff] %v8604_v21  ;;  %v8622_v6 = vmax.f32 %v14356_v41, %v2251_v43  ;;  %14358 = vst [vmem:[#allocation160_spill] sm:$0xff] %v8624_v9  ;;  %v14366_v43 = vunpack.c.l.bf16 %v8175_v46  ;;  %v8671_v11 = vmul.f32 %v14376_v12, %v8598_v59  ;;  %v8681_v44 = vmul.f32 %v14380_v25, %v8604_v21  ;;  %v14385_v34 = vld [vmem:[#allocation289_spill] sm:$0xff]  ;;  %v14390_v21 = vld [vmem:[#allocation298_spill] sm:$0xff] }
 0x28b   :  { %v8619_v37 = vmul.f32 %v14354_v57, %v8535_v18  ;;  %14361 = vst [vmem:[#allocation552_spill] sm:$0xff] %v8631_v49  ;;  %14363 = vst [vmem:[#allocation553_spill] sm:$0xff] %v8636_v7  ;;  %v14364_v57 = vunpack.c.l.bf16 %v8118_v58  ;;  %v2253_v58 = vsel %vm2192_vm1, %v14373_v48, %v14372_v33  ;;  %v8676_v48 = vmul.f32 %v14378_v40, %v8601_v17  ;;  %v14387_v52 = vld [vmem:[#allocation293_spill] sm:$0xff]  ;;  %v14388_v17 = vld [vmem:[#allocation294_spill] sm:$0xff] }
 0x28c   :  { %14357 = vst [vmem:[#allocation156_spill] sm:$0xff] %v8622_v6  ;;  %v8646_v9 = vmul.f32 %v14366_v43, %v8571_v39  ;;  %14369 = vst [vmem:[#allocation556_spill] sm:$0xff] %v8651_v13  ;;  %v2255_v55 = vsel %vm2192_vm1, %v14388_v17, %v14387_v52  ;;  %v14389_v25 = vld [vmem:[#allocation297_spill] sm:$0xff]  ;;  %v8704_v39 = vpop.permute.xlu0 %2180  ;;  %v14400_v17 = vld [vmem:[#allocation306_spill] sm:$0xff]  ;;  %2661 = vrot.lane.b32.xlu0 %v14340_v63, %s5585_s19 }
 0x28d   :  { %14355 = vst [vmem:[#allocation152_spill] sm:$0xff] %v8619_v37  ;;  %v8641_v18 = vmul.f32 %v14364_v57, %v8568_v3  ;;  %v14374_v57 = vunpack.c.l.bf16 %v8292_v28  ;;  %14377 = vst [vmem:[#allocation286_spill] sm:$0xff] %v8671_v11  ;;  %v14386_v28 = vld [vmem:[#allocation290_spill] sm:$0xff]  ;;  %v2256_v59 = vsel %vm2192_vm1, %v14390_v21, %v14389_v25  ;;  %v14393_v3 = vld [vmem:[#allocation164_spill] sm:$0xff]  ;;  %v2258_v32 = vsel %vm2192_vm1, %v14400_v17, %v14399_v23 }
 0x28e   :  { %14367 = vst [vmem:[#allocation555_spill] sm:$0xff] %v8646_v9  ;;  %14379 = vst [vmem:[#allocation557_spill] sm:$0xff] %v8676_v48  ;;  %v2254_v40 = vsel %vm2192_vm1, %v14386_v28, %v14385_v34  ;;  %v14397_v46 = vld [vmem:[#allocation301_spill] sm:$0xff]  ;;  %v14398_v28 = vld [vmem:[#allocation302_spill] sm:$0xff]  ;;  %2663 = vrot.lane.b32.xlu1 %v14342_v60, %s5585_s19 }
 0x28f   :  { %14365 = vst [vmem:[#allocation554_spill] sm:$0xff] %v8641_v18  ;;  %v8666_v43 = vmul.f32 %v14374_v57, %v8595_v26  ;;  %14381 = vst [vmem:[#allocation558_spill] sm:$0xff] %v8681_v44  ;;  %v14383_v57 = vunpack.c.l.bf16 %v8546_v50  ;;  %v8702_v26 = vpop.permute.xlu1 %2182  ;;  %v8707_v50 = vmax.f32 %v14393_v3, %v2252_v35  ;;  %v2257_v38 = vsel %vm2192_vm1, %v14398_v28, %v14397_v46  ;;  %v14403_v52 = vld [vmem:[#allocation313_spill] sm:$0xff]  ;;  %v14404_v35 = vld [vmem:[#allocation314_spill] sm:$0xff] }
 0x290   :  { %14391 = vst [vmem:[#allocation290_spill] sm:$0xff] %v8702_v26  ;;  %14392 = vst [vmem:[#allocation294_spill] sm:$0xff] %v8704_v39  ;;  %v14402_v26 = vld [vmem:[#allocation310_spill] sm:$0xff]  ;;  %v2260_v25 = vsel %vm2192_vm1, %v14404_v35, %v14403_v52  ;;  %v14407_v28 = vld [vmem:[#allocation172_spill] sm:$0xff]  ;;  %v8758_v13 = vpop.permute.xlu0 %2184  ;;  %2665 = vrot.lane.b32.xlu0 %v14344_v1, %s5585_s19 }
 0x291   :  { %14375 = vst [vmem:[#allocation282_spill] sm:$0xff] %v8666_v43  ;;  %v8691_v12 = vmul.f32 %v14383_v57, %v8622_v6  ;;  %14394 = vst [vmem:[#allocation298_spill] sm:$0xff] %v8707_v50  ;;  %v14395_v57 = vld [vmem:[#allocation168_spill] sm:$0xff]  ;;  %v14406_v44 = vld [vmem:[#allocation318_spill] sm:$0xff]  ;;  %v8733_v17 = vmax.f32 %v14407_v28, %v2254_v40 }
 0x292   :  { %v8710_v6 = vmax.f32 %v14395_v57, %v2253_v58  ;;  %v14405_v58 = vld [vmem:[#allocation317_spill] sm:$0xff]  ;;  %v14409_v21 = vld [vmem:[#allocation176_spill] sm:$0xff]  ;;  %v14414_v52 = vld [vmem:[#allocation322_spill] sm:$0xff]  ;;  %14424 = vst [vmem:[#allocation318_spill] sm:$0xff] %v8758_v13  ;;  %2667 = vrot.lane.b32.xlu1 %v14346_v4, %s5585_s19 }
 0x293   :  { %14384 = vst [vmem:[#allocation560_spill] sm:$0xff] %v8691_v12  ;;  %v14401_v12 = vld [vmem:[#allocation309_spill] sm:$0xff]  ;;  %v2261_v48 = vsel %vm2192_vm1, %v14406_v44, %v14405_v58  ;;  %14408 = vst [vmem:[#allocation168_spill] sm:$0xff] %v8733_v17  ;;  %v8736_v46 = vmax.f32 %v14409_v21, %v2255_v55  ;;  %v14415_v44 = vld [vmem:[#allocation184_spill] sm:$0xff]  ;;  %v8756_v56 = vpop.permute.xlu1 %2186 }
 0x294   :  { %14396 = vst [vmem:[#allocation164_spill] sm:$0xff] %v8710_v6  ;;  %v2259_v39 = vsel %vm2192_vm1, %v14402_v26, %v14401_v12  ;;  %v14411_v26 = vld [vmem:[#allocation180_spill] sm:$0xff]  ;;  %v14413_v35 = vld [vmem:[#allocation321_spill] sm:$0xff]  ;;  %v8745_v58 = vmax.f32 %v14415_v44, %v2257_v38  ;;  %v14418_v33 = vld [vmem:[#allocation326_spill] sm:$0xff]  ;;  %2669 = vrot.lane.b32.xlu0 %v14356_v41, %s5585_s19 }
 0x295   :  { %14410 = vst [vmem:[#allocation302_spill] sm:$0xff] %v8736_v46  ;;  %v8739_v12 = vmax.f32 %v14411_v26, %v2256_v59  ;;  %v2262_v23 = vsel %vm2192_vm1, %v14414_v52, %v14413_v35  ;;  %v14417_v51 = vld [vmem:[#allocation325_spill] sm:$0xff]  ;;  %v14420_v40 = vld [vmem:[#allocation330_spill] sm:$0xff]  ;;  %14423 = vst [vmem:[#allocation314_spill] sm:$0xff] %v8756_v56 }
 0x296   :  { %14416 = vst [vmem:[#allocation310_spill] sm:$0xff] %v8745_v58  ;;  %v2263_v30 = vsel %vm2192_vm1, %v14418_v33, %v14417_v51  ;;  %v14419_v34 = vld [vmem:[#allocation329_spill] sm:$0xff]  ;;  %v14422_v43 = vld [vmem:[#allocation334_spill] sm:$0xff]  ;;  %v14425_v52 = vld [vmem:[#allocation188_spill] sm:$0xff]  ;;  %2671 = vrot.lane.b32.xlu1 %v14393_v3, %s5585_s19 }
 0x297   :  { %14412 = vst [vmem:[#allocation306_spill] sm:$0xff] %v8739_v12  ;;  %v2264_v11 = vsel %vm2192_vm1, %v14420_v40, %v14419_v34  ;;  %v14421_v55 = vld [vmem:[#allocation333_spill] sm:$0xff]  ;;  %v8761_v35 = vmax.f32 %v14425_v52, %v2258_v32  ;;  %v14427_v38 = vld [vmem:[#allocation192_spill] sm:$0xff]  ;;  %v14433_v40 = vunpack.c.l.bf16 %v8686_v42  ;;  %v14435_v56 = vld [vmem:[#allocation474_spill] sm:$0xff] }
 0x298   :  { %v2265_v59 = vsel %vm2192_vm1, %v14422_v43, %v14421_v55  ;;  %v8764_v9 = vmax.f32 %v14427_v38, %v2259_v39  ;;  %v14429_v18 = vld [vmem:[#allocation196_spill] sm:$0xff]  ;;  %v14436_v13 = vunpack.c.l.bf16 %v14435_v56  ;;  %v14451_v63 = vld [vmem:[#allocation418_spill] sm:$0xff]  ;;  %2673 = vrot.lane.b32.xlu0 %v14395_v57, %s5585_s19 }
 0x299   :  { %14426 = vst [vmem:[#allocation172_spill] sm:$0xff] %v8761_v35  ;;  %v8767_v33 = vmax.f32 %v14429_v18, %v2260_v25  ;;  %v14431_v51 = vld [vmem:[#allocation200_spill] sm:$0xff]  ;;  %v8775_v43 = vmul.f32 %v14433_v40, %v8707_v50  ;;  %v14452_v49 = vunpack.c.l.bf16 %v14451_v63  ;;  %v14517_v3 = vld [vmem:[#allocation446_spill] sm:$0xff] }
 0x29a   :  { %14428 = vst [vmem:[#allocation176_spill] sm:$0xff] %v8764_v9  ;;  %v8770_v7 = vmax.f32 %v14431_v51, %v2261_v48  ;;  %v8780_v55 = vmul.f32 %v14436_v13, %v8710_v6  ;;  %v14438_v32 = vld [vmem:[#allocation204_spill] sm:$0xff]  ;;  %v14446_v13 = vld [vmem:[#allocation337_spill] sm:$0xff]  ;;  %v14447_v6 = vld [vmem:[#allocation338_spill] sm:$0xff]  ;;  %2675 = vrot.lane.b32.xlu1 %v14407_v28, %s5585_s19 }
 0x29b   :  { %14430 = vst [vmem:[#allocation180_spill] sm:$0xff] %v8767_v33  ;;  %14434 = vst [vmem:[#allocation184_spill] sm:$0xff] %v8775_v43  ;;  %v8783_v34 = vmax.f32 %v14438_v32, %v2262_v23  ;;  %v14440_v39 = vld [vmem:[#allocation208_spill] sm:$0xff]  ;;  %v2266_v23 = vsel %vm2192_vm1, %v14447_v6, %v14446_v13  ;;  %v8821_v6 = vpop.permute.xlu1 %2190  ;;  %v8823_v13 = vpop.permute.xlu0 %2188 }
 0x29c   :  { %14432 = vst [vmem:[#allocation322_spill] sm:$0xff] %v8770_v7  ;;  %14437 = vst [vmem:[#allocation326_spill] sm:$0xff] %v8780_v55  ;;  %v8790_v48 = vmax.f32 %v14440_v39, %v2263_v30  ;;  %v14442_v25 = vld [vmem:[#allocation212_spill] sm:$0xff]  ;;  %v14448_v55 = vld [vmem:[#allocation478_spill] sm:$0xff]  ;;  %v8809_v30 = vmul.f32 %v14452_v49, %v8736_v46  ;;  %2677 = vrot.lane.b32.xlu0 %v14409_v21, %s5585_s19 }
 0x29d   :  { %14439 = vst [vmem:[#allocation330_spill] sm:$0xff] %v8783_v34  ;;  %v8793_v40 = vmax.f32 %v14442_v25, %v2264_v11  ;;  %v14444_v42 = vld [vmem:[#allocation216_spill] sm:$0xff]  ;;  %v14449_v43 = vunpack.c.l.bf16 %v14448_v55  ;;  %14460 = vst [vmem:[#allocation208_spill] sm:$0xff] %v8821_v6  ;;  %v14515_v41 = vunpack.c.h.bf16 %v14448_v55 }
 0x29e   :  { %14441 = vst [vmem:[#allocation334_spill] sm:$0xff] %v8790_v48  ;;  %v8796_v50 = vmax.f32 %v14444_v42, %v2265_v59  ;;  %14453 = vst [vmem:[#allocation200_spill] sm:$0xff] %v8809_v30  ;;  %v14454_v11 = vld [vmem:[#allocation420_spill] sm:$0xff]  ;;  %v14457_v59 = vld [vmem:[#allocation422_spill] sm:$0xff]  ;;  %2679 = vrot.lane.b32.xlu1 %v14411_v26, %s5585_s19 }
 0x29f   :  { %14443 = vst [vmem:[#allocation188_spill] sm:$0xff] %v8793_v40  ;;  %v8804_v60 = vmul.f32 %v14449_v43, %v8733_v17  ;;  %v14455_v37 = vunpack.c.l.bf16 %v14454_v11  ;;  %v14458_v5 = vunpack.c.l.bf16 %v14457_v59  ;;  %14461 = vst [vmem:[#allocation212_spill] sm:$0xff] %v8823_v13  ;;  %v14462_v43 = vld [vmem:[#allocation426_spill] sm:$0xff]  ;;  %v14465_v49 = vld [vmem:[#allocation428_spill] sm:$0xff] }
 0x2a0   :  { %14445 = vst [vmem:[#allocation192_spill] sm:$0xff] %v8796_v50  ;;  %v14463_v17 = vunpack.c.l.bf16 %v14462_v43  ;;  %v14466_v46 = vunpack.c.l.bf16 %v14465_v49  ;;  %v14474_v13 = vld [vmem:[#allocation220_spill] sm:$0xff]  ;;  %v14477_v43 = vld [vmem:[#allocation342_spill] sm:$0xff]  ;;  %v14478_v49 = vld [vmem:[#allocation345_spill] sm:$0xff]  ;;  %2681 = vrot.lane.b32.xlu0 %v14415_v44, %s5585_s19 }
 0x2a1   :  { %14450 = vst [vmem:[#allocation196_spill] sm:$0xff] %v8804_v60  ;;  %v8814_v36 = vmul.f32 %v14455_v37, %v8739_v12  ;;  %v8819_v16 = vmul.f32 %v14458_v5, %v8745_v58  ;;  %v14468_v37 = vld [vmem:[#allocation430_spill] sm:$0xff]  ;;  %v14471_v5 = vld [vmem:[#allocation432_spill] sm:$0xff]  ;;  %v14527_v30 = vld [vmem:[#allocation11_spill] sm:$0xff] }
 0x2a2   :  { %v8828_v63 = vmul.f32 %v14463_v17, %v8761_v35  ;;  %v8833_v11 = vmul.f32 %v14466_v46, %v8764_v9  ;;  %v14469_v12 = vunpack.c.l.bf16 %v14468_v37  ;;  %v14472_v6 = vunpack.c.l.bf16 %v14471_v5  ;;  %v14476_v17 = vld [vmem:[#allocation341_spill] sm:$0xff]  ;;  %v14479_v46 = vld [vmem:[#allocation346_spill] sm:$0xff]  ;;  %v14483_v37 = vld [vmem:[#allocation436_spill] sm:$0xff]  ;;  %2683 = vrot.lane.b32.xlu1 %v14425_v52, %s5585_s19 }
 0x2a3   :  { %14456 = vst [vmem:[#allocation474_spill] sm:$0xff] %v8814_v36  ;;  %14459 = vst [vmem:[#allocation204_spill] sm:$0xff] %v8819_v16  ;;  %v8846_v16 = vmax.f32 %v14474_v13, %v2266_v23  ;;  %v2267_v35 = vsel %vm2192_vm1, %v14477_v43, %v14476_v17  ;;  %v2268_v9 = vsel %vm2192_vm1, %v14479_v46, %v14478_v49  ;;  %v14484_v5 = vunpack.c.l.bf16 %v14483_v37  ;;  %v14489_v4 = vld [vmem:[#allocation440_spill] sm:$0xff]  ;;  %v14492_v49 = vld [vmem:[#allocation349_spill] sm:$0xff] }
 0x2a4   :  { %14464 = vst [vmem:[#allocation216_spill] sm:$0xff] %v8828_v63  ;;  %14467 = vst [vmem:[#allocation338_spill] sm:$0xff] %v8833_v11  ;;  %v8838_v59 = vmul.f32 %v14469_v12, %v8767_v33  ;;  %v8843_v58 = vmul.f32 %v14472_v6, %v8770_v7  ;;  %v14480_v12 = vld [vmem:[#allocation434_spill] sm:$0xff]  ;;  %v14490_v17 = vunpack.c.l.bf16 %v14489_v4  ;;  %v14498_v4 = vld [vmem:[#allocation228_spill] sm:$0xff]  ;;  %2685 = vrot.lane.b32.xlu0 %v14427_v38, %s5585_s19 }
 0x2a5   :  { %14475 = vst [vmem:[#allocation420_spill] sm:$0xff] %v8846_v16  ;;  %v14481_v6 = vunpack.c.l.bf16 %v14480_v12  ;;  %v8866_v43 = vmul.f32 %v14484_v5, %v8790_v48  ;;  %v14486_v7 = vld [vmem:[#allocation438_spill] sm:$0xff]  ;;  %v2556_v48 = vpop.permute.xlu1 %2555  ;;  %v14525_v36 = vld [vmem:[#allocation240_spill] sm:$0xff] }
 0x2a6   :  { %14470 = vst [vmem:[#allocation478_spill] sm:$0xff] %v8838_v59  ;;  %14473 = vst [vmem:[#allocation418_spill] sm:$0xff] %v8843_v58  ;;  %v14487_v46 = vunpack.c.l.bf16 %v14486_v7  ;;  %v8876_v1 = vmul.f32 %v14490_v17, %v8796_v50  ;;  %v14493_v58 = vld [vmem:[#allocation350_spill] sm:$0xff]  ;;  %v8890_v17 = vmax.f32 %v14498_v4, %v2268_v9  ;;  %v9086_v44 = vld [vmem:[%s12538_s1 + $0x228] sm:$0xff]  ;;  %2687 = vrot.lane.b32.xlu1 %v14429_v18, %s5585_s19 }
 0x2a7   :  { %v8861_v23 = vmul.f32 %v14481_v6, %v8783_v34  ;;  %14485 = vst [vmem:[#allocation426_spill] sm:$0xff] %v8866_v43  ;;  %v2269_v12 = vsel %vm2192_vm1, %v14493_v58, %v14492_v49  ;;  %v14494_v6 = vld [vmem:[#allocation353_spill] sm:$0xff]  ;;  %v14495_v34 = vld [vmem:[#allocation354_spill] sm:$0xff]  ;;  %v14501_v58 = vld [vmem:[#allocation55_spill] sm:$0xff]  ;;  %v14591_v18 = vunpack.c.h.bf16 %v9086_v44 }
 0x2a8   :  { %v8871_v33 = vmul.f32 %v14487_v46, %v8793_v40  ;;  %14491 = vst [vmem:[#allocation430_spill] sm:$0xff] %v8876_v1  ;;  %v2270_v37 = vsel %vm2192_vm1, %v14495_v34, %v14494_v6  ;;  %v2554_v46 = vpop.permute.xlu0 %2553  ;;  %v14496_v40 = vld [vmem:[#allocation224_spill] sm:$0xff]  ;;  %14499 = vst [vmem:[#allocation220_spill] sm:$0xff] %v8890_v17  ;;  %v14500_v50 = vld [vmem:[#allocation54_spill] sm:$0xff]  ;;  %2689 = vrot.lane.b32.xlu0 %v14431_v51, %s5585_s19 }
 0x2a9   :  { %14482 = vst [vmem:[#allocation422_spill] sm:$0xff] %v8861_v23  ;;  %v2915_v1 = vsel %vm2913_vm2, %v14500_v50, %v2556_v48  ;;  %v2914_v49 = vsel %vm2913_vm2, %v14501_v58, %v2554_v46  ;;  %v14502_v34 = vld [vmem:[#allocation444_spill] sm:$0xff]  ;;  %v14507_v23 = vld [vmem:[#allocation9_spill] sm:$0xff]  ;;  %v14514_v58 = vld [vmem:[#allocation358_spill] sm:$0xff] }
 0x2aa   :  { %14488 = vst [vmem:[#allocation428_spill] sm:$0xff] %v8871_v33  ;;  %v8887_v33 = vmax.f32 %v14496_v40, %v2267_v35  ;;  %v14503_v6 = vunpack.c.l.bf16 %v14502_v34  ;;  %v14505_v43 = vld [vmem:[#allocation8_spill] sm:$0xff]  ;;  %v8905_v35 = vmax.f32 %v14507_v23, %v2914_v49  ;;  %v8923_v49 = vld [vmem:[%s12538_s1 + $0x1f8] sm:$0xff]  ;;  %v8935_v34 = vld [vmem:[%s12538_s1 + $0x1f0] sm:$0xff]  ;;  %2691 = vrot.lane.b32.xlu1 %v14438_v32, %s5585_s19 }
 0x2ab   :  { %v8902_v7 = vmax.f32 %v14505_v43, %v2915_v1  ;;  %v14509_v50 = vld [vmem:[#allocation232_spill] sm:$0xff]  ;;  %v14516_v1 = vunpack.c.h.bf16 %v14435_v56  ;;  %v14524_v11 = vld [vmem:[#allocation58_spill] sm:$0xff]  ;;  %v14535_v28 = vunpack.c.h.bf16 %v8923_v49  ;;  %v14536_v57 = vunpack.c.h.bf16 %v8935_v34 }
 0x2ac   :  { %14497 = vst [vmem:[#allocation432_spill] sm:$0xff] %v8887_v33  ;;  %v8899_v5 = vmul.f32 %v14503_v6, %v8846_v16  ;;  %14508 = vst [vmem:[#allocation434_spill] sm:$0xff] %v8905_v35  ;;  %v8912_v9 = vmax.f32 %v14509_v50, %v2269_v12  ;;  %v14511_v48 = vld [vmem:[#allocation236_spill] sm:$0xff]  ;;  %v14513_v6 = vld [vmem:[#allocation357_spill] sm:$0xff]  ;;  %v2558_v16 = vpop.permute.xlu0 %2557  ;;  %2693 = vrot.lane.b32.xlu0 %v14440_v39, %s5585_s19 }
 0x2ad   :  { %14506 = vst [vmem:[#allocation346_spill] sm:$0xff] %v8902_v7  ;;  %v8915_v46 = vmax.f32 %v14511_v48, %v2270_v37  ;;  %v2271_v43 = vsel %vm2192_vm1, %v14514_v58, %v14513_v6  ;;  %v4491_v23 = vmul.f32 %v14515_v41, %v8902_v7  ;;  %v4489_v12 = vmul.f32 %v14516_v1, %v8905_v35  ;;  %v2560_v37 = vpop.permute.xlu1 %2559  ;;  %v14520_v41 = vld [vmem:[#allocation448_spill] sm:$0xff]  ;;  %v14523_v1 = vld [vmem:[#allocation61_spill] sm:$0xff]  ;;  %v9239_v39 = vld [vmem:[%s12538_s1 + $0x258] sm:$0xff] }
 0x2ae   :  { %14504 = vst [vmem:[#allocation342_spill] sm:$0xff] %v8899_v5  ;;  %14510 = vst [vmem:[#allocation436_spill] sm:$0xff] %v8912_v9  ;;  %v14518_v6 = vunpack.c.l.bf16 %v14517_v3  ;;  %v14521_v7 = vunpack.c.l.bf16 %v14520_v41  ;;  %v2917_v35 = vsel %vm2913_vm2, %v14523_v1, %v2560_v37  ;;  %v2916_v63 = vsel %vm2913_vm2, %v14524_v11, %v2558_v16  ;;  %v14529_v3 = vld [vmem:[#allocation10_spill] sm:$0xff]  ;;  %2695 = vrot.lane.b32.xlu1 %v14442_v25, %s5585_s19 }
 0x2af   :  { %14512 = vst [vmem:[#allocation438_spill] sm:$0xff] %v8915_v46  ;;  %v8953_v58 = vmax.f32 %v14525_v36, %v2271_v43  ;;  %v8956_v60 = vmax.f32 %v14527_v30, %v2917_v35  ;;  %v14533_v16 = vunpack.c.l.bf16 %v14092_v14  ;;  %v4608_v30 = vsel %vm3574_vm3, %v4489_v12, 0.0 }
 0x2b0   :  { %v8941_v5 = vmul.f32 %v14518_v6, %v8887_v33  ;;  %v8946_v59 = vmul.f32 %v14521_v7, %v8890_v17  ;;  %v8959_v6 = vmax.f32 %v14529_v3, %v2916_v63  ;;  %v14531_v7 = vunpack.c.l.bf16 %v14084_v54  ;;  %v8986_v54 = vld [vmem:[%s12538_s1 + $0x208] sm:$0xff]  ;;  %v2562_v1 = vpop.permute.xlu0 %2561  ;;  %v14537_v3 = vld [vmem:[#allocation67_spill] sm:$0xff]  ;;  %v14543_v17 = vld [vmem:[#allocation454_spill] sm:$0xff]  ;;  %2697 = vrot.lane.b32.xlu0 %v14444_v42, %s5585_s19 }
 0x2b1   :  { %14526 = vst [vmem:[#allocation354_spill] sm:$0xff] %v8953_v58  ;;  %14528 = vst [vmem:[#allocation224_spill] sm:$0xff] %v8956_v60  ;;  %v8973_v11 = vmul.f32 %v14533_v16, %v8915_v46  ;;  %v4612_v63 = vsel %vm3574_vm3, %v4491_v23, 0.0  ;;  %v4495_v35 = vmul.f32 %v14535_v28, %v8956_v60  ;;  %v2564_v41 = vpop.permute.xlu1 %2563  ;;  %v8992_v23 = vld [vmem:[%s12538_s1 + $0x200] sm:$0xff]  ;;  %v14544_v33 = vunpack.c.l.bf16 %v14543_v17  ;;  %v14553_v17 = vld [vmem:[#allocation366_spill] sm:$0xff] }
 0x2b2   :  { %14519 = vst [vmem:[#allocation440_spill] sm:$0xff] %v8941_v5  ;;  %14522 = vst [vmem:[#allocation350_spill] sm:$0xff] %v8946_v59  ;;  %v8968_v37 = vmul.f32 %v14531_v7, %v8912_v9  ;;  %v4493_v43 = vmul.f32 %v14536_v57, %v8959_v6  ;;  %v2919_v7 = vsel %vm2913_vm2, %v14537_v3, %v2564_v41  ;;  %v14538_v16 = vld [vmem:[#allocation64_spill] sm:$0xff]  ;;  %v14552_v41 = vld [vmem:[#allocation365_spill] sm:$0xff]  ;;  %v14555_v26 = vunpack.c.h.bf16 %v8992_v23 }
 0x2b3   :  { %14530 = vst [vmem:[#allocation228_spill] sm:$0xff] %v8959_v6  ;;  %14534 = vst [vmem:[#allocation55_spill] sm:$0xff] %v8973_v11  ;;  %v2918_v28 = vsel %vm2913_vm2, %v14538_v16, %v2562_v1  ;;  %v14539_v57 = vld [vmem:[#allocation500_spill] sm:$0xff]  ;;  %v9008_v11 = vmul.f32 %v14544_v33, %v8953_v58  ;;  %v2273_v33 = vsel %vm2192_vm1, %v14553_v17, %v14552_v41  ;;  %v4620_v1 = vsel %vm3574_vm3, %v4495_v35, 0.0  ;;  %v9043_v35 = vld [vmem:[%s12538_s1 + $0x210] sm:$0xff] }
 0x2b4   :  { %14532 = vst [vmem:[#allocation54_spill] sm:$0xff] %v8968_v37  ;;  %v9000_v46 = vadd.f32 %v4608_v30, %v14539_v57  ;;  %v14541_v9 = vld [vmem:[#allocation504_spill] sm:$0xff]  ;;  %v14546_v37 = vld [vmem:[#allocation13_spill] sm:$0xff]  ;;  %14556 = vst [vmem:[#allocation358_spill] sm:$0xff] %v9043_v35  ;;  %v2566_v57 = vpop.permute.xlu0 %2565  ;;  %v14574_v52 = vunpack.c.h.bf16 %v9043_v35  ;;  %2699 = vrot.lane.b32.xlu1 %v14474_v13, %s5585_s19  ;;  %v14645_v13 = vunpack.c.h.bf16 %v9239_v39  ;;  %2701 = vrot.lane.b32.xlu0 %v14496_v40, %s5585_s19 }
 0x2b5   :  { %v9003_v14 = vadd.f32 %v4612_v63, %v14541_v9  ;;  %14545 = vst [vmem:[#allocation9_spill] sm:$0xff] %v9008_v11  ;;  %v9011_v12 = vmax.f32 %v14546_v37, %v2919_v7  ;;  %v14548_v59 = vld [vmem:[#allocation12_spill] sm:$0xff]  ;;  %v14550_v30 = vld [vmem:[#allocation361_spill] sm:$0xff]  ;;  %v14551_v9 = vld [vmem:[#allocation362_spill] sm:$0xff]  ;;  %v4616_v37 = vsel %vm3574_vm3, %v4493_v43, 0.0 }
 0x2b6   :  { %14540 = vst [vmem:[#allocation444_spill] sm:$0xff] %v9000_v46  ;;  %v9014_v5 = vmax.f32 %v14548_v59, %v2918_v28  ;;  %v2272_v63 = vsel %vm2192_vm1, %v14551_v9, %v14550_v30  ;;  %v14554_v59 = vunpack.c.h.bf16 %v8986_v54  ;;  %v9037_v7 = vld [vmem:[%s12538_s1 + $0x218] sm:$0xff]  ;;  %v2568_v28 = vpop.permute.xlu1 %2567  ;;  %v14557_v9 = vld [vmem:[#allocation73_spill] sm:$0xff]  ;;  %v14563_v11 = vld [vmem:[#allocation244_spill] sm:$0xff] }
 0x2b7   :  { %14542 = vst [vmem:[#allocation8_spill] sm:$0xff] %v9003_v14  ;;  %14547 = vst [vmem:[#allocation232_spill] sm:$0xff] %v9011_v12  ;;  %v2921_v17 = vsel %vm2913_vm2, %v14557_v9, %v2568_v28  ;;  %v14559_v14 = vld [vmem:[#allocation505_spill] sm:$0xff]  ;;  %v14561_v58 = vld [vmem:[#allocation39_spill] sm:$0xff]  ;;  %v9057_v41 = vmax.f32 %v14563_v11, %v2272_v63 }
 0x2b8   :  { %14549 = vst [vmem:[#allocation236_spill] sm:$0xff] %v9014_v5  ;;  %v4499_v3 = vmul.f32 %v14554_v59, %v9011_v12  ;;  %v4497_v21 = vmul.f32 %v14555_v26, %v9014_v5  ;;  %v14558_v59 = vld [vmem:[#allocation70_spill] sm:$0xff]  ;;  %v9051_v46 = vadd.f32 %v4616_v37, %v14559_v14  ;;  %v9054_v16 = vadd.f32 %v4620_v1, %v14561_v58  ;;  %v14565_v30 = vld [vmem:[#allocation15_spill] sm:$0xff]  ;;  %v14569_v14 = vld [vmem:[#allocation248_spill] sm:$0xff] }
 0x2b9   :  { %v2920_v26 = vsel %vm2913_vm2, %v14558_v59, %v2566_v57  ;;  %14564 = vst [vmem:[#allocation61_spill] sm:$0xff] %v9057_v41  ;;  %v9060_v12 = vmax.f32 %v14565_v30, %v2921_v17  ;;  %v14567_v43 = vld [vmem:[#allocation14_spill] sm:$0xff]  ;;  %v9070_v37 = vmax.f32 %v14569_v14, %v2273_v33  ;;  %v14571_v58 = vld [vmem:[#allocation369_spill] sm:$0xff]  ;;  %v2570_v59 = vpop.permute.xlu0 %2569  ;;  %2703 = vrot.lane.b32.xlu1 %v14498_v4, %s5585_s19 }
 0x2ba   :  { %14560 = vst [vmem:[#allocation446_spill] sm:$0xff] %v9051_v46  ;;  %14562 = vst [vmem:[#allocation448_spill] sm:$0xff] %v9054_v16  ;;  %v9063_v5 = vmax.f32 %v14567_v43, %v2920_v26  ;;  %v14572_v1 = vld [vmem:[#allocation370_spill] sm:$0xff]  ;;  %v4624_v28 = vsel %vm3574_vm3, %v4497_v21, 0.0  ;;  %v4628_v30 = vsel %vm3574_vm3, %v4499_v3, 0.0  ;;  %v14573_v43 = vunpack.c.h.bf16 %v9037_v7  ;;  %v2572_v17 = vpop.permute.xlu1 %2571  ;;  %v9092_v3 = vld [vmem:[%s12538_s1 + $0x220] sm:$0xff]  ;;  %2705 = vrot.lane.b32.xlu0 %v14509_v50, %s5585_s19 }
 0x2bb   :  { %14566 = vst [vmem:[#allocation58_spill] sm:$0xff] %v9060_v12  ;;  %14570 = vst [vmem:[#allocation11_spill] sm:$0xff] %v9070_v37  ;;  %v2274_v63 = vsel %vm2192_vm1, %v14572_v1, %v14571_v58  ;;  %v14575_v26 = vld [vmem:[#allocation81_spill] sm:$0xff]  ;;  %v14577_v16 = vld [vmem:[#allocation510_spill] sm:$0xff]  ;;  %v14592_v38 = vunpack.c.h.bf16 %v9092_v3 }
 0x2bc   :  { %14568 = vst [vmem:[#allocation240_spill] sm:$0xff] %v9063_v5  ;;  %v4503_v57 = vmul.f32 %v14573_v43, %v9060_v12  ;;  %v4501_v9 = vmul.f32 %v14574_v52, %v9063_v5  ;;  %v2923_v1 = vsel %vm2913_vm2, %v14575_v26, %v2572_v17  ;;  %v14576_v43 = vld [vmem:[#allocation77_spill] sm:$0xff]  ;;  %v9100_v46 = vadd.f32 %v4624_v28, %v14577_v16  ;;  %v14579_v58 = vld [vmem:[#allocation43_spill] sm:$0xff]  ;;  %v14581_v12 = vld [vmem:[#allocation252_spill] sm:$0xff] }
 0x2bd   :  { %v2922_v52 = vsel %vm2913_vm2, %v14576_v43, %v2570_v59  ;;  %v9103_v33 = vadd.f32 %v4628_v30, %v14579_v58  ;;  %v9106_v5 = vmax.f32 %v14581_v12, %v2274_v63  ;;  %v14583_v60 = vld [vmem:[#allocation18_spill] sm:$0xff]  ;;  %v14585_v21 = vld [vmem:[#allocation16_spill] sm:$0xff]  ;;  %v14587_v16 = vunpack.c.l.bf16 %v7443_v22  ;;  %v2574_v26 = vpop.permute.xlu0 %2573  ;;  %2707 = vrot.lane.b32.xlu1 %v14511_v48, %s5585_s19 }
 0x2be   :  { %14578 = vst [vmem:[#allocation10_spill] sm:$0xff] %v9100_v46  ;;  %v9109_v6 = vmax.f32 %v14583_v60, %v2923_v1  ;;  %v9112_v35 = vmax.f32 %v14585_v21, %v2922_v52  ;;  %v14589_v63 = vunpack.c.l.bf16 %v14114_v47  ;;  %v4632_v60 = vsel %vm3574_vm3, %v4501_v9, 0.0  ;;  %v9139_v22 = vld [vmem:[%s12538_s1 + $0x238] sm:$0xff]  ;;  %v2576_v59 = vpop.permute.xlu1 %2575  ;;  %v14593_v1 = vld [vmem:[#allocation89_spill] sm:$0xff]  ;;  %2709 = vrot.lane.b32.xlu0 %v14525_v36, %s5585_s19 }
 0x2bf   :  { %14580 = vst [vmem:[#allocation67_spill] sm:$0xff] %v9103_v33  ;;  %14582 = vst [vmem:[#allocation64_spill] sm:$0xff] %v9106_v5  ;;  %v9121_v58 = vmul.f32 %v14587_v16, %v9057_v41  ;;  %v4636_v30 = vsel %vm3574_vm3, %v4503_v57, 0.0  ;;  %v9145_v57 = vld [vmem:[%s12538_s1 + $0x230] sm:$0xff]  ;;  %v2925_v43 = vsel %vm2913_vm2, %v14593_v1, %v2576_v59  ;;  %v14599_v33 = vunpack.c.l.bf16 %v7475_v24  ;;  %v14603_v41 = vld [vmem:[#allocation20_spill] sm:$0xff] }
 0x2c0   :  { %14584 = vst [vmem:[#allocation500_spill] sm:$0xff] %v9109_v6  ;;  %14586 = vst [vmem:[#allocation504_spill] sm:$0xff] %v9112_v35  ;;  %v9126_v28 = vmul.f32 %v14589_v63, %v9070_v37  ;;  %v4507_v17 = vmul.f32 %v14591_v18, %v9109_v6  ;;  %v4505_v21 = vmul.f32 %v14592_v38, %v9112_v35  ;;  %v14594_v52 = vld [vmem:[#allocation85_spill] sm:$0xff]  ;;  %v14595_v63 = vld [vmem:[#allocation90_spill] sm:$0xff]  ;;  %v14610_v32 = vunpack.c.h.bf16 %v9145_v57 }
 0x2c1   :  { %14588 = vst [vmem:[#allocation454_spill] sm:$0xff] %v9121_v58  ;;  %v2924_v16 = vsel %vm2913_vm2, %v14594_v52, %v2574_v26  ;;  %v9153_v18 = vadd.f32 %v4632_v60, %v14595_v63  ;;  %v14597_v38 = vld [vmem:[#allocation21_spill] sm:$0xff]  ;;  %v9161_v46 = vmul.f32 %v14599_v33, %v9106_v5  ;;  %v14601_v37 = vld [vmem:[#allocation22_spill] sm:$0xff]  ;;  %v14615_v5 = vld [vmem:[#allocation516_spill] sm:$0xff]  ;;  %2711 = vrot.lane.b32.xlu1 %v14563_v11, %s5585_s19 }
 0x2c2   :  { %14590 = vst [vmem:[#allocation13_spill] sm:$0xff] %v9126_v28  ;;  %v9156_v47 = vadd.f32 %v4636_v30, %v14597_v38  ;;  %v9164_v9 = vmax.f32 %v14601_v37, %v2925_v43  ;;  %v9167_v28 = vmax.f32 %v14603_v41, %v2924_v16  ;;  %v14605_v60 = vld [vmem:[#allocation373_spill] sm:$0xff]  ;;  %v14606_v30 = vld [vmem:[#allocation374_spill] sm:$0xff]  ;;  %v4640_v37 = vsel %vm3574_vm3, %v4505_v21, 0.0  ;;  %v2580_v63 = vpop.permute.xlu1 %2579  ;;  %v2578_v38 = vpop.permute.xlu0 %2577  ;;  %v14621_v21 = vld [vmem:[#allocation24_spill] sm:$0xff]  ;;  %2713 = vrot.lane.b32.xlu0 %v14569_v14, %s5585_s19 }
 0x2c3   :  { %14596 = vst [vmem:[#allocation12_spill] sm:$0xff] %v9153_v18  ;;  %14600 = vst [vmem:[#allocation366_spill] sm:$0xff] %v9161_v46  ;;  %v2275_v59 = vsel %vm2192_vm1, %v14606_v30, %v14605_v60  ;;  %v14607_v26 = vld [vmem:[#allocation377_spill] sm:$0xff]  ;;  %v14608_v24 = vld [vmem:[#allocation378_spill] sm:$0xff]  ;;  %v4644_v1 = vsel %vm3574_vm3, %v4507_v17, 0.0  ;;  %v14609_v41 = vunpack.c.h.bf16 %v9139_v22 }
 0x2c4   :  { %14598 = vst [vmem:[#allocation362_spill] sm:$0xff] %v9156_v47  ;;  %14602 = vst [vmem:[#allocation73_spill] sm:$0xff] %v9164_v9  ;;  %v2276_v33 = vsel %vm2192_vm1, %v14608_v24, %v14607_v26  ;;  %v4509_v51 = vmul.f32 %v14610_v32, %v9167_v28  ;;  %v9190_v52 = vld [vmem:[%s12538_s1 + $0x248] sm:$0xff]  ;;  %v9196_v17 = vld [vmem:[%s12538_s1 + $0x240] sm:$0xff]  ;;  %v9207_v16 = vadd.f32 %v4644_v1, %v14615_v5 }
 0x2c5   :  { %14604 = vst [vmem:[#allocation70_spill] sm:$0xff] %v9167_v28  ;;  %v4511_v43 = vmul.f32 %v14609_v41, %v9164_v9  ;;  %v14611_v30 = vld [vmem:[#allocation97_spill] sm:$0xff]  ;;  %v14613_v47 = vld [vmem:[#allocation98_spill] sm:$0xff]  ;;  %v14617_v46 = vld [vmem:[#allocation256_spill] sm:$0xff]  ;;  %v14628_v25 = vunpack.c.h.bf16 %v9196_v17  ;;  %2715 = vrot.lane.b32.xlu1 %v14581_v12, %s5585_s19 }
 0x2c6   :  { %v2927_v24 = vsel %vm2913_vm2, %v14611_v30, %v2580_v63  ;;  %v14612_v41 = vld [vmem:[#allocation93_spill] sm:$0xff]  ;;  %v9204_v18 = vadd.f32 %v4640_v37, %v14613_v47  ;;  %14616 = vst [vmem:[#allocation39_spill] sm:$0xff] %v9207_v16  ;;  %v9210_v9 = vmax.f32 %v14617_v46, %v2275_v59  ;;  %v14619_v58 = vld [vmem:[#allocation26_spill] sm:$0xff]  ;;  %v14623_v47 = vld [vmem:[#allocation260_spill] sm:$0xff]  ;;  %v4648_v63 = vsel %vm3574_vm3, %v4509_v51, 0.0  ;;  %2717 = vrot.lane.b32.xlu0 %v14617_v46, %s5585_s19 }
 0x2c7   :  { %v2926_v32 = vsel %vm2913_vm2, %v14612_v41, %v2578_v38  ;;  %v9213_v60 = vmax.f32 %v14619_v58, %v2927_v24  ;;  %v9223_v37 = vmax.f32 %v14623_v47, %v2276_v33  ;;  %v14625_v5 = vld [vmem:[#allocation381_spill] sm:$0xff]  ;;  %v14626_v1 = vld [vmem:[#allocation382_spill] sm:$0xff]  ;;  %v4652_v58 = vsel %vm3574_vm3, %v4511_v43, 0.0  ;;  %v2584_v24 = vpop.permute.xlu1 %2583  ;;  %v2582_v41 = vpop.permute.xlu0 %2581  ;;  %v14631_v16 = vld [vmem:[#allocation27_spill] sm:$0xff] }
 0x2c8   :  { %14614 = vst [vmem:[#allocation505_spill] sm:$0xff] %v9204_v18  ;;  %14618 = vst [vmem:[#allocation244_spill] sm:$0xff] %v9210_v9  ;;  %v9216_v26 = vmax.f32 %v14621_v21, %v2926_v32  ;;  %v2277_v59 = vsel %vm2192_vm1, %v14626_v1, %v14625_v5  ;;  %v14627_v21 = vunpack.c.h.bf16 %v9190_v52  ;;  %v9245_v43 = vld [vmem:[%s12538_s1 + $0x250] sm:$0xff]  ;;  %v9253_v18 = vadd.f32 %v4648_v63, %v14631_v16  ;;  %v14635_v5 = vld [vmem:[#allocation264_spill] sm:$0xff] }
 0x2c9   :  { %14620 = vst [vmem:[#allocation15_spill] sm:$0xff] %v9213_v60  ;;  %14624 = vst [vmem:[#allocation248_spill] sm:$0xff] %v9223_v37  ;;  %v14629_v32 = vld [vmem:[#allocation105_spill] sm:$0xff]  ;;  %v14639_v51 = vld [vmem:[#allocation28_spill] sm:$0xff]  ;;  %v14641_v16 = vunpack.c.l.bf16 %v14133_v62  ;;  %v14646_v42 = vunpack.c.h.bf16 %v9245_v43  ;;  %2719 = vrot.lane.b32.xlu1 %v14623_v47, %s5585_s19 }
 0x2ca   :  { %14622 = vst [vmem:[#allocation14_spill] sm:$0xff] %v9216_v26  ;;  %v4515_v38 = vmul.f32 %v14627_v21, %v9213_v60  ;;  %v4513_v30 = vmul.f32 %v14628_v25, %v9216_v26  ;;  %v2929_v1 = vsel %vm2913_vm2, %v14629_v32, %v2584_v24  ;;  %v14630_v21 = vld [vmem:[#allocation101_spill] sm:$0xff]  ;;  %14632 = vst [vmem:[#allocation370_spill] sm:$0xff] %v9253_v18  ;;  %v14633_v60 = vld [vmem:[#allocation51_spill] sm:$0xff]  ;;  %2721 = vrot.lane.b32.xlu0 %v14635_v5, %s5585_s19 }
 0x2cb   :  { %v2928_v25 = vsel %vm2913_vm2, %v14630_v21, %v2582_v41  ;;  %v9256_v33 = vadd.f32 %v4652_v58, %v14633_v60  ;;  %v9259_v26 = vmax.f32 %v14635_v5, %v2277_v59  ;;  %v14637_v28 = vld [vmem:[#allocation29_spill] sm:$0xff]  ;;  %v9274_v60 = vmul.f32 %v14641_v16, %v9210_v9  ;;  %v2588_v41 = vpop.permute.xlu1 %2587  ;;  %v2586_v32 = vpop.permute.xlu0 %2585  ;;  %v14657_v9 = vld [vmem:[#allocation31_spill] sm:$0xff] }
 0x2cc   :  { %v9262_v6 = vmax.f32 %v14637_v28, %v2929_v1  ;;  %v9265_v35 = vmax.f32 %v14639_v51, %v2928_v25  ;;  %v14643_v59 = vunpack.c.l.bf16 %v14144_v53  ;;  %v4656_v28 = vsel %vm3574_vm3, %v4513_v30, 0.0  ;;  %v9292_v62 = vld [vmem:[%s12538_s1 + $0x268] sm:$0xff] }
 0x2cd   :  { %14634 = vst [vmem:[#allocation81_spill] sm:$0xff] %v9256_v33  ;;  %14636 = vst [vmem:[#allocation77_spill] sm:$0xff] %v9259_v26  ;;  %v4660_v58 = vsel %vm3574_vm3, %v4515_v38, 0.0  ;;  %v9298_v38 = vld [vmem:[%s12538_s1 + $0x260] sm:$0xff]  ;;  %v14648_v1 = vld [vmem:[#allocation113_spill] sm:$0xff] }
 0x2ce   :  { %14638 = vst [vmem:[#allocation510_spill] sm:$0xff] %v9262_v6  ;;  %14640 = vst [vmem:[#allocation43_spill] sm:$0xff] %v9265_v35  ;;  %v9279_v63 = vmul.f32 %v14643_v59, %v9223_v37  ;;  %v4519_v24 = vmul.f32 %v14645_v13, %v9262_v6  ;;  %v4517_v51 = vmul.f32 %v14646_v42, %v9265_v35  ;;  %v14649_v25 = vld [vmem:[#allocation109_spill] sm:$0xff]  ;;  %v14650_v59 = vld [vmem:[#allocation519_spill] sm:$0xff]  ;;  %v14666_v4 = vunpack.c.h.bf16 %v9298_v38 }
 0x2cf   :  { %14642 = vst [vmem:[#allocation252_spill] sm:$0xff] %v9274_v60  ;;  %14647 = vst [vmem:[#allocation16_spill] sm:$0xff] %v9298_v38  ;;  %v2931_v21 = vsel %vm2913_vm2, %v14648_v1, %v2588_v41  ;;  %v2930_v16 = vsel %vm2913_vm2, %v14649_v25, %v2586_v32  ;;  %v9306_v13 = vadd.f32 %v4656_v28, %v14650_v59  ;;  %v14652_v42 = vld [vmem:[#allocation523_spill] sm:$0xff]  ;;  %v14654_v33 = vld [vmem:[#allocation466_spill] sm:$0xff]  ;;  %v2592_v59 = vpop.permute.xlu1 %2591 }
 0x2d0   :  { %14644 = vst [vmem:[#allocation18_spill] sm:$0xff] %v9279_v63  ;;  %v9309_v53 = vadd.f32 %v4660_v58, %v14652_v42  ;;  %v14655_v18 = vunpack.c.l.bf16 %v14654_v33  ;;  %v9317_v30 = vmax.f32 %v14657_v9, %v2931_v21  ;;  %v14659_v6 = vld [vmem:[#allocation30_spill] sm:$0xff]  ;;  %v14661_v28 = vld [vmem:[#allocation385_spill] sm:$0xff]  ;;  %v4664_v9 = vsel %vm3574_vm3, %v4517_v51, 0.0  ;;  %v2590_v42 = vpop.permute.xlu0 %2589  ;;  %v14679_v51 = vld [vmem:[#allocation32_spill] sm:$0xff] }
 0x2d1   :  { %14651 = vst [vmem:[#allocation89_spill] sm:$0xff] %v9306_v13  ;;  %v9320_v63 = vmax.f32 %v14659_v6, %v2930_v16  ;;  %v14662_v58 = vld [vmem:[#allocation386_spill] sm:$0xff]  ;;  %v14663_v32 = vld [vmem:[#allocation389_spill] sm:$0xff]  ;;  %v4668_v1 = vsel %vm3574_vm3, %v4519_v24, 0.0  ;;  %v14665_v6 = vunpack.c.h.bf16 %v9292_v62  ;;  %v14694_v35 = vld [vmem:[#allocation276_spill] sm:$0xff] }
 0x2d2   :  { %14653 = vst [vmem:[#allocation85_spill] sm:$0xff] %v9309_v53  ;;  %v9314_v37 = vmul.f32 %v14655_v18, %v9259_v26  ;;  %14658 = vst [vmem:[#allocation21_spill] sm:$0xff] %v9317_v30  ;;  %v2278_v41 = vsel %vm2192_vm1, %v14662_v58, %v14661_v28  ;;  %v14664_v33 = vld [vmem:[#allocation390_spill] sm:$0xff]  ;;  %v14669_v58 = vld [vmem:[#allocation121_spill] sm:$0xff] }
 0x2d3   :  { %14660 = vst [vmem:[#allocation22_spill] sm:$0xff] %v9320_v63  ;;  %v2279_v18 = vsel %vm2192_vm1, %v14664_v33, %v14663_v32  ;;  %v4523_v21 = vmul.f32 %v14665_v6, %v9317_v30  ;;  %v4521_v40 = vmul.f32 %v14666_v4, %v9320_v63  ;;  %v9343_v25 = vld [vmem:[%s12538_s1 + $0x278] sm:$0xff]  ;;  %v9349_v24 = vld [vmem:[%s12538_s1 + $0x270] sm:$0xff]  ;;  %v2933_v33 = vsel %vm2913_vm2, %v14669_v58, %v2592_v59  ;;  %v14675_v30 = vld [vmem:[#allocation268_spill] sm:$0xff] }
 0x2d4   :  { %14656 = vst [vmem:[#allocation90_spill] sm:$0xff] %v9314_v37  ;;  %14667 = vst [vmem:[#allocation20_spill] sm:$0xff] %v9343_v25  ;;  %v14670_v6 = vld [vmem:[#allocation117_spill] sm:$0xff]  ;;  %v14671_v53 = vld [vmem:[#allocation126_spill] sm:$0xff]  ;;  %v9363_v37 = vmax.f32 %v14675_v30, %v2278_v41  ;;  %v14686_v48 = vunpack.c.h.bf16 %v9343_v25  ;;  %2723 = vrot.lane.b32.xlu1 %v14675_v30, %s5585_s19 }
 0x2d5   :  { %14668 = vst [vmem:[#allocation374_spill] sm:$0xff] %v9349_v24  ;;  %v2932_v4 = vsel %vm2913_vm2, %v14670_v6, %v2590_v42  ;;  %v9357_v13 = vadd.f32 %v4664_v9, %v14671_v53  ;;  %v14673_v26 = vld [vmem:[#allocation525_spill] sm:$0xff]  ;;  %v14682_v53 = vld [vmem:[#allocation272_spill] sm:$0xff]  ;;  %v4672_v59 = vsel %vm3574_vm3, %v4521_v40, 0.0  ;;  %v14687_v42 = vunpack.c.h.bf16 %v9349_v24  ;;  %v2596_v6 = vpop.permute.xlu1 %2595  ;;  %v14696_v24 = vld [vmem:[#allocation35_spill] sm:$0xff] }
 0x2d6   :  { %v9360_v16 = vadd.f32 %v4668_v1, %v14673_v26  ;;  %14676 = vst [vmem:[#allocation93_spill] sm:$0xff] %v9363_v37  ;;  %v14677_v63 = vld [vmem:[#allocation33_spill] sm:$0xff]  ;;  %v9369_v32 = vmax.f32 %v14679_v51, %v2932_v4  ;;  %v9378_v26 = vld [vmem:[%s12538_s1 + $0x140] sm:$0xff]  ;;  %v9381_v41 = vmax.f32 %v14682_v53, %v2279_v18  ;;  %v4676_v51 = vsel %vm3574_vm3, %v4523_v21, 0.0  ;;  %v2594_v4 = vpop.permute.xlu0 %2593  ;;  %v14698_v25 = vld [vmem:[#allocation34_spill] sm:$0xff]  ;;  %2725 = vrot.lane.b32.xlu0 %v14682_v53, %s5585_s19 }
 0x2d7   :  { %14672 = vst [vmem:[#allocation378_spill] sm:$0xff] %v9357_v13  ;;  %v9366_v60 = vmax.f32 %v14677_v63, %v2933_v33  ;;  %14681 = vst [vmem:[#allocation256_spill] sm:$0xff] %v9378_v26  ;;  %v14684_v9 = vld [vmem:[#allocation393_spill] sm:$0xff]  ;;  %v14685_v63 = vld [vmem:[#allocation394_spill] sm:$0xff] }
 0x2d8   :  { %14674 = vst [vmem:[#allocation97_spill] sm:$0xff] %v9360_v16  ;;  %14680 = vst [vmem:[#allocation516_spill] sm:$0xff] %v9369_v32  ;;  %v2280_v1 = vsel %vm2192_vm1, %v14685_v63, %v14684_v9  ;;  %v4525_v58 = vmul.f32 %v14687_v42, %v9369_v32  ;;  %v9397_v18 = vld [vmem:[%s12538_s1 + $0x288] sm:$0xff]  ;;  %v9403_v21 = vld [vmem:[%s12538_s1 + $0x280] sm:$0xff]  ;;  %2727 = vrot.lane.b32.xlu1 %v14694_v35, %s5585_s19 }
 0x2d9   :  { %14678 = vst [vmem:[#allocation98_spill] sm:$0xff] %v9366_v60  ;;  %14683 = vst [vmem:[#allocation26_spill] sm:$0xff] %v9381_v41  ;;  %v4527_v50 = vmul.f32 %v14686_v48, %v9366_v60  ;;  %v14688_v63 = vld [vmem:[#allocation129_spill] sm:$0xff]  ;;  %v14690_v13 = vld [vmem:[#allocation138_spill] sm:$0xff]  ;;  %v9418_v28 = vmax.f32 %v14694_v35, %v2280_v1  ;;  %v14706_v36 = vunpack.c.h.bf16 %v9397_v18 }
 0x2da   :  { %v2935_v48 = vsel %vm2913_vm2, %v14688_v63, %v2596_v6  ;;  %v14689_v42 = vld [vmem:[#allocation125_spill] sm:$0xff]  ;;  %v9411_v60 = vadd.f32 %v4672_v59, %v14690_v13  ;;  %v14692_v32 = vld [vmem:[#allocation63_spill] sm:$0xff]  ;;  %v4680_v11 = vsel %vm3574_vm3, %v4525_v58, 0.0  ;;  %v14707_v6 = vunpack.c.h.bf16 %v9403_v21  ;;  %v14718_v58 = vld [vmem:[#allocation38_spill] sm:$0xff] }
 0x2db   :  { %v2934_v16 = vsel %vm2913_vm2, %v14689_v42, %v2594_v4  ;;  %v9414_v33 = vadd.f32 %v4676_v51, %v14692_v32  ;;  %14695 = vst [vmem:[#allocation382_spill] sm:$0xff] %v9418_v28  ;;  %v9421_v40 = vmax.f32 %v14696_v24, %v2935_v48  ;;  %v9433_v13 = vld [vmem:[%s12538_s1 + $0x148] sm:$0xff]  ;;  %v14701_v32 = vld [vmem:[#allocation471_spill] sm:$0xff]  ;;  %v4684_v24 = vsel %vm3574_vm3, %v4527_v50, 0.0  ;;  %v2600_v48 = vpop.permute.xlu1 %2599  ;;  %v9462_v50 = vld [vmem:[%s12538_s1 + $0x290] sm:$0xff]  ;;  %v2598_v42 = vpop.permute.xlu0 %2597 }
 0x2dc   :  { %14691 = vst [vmem:[#allocation24_spill] sm:$0xff] %v9411_v60  ;;  %v9424_v38 = vmax.f32 %v14698_v25, %v2934_v16  ;;  %14700 = vst [vmem:[#allocation27_spill] sm:$0xff] %v9433_v13  ;;  %v14702_v1 = vunpack.c.l.bf16 %v14701_v32  ;;  %v14704_v25 = vunpack.c.l.bf16 %v14172_v29  ;;  %v9456_v63 = vld [vmem:[%s12538_s1 + $0x298] sm:$0xff]  ;;  %v14710_v32 = vld [vmem:[#allocation137_spill] sm:$0xff]  ;;  %v14727_v12 = vunpack.c.h.bf16 %v9462_v50 }
 0x2dd   :  { %14693 = vst [vmem:[#allocation260_spill] sm:$0xff] %v9414_v33  ;;  %14697 = vst [vmem:[#allocation105_spill] sm:$0xff] %v9421_v40  ;;  %v4531_v51 = vmul.f32 %v14706_v36, %v9421_v40  ;;  %v14714_v33 = vld [vmem:[#allocation530_spill] sm:$0xff]  ;;  %v15226_v13 = vld [vmem:[#allocation333_spill] sm:$0xff] }
 0x2de   :  { %14699 = vst [vmem:[#allocation101_spill] sm:$0xff] %v9424_v38  ;;  %v9438_v59 = vmul.f32 %v14702_v1, %v9363_v37  ;;  %v9443_v16 = vmul.f32 %v14704_v25, %v9381_v41  ;;  %v4529_v4 = vmul.f32 %v14707_v6, %v9424_v38  ;;  %14708 = vst [vmem:[#allocation29_spill] sm:$0xff] %v9456_v63  ;;  %v14711_v25 = vld [vmem:[#allocation133_spill] sm:$0xff]  ;;  %v14712_v6 = vld [vmem:[#allocation528_spill] sm:$0xff]  ;;  %v14716_v41 = vunpack.c.l.bf16 %v14177_v31 }
 0x2df   :  { %14709 = vst [vmem:[#allocation28_spill] sm:$0xff] %v9462_v50  ;;  %v2937_v1 = vsel %vm2913_vm2, %v14710_v32, %v2600_v48  ;;  %v2936_v36 = vsel %vm2913_vm2, %v14711_v25, %v2598_v42  ;;  %v9470_v9 = vadd.f32 %v4680_v11, %v14712_v6  ;;  %v9473_v29 = vadd.f32 %v4684_v24, %v14714_v33  ;;  %v14720_v48 = vld [vmem:[#allocation36_spill] sm:$0xff]  ;;  %v14722_v33 = vld [vmem:[#allocation397_spill] sm:$0xff]  ;;  %v14723_v11 = vld [vmem:[#allocation398_spill] sm:$0xff] }
 0x2e0   :  { %14703 = vst [vmem:[#allocation51_spill] sm:$0xff] %v9438_v59  ;;  %14705 = vst [vmem:[#allocation264_spill] sm:$0xff] %v9443_v16  ;;  %v9479_v37 = vmul.f32 %v14716_v41, %v9418_v28  ;;  %v9482_v40 = vmax.f32 %v14718_v58, %v2937_v1  ;;  %v9485_v32 = vmax.f32 %v14720_v48, %v2936_v36  ;;  %v14724_v42 = vld [vmem:[#allocation401_spill] sm:$0xff]  ;;  %v14725_v31 = vld [vmem:[#allocation402_spill] sm:$0xff]  ;;  %v4688_v58 = vsel %vm3574_vm3, %v4529_v4, 0.0 }
 0x2e1   :  { %14713 = vst [vmem:[#allocation113_spill] sm:$0xff] %v9470_v9  ;;  %14715 = vst [vmem:[#allocation109_spill] sm:$0xff] %v9473_v29  ;;  %v2281_v24 = vsel %vm2192_vm1, %v14723_v11, %v14722_v33  ;;  %v2282_v41 = vsel %vm2192_vm1, %v14725_v31, %v14724_v42  ;;  %v4692_v1 = vsel %vm3574_vm3, %v4531_v51, 0.0  ;;  %v14726_v25 = vunpack.c.h.bf16 %v9456_v63  ;;  %v9508_v6 = vld [vmem:[%s12538_s1 + $0x2a8] sm:$0xff]  ;;  %v2604_v11 = vpop.permute.xlu1 %2603  ;;  %v9514_v51 = vld [vmem:[%s12538_s1 + $0x2a0] sm:$0xff]  ;;  %v2602_v31 = vpop.permute.xlu0 %2601 }
 0x2e2   :  { %14717 = vst [vmem:[#allocation519_spill] sm:$0xff] %v9479_v37  ;;  %14719 = vst [vmem:[#allocation523_spill] sm:$0xff] %v9482_v40  ;;  %v4533_v14 = vmul.f32 %v14727_v12, %v9485_v32  ;;  %v14731_v12 = vld [vmem:[#allocation141_spill] sm:$0xff]  ;;  %v14732_v9 = vld [vmem:[#allocation459_spill] sm:$0xff]  ;;  %v14744_v47 = vunpack.c.h.bf16 %v9508_v6  ;;  %v14745_v46 = vunpack.c.h.bf16 %v9514_v51  ;;  %v14754_v59 = vunpack.c.l.bf16 %v14186_v61 }
 0x2e3   :  { %14721 = vst [vmem:[#allocation466_spill] sm:$0xff] %v9485_v32  ;;  %v4535_v36 = vmul.f32 %v14726_v25, %v9482_v40  ;;  %14728 = vst [vmem:[#allocation31_spill] sm:$0xff] %v9508_v6  ;;  %v14730_v25 = vld [vmem:[#allocation145_spill] sm:$0xff]  ;;  %v2938_v29 = vsel %vm2913_vm2, %v14731_v12, %v2602_v31  ;;  %v9522_v28 = vadd.f32 %v4688_v58, %v14732_v9  ;;  %v14736_v32 = vld [vmem:[#allocation280_spill] sm:$0xff]  ;;  %v14760_v61 = vunpack.c.l.bf16 %v7621_v45 }
 0x2e4   :  { %14729 = vst [vmem:[#allocation30_spill] sm:$0xff] %v9514_v51  ;;  %v2939_v60 = vsel %vm2913_vm2, %v14730_v25, %v2604_v11  ;;  %v14734_v40 = vld [vmem:[#allocation69_spill] sm:$0xff]  ;;  %v9528_v38 = vmax.f32 %v14736_v32, %v2281_v24  ;;  %v14738_v11 = vld [vmem:[#allocation42_spill] sm:$0xff]  ;;  %v14740_v31 = vld [vmem:[#allocation40_spill] sm:$0xff]  ;;  %v4696_v58 = vsel %vm3574_vm3, %v4533_v14, 0.0  ;;  %2729 = vrot.lane.b32.xlu0 %v14736_v32, %s5585_s19 }
 0x2e5   :  { %14733 = vst [vmem:[#allocation386_spill] sm:$0xff] %v9522_v28  ;;  %v9525_v48 = vadd.f32 %v4692_v1, %v14734_v40  ;;  %v9533_v4 = vld [vmem:[%s12538_s1 + $0x8] sm:$0xff]  ;;  %v9537_v25 = vmax.f32 %v14738_v11, %v2939_v60  ;;  %v9540_v12 = vmax.f32 %v14740_v31, %v2938_v29  ;;  %v9552_v24 = vld [vmem:[%s12538_s1] sm:$0xff]  ;;  %v4700_v29 = vsel %vm3574_vm3, %v4535_v36, 0.0  ;;  %v9566_v11 = vld [vmem:[%s12538_s1 + $0x2b8] sm:$0xff]  ;;  %v2608_v37 = vpop.permute.xlu1 %2607 }
 0x2e6   :  { %14737 = vst [vmem:[#allocation121_spill] sm:$0xff] %v9528_v38  ;;  %v14742_v9 = vld [vmem:[#allocation284_spill] sm:$0xff]  ;;  %14746 = vst [vmem:[#allocation268_spill] sm:$0xff] %v9566_v11  ;;  %v9572_v36 = vld [vmem:[%s12538_s1 + $0x2b0] sm:$0xff]  ;;  %v9588_v33 = vmul.f32 %v14754_v59, %v9528_v38 }
 0x2e7   :  { %14735 = vst [vmem:[#allocation390_spill] sm:$0xff] %v9525_v48  ;;  %14739 = vst [vmem:[#allocation117_spill] sm:$0xff] %v9537_v25  ;;  %v9547_v40 = vmax.f32 %v14742_v9, %v2282_v41  ;;  %v4539_v1 = vmul.f32 %v14744_v47, %v9537_v25  ;;  %v4537_v41 = vmul.f32 %v14745_v46, %v9540_v12  ;;  %v2606_v47 = vpop.permute.xlu0 %2605  ;;  %v14748_v60 = vld [vmem:[#allocation153_spill] sm:$0xff]  ;;  %v14750_v25 = vld [vmem:[#allocation158_spill] sm:$0xff]  ;;  %v14765_v5 = vunpack.c.h.bf16 %v9572_v36 }
 0x2e8   :  { %14741 = vst [vmem:[#allocation126_spill] sm:$0xff] %v9540_v12  ;;  %14747 = vst [vmem:[#allocation33_spill] sm:$0xff] %v9572_v36  ;;  %v2941_v48 = vsel %vm2913_vm2, %v14748_v60, %v2608_v37  ;;  %v14749_v46 = vld [vmem:[#allocation149_spill] sm:$0xff]  ;;  %v9580_v12 = vadd.f32 %v4696_v58, %v14750_v25  ;;  %v14752_v16 = vld [vmem:[#allocation162_spill] sm:$0xff]  ;;  %2731 = vrot.lane.b32.xlu1 %v14742_v9, %s5585_s19 }
 0x2e9   :  { %14743 = vst [vmem:[#allocation525_spill] sm:$0xff] %v9547_v40  ;;  %v2940_v28 = vsel %vm2913_vm2, %v14749_v46, %v2606_v47  ;;  %v9583_v31 = vadd.f32 %v4700_v29, %v14752_v16  ;;  %14755 = vst [vmem:[#allocation394_spill] sm:$0xff] %v9588_v33  ;;  %v9593_v14 = vld [vmem:[%s12538_s1 + $0x18] sm:$0xff]  ;;  %v14758_v25 = vld [vmem:[#allocation44_spill] sm:$0xff]  ;;  %v9609_v59 = vmul.f32 %v14760_v61, %v9547_v40 }
 0x2ea   :  { %14751 = vst [vmem:[#allocation32_spill] sm:$0xff] %v9580_v12  ;;  %v14756_v60 = vld [vmem:[#allocation46_spill] sm:$0xff]  ;;  %v9600_v58 = vmax.f32 %v14758_v25, %v2940_v28  ;;  %v14762_v16 = vld [vmem:[#allocation405_spill] sm:$0xff]  ;;  %v4708_v28 = vsel %vm3574_vm3, %v4539_v1, 0.0  ;;  %v9631_v1 = vld [vmem:[%s12538_s1 + $0x2c0] sm:$0xff] }
 0x2eb   :  { %14753 = vst [vmem:[#allocation272_spill] sm:$0xff] %v9583_v31  ;;  %v9597_v47 = vmax.f32 %v14756_v60, %v2941_v48  ;;  %14761 = vst [vmem:[#allocation138_spill] sm:$0xff] %v9609_v59  ;;  %v14763_v29 = vld [vmem:[#allocation406_spill] sm:$0xff]  ;;  %v4704_v48 = vsel %vm3574_vm3, %v4537_v41, 0.0  ;;  %v14764_v60 = vunpack.c.h.bf16 %v9566_v11  ;;  %v9625_v45 = vld [vmem:[%s12538_s1 + $0x2c8] sm:$0xff]  ;;  %v14783_v53 = vunpack.c.h.bf16 %v9631_v1 }
 0x2ec   :  { %14759 = vst [vmem:[#allocation125_spill] sm:$0xff] %v9600_v58  ;;  %v2283_v46 = vsel %vm2192_vm1, %v14763_v29, %v14762_v16  ;;  %v4541_v25 = vmul.f32 %v14765_v5, %v9600_v58  ;;  %14766 = vst [vmem:[#allocation63_spill] sm:$0xff] %v9625_v45  ;;  %v2612_v29 = vpop.permute.xlu1 %2611  ;;  %v14768_v37 = vld [vmem:[#allocation161_spill] sm:$0xff]  ;;  %v14770_v40 = vld [vmem:[#allocation464_spill] sm:$0xff]  ;;  %v14782_v35 = vunpack.c.h.bf16 %v9625_v45  ;;  %v14790_v16 = vunpack.c.l.bf16 %v7637_v0 }
 0x2ed   :  { %14757 = vst [vmem:[#allocation129_spill] sm:$0xff] %v9597_v47  ;;  %v4543_v30 = vmul.f32 %v14764_v60, %v9597_v47  ;;  %14767 = vst [vmem:[#allocation276_spill] sm:$0xff] %v9631_v1  ;;  %v2610_v60 = vpop.permute.xlu0 %2609  ;;  %v2943_v31 = vsel %vm2913_vm2, %v14768_v37, %v2612_v29  ;;  %v14769_v5 = vld [vmem:[#allocation157_spill] sm:$0xff]  ;;  %v9639_v38 = vadd.f32 %v4704_v48, %v14770_v40  ;;  %v14772_v47 = vld [vmem:[#allocation76_spill] sm:$0xff] }
 0x2ee   :  { %v2942_v12 = vsel %vm2913_vm2, %v14769_v5, %v2610_v60  ;;  %v9642_v61 = vadd.f32 %v4708_v28, %v14772_v47  ;;  %v14774_v58 = vld [vmem:[#allocation288_spill] sm:$0xff]  ;;  %v9650_v41 = vld [vmem:[%s12538_s1 + $0x10] sm:$0xff]  ;;  %v14780_v40 = vld [vmem:[#allocation407_spill] sm:$0xff] }
 0x2ef   :  { %14771 = vst [vmem:[#allocation35_spill] sm:$0xff] %v9639_v38  ;;  %v9645_v59 = vmax.f32 %v14774_v58, %v2283_v46  ;;  %v14776_v37 = vld [vmem:[#allocation50_spill] sm:$0xff]  ;;  %v14778_v60 = vld [vmem:[#allocation48_spill] sm:$0xff]  ;;  %v4716_v28 = vsel %vm3574_vm3, %v4543_v30, 0.0  ;;  %2733 = vrot.lane.b32.xlu0 %v14774_v58, %s5585_s19  ;;  %v14909_v42 = vld [vmem:[#allocation495_spill] sm:$0xff] }
 0x2f0   :  { %14773 = vst [vmem:[#allocation34_spill] sm:$0xff] %v9642_v61  ;;  %v9654_v29 = vmax.f32 %v14776_v37, %v2943_v31  ;;  %v9657_v5 = vmax.f32 %v14778_v60, %v2942_v12  ;;  %v14781_v47 = vld [vmem:[#allocation408_spill] sm:$0xff]  ;;  %v4712_v12 = vsel %vm3574_vm3, %v4541_v25, 0.0  ;;  %v2616_v31 = vpop.permute.xlu1 %2615  ;;  %v9689_v30 = vld [vmem:[%s12538_s1 + $0x2d0] sm:$0xff]  ;;  %v9700_v33 = vadd.f32 %v4716_v28, %v8266_v20 }
 0x2f1   :  { %14775 = vst [vmem:[#allocation471_spill] sm:$0xff] %v9645_v59  ;;  %v2284_v46 = vsel %vm2192_vm1, %v14781_v47, %v14780_v40  ;;  %v9669_v48 = vld [vmem:[%s12538_s1 + $0x28] sm:$0xff]  ;;  %v9683_v47 = vld [vmem:[%s12538_s1 + $0x2d8] sm:$0xff]  ;;  %14785 = vst [vmem:[#allocation530_spill] sm:$0xff] %v9689_v30  ;;  %v9705_v40 = vmul.f32 %v14790_v16, %v9645_v59  ;;  %v14801_v9 = vunpack.c.h.bf16 %v9689_v30  ;;  %v14910_v36 = vunpack.c.l.bf16 %v14909_v42 }
 0x2f2   :  { %14777 = vst [vmem:[#allocation137_spill] sm:$0xff] %v9654_v29  ;;  %14779 = vst [vmem:[#allocation133_spill] sm:$0xff] %v9657_v5  ;;  %v4547_v37 = vmul.f32 %v14782_v35, %v9654_v29  ;;  %v4545_v60 = vmul.f32 %v14783_v53, %v9657_v5  ;;  %v2614_v35 = vpop.permute.xlu0 %2613  ;;  %v14786_v61 = vld [vmem:[#allocation169_spill] sm:$0xff]  ;;  %v9697_v5 = vadd.f32 %v4712_v12, %v8257_v10  ;;  %v9710_v25 = vld [vmem:[%s12538_s1 + $0x20] sm:$0xff] }
 0x2f3   :  { %14784 = vst [vmem:[#allocation528_spill] sm:$0xff] %v9683_v47  ;;  %v2945_v38 = vsel %vm2913_vm2, %v14786_v61, %v2616_v31  ;;  %v14787_v53 = vld [vmem:[#allocation165_spill] sm:$0xff]  ;;  %14789 = vst [vmem:[#allocation36_spill] sm:$0xff] %v9700_v33  ;;  %v14792_v31 = vld [vmem:[#allocation56_spill] sm:$0xff] }
 0x2f4   :  { %v2944_v29 = vsel %vm2913_vm2, %v14787_v53, %v2614_v35  ;;  %14788 = vst [vmem:[#allocation38_spill] sm:$0xff] %v9697_v5  ;;  %14791 = vst [vmem:[#allocation398_spill] sm:$0xff] %v9705_v40  ;;  %v9714_v35 = vmax.f32 %v14792_v31, %v2945_v38  ;;  %v14794_v10 = vld [vmem:[#allocation52_spill] sm:$0xff]  ;;  %v14798_v16 = vld [vmem:[#allocation409_spill] sm:$0xff]  ;;  %v4720_v61 = vsel %vm3574_vm3, %v4545_v60, 0.0  ;;  %v4724_v38 = vsel %vm3574_vm3, %v4547_v37, 0.0 }
 0x2f5   :  { %v9717_v12 = vmax.f32 %v14794_v10, %v2944_v29  ;;  %v14796_v0 = vld [vmem:[#allocation292_spill] sm:$0xff]  ;;  %v14799_v28 = vld [vmem:[#allocation410_spill] sm:$0xff]  ;;  %v14800_v29 = vunpack.c.h.bf16 %v9683_v47  ;;  %v14804_v33 = vld [vmem:[#allocation177_spill] sm:$0xff] }
 0x2f6   :  { %14793 = vst [vmem:[#allocation402_spill] sm:$0xff] %v9714_v35  ;;  %v9724_v20 = vmax.f32 %v14796_v0, %v2284_v46  ;;  %v2285_v53 = vsel %vm2192_vm1, %v14799_v28, %v14798_v16  ;;  %v9740_v32 = vld [vmem:[%s12538_s1 + $0x2e8] sm:$0xff]  ;;  %v2620_v28 = vpop.permute.xlu1 %2619  ;;  %v9746_v37 = vld [vmem:[%s12538_s1 + $0x2e0] sm:$0xff]  ;;  %v9762_v16 = vld [vmem:[%s12538_s1 + $0x38] sm:$0xff]  ;;  %2735 = vrot.lane.b32.xlu1 %v14796_v0, %s5585_s19 }
 0x2f7   :  { %14795 = vst [vmem:[#allocation145_spill] sm:$0xff] %v9717_v12  ;;  %v4551_v31 = vmul.f32 %v14800_v29, %v9714_v35  ;;  %v4549_v10 = vmul.f32 %v14801_v9, %v9717_v12  ;;  %14802 = vst [vmem:[#allocation459_spill] sm:$0xff] %v9740_v32  ;;  %v2618_v29 = vpop.permute.xlu0 %2617  ;;  %v2947_v5 = vsel %vm2913_vm2, %v14804_v33, %v2620_v28  ;;  %v14805_v9 = vld [vmem:[#allocation173_spill] sm:$0xff]  ;;  %v14806_v35 = vld [vmem:[#allocation182_spill] sm:$0xff]  ;;  %v14820_v0 = vunpack.c.h.bf16 %v9746_v37 }
 0x2f8   :  { %14797 = vst [vmem:[#allocation141_spill] sm:$0xff] %v9724_v20  ;;  %14803 = vst [vmem:[#allocation69_spill] sm:$0xff] %v9746_v37  ;;  %v2946_v59 = vsel %vm2913_vm2, %v14805_v9, %v2618_v29  ;;  %v9754_v12 = vadd.f32 %v4720_v61, %v14806_v35  ;;  %v14808_v40 = vld [vmem:[#allocation480_spill] sm:$0xff]  ;;  %v9768_v33 = vld [vmem:[%s12538_s1 + $0x30] sm:$0xff] }
 0x2f9   :  { %v9757_v46 = vadd.f32 %v4724_v38, %v14808_v40  ;;  %14810 = vst [vmem:[#allocation40_spill] sm:$0xff] %v9768_v33  ;;  %v14811_v29 = vld [vmem:[#allocation62_spill] sm:$0xff]  ;;  %v14813_v35 = vld [vmem:[#allocation59_spill] sm:$0xff]  ;;  %v14815_v38 = vunpack.c.l.bf16 %v7657_v8  ;;  %v14817_v60 = vld [vmem:[#allocation296_spill] sm:$0xff] }
 0x2fa   :  { %14807 = vst [vmem:[#allocation280_spill] sm:$0xff] %v9754_v12  ;;  %v9772_v61 = vmax.f32 %v14811_v29, %v2947_v5  ;;  %v9775_v40 = vmax.f32 %v14813_v35, %v2946_v59  ;;  %v4728_v5 = vsel %vm3574_vm3, %v4549_v10, 0.0  ;;  %v4732_v29 = vsel %vm3574_vm3, %v4551_v31, 0.0  ;;  %v9800_v8 = vld [vmem:[%s12538_s1 + $0x2f8] sm:$0xff]  ;;  %v9806_v31 = vld [vmem:[%s12538_s1 + $0x2f0] sm:$0xff]  ;;  %2737 = vrot.lane.b32.xlu0 %v14817_v60, %s5585_s19  ;;  %v14918_v42 = vld [vmem:[#allocation328_spill] sm:$0xff] }
 0x2fb   :  { %14809 = vst [vmem:[#allocation42_spill] sm:$0xff] %v9757_v46  ;;  %v9784_v9 = vmul.f32 %v14815_v38, %v9724_v20  ;;  %v9787_v46 = vmax.f32 %v14817_v60, %v2285_v53  ;;  %v14819_v59 = vunpack.c.h.bf16 %v9740_v32  ;;  %14821 = vst [vmem:[#allocation162_spill] sm:$0xff] %v9800_v8  ;;  %v2624_v38 = vpop.permute.xlu1 %2623  ;;  %v14823_v28 = vld [vmem:[#allocation185_spill] sm:$0xff]  ;;  %v9817_v53 = vadd.f32 %v4732_v29, %v8327_v27  ;;  %v14831_v29 = vld [vmem:[#allocation300_spill] sm:$0xff] }
 0x2fc   :  { %14812 = vst [vmem:[#allocation284_spill] sm:$0xff] %v9772_v61  ;;  %14814 = vst [vmem:[#allocation153_spill] sm:$0xff] %v9775_v40  ;;  %v4553_v58 = vmul.f32 %v14820_v0, %v9775_v40  ;;  %v2949_v12 = vsel %vm2913_vm2, %v14823_v28, %v2624_v38  ;;  %v14824_v0 = vld [vmem:[#allocation181_spill] sm:$0xff]  ;;  %v9828_v28 = vld [vmem:[%s12538_s1 + $0x40] sm:$0xff]  ;;  %2739 = vrot.lane.b32.xlu1 %v14831_v29, %s5585_s19  ;;  %v14838_v60 = vunpack.c.h.bf16 %v9806_v31 }
 0x2fd   :  { %14816 = vst [vmem:[#allocation149_spill] sm:$0xff] %v9784_v9  ;;  %14818 = vst [vmem:[#allocation158_spill] sm:$0xff] %v9787_v46  ;;  %v4555_v35 = vmul.f32 %v14819_v59, %v9772_v61  ;;  %v2622_v59 = vpop.permute.xlu0 %2621  ;;  %v9814_v61 = vadd.f32 %v4728_v5, %v8315_v2  ;;  %v9822_v40 = vld [vmem:[%s12538_s1 + $0x48] sm:$0xff] }
 0x2fe   :  { %14822 = vst [vmem:[#allocation46_spill] sm:$0xff] %v9806_v31  ;;  %v2948_v20 = vsel %vm2913_vm2, %v14824_v0, %v2622_v59  ;;  %14826 = vst [vmem:[#allocation406_spill] sm:$0xff] %v9817_v53  ;;  %v14827_v59 = vld [vmem:[#allocation68_spill] sm:$0xff]  ;;  %v14829_v5 = vld [vmem:[#allocation65_spill] sm:$0xff] }
 0x2ff   :  { %14825 = vst [vmem:[#allocation44_spill] sm:$0xff] %v9814_v61  ;;  %v9832_v2 = vmax.f32 %v14827_v59, %v2949_v12  ;;  %v9835_v27 = vmax.f32 %v14829_v5, %v2948_v20  ;;  %v14832_v0 = vld [vmem:[#allocation487_spill] sm:$0xff]  ;;  %v14836_v9 = vld [vmem:[#allocation412_spill] sm:$0xff]  ;;  %v4736_v12 = vsel %vm3574_vm3, %v4553_v58, 0.0  ;;  %v4740_v20 = vsel %vm3574_vm3, %v4555_v35, 0.0  ;;  %v14864_v30 = vld [vmem:[#allocation489_spill] sm:$0xff] }
 0x300   :  { %v14833_v10 = vunpack.c.l.bf16 %v14832_v0  ;;  %v14835_v61 = vld [vmem:[#allocation411_spill] sm:$0xff]  ;;  %v14837_v59 = vunpack.c.h.bf16 %v9800_v8  ;;  %v9877_v0 = vadd.f32 %v4740_v20, %v8372_v19  ;;  %v14852_v19 = vld [vmem:[#allocation304_spill] sm:$0xff]  ;;  %v9904_v20 = vld [vmem:[%s12538_s1 + $0x50] sm:$0xff]  ;;  %v14865_v47 = vunpack.c.l.bf16 %v14864_v30 }
 0x301   :  { %14828 = vst [vmem:[#allocation161_spill] sm:$0xff] %v9832_v2  ;;  %14830 = vst [vmem:[#allocation157_spill] sm:$0xff] %v9835_v27  ;;  %v2286_v38 = vsel %vm2192_vm1, %v14836_v9, %v14835_v61  ;;  %v4557_v37 = vmul.f32 %v14838_v60, %v9835_v27  ;;  %v2628_v9 = vpop.permute.xlu1 %2627  ;;  %v9866_v35 = vld [vmem:[%s12538_s1 + $0x300] sm:$0xff]  ;;  %v14842_v60 = vld [vmem:[#allocation189_spill] sm:$0xff]  ;;  %2741 = vrot.lane.b32.xlu0 %v14852_v19, %s5585_s19 }
 0x302   :  { %v9844_v53 = vmul.f32 %v14833_v10, %v9787_v46  ;;  %v4559_v5 = vmul.f32 %v14837_v59, %v9832_v2  ;;  %v9860_v10 = vld [vmem:[%s12538_s1 + $0x308] sm:$0xff]  ;;  %14840 = vst [vmem:[#allocation288_spill] sm:$0xff] %v9866_v35  ;;  %v2626_v59 = vpop.permute.xlu0 %2625  ;;  %14845 = vst [vmem:[#allocation48_spill] sm:$0xff] %v9877_v0  ;;  %v9880_v8 = vmax.f32 %v14831_v29, %v2286_v38  ;;  %v9885_v58 = vld [vmem:[%s12538_s1 + $0x58] sm:$0xff]  ;;  %v14856_v0 = vunpack.c.h.bf16 %v9866_v35 }
 0x303   :  { %14839 = vst [vmem:[#allocation76_spill] sm:$0xff] %v9860_v10  ;;  %v14841_v46 = vld [vmem:[#allocation193_spill] sm:$0xff]  ;;  %v2950_v27 = vsel %vm2913_vm2, %v14842_v60, %v2626_v59  ;;  %v14849_v59 = vld [vmem:[#allocation71_spill] sm:$0xff]  ;;  %v14854_v29 = vld [vmem:[#allocation414_spill] sm:$0xff] }
 0x304   :  { %14834 = vst [vmem:[#allocation464_spill] sm:$0xff] %v9844_v53  ;;  %v2951_v2 = vsel %vm2913_vm2, %v14841_v46, %v2628_v9  ;;  %v14843_v53 = vld [vmem:[#allocation198_spill] sm:$0xff]  ;;  %14846 = vst [vmem:[#allocation408_spill] sm:$0xff] %v9880_v8  ;;  %v14847_v46 = vld [vmem:[#allocation75_spill] sm:$0xff]  ;;  %v9892_v60 = vmax.f32 %v14849_v59, %v2950_v27  ;;  %v4744_v27 = vsel %vm3574_vm3, %v4557_v37, 0.0  ;;  %v14855_v59 = vunpack.c.h.bf16 %v9860_v10 }
 0x305   :  { %v9874_v31 = vadd.f32 %v4736_v12, %v14843_v53  ;;  %v9889_v9 = vmax.f32 %v14847_v46, %v2951_v2  ;;  %v14851_v53 = vld [vmem:[#allocation308_spill] sm:$0xff]  ;;  %v14853_v38 = vld [vmem:[#allocation413_spill] sm:$0xff]  ;;  %v4748_v46 = vsel %vm3574_vm3, %v4559_v5, 0.0  ;;  %v2632_v2 = vpop.permute.xlu1 %2631  ;;  %v9932_v10 = vadd.f32 %v4744_v27, %v8384_v15  ;;  %v14862_v61 = vld [vmem:[#allocation218_spill] sm:$0xff] }
 0x306   :  { %14850 = vst [vmem:[#allocation165_spill] sm:$0xff] %v9892_v60  ;;  %2743 = vrot.lane.b32.xlu1 %v14851_v53, %s5585_s19  ;;  %v2287_v12 = vsel %vm2192_vm1, %v14854_v29, %v14853_v38  ;;  %v9918_v29 = vld [vmem:[%s12538_s1 + $0x318] sm:$0xff]  ;;  %v9924_v37 = vld [vmem:[%s12538_s1 + $0x310] sm:$0xff]  ;;  %v9935_v38 = vadd.f32 %v4748_v46, %v14862_v61  ;;  %v9940_v1 = vmul.f32 %v14865_v47, %v9880_v8  ;;  %v9945_v5 = vld [vmem:[%s12538_s1 + $0x68] sm:$0xff] }
 0x307   :  { %14844 = vst [vmem:[#allocation50_spill] sm:$0xff] %v9874_v31  ;;  %14848 = vst [vmem:[#allocation169_spill] sm:$0xff] %v9889_v9  ;;  %v4563_v32 = vmul.f32 %v14855_v59, %v9889_v9  ;;  %v4561_v31 = vmul.f32 %v14856_v0, %v9892_v60  ;;  %v2630_v59 = vpop.permute.xlu0 %2629  ;;  %v14859_v9 = vld [vmem:[#allocation201_spill] sm:$0xff]  ;;  %v14870_v15 = vld [vmem:[#allocation79_spill] sm:$0xff]  ;;  %v9959_v47 = vmax.f32 %v14852_v19, %v2287_v12 }
 0x308   :  { %14857 = vst [vmem:[#allocation56_spill] sm:$0xff] %v9918_v29  ;;  %14858 = vst [vmem:[#allocation52_spill] sm:$0xff] %v9924_v37  ;;  %v2953_v35 = vsel %vm2913_vm2, %v14859_v9, %v2632_v2  ;;  %v14860_v0 = vld [vmem:[#allocation197_spill] sm:$0xff]  ;;  %v14868_v2 = vld [vmem:[#allocation83_spill] sm:$0xff] }
 0x309   :  { %v2952_v60 = vsel %vm2913_vm2, %v14860_v0, %v2630_v59  ;;  %14861 = vst [vmem:[#allocation292_spill] sm:$0xff] %v9932_v10  ;;  %14863 = vst [vmem:[#allocation410_spill] sm:$0xff] %v9935_v38  ;;  %v9949_v59 = vmax.f32 %v14868_v2, %v2953_v35  ;;  %v14872_v61 = vld [vmem:[#allocation316_spill] sm:$0xff]  ;;  %v14875_v46 = vld [vmem:[#allocation415_spill] sm:$0xff]  ;;  %v4752_v9 = vsel %vm3574_vm3, %v4561_v31, 0.0  ;;  %v4756_v35 = vsel %vm3574_vm3, %v4563_v32, 0.0 }
 0x30a   :  { %14866 = vst [vmem:[#allocation177_spill] sm:$0xff] %v9940_v1  ;;  %14867 = vst [vmem:[#allocation173_spill] sm:$0xff] %v9945_v5  ;;  %v9952_v27 = vmax.f32 %v14870_v15, %v2952_v60  ;;  %2747 = vrot.lane.b32.xlu1 %v14872_v61, %s5585_s19  ;;  %v14873_v30 = vld [vmem:[#allocation312_spill] sm:$0xff]  ;;  %v14877_v60 = vunpack.c.h.bf16 %v9918_v29  ;;  %v14878_v15 = vunpack.c.h.bf16 %v9924_v37  ;;  %v14881_v8 = vld [vmem:[#allocation209_spill] sm:$0xff] }
 0x30b   :  { %14869 = vst [vmem:[#allocation182_spill] sm:$0xff] %v9949_v59  ;;  %2745 = vrot.lane.b32.xlu0 %v14873_v30, %s5585_s19  ;;  %14874 = vst [vmem:[#allocation62_spill] sm:$0xff] %v9959_v47  ;;  %v14876_v0 = vld [vmem:[#allocation416_spill] sm:$0xff]  ;;  %v14883_v37 = vld [vmem:[#allocation539_spill] sm:$0xff] }
 0x30c   :  { %14871 = vst [vmem:[#allocation480_spill] sm:$0xff] %v9952_v27  ;;  %v2288_v38 = vsel %vm2192_vm1, %v14876_v0, %v14875_v46  ;;  %v4567_v2 = vmul.f32 %v14877_v60, %v9949_v59  ;;  %v4565_v10 = vmul.f32 %v14878_v15, %v9952_v27  ;;  %v9975_v19 = vld [vmem:[%s12538_s1 + $0x328] sm:$0xff]  ;;  %v2636_v0 = vpop.permute.xlu1 %2635  ;;  %v9981_v32 = vld [vmem:[%s12538_s1 + $0x320] sm:$0xff]  ;;  %v2634_v60 = vpop.permute.xlu0 %2633  ;;  %v9989_v29 = vadd.f32 %v4752_v9, %v14883_v37  ;;  %v14999_v5 = vld [vmem:[#allocation82_spill] sm:$0xff] }
 0x30d   :  { %14879 = vst [vmem:[#allocation59_spill] sm:$0xff] %v9975_v19  ;;  %14880 = vst [vmem:[#allocation296_spill] sm:$0xff] %v9981_v32  ;;  %v2955_v59 = vsel %vm2913_vm2, %v14881_v8, %v2636_v0  ;;  %v14882_v15 = vld [vmem:[#allocation205_spill] sm:$0xff]  ;;  %v14885_v1 = vld [vmem:[#allocation544_spill] sm:$0xff]  ;;  %v9995_v46 = vmax.f32 %v14851_v53, %v2288_v38  ;;  %v15000_v50 = vunpack.c.l.bf16 %v14999_v5 }
 0x30e   :  { %v2954_v27 = vsel %vm2913_vm2, %v14882_v15, %v2634_v60  ;;  %14884 = vst [vmem:[#allocation185_spill] sm:$0xff] %v9989_v29  ;;  %v9992_v12 = vadd.f32 %v4756_v35, %v14885_v1  ;;  %v10000_v31 = vld [vmem:[%s12538_s1 + $0x60] sm:$0xff]  ;;  %v14895_v53 = vld [vmem:[#allocation493_spill] sm:$0xff]  ;;  %v10021_v35 = vld [vmem:[%s12538_s1 + $0x78] sm:$0xff] }
 0x30f   :  { %14887 = vst [vmem:[#allocation68_spill] sm:$0xff] %v9995_v46  ;;  %14888 = vst [vmem:[#allocation65_spill] sm:$0xff] %v10000_v31  ;;  %v14889_v8 = vld [vmem:[#allocation91_spill] sm:$0xff]  ;;  %v14893_v37 = vld [vmem:[#allocation324_spill] sm:$0xff]  ;;  %v14896_v38 = vunpack.c.l.bf16 %v14895_v53  ;;  %v14900_v53 = vunpack.c.h.bf16 %v9981_v32  ;;  %v10057_v11 = vmul.f32 %v14910_v36, %v9995_v46 }
 0x310   :  { %14886 = vst [vmem:[#allocation181_spill] sm:$0xff] %v9992_v12  ;;  %v10004_v0 = vmax.f32 %v14889_v8, %v2955_v59  ;;  %v14891_v60 = vld [vmem:[#allocation87_spill] sm:$0xff]  ;;  %2751 = vrot.lane.b32.xlu1 %v14893_v37, %s5585_s19  ;;  %v14894_v1 = vld [vmem:[#allocation320_spill] sm:$0xff]  ;;  %14898 = vst [vmem:[#allocation193_spill] sm:$0xff] %v10021_v35  ;;  %v4764_v8 = vsel %vm3574_vm3, %v4567_v2, 0.0  ;;  %v2640_v59 = vpop.permute.xlu1 %2639 }
 0x311   :  { %v10007_v15 = vmax.f32 %v14891_v60, %v2954_v27  ;;  %2749 = vrot.lane.b32.xlu0 %v14894_v1, %s5585_s19  ;;  %v10016_v9 = vmul.f32 %v14896_v38, %v9959_v47  ;;  %v4760_v27 = vsel %vm3574_vm3, %v4565_v10, 0.0  ;;  %v14899_v60 = vunpack.c.h.bf16 %v9975_v19  ;;  %v10035_v12 = vld [vmem:[%s12538_s1 + $0x338] sm:$0xff]  ;;  %v10041_v10 = vld [vmem:[%s12538_s1 + $0x330] sm:$0xff]  ;;  %14911 = vst [vmem:[#allocation308_spill] sm:$0xff] %v10057_v11  ;;  %v14931_v35 = vld [vmem:[#allocation108_spill] sm:$0xff] }
 0x312   :  { %14890 = vst [vmem:[#allocation300_spill] sm:$0xff] %v10004_v0  ;;  %14901 = vst [vmem:[#allocation189_spill] sm:$0xff] %v10035_v12  ;;  %v14903_v47 = vld [vmem:[#allocation217_spill] sm:$0xff]  ;;  %v14905_v32 = vld [vmem:[#allocation546_spill] sm:$0xff]  ;;  %v14924_v46 = vunpack.c.h.bf16 %v10041_v10 }
 0x313   :  { %14892 = vst [vmem:[#allocation487_spill] sm:$0xff] %v10007_v15  ;;  %14897 = vst [vmem:[#allocation412_spill] sm:$0xff] %v10016_v9  ;;  %v4571_v45 = vmul.f32 %v14899_v60, %v10004_v0  ;;  %v4569_v38 = vmul.f32 %v14900_v53, %v10007_v15  ;;  %v2638_v60 = vpop.permute.xlu0 %2637  ;;  %v2957_v0 = vsel %vm2913_vm2, %v14903_v47, %v2640_v59  ;;  %v14904_v53 = vld [vmem:[#allocation213_spill] sm:$0xff]  ;;  %v14907_v9 = vld [vmem:[#allocation226_spill] sm:$0xff] }
 0x314   :  { %14902 = vst [vmem:[#allocation198_spill] sm:$0xff] %v10041_v10  ;;  %v2956_v15 = vsel %vm2913_vm2, %v14904_v53, %v2638_v60  ;;  %v10049_v19 = vadd.f32 %v4760_v27, %v14905_v32  ;;  %v10052_v29 = vadd.f32 %v4764_v8, %v14907_v9  ;;  %v10062_v2 = vld [vmem:[%s12538_s1 + $0x70] sm:$0xff]  ;;  %v14913_v59 = vld [vmem:[#allocation99_spill] sm:$0xff]  ;;  %v14917_v9 = vld [vmem:[#allocation332_spill] sm:$0xff] }
 0x315   :  { %14912 = vst [vmem:[#allocation304_spill] sm:$0xff] %v10062_v2  ;;  %v10066_v60 = vmax.f32 %v14913_v59, %v2957_v0  ;;  %v14915_v32 = vld [vmem:[#allocation95_spill] sm:$0xff]  ;;  %2755 = vrot.lane.b32.xlu1 %v14917_v9, %s5585_s19  ;;  %2753 = vrot.lane.b32.xlu0 %v14918_v42, %s5585_s19  ;;  %v14920_v8 = vld [vmem:[#allocation424_spill] sm:$0xff]  ;;  %v4768_v0 = vsel %vm3574_vm3, %v4569_v38, 0.0  ;;  %v4772_v59 = vsel %vm3574_vm3, %v4571_v45, 0.0 }
 0x316   :  { %14906 = vst [vmem:[#allocation75_spill] sm:$0xff] %v10049_v19  ;;  %14908 = vst [vmem:[#allocation71_spill] sm:$0xff] %v10052_v29  ;;  %v10069_v27 = vmax.f32 %v14915_v32, %v2956_v15  ;;  %v14919_v36 = vld [vmem:[#allocation423_spill] sm:$0xff]  ;;  %v14921_v29 = vld [vmem:[#allocation441_spill] sm:$0xff]  ;;  %v14923_v15 = vunpack.c.h.bf16 %v10035_v12 }
 0x317   :  { %14914 = vst [vmem:[#allocation414_spill] sm:$0xff] %v10066_v60  ;;  %v2289_v53 = vsel %vm2192_vm1, %v14920_v8, %v14919_v36  ;;  %v14922_v19 = vld [vmem:[#allocation442_spill] sm:$0xff]  ;;  %v10092_v8 = vld [vmem:[%s12538_s1 + $0x348] sm:$0xff]  ;;  %v10098_v45 = vld [vmem:[%s12538_s1 + $0x340] sm:$0xff]  ;;  %v10109_v36 = vadd.f32 %v4772_v59, %v14931_v35 }
 0x318   :  { %14916 = vst [vmem:[#allocation201_spill] sm:$0xff] %v10069_v27  ;;  %v2290_v47 = vsel %vm2192_vm1, %v14922_v19, %v14921_v29  ;;  %v4575_v32 = vmul.f32 %v14923_v15, %v10066_v60  ;;  %v4573_v11 = vmul.f32 %v14924_v46, %v10069_v27  ;;  %14925 = vst [vmem:[#allocation197_spill] sm:$0xff] %v10092_v8  ;;  %v2644_v19 = vpop.permute.xlu1 %2643  ;;  %v2642_v15 = vpop.permute.xlu0 %2641  ;;  %v14927_v60 = vld [vmem:[#allocation225_spill] sm:$0xff]  ;;  %v14929_v12 = vld [vmem:[#allocation230_spill] sm:$0xff]  ;;  %v14943_v59 = vunpack.c.h.bf16 %v10092_v8 }
 0x319   :  { %14926 = vst [vmem:[#allocation218_spill] sm:$0xff] %v10098_v45  ;;  %v2959_v10 = vsel %vm2913_vm2, %v14927_v60, %v2644_v19  ;;  %v14928_v46 = vld [vmem:[#allocation221_spill] sm:$0xff]  ;;  %v10106_v29 = vadd.f32 %v4768_v0, %v14929_v12  ;;  %14932 = vst [vmem:[#allocation83_spill] sm:$0xff] %v10109_v36  ;;  %v10112_v51 = vmax.f32 %v14873_v30, %v2289_v53  ;;  %v14935_v60 = vld [vmem:[#allocation107_spill] sm:$0xff] }
 0x31a   :  { %v2958_v27 = vsel %vm2913_vm2, %v14928_v46, %v2642_v15  ;;  %v10117_v38 = vld [vmem:[%s12538_s1 + $0x88] sm:$0xff]  ;;  %v10121_v19 = vmax.f32 %v14935_v60, %v2959_v10  ;;  %v14937_v15 = vld [vmem:[#allocation103_spill] sm:$0xff]  ;;  %v10131_v30 = vmax.f32 %v14872_v61, %v2290_v47  ;;  %v4776_v0 = vsel %vm3574_vm3, %v4573_v11, 0.0  ;;  %v10156_v11 = vld [vmem:[%s12538_s1 + $0x350] sm:$0xff] }
 0x31b   :  { %14930 = vst [vmem:[#allocation489_spill] sm:$0xff] %v10106_v29  ;;  %14933 = vst [vmem:[#allocation79_spill] sm:$0xff] %v10112_v51  ;;  %v10124_v46 = vmax.f32 %v14937_v15, %v2958_v27  ;;  %v14939_v12 = vld [vmem:[#allocation340_spill] sm:$0xff]  ;;  %v4780_v27 = vsel %vm3574_vm3, %v4575_v32, 0.0  ;;  %v14944_v15 = vunpack.c.h.bf16 %v10098_v45  ;;  %v10150_v47 = vld [vmem:[%s12538_s1 + $0x358] sm:$0xff] }
 0x31c   :  { %14934 = vst [vmem:[#allocation316_spill] sm:$0xff] %v10117_v38  ;;  %14936 = vst [vmem:[#allocation312_spill] sm:$0xff] %v10121_v19  ;;  %2759 = vrot.lane.b32.xlu1 %v14939_v12, %s5585_s19  ;;  %v14940_v35 = vld [vmem:[#allocation336_spill] sm:$0xff]  ;;  %v4579_v60 = vmul.f32 %v14943_v59, %v10121_v19  ;;  %v2648_v10 = vpop.permute.xlu1 %2647  ;;  %v2646_v59 = vpop.permute.xlu0 %2645  ;;  %v14947_v36 = vld [vmem:[#allocation233_spill] sm:$0xff] }
 0x31d   :  { %14938 = vst [vmem:[#allocation416_spill] sm:$0xff] %v10124_v46  ;;  %2757 = vrot.lane.b32.xlu0 %v14940_v35, %s5585_s19  ;;  %14941 = vst [vmem:[#allocation209_spill] sm:$0xff] %v10131_v30  ;;  %v10136_v53 = vld [vmem:[%s12538_s1 + $0x80] sm:$0xff]  ;;  %v4577_v61 = vmul.f32 %v14944_v15, %v10124_v46  ;;  %v2961_v29 = vsel %vm2913_vm2, %v14947_v36, %v2648_v10  ;;  %v14948_v15 = vld [vmem:[#allocation229_spill] sm:$0xff] }
 0x31e   :  { %14942 = vst [vmem:[#allocation205_spill] sm:$0xff] %v10136_v53  ;;  %14945 = vst [vmem:[#allocation539_spill] sm:$0xff] %v10150_v47  ;;  %v2960_v19 = vsel %vm2913_vm2, %v14948_v15, %v2646_v59  ;;  %v14949_v46 = vld [vmem:[#allocation548_spill] sm:$0xff]  ;;  %v14951_v8 = vld [vmem:[#allocation242_spill] sm:$0xff] }
 0x31f   :  { %14946 = vst [vmem:[#allocation544_spill] sm:$0xff] %v10156_v11  ;;  %v10164_v45 = vadd.f32 %v4776_v0, %v14949_v46  ;;  %v10167_v6 = vadd.f32 %v4780_v27, %v14951_v8  ;;  %v14953_v38 = vld [vmem:[#allocation503_spill] sm:$0xff]  ;;  %v14961_v8 = vld [vmem:[#allocation348_spill] sm:$0xff] }
 0x320   :  { %v14954_v53 = vunpack.c.l.bf16 %v14953_v38  ;;  %v10177_v32 = vld [vmem:[%s12538_s1 + $0x98] sm:$0xff]  ;;  %2763 = vrot.lane.b32.xlu1 %v14961_v8, %s5585_s19  ;;  %v14962_v38 = vld [vmem:[#allocation344_spill] sm:$0xff] }
 0x321   :  { %14950 = vst [vmem:[#allocation91_spill] sm:$0xff] %v10164_v45  ;;  %14952 = vst [vmem:[#allocation87_spill] sm:$0xff] %v10167_v6  ;;  %v14957_v10 = vld [vmem:[#allocation115_spill] sm:$0xff]  ;;  %2761 = vrot.lane.b32.xlu0 %v14962_v38, %s5585_s19  ;;  %v14966_v6 = vld [vmem:[#allocation456_spill] sm:$0xff] }
 0x322   :  { %v10172_v2 = vmul.f32 %v14954_v53, %v10112_v51  ;;  %14956 = vst [vmem:[#allocation320_spill] sm:$0xff] %v10177_v32  ;;  %v10181_v59 = vmax.f32 %v14957_v10, %v2961_v29  ;;  %v14959_v46 = vld [vmem:[#allocation111_spill] sm:$0xff]  ;;  %v14963_v53 = vld [vmem:[#allocation506_spill] sm:$0xff]  ;;  %v14967_v45 = vld [vmem:[#allocation457_spill] sm:$0xff]  ;;  %v4784_v29 = vsel %vm3574_vm3, %v4577_v61, 0.0  ;;  %v14968_v10 = vunpack.c.h.bf16 %v10150_v47 }
 0x323   :  { %v10184_v0 = vmax.f32 %v14959_v46, %v2960_v19  ;;  %v14964_v27 = vunpack.c.l.bf16 %v14963_v53  ;;  %v2291_v36 = vsel %vm2192_vm1, %v14967_v45, %v14966_v6  ;;  %v4788_v19 = vsel %vm3574_vm3, %v4579_v60, 0.0  ;;  %v10209_v53 = vld [vmem:[%s12538_s1 + $0x368] sm:$0xff]  ;;  %v2652_v45 = vpop.permute.xlu1 %2651  ;;  %v10215_v60 = vld [vmem:[%s12538_s1 + $0x360] sm:$0xff]  ;;  %v10234_v61 = vld [vmem:[%s12538_s1 + $0x90] sm:$0xff] }
 0x324   :  { %14955 = vst [vmem:[#allocation324_spill] sm:$0xff] %v10172_v2  ;;  %14958 = vst [vmem:[#allocation493_spill] sm:$0xff] %v10181_v59  ;;  %v4583_v46 = vmul.f32 %v14968_v10, %v10181_v59  ;;  %v14969_v51 = vunpack.c.h.bf16 %v10156_v11  ;;  %v2650_v10 = vpop.permute.xlu0 %2649  ;;  %v14974_v11 = vld [vmem:[#allocation270_spill] sm:$0xff]  ;;  %v10229_v6 = vmax.f32 %v14894_v1, %v2291_v36  ;;  %v14986_v1 = vld [vmem:[#allocation469_spill] sm:$0xff] }
 0x325   :  { %14960 = vst [vmem:[#allocation217_spill] sm:$0xff] %v10184_v0  ;;  %v10193_v15 = vmul.f32 %v14964_v27, %v10131_v30  ;;  %14970 = vst [vmem:[#allocation546_spill] sm:$0xff] %v10209_v53  ;;  %v14972_v30 = vld [vmem:[#allocation241_spill] sm:$0xff]  ;;  %v10223_v47 = vadd.f32 %v4784_v29, %v14974_v11  ;;  %v14984_v11 = vld [vmem:[#allocation356_spill] sm:$0xff] }
 0x326   :  { %v4581_v2 = vmul.f32 %v14969_v51, %v10184_v0  ;;  %14971 = vst [vmem:[#allocation226_spill] sm:$0xff] %v10215_v60  ;;  %v2963_v59 = vsel %vm2913_vm2, %v14972_v30, %v2652_v45  ;;  %v14973_v51 = vld [vmem:[#allocation237_spill] sm:$0xff]  ;;  %14978 = vst [vmem:[#allocation95_spill] sm:$0xff] %v10229_v6  ;;  %v14980_v30 = vld [vmem:[#allocation123_spill] sm:$0xff]  ;;  %2767 = vrot.lane.b32.xlu1 %v14984_v11, %s5585_s19  ;;  %v10289_v63 = vmul.f32 %v15000_v50, %v10229_v6 }
 0x327   :  { %14965 = vst [vmem:[#allocation213_spill] sm:$0xff] %v10193_v15  ;;  %v2962_v0 = vsel %vm2913_vm2, %v14973_v51, %v2650_v10  ;;  %14975 = vst [vmem:[#allocation495_spill] sm:$0xff] %v10223_v47  ;;  %v14976_v15 = vld [vmem:[#allocation274_spill] sm:$0xff]  ;;  %v10238_v45 = vmax.f32 %v14980_v30, %v2963_v59  ;;  %v14982_v10 = vld [vmem:[#allocation119_spill] sm:$0xff]  ;;  %v4796_v30 = vsel %vm3574_vm3, %v4583_v46, 0.0  ;;  %v2656_v59 = vpop.permute.xlu1 %2655 }
 0x328   :  { %v10226_v27 = vadd.f32 %v4788_v19, %v14976_v15  ;;  %14979 = vst [vmem:[#allocation332_spill] sm:$0xff] %v10234_v61  ;;  %v10241_v51 = vmax.f32 %v14982_v10, %v2962_v0  ;;  %v14985_v15 = vld [vmem:[#allocation352_spill] sm:$0xff]  ;;  %v14987_v36 = vld [vmem:[#allocation470_spill] sm:$0xff]  ;;  %v4792_v0 = vsel %vm3574_vm3, %v4581_v2, 0.0  ;;  %v14989_v10 = vunpack.c.h.bf16 %v10209_v53  ;;  %15001 = vst [vmem:[#allocation107_spill] sm:$0xff] %v10289_v63 }
 0x329   :  { %14981 = vst [vmem:[#allocation328_spill] sm:$0xff] %v10238_v45  ;;  %2765 = vrot.lane.b32.xlu0 %v14985_v15, %s5585_s19  ;;  %v2292_v29 = vsel %vm2192_vm1, %v14987_v36, %v14986_v1  ;;  %v10253_v19 = vld [vmem:[%s12538_s1 + $0xa8] sm:$0xff]  ;;  %v10267_v36 = vld [vmem:[%s12538_s1 + $0x378] sm:$0xff]  ;;  %v10273_v2 = vld [vmem:[%s12538_s1 + $0x370] sm:$0xff] }
 0x32a   :  { %14977 = vst [vmem:[#allocation99_spill] sm:$0xff] %v10226_v27  ;;  %14983 = vst [vmem:[#allocation424_spill] sm:$0xff] %v10241_v51  ;;  %v4587_v32 = vmul.f32 %v14989_v10, %v10238_v45  ;;  %v14990_v27 = vunpack.c.h.bf16 %v10215_v60  ;;  %v2654_v10 = vpop.permute.xlu0 %2653  ;;  %v14993_v45 = vld [vmem:[#allocation249_spill] sm:$0xff]  ;;  %v14995_v53 = vld [vmem:[#allocation144_spill] sm:$0xff]  ;;  %v10308_v50 = vmax.f32 %v14893_v37, %v2292_v29 }
 0x32b   :  { %14988 = vst [vmem:[#allocation442_spill] sm:$0xff] %v10253_v19  ;;  %14991 = vst [vmem:[#allocation225_spill] sm:$0xff] %v10267_v36  ;;  %v2965_v60 = vsel %vm2913_vm2, %v14993_v45, %v2656_v59  ;;  %v10281_v19 = vadd.f32 %v4792_v0, %v14995_v53  ;;  %v14997_v61 = vld [vmem:[#allocation148_spill] sm:$0xff]  ;;  %v15003_v59 = vld [vmem:[#allocation131_spill] sm:$0xff] }
 0x32c   :  { %v4585_v47 = vmul.f32 %v14990_v27, %v10241_v51  ;;  %14992 = vst [vmem:[#allocation221_spill] sm:$0xff] %v10273_v2  ;;  %v14994_v27 = vld [vmem:[#allocation245_spill] sm:$0xff]  ;;  %v10284_v1 = vadd.f32 %v4796_v30, %v14997_v61  ;;  %v10294_v46 = vld [vmem:[%s12538_s1 + $0xa0] sm:$0xff]  ;;  %15009 = vst [vmem:[#allocation233_spill] sm:$0xff] %v10308_v50 }
 0x32d   :  { %v2964_v51 = vsel %vm2913_vm2, %v14994_v27, %v2654_v10  ;;  %14996 = vst [vmem:[#allocation230_spill] sm:$0xff] %v10281_v19  ;;  %15002 = vst [vmem:[#allocation103_spill] sm:$0xff] %v10294_v46  ;;  %v10298_v10 = vmax.f32 %v15003_v59, %v2965_v60  ;;  %v15005_v53 = vld [vmem:[#allocation127_spill] sm:$0xff]  ;;  %v15007_v61 = vld [vmem:[#allocation364_spill] sm:$0xff]  ;;  %v4804_v60 = vsel %vm3574_vm3, %v4587_v32, 0.0 }
 0x32e   :  { %14998 = vst [vmem:[#allocation108_spill] sm:$0xff] %v10284_v1  ;;  %v10301_v0 = vmax.f32 %v15005_v53, %v2964_v51  ;;  %2771 = vrot.lane.b32.xlu1 %v15007_v61, %s5585_s19  ;;  %v15008_v5 = vld [vmem:[#allocation360_spill] sm:$0xff]  ;;  %v15010_v30 = vld [vmem:[#allocation482_spill] sm:$0xff]  ;;  %v15011_v27 = vld [vmem:[#allocation483_spill] sm:$0xff]  ;;  %v4800_v45 = vsel %vm3574_vm3, %v4585_v47, 0.0  ;;  %v15012_v51 = vunpack.c.h.bf16 %v10267_v36  ;;  %v15013_v53 = vunpack.c.h.bf16 %v10273_v2 }
 0x32f   :  { %15004 = vst [vmem:[#allocation340_spill] sm:$0xff] %v10298_v10  ;;  %2769 = vrot.lane.b32.xlu0 %v15008_v5, %s5585_s19  ;;  %v2293_v1 = vsel %vm2192_vm1, %v15011_v27, %v15010_v30  ;;  %v10324_v37 = vld [vmem:[%s12538_s1 + $0x388] sm:$0xff]  ;;  %v2660_v27 = vpop.permute.xlu1 %2659  ;;  %v10330_v47 = vld [vmem:[%s12538_s1 + $0x380] sm:$0xff]  ;;  %v10349_v32 = vld [vmem:[%s12538_s1 + $0xb8] sm:$0xff] }
 0x330   :  { %15006 = vst [vmem:[#allocation336_spill] sm:$0xff] %v10301_v0  ;;  %v4591_v59 = vmul.f32 %v15012_v51, %v10298_v10  ;;  %v4589_v19 = vmul.f32 %v15013_v53, %v10301_v0  ;;  %15014 = vst [vmem:[#allocation229_spill] sm:$0xff] %v10324_v37  ;;  %v2658_v51 = vpop.permute.xlu0 %2657  ;;  %v15016_v6 = vld [vmem:[#allocation257_spill] sm:$0xff]  ;;  %v15018_v2 = vld [vmem:[#allocation152_spill] sm:$0xff]  ;;  %v10344_v30 = vmax.f32 %v14918_v42, %v2293_v1 }
 0x331   :  { %15015 = vst [vmem:[#allocation548_spill] sm:$0xff] %v10330_v47  ;;  %v2967_v10 = vsel %vm2913_vm2, %v15016_v6, %v2660_v27  ;;  %v15017_v53 = vld [vmem:[#allocation253_spill] sm:$0xff]  ;;  %v10338_v36 = vadd.f32 %v4800_v45, %v15018_v2  ;;  %v15020_v63 = vld [vmem:[#allocation552_spill] sm:$0xff]  ;;  %15023 = vst [vmem:[#allocation111_spill] sm:$0xff] %v10349_v32 }
 0x332   :  { %v2966_v0 = vsel %vm2913_vm2, %v15017_v53, %v2658_v51  ;;  %v10341_v29 = vadd.f32 %v4804_v60, %v15020_v63  ;;  %15022 = vst [vmem:[#allocation115_spill] sm:$0xff] %v10344_v30  ;;  %v15024_v6 = vld [vmem:[#allocation139_spill] sm:$0xff]  ;;  %v15028_v2 = vld [vmem:[#allocation372_spill] sm:$0xff]  ;;  %v15030_v42 = vld [vmem:[#allocation41_spill] sm:$0xff] }
 0x333   :  { %15019 = vst [vmem:[#allocation242_spill] sm:$0xff] %v10338_v36  ;;  %v10353_v27 = vmax.f32 %v15024_v6, %v2967_v10  ;;  %v15026_v51 = vld [vmem:[#allocation135_spill] sm:$0xff]  ;;  %2775 = vrot.lane.b32.xlu1 %v15028_v2, %s5585_s19  ;;  %v15029_v63 = vld [vmem:[#allocation368_spill] sm:$0xff]  ;;  %v15031_v1 = vunpack.c.l.bf16 %v15030_v42  ;;  %v10370_v60 = vld [vmem:[%s12538_s1 + $0xb0] sm:$0xff]  ;;  %v4812_v6 = vsel %vm3574_vm3, %v4591_v59, 0.0  ;;  %v15035_v42 = vunpack.c.h.bf16 %v10330_v47  ;;  %v2664_v10 = vpop.permute.xlu1 %2663 }
 0x334   :  { %15021 = vst [vmem:[#allocation503_spill] sm:$0xff] %v10341_v29  ;;  %v10356_v53 = vmax.f32 %v15026_v51, %v2966_v0  ;;  %2773 = vrot.lane.b32.xlu0 %v15029_v63, %s5585_s19  ;;  %15033 = vst [vmem:[#allocation457_spill] sm:$0xff] %v10370_v60  ;;  %v4808_v0 = vsel %vm3574_vm3, %v4589_v19, 0.0  ;;  %v15034_v51 = vunpack.c.h.bf16 %v10324_v37  ;;  %v10384_v29 = vld [vmem:[%s12538_s1 + $0x398] sm:$0xff]  ;;  %v10390_v19 = vld [vmem:[%s12538_s1 + $0x390] sm:$0xff] }
 0x335   :  { %15025 = vst [vmem:[#allocation348_spill] sm:$0xff] %v10353_v27  ;;  %v10365_v45 = vmul.f32 %v15031_v1, %v10308_v50  ;;  %15036 = vst [vmem:[#allocation241_spill] sm:$0xff] %v10384_v29  ;;  %v15038_v37 = vld [vmem:[#allocation265_spill] sm:$0xff]  ;;  %v15044_v32 = vld [vmem:[#allocation19_spill] sm:$0xff] }
 0x336   :  { %15027 = vst [vmem:[#allocation344_spill] sm:$0xff] %v10356_v53  ;;  %v4595_v46 = vmul.f32 %v15034_v51, %v10353_v27  ;;  %v4593_v1 = vmul.f32 %v15035_v42, %v10356_v53  ;;  %15037 = vst [vmem:[#allocation237_spill] sm:$0xff] %v10390_v19  ;;  %v2662_v51 = vpop.permute.xlu0 %2661  ;;  %v2969_v50 = vsel %vm2913_vm2, %v15038_v37, %v2664_v10  ;;  %v15039_v42 = vld [vmem:[#allocation261_spill] sm:$0xff]  ;;  %v15045_v60 = vunpack.c.l.bf16 %v15044_v32  ;;  %v15048_v10 = vld [vmem:[#allocation147_spill] sm:$0xff] }
 0x337   :  { %15032 = vst [vmem:[#allocation506_spill] sm:$0xff] %v10365_v45  ;;  %v2968_v27 = vsel %vm2913_vm2, %v15039_v42, %v2662_v51  ;;  %v15040_v53 = vld [vmem:[#allocation553_spill] sm:$0xff]  ;;  %v15042_v45 = vld [vmem:[#allocation554_spill] sm:$0xff]  ;;  %v10415_v51 = vmax.f32 %v15048_v10, %v2969_v50  ;;  %v15053_v32 = vld [vmem:[#allocation376_spill] sm:$0xff] }
 0x338   :  { %v10398_v47 = vadd.f32 %v4808_v0, %v15040_v53  ;;  %v10401_v36 = vadd.f32 %v4812_v6, %v15042_v45  ;;  %v10406_v31 = vmul.f32 %v15045_v60, %v10344_v30  ;;  %v10411_v59 = vld [vmem:[%s12538_s1 + $0xc8] sm:$0xff]  ;;  %v15050_v53 = vld [vmem:[#allocation143_spill] sm:$0xff]  ;;  %2777 = vrot.lane.b32.xlu0 %v15053_v32, %s5585_s19  ;;  %v15054_v60 = vld [vmem:[#allocation490_spill] sm:$0xff]  ;;  %v4816_v50 = vsel %vm3574_vm3, %v4593_v1, 0.0 }
 0x339   :  { %15047 = vst [vmem:[#allocation119_spill] sm:$0xff] %v10411_v59  ;;  %15049 = vst [vmem:[#allocation356_spill] sm:$0xff] %v10415_v51  ;;  %v10418_v0 = vmax.f32 %v15050_v53, %v2968_v27  ;;  %v15052_v45 = vld [vmem:[#allocation380_spill] sm:$0xff]  ;;  %v15055_v6 = vld [vmem:[#allocation491_spill] sm:$0xff]  ;;  %v4820_v10 = vsel %vm3574_vm3, %v4595_v46, 0.0  ;;  %v15058_v27 = vunpack.c.h.bf16 %v10384_v29 }
 0x33a   :  { %15041 = vst [vmem:[#allocation270_spill] sm:$0xff] %v10398_v47  ;;  %15043 = vst [vmem:[#allocation274_spill] sm:$0xff] %v10401_v36  ;;  %2779 = vrot.lane.b32.xlu1 %v15052_v45, %s5585_s19  ;;  %v2294_v42 = vsel %vm2192_vm1, %v15055_v6, %v15054_v60  ;;  %v15056_v36 = vld [vmem:[#allocation496_spill] sm:$0xff]  ;;  %v15057_v47 = vld [vmem:[#allocation497_spill] sm:$0xff]  ;;  %v15059_v45 = vunpack.c.h.bf16 %v10390_v19 }
 0x33b   :  { %15046 = vst [vmem:[#allocation123_spill] sm:$0xff] %v10406_v31  ;;  %15051 = vst [vmem:[#allocation352_spill] sm:$0xff] %v10418_v0  ;;  %v2295_v37 = vsel %vm2192_vm1, %v15057_v47, %v15056_v36  ;;  %v4599_v53 = vmul.f32 %v15058_v27, %v10415_v51  ;;  %v10441_v6 = vld [vmem:[%s12538_s1 + $0x3a8] sm:$0xff]  ;;  %v2668_v47 = vpop.permute.xlu1 %2667  ;;  %v10447_v46 = vld [vmem:[%s12538_s1 + $0x3a0] sm:$0xff]  ;;  %v2666_v27 = vpop.permute.xlu0 %2665  ;;  %v10461_v60 = vmax.f32 %v14917_v9, %v2294_v42 }
 0x33c   :  { %v4597_v30 = vmul.f32 %v15059_v45, %v10418_v0  ;;  %15060 = vst [vmem:[#allocation470_spill] sm:$0xff] %v10441_v6  ;;  %15061 = vst [vmem:[#allocation249_spill] sm:$0xff] %v10447_v46  ;;  %v15062_v29 = vld [vmem:[#allocation273_spill] sm:$0xff]  ;;  %v15064_v0 = vld [vmem:[#allocation555_spill] sm:$0xff]  ;;  %v10480_v9 = vmax.f32 %v14940_v35, %v2295_v37 }
 0x33d   :  { %v2971_v19 = vsel %vm2913_vm2, %v15062_v29, %v2668_v47  ;;  %v15063_v45 = vld [vmem:[#allocation269_spill] sm:$0xff]  ;;  %v10455_v31 = vadd.f32 %v4816_v50, %v15064_v0  ;;  %v15066_v36 = vld [vmem:[#allocation556_spill] sm:$0xff]  ;;  %15068 = vst [vmem:[#allocation148_spill] sm:$0xff] %v10461_v60  ;;  %v15070_v29 = vld [vmem:[#allocation155_spill] sm:$0xff] }
 0x33e   :  { %v2970_v51 = vsel %vm2913_vm2, %v15063_v45, %v2666_v27  ;;  %v10458_v32 = vadd.f32 %v4820_v10, %v15066_v36  ;;  %v10466_v1 = vld [vmem:[%s12538_s1 + $0xc0] sm:$0xff]  ;;  %v10470_v47 = vmax.f32 %v15070_v29, %v2971_v19  ;;  %15076 = vst [vmem:[#allocation364_spill] sm:$0xff] %v10480_v9  ;;  %v10485_v42 = vld [vmem:[%s12538_s1 + $0xd8] sm:$0xff]  ;;  %v4824_v50 = vsel %vm3574_vm3, %v4597_v30, 0.0  ;;  %v10505_v30 = vld [vmem:[%s12538_s1 + $0x3b0] sm:$0xff] }
 0x33f   :  { %15065 = vst [vmem:[#allocation245_spill] sm:$0xff] %v10455_v31  ;;  %15069 = vst [vmem:[#allocation82_spill] sm:$0xff] %v10466_v1  ;;  %v15072_v27 = vld [vmem:[#allocation151_spill] sm:$0xff]  ;;  %v15074_v0 = vld [vmem:[#allocation388_spill] sm:$0xff]  ;;  %v15078_v10 = vunpack.c.h.bf16 %v10441_v6  ;;  %v2672_v19 = vpop.permute.xlu1 %2671 }
 0x340   :  { %15067 = vst [vmem:[#allocation144_spill] sm:$0xff] %v10458_v32  ;;  %15071 = vst [vmem:[#allocation131_spill] sm:$0xff] %v10470_v47  ;;  %v10473_v45 = vmax.f32 %v15072_v27, %v2970_v51  ;;  %2783 = vrot.lane.b32.xlu1 %v15074_v0, %s5585_s19  ;;  %v15075_v36 = vld [vmem:[#allocation384_spill] sm:$0xff]  ;;  %v4828_v51 = vsel %vm3574_vm3, %v4599_v53, 0.0  ;;  %v15079_v27 = vunpack.c.h.bf16 %v10447_v46  ;;  %v10499_v37 = vld [vmem:[%s12538_s1 + $0x3b8] sm:$0xff] }
 0x341   :  { %2781 = vrot.lane.b32.xlu0 %v15075_v36, %s5585_s19  ;;  %15077 = vst [vmem:[#allocation360_spill] sm:$0xff] %v10485_v42  ;;  %v4603_v29 = vmul.f32 %v15078_v10, %v10470_v47  ;;  %15080 = vst [vmem:[#allocation483_spill] sm:$0xff] %v10499_v37  ;;  %v2670_v10 = vpop.permute.xlu0 %2669  ;;  %v15082_v6 = vld [vmem:[#allocation281_spill] sm:$0xff]  ;;  %v15084_v32 = vld [vmem:[#allocation282_spill] sm:$0xff] }
 0x342   :  { %15073 = vst [vmem:[#allocation127_spill] sm:$0xff] %v10473_v45  ;;  %v4601_v35 = vmul.f32 %v15079_v27, %v10473_v45  ;;  %15081 = vst [vmem:[#allocation257_spill] sm:$0xff] %v10505_v30  ;;  %v2973_v46 = vsel %vm2913_vm2, %v15082_v6, %v2672_v19  ;;  %v15083_v27 = vld [vmem:[#allocation277_spill] sm:$0xff]  ;;  %v10513_v36 = vadd.f32 %v4824_v50, %v15084_v32  ;;  %v15086_v31 = vld [vmem:[#allocation286_spill] sm:$0xff] }
 0x343   :  { %v2972_v0 = vsel %vm2913_vm2, %v15083_v27, %v2670_v10  ;;  %v10516_v59 = vadd.f32 %v4828_v51, %v15086_v31  ;;  %v15088_v47 = vld [vmem:[#allocation512_spill] sm:$0xff]  ;;  %v10526_v53 = vld [vmem:[%s12538_s1 + $0xd0] sm:$0xff]  ;;  %v15092_v19 = vld [vmem:[#allocation163_spill] sm:$0xff] }
 0x344   :  { %15085 = vst [vmem:[#allocation253_spill] sm:$0xff] %v10513_v36  ;;  %v15089_v45 = vunpack.c.l.bf16 %v15088_v47  ;;  %15091 = vst [vmem:[#allocation139_spill] sm:$0xff] %v10526_v53  ;;  %v10530_v10 = vmax.f32 %v15092_v19, %v2973_v46  ;;  %v15094_v32 = vld [vmem:[#allocation159_spill] sm:$0xff]  ;;  %v15096_v31 = vld [vmem:[#allocation396_spill] sm:$0xff]  ;;  %v4836_v19 = vsel %vm3574_vm3, %v4603_v29, 0.0  ;;  %v15107_v46 = vunpack.c.h.bf16 %v10505_v30 }
 0x345   :  { %15087 = vst [vmem:[#allocation152_spill] sm:$0xff] %v10516_v59  ;;  %v10533_v50 = vmax.f32 %v15094_v32, %v2972_v0  ;;  %2787 = vrot.lane.b32.xlu1 %v15096_v31, %s5585_s19  ;;  %v15097_v47 = vld [vmem:[#allocation392_spill] sm:$0xff]  ;;  %v4832_v0 = vsel %vm3574_vm3, %v4601_v35, 0.0  ;;  %v15101_v32 = vld [vmem:[#allocation94_spill] sm:$0xff]  ;;  %v2676_v35 = vpop.permute.xlu1 %2675  ;;  %v15108_v29 = vld [vmem:[#allocation289_spill] sm:$0xff] }
 0x346   :  { %v10521_v42 = vmul.f32 %v15089_v45, %v10461_v60  ;;  %15093 = vst [vmem:[#allocation135_spill] sm:$0xff] %v10530_v10  ;;  %2785 = vrot.lane.b32.xlu0 %v15097_v47, %s5585_s19  ;;  %v15098_v45 = vld [vmem:[#allocation507_spill] sm:$0xff]  ;;  %v15099_v51 = vld [vmem:[#allocation508_spill] sm:$0xff]  ;;  %v15102_v31 = vunpack.c.l.bf16 %v15101_v32  ;;  %v15104_v47 = vld [vmem:[#allocation513_spill] sm:$0xff]  ;;  %v15106_v60 = vunpack.c.h.bf16 %v10499_v37  ;;  %v2975_v53 = vsel %vm2913_vm2, %v15108_v29, %v2676_v35 }
 0x347   :  { %15095 = vst [vmem:[#allocation372_spill] sm:$0xff] %v10533_v50  ;;  %v2296_v27 = vsel %vm2192_vm1, %v15099_v51, %v15098_v45  ;;  %v10545_v6 = vld [vmem:[%s12538_s1 + $0xe8] sm:$0xff]  ;;  %v15105_v36 = vld [vmem:[#allocation514_spill] sm:$0xff]  ;;  %v4605_v45 = vmul.f32 %v15107_v46, %v10533_v50  ;;  %v10580_v46 = vld [vmem:[%s12538_s1 + $0xe0] sm:$0xff]  ;;  %v15125_v37 = vunpack.c.h.bf16 %v14448_v55 }
 0x348   :  { %15090 = vst [vmem:[#allocation552_spill] sm:$0xff] %v10521_v42  ;;  %15100 = vst [vmem:[#allocation368_spill] sm:$0xff] %v10545_v6  ;;  %v10553_v59 = vmul.f32 %v15102_v31, %v10480_v9  ;;  %v2297_v51 = vsel %vm2192_vm1, %v15105_v36, %v15104_v47  ;;  %v4607_v42 = vmul.f32 %v15106_v60, %v10530_v10  ;;  %v2674_v6 = vpop.permute.xlu0 %2673  ;;  %v15109_v32 = vld [vmem:[#allocation285_spill] sm:$0xff]  ;;  %v15112_v36 = vld [vmem:[#allocation558_spill] sm:$0xff] }
 0x349   :  { %v2974_v31 = vsel %vm2913_vm2, %v15109_v32, %v2674_v6  ;;  %v15110_v9 = vld [vmem:[#allocation557_spill] sm:$0xff]  ;;  %v10572_v47 = vadd.f32 %v4836_v19, %v15112_v36  ;;  %v10575_v60 = vmax.f32 %v14939_v12, %v2296_v27  ;;  %v15115_v35 = vld [vmem:[#allocation171_spill] sm:$0xff]  ;;  %v10594_v12 = vmax.f32 %v14962_v38, %v2297_v51  ;;  %v15122_v36 = vld [vmem:[#allocation102_spill] sm:$0xff] }
 0x34a   :  { %15103 = vst [vmem:[#allocation41_spill] sm:$0xff] %v10553_v59  ;;  %v10569_v59 = vadd.f32 %v4832_v0, %v15110_v9  ;;  %v10584_v29 = vmax.f32 %v15115_v35, %v2975_v53  ;;  %v15117_v6 = vld [vmem:[#allocation167_spill] sm:$0xff]  ;;  %v15119_v9 = vld [vmem:[#allocation404_spill] sm:$0xff]  ;;  %v4840_v19 = vsel %vm3574_vm3, %v4605_v45, 0.0  ;;  %v15123_v35 = vld [vmem:[#allocation517_spill] sm:$0xff]  ;;  %v15126_v45 = vunpack.c.h.bf16 %v14435_v56 }
 0x34b   :  { %15113 = vst [vmem:[#allocation261_spill] sm:$0xff] %v10572_v47  ;;  %15114 = vst [vmem:[#allocation553_spill] sm:$0xff] %v10575_v60  ;;  %v10587_v32 = vmax.f32 %v15117_v6, %v2974_v31  ;;  %2791 = vrot.lane.b32.xlu1 %v15119_v9, %s5585_s19  ;;  %v15120_v0 = vld [vmem:[#allocation400_spill] sm:$0xff]  ;;  %v10599_v27 = vld [vmem:[%s12538_s1 + $0xf8] sm:$0xff]  ;;  %v4844_v31 = vsel %vm3574_vm3, %v4607_v42, 0.0  ;;  %v2298_v6 = vsel %vm2192_vm1, %v15123_v35, %v15122_v36  ;;  %v2680_v42 = vpop.permute.xlu1 %2679 }
 0x34c   :  { %15111 = vst [vmem:[#allocation265_spill] sm:$0xff] %v10569_v59  ;;  %15116 = vst [vmem:[#allocation554_spill] sm:$0xff] %v10584_v29  ;;  %2789 = vrot.lane.b32.xlu0 %v15120_v0, %s5585_s19  ;;  %v10610_v38 = vld [vmem:[%s12538_s1 + $0xf0] sm:$0xff]  ;;  %v4916_v9 = vmul.f32 %v15125_v37, %v10584_v29  ;;  %v2678_v47 = vpop.permute.xlu0 %2677  ;;  %v15129_v10 = vld [vmem:[#allocation560_spill] sm:$0xff]  ;;  %s5362_s19 = sshll.u32 %s5587_s24, 4  ;;  %s5363_s19 = int_to_ptr.vmem [resolvable:$true] %s5362_s19 }
 0x34d   :  { %15118 = vst [vmem:[#allocation19_spill] sm:$0xff] %v10587_v32  ;;  %15121 = vst [vmem:[#allocation147_spill] sm:$0xff] %v10594_v12  ;;  %v4914_v53 = vmul.f32 %v15126_v45, %v10587_v32  ;;  %v15127_v0 = vld [vmem:[#allocation297_spill] sm:$0xff]  ;;  %v10624_v50 = vadd.f32 %v4840_v19, %v15129_v10  ;;  %v15131_v51 = vld [vmem:[#allocation184_spill] sm:$0xff]  ;;  %s5557_s25 = scalar_lea.vmem %s5363_s19, 32  ;;  %p5562_p6 = scmp.lt.s32.totalorder %s5363_s19, %s5363_s19 }
 0x34e   :  { %15124 = vst [vmem:[#allocation143_spill] sm:$0xff] %v10610_v38  ;;  %v2977_v35 = vsel %vm2913_vm2, %v15127_v0, %v2680_v42  ;;  %v15128_v59 = vld [vmem:[#allocation293_spill] sm:$0xff]  ;;  %v10627_v36 = vadd.f32 %v4844_v31, %v15131_v51  ;;  %v15133_v55 = vld [vmem:[#allocation47_spill] sm:$0xff]  ;;  %p5558_p5 = scmp.ne.s32.totalorder %s5363_s19, %s5557_s25  ;;  %p5563_p7 = scmp.lt.s32.totalorder %s5557_s25, %s5557_s25 }
 0x34f   :  { %v2976_v30 = vsel %vm2913_vm2, %v15128_v59, %v2678_v47  ;;  %15130 = vst [vmem:[#allocation491_spill] sm:$0xff] %v10624_v50  ;;  %v15134_v37 = vunpack.c.l.bf16 %v15133_v55  ;;  %v10637_v56 = vld [vmem:[%s12538_s1 + $0x108] sm:$0xff]  ;;  %v15135_v45 = vld [vmem:[#allocation179_spill] sm:$0xff]  ;;  %v2684_v55 = vpop.permute.xlu1 %2683 }
 0x350   :  { %15132 = vst [vmem:[#allocation497_spill] sm:$0xff] %v10627_v36  ;;  %v10641_v59 = vmax.f32 %v15135_v45, %v2977_v35  ;;  %v15137_v10 = vld [vmem:[#allocation175_spill] sm:$0xff]  ;;  %v15139_v19 = vld [vmem:[#allocation25_spill] sm:$0xff]  ;;  %v5037_v35 = vsel %vm3574_vm3, %v4916_v9, 0.0  ;;  %v10660_v45 = vmax.f32 %v14961_v8, %v2298_v6  ;;  %v15146_v36 = vunpack.c.h.bf16 %v8935_v34  ;;  %v15149_v6 = vld [vmem:[#allocation326_spill] sm:$0xff]  ;;  %p5564_p8 = por %p5563_p7, %p5562_p6 }
 0x351   :  { %v10632_v29 = vmul.f32 %v15134_v37, %v10575_v60  ;;  %v10644_v47 = vmax.f32 %v15137_v10, %v2976_v30  ;;  %v15140_v31 = vunpack.c.l.bf16 %v15139_v19  ;;  %v10654_v42 = vld [vmem:[%s12538_s1 + $0x100] sm:$0xff]  ;;  %v5033_v37 = vsel %vm3574_vm3, %v4914_v53, 0.0  ;;  %v15144_v10 = vld [vmem:[#allocation521_spill] sm:$0xff] }
 0x352   :  { %15136 = vst [vmem:[#allocation273_spill] sm:$0xff] %v10641_v59  ;;  %15142 = vst [vmem:[#allocation556_spill] sm:$0xff] %v10660_v45  ;;  %v15143_v30 = vld [vmem:[#allocation520_spill] sm:$0xff]  ;;  %v15147_v53 = vld [vmem:[#allocation305_spill] sm:$0xff]  ;;  %v10676_v32 = vadd.f32 %v5033_v37, %v15149_v6  ;;  %p5565_p9 = pnand %p5564_p8, %p5558_p5 }
 0x353   :  { %15138 = vst [vmem:[#allocation269_spill] sm:$0xff] %v10644_v47  ;;  %v10649_v51 = vmul.f32 %v15140_v31, %v10594_v12  ;;  %v2299_v19 = vsel %vm2192_vm1, %v15144_v10, %v15143_v30  ;;  %v15145_v31 = vunpack.c.h.bf16 %v8923_v49  ;;  %v4918_v50 = vmul.f32 %v15146_v36, %v10644_v47  ;;  %v2682_v12 = vpop.permute.xlu0 %2681  ;;  %v15148_v60 = vld [vmem:[#allocation301_spill] sm:$0xff]  ;;  %v15151_v10 = vld [vmem:[#allocation196_spill] sm:$0xff]  ;;  %v10684_v49 = vld [vmem:[%s12538_s1 + $0x118] sm:$0xff] }
 0x354   :  { %v2979_v9 = vsel %vm2913_vm2, %v15147_v53, %v2684_v55  ;;  %v2978_v8 = vsel %vm2913_vm2, %v15148_v60, %v2682_v12  ;;  %15150 = vst [vmem:[#allocation155_spill] sm:$0xff] %v10676_v32  ;;  %15153 = vst [vmem:[#allocation281_spill] sm:$0xff] %v10684_v49  ;;  %v10690_v36 = vld [vmem:[%s12538_s1 + $0x110] sm:$0xff]  ;;  %v15154_v12 = vld [vmem:[#allocation187_spill] sm:$0xff] }
 0x355   :  { %15141 = vst [vmem:[#allocation555_spill] sm:$0xff] %v10649_v51  ;;  %v4920_v0 = vmul.f32 %v15145_v31, %v10641_v59  ;;  %v10679_v51 = vadd.f32 %v5037_v35, %v15151_v10  ;;  %v10694_v55 = vmax.f32 %v15154_v12, %v2979_v9  ;;  %v15156_v37 = vld [vmem:[#allocation183_spill] sm:$0xff]  ;;  %v10700_v31 = vmax.f32 %v14985_v15, %v2299_v19  ;;  %v15159_v53 = vld [vmem:[#allocation526_spill] sm:$0xff] }
 0x356   :  { %v10697_v35 = vmax.f32 %v15156_v37, %v2978_v8  ;;  %v15160_v6 = vld [vmem:[#allocation527_spill] sm:$0xff]  ;;  %v5041_v34 = vsel %vm3574_vm3, %v4918_v50, 0.0  ;;  %v15161_v32 = vld [vmem:[#allocation110_spill] sm:$0xff]  ;;  %v15166_v15 = vunpack.c.h.bf16 %v8986_v54  ;;  %v15167_v37 = vunpack.c.h.bf16 %v8992_v23  ;;  %v2688_v50 = vpop.permute.xlu1 %2687  ;;  %v10737_v23 = vld [vmem:[%s12538_s1 + $0x128] sm:$0xff] }
 0x357   :  { %15152 = vst [vmem:[#allocation151_spill] sm:$0xff] %v10679_v51  ;;  %15155 = vst [vmem:[#allocation277_spill] sm:$0xff] %v10694_v55  ;;  %v2300_v10 = vsel %vm2192_vm1, %v15160_v6, %v15159_v53  ;;  %v5045_v51 = vsel %vm3574_vm3, %v4920_v0, 0.0  ;;  %v15162_v60 = vunpack.c.l.bf16 %v15161_v32  ;;  %v15164_v9 = vld [vmem:[#allocation142_spill] sm:$0xff]  ;;  %v2686_v47 = vpop.permute.xlu0 %2685  ;;  %v15168_v0 = vld [vmem:[#allocation313_spill] sm:$0xff] }
 0x358   :  { %15157 = vst [vmem:[#allocation282_spill] sm:$0xff] %v10697_v35  ;;  %15158 = vst [vmem:[#allocation286_spill] sm:$0xff] %v10700_v31  ;;  %v15165_v12 = vld [vmem:[#allocation146_spill] sm:$0xff]  ;;  %v4924_v19 = vmul.f32 %v15166_v15, %v10694_v55  ;;  %v4922_v6 = vmul.f32 %v15167_v37, %v10697_v35  ;;  %v2981_v49 = vsel %vm2913_vm2, %v15168_v0, %v2688_v50  ;;  %v15169_v32 = vld [vmem:[#allocation309_spill] sm:$0xff] }
 0x359   :  { %v10710_v59 = vmul.f32 %v15162_v60, %v10660_v45  ;;  %v2301_v8 = vsel %vm2192_vm1, %v15165_v12, %v15164_v9  ;;  %v2980_v60 = vsel %vm2913_vm2, %v15169_v32, %v2686_v47  ;;  %v15170_v45 = vld [vmem:[#allocation200_spill] sm:$0xff]  ;;  %v15172_v12 = vld [vmem:[#allocation474_spill] sm:$0xff]  ;;  %v10732_v54 = vmax.f32 %v14984_v11, %v2300_v10  ;;  %v15175_v37 = vld [vmem:[#allocation195_spill] sm:$0xff] }
 0x35a   :  { %v10729_v9 = vadd.f32 %v5045_v51, %v15172_v12  ;;  %v10741_v50 = vmax.f32 %v15175_v37, %v2981_v49  ;;  %v15177_v47 = vld [vmem:[#allocation191_spill] sm:$0xff]  ;;  %v5049_v32 = vsel %vm3574_vm3, %v4922_v6, 0.0  ;;  %v5053_v49 = vsel %vm3574_vm3, %v4924_v19, 0.0  ;;  %v2692_v10 = vpop.permute.xlu1 %2691  ;;  %v15189_v37 = vld [vmem:[#allocation216_spill] sm:$0xff] }
 0x35b   :  { %15163 = vst [vmem:[#allocation512_spill] sm:$0xff] %v10710_v59  ;;  %v10726_v59 = vadd.f32 %v5041_v34, %v15170_v45  ;;  %15174 = vst [vmem:[#allocation508_spill] sm:$0xff] %v10732_v54  ;;  %v10744_v0 = vmax.f32 %v15177_v47, %v2980_v60  ;;  %v15179_v45 = vld [vmem:[#allocation49_spill] sm:$0xff]  ;;  %v10754_v11 = vld [vmem:[%s12538_s1 + $0x120] sm:$0xff]  ;;  %v10760_v12 = vmax.f32 %v15008_v5, %v2301_v8  ;;  %v15182_v47 = vunpack.c.h.bf16 %v9037_v7  ;;  %v2690_v19 = vpop.permute.xlu0 %2689 }
 0x35c   :  { %15173 = vst [vmem:[#allocation159_spill] sm:$0xff] %v10729_v9  ;;  %15176 = vst [vmem:[#allocation94_spill] sm:$0xff] %v10741_v50  ;;  %v15180_v51 = vunpack.c.l.bf16 %v15179_v45  ;;  %v10765_v60 = vld [vmem:[%s12538_s1 + $0x138] sm:$0xff]  ;;  %v15185_v9 = vld [vmem:[#allocation321_spill] sm:$0xff]  ;;  %v10782_v35 = vadd.f32 %v5053_v49, %v15189_v37 }
 0x35d   :  { %15171 = vst [vmem:[#allocation163_spill] sm:$0xff] %v10726_v59  ;;  %15178 = vst [vmem:[#allocation514_spill] sm:$0xff] %v10744_v0  ;;  %v4928_v45 = vmul.f32 %v15182_v47, %v10741_v50  ;;  %v2983_v5 = vsel %vm2913_vm2, %v15185_v9, %v2692_v10  ;;  %v15186_v8 = vld [vmem:[#allocation317_spill] sm:$0xff]  ;;  %v15191_v7 = vld [vmem:[#allocation118_spill] sm:$0xff] }
 0x35e   :  { %v10749_v34 = vmul.f32 %v15180_v51, %v10700_v31  ;;  %15181 = vst [vmem:[#allocation289_spill] sm:$0xff] %v10760_v12  ;;  %v15183_v51 = vld [vmem:[#allocation358_spill] sm:$0xff]  ;;  %v2982_v59 = vsel %vm2913_vm2, %v15186_v8, %v2690_v19  ;;  %v15187_v31 = vld [vmem:[#allocation204_spill] sm:$0xff]  ;;  %15190 = vst [vmem:[#allocation557_spill] sm:$0xff] %v10782_v35  ;;  %v15192_v47 = vunpack.c.l.bf16 %v15191_v7  ;;  %v2696_v8 = vpop.permute.xlu1 %2695 }
 0x35f   :  { %v15184_v15 = vunpack.c.h.bf16 %v15183_v51  ;;  %v10779_v55 = vadd.f32 %v5049_v32, %v15187_v31  ;;  %v15193_v10 = vld [vmem:[#allocation203_spill] sm:$0xff]  ;;  %v15197_v49 = vld [vmem:[#allocation532_spill] sm:$0xff]  ;;  %v15198_v37 = vld [vmem:[#allocation533_spill] sm:$0xff] }
 0x360   :  { %v10787_v50 = vmul.f32 %v15192_v47, %v10732_v54  ;;  %v10796_v51 = vmax.f32 %v15193_v10, %v2983_v5  ;;  %v15195_v31 = vld [vmem:[#allocation199_spill] sm:$0xff]  ;;  %v2302_v19 = vsel %vm2192_vm1, %v15198_v37, %v15197_v49  ;;  %v5061_v47 = vsel %vm3574_vm3, %v4928_v45, 0.0  ;;  %v15199_v35 = vld [vmem:[#allocation524_spill] sm:$0xff]  ;;  %v2694_v54 = vpop.permute.xlu0 %2693 }
 0x361   :  { %v4926_v6 = vmul.f32 %v15184_v15, %v10744_v0  ;;  %15188 = vst [vmem:[#allocation285_spill] sm:$0xff] %v10779_v55  ;;  %v10792_v15 = vld [vmem:[%s12538_s1 + $0x130] sm:$0xff]  ;;  %v10799_v32 = vmax.f32 %v15195_v31, %v2982_v59  ;;  %v15200_v55 = vunpack.c.l.bf16 %v15199_v35  ;;  %v15202_v59 = vunpack.c.h.bf16 %v9086_v44  ;;  %v10822_v45 = vld [vmem:[%s12538_s1 + $0x158] sm:$0xff] }
 0x362   :  { %15194 = vst [vmem:[#allocation558_spill] sm:$0xff] %v10796_v51  ;;  %v15203_v31 = vunpack.c.h.bf16 %v9092_v3  ;;  %15204 = vst [vmem:[#allocation517_spill] sm:$0xff] %v10822_v45  ;;  %v15205_v35 = vld [vmem:[#allocation329_spill] sm:$0xff]  ;;  %v15221_v0 = vld [vmem:[#allocation434_spill] sm:$0xff]  ;;  %v2700_v45 = vpop.permute.xlu1 %2699 }
 0x363   :  { %15196 = vst [vmem:[#allocation171_spill] sm:$0xff] %v10799_v32  ;;  %v5057_v7 = vsel %vm3574_vm3, %v4926_v6, 0.0  ;;  %v10810_v9 = vmul.f32 %v15200_v55, %v10760_v12  ;;  %v4932_v10 = vmul.f32 %v15202_v59, %v10796_v51  ;;  %v2985_v55 = vsel %vm2913_vm2, %v15205_v35, %v2696_v8  ;;  %v15206_v6 = vld [vmem:[#allocation325_spill] sm:$0xff]  ;;  %v15207_v12 = vld [vmem:[#allocation338_spill] sm:$0xff]  ;;  %v15213_v8 = vld [vmem:[#allocation211_spill] sm:$0xff] }
 0x364   :  { %v4930_v37 = vmul.f32 %v15203_v31, %v10799_v32  ;;  %v2984_v5 = vsel %vm2913_vm2, %v15206_v6, %v2694_v54  ;;  %v10829_v44 = vadd.f32 %v5057_v7, %v15207_v12  ;;  %v15209_v59 = vld [vmem:[#allocation478_spill] sm:$0xff]  ;;  %v10840_v31 = vmax.f32 %v15007_v61, %v2302_v19  ;;  %v15215_v54 = vld [vmem:[#allocation207_spill] sm:$0xff] }
 0x365   :  { %15201 = vst [vmem:[#allocation167_spill] sm:$0xff] %v10810_v9  ;;  %v10832_v51 = vadd.f32 %v5061_v47, %v15209_v59  ;;  %v10837_v3 = vld [vmem:[%s12538_s1 + $0x150] sm:$0xff]  ;;  %v10844_v35 = vmax.f32 %v15213_v8, %v2985_v55  ;;  %v10847_v6 = vmax.f32 %v15215_v54, %v2984_v5  ;;  %v15220_v19 = vld [vmem:[#allocation535_spill] sm:$0xff]  ;;  %v15222_v55 = vunpack.c.h.bf16 %v9552_v24 }
 0x366   :  { %15208 = vst [vmem:[#allocation297_spill] sm:$0xff] %v10829_v44  ;;  %15211 = vst [vmem:[#allocation560_spill] sm:$0xff] %v10837_v3  ;;  %v15217_v12 = vld [vmem:[#allocation174_spill] sm:$0xff]  ;;  %v5069_v44 = vsel %vm3574_vm3, %v4932_v10, 0.0  ;;  %v15223_v5 = vunpack.c.h.bf16 %v9139_v22  ;;  %v15225_v3 = vld [vmem:[#allocation337_spill] sm:$0xff] }
 0x367   :  { %15210 = vst [vmem:[#allocation293_spill] sm:$0xff] %v10832_v51  ;;  %15212 = vst [vmem:[#allocation184_spill] sm:$0xff] %v10840_v31  ;;  %v15218_v7 = vld [vmem:[#allocation178_spill] sm:$0xff]  ;;  %v5065_v51 = vsel %vm3574_vm3, %v4930_v37, 0.0  ;;  %v3455_v8 = vmul.f32 %v15222_v55, %v15221_v0  ;;  %v2698_v37 = vpop.permute.xlu0 %2697  ;;  %v2987_v10 = vsel %vm2913_vm2, %v15225_v3, %v2700_v45  ;;  %v15231_v22 = vld [vmem:[#allocation57_spill] sm:$0xff] }
 0x368   :  { %15214 = vst [vmem:[#allocation47_spill] sm:$0xff] %v10844_v35  ;;  %15216 = vst [vmem:[#allocation179_spill] sm:$0xff] %v10847_v6  ;;  %v2303_v47 = vsel %vm2192_vm1, %v15218_v7, %v15217_v12  ;;  %v15219_v61 = vld [vmem:[#allocation190_spill] sm:$0xff]  ;;  %v4936_v54 = vmul.f32 %v15223_v5, %v10844_v35  ;;  %v15224_v7 = vunpack.c.h.bf16 %v9145_v57  ;;  %v15232_v5 = vunpack.c.l.bf16 %v15231_v22  ;;  %v15236_v45 = vld [vmem:[#allocation215_spill] sm:$0xff] }
 0x369   :  { %v2304_v32 = vsel %vm2192_vm1, %v15220_v19, %v15219_v61  ;;  %v2986_v19 = vsel %vm2913_vm2, %v15226_v13, %v2698_v37  ;;  %v15227_v9 = vld [vmem:[#allocation418_spill] sm:$0xff]  ;;  %v10883_v57 = vmax.f32 %v15029_v63, %v2303_v47  ;;  %v15241_v22 = vld [vmem:[#allocation228_spill] sm:$0xff]  ;;  %v15242_v63 = vunpack.c.h.bf16 %v9650_v41 }
 0x36a   :  { %v4934_v59 = vmul.f32 %v15224_v7, %v10847_v6  ;;  %v10872_v26 = vadd.f32 %v5065_v51, %v15227_v9  ;;  %v15229_v0 = vld [vmem:[#allocation422_spill] sm:$0xff]  ;;  %v10880_v35 = vmul.f32 %v15232_v5, %v10840_v31  ;;  %v15234_v7 = vld [vmem:[#allocation219_spill] sm:$0xff]  ;;  %v10889_v3 = vmax.f32 %v15236_v45, %v2986_v19  ;;  %v2704_v5 = vpop.permute.xlu1 %2703 }
 0x36b   :  { %v10875_v55 = vadd.f32 %v5069_v44, %v15229_v0  ;;  %15233 = vst [vmem:[#allocation520_spill] sm:$0xff] %v10883_v57  ;;  %v10886_v6 = vmax.f32 %v15234_v7, %v2987_v10  ;;  %v10892_v13 = vmax.f32 %v15028_v2, %v2304_v32  ;;  %v15239_v9 = vld [vmem:[#allocation346_spill] sm:$0xff]  ;;  %v15240_v51 = vunpack.c.h.bf16 %v9533_v4  ;;  %v2702_v7 = vpop.permute.xlu0 %2701 }
 0x36c   :  { %15228 = vst [vmem:[#allocation175_spill] sm:$0xff] %v10872_v26  ;;  %15237 = vst [vmem:[#allocation305_spill] sm:$0xff] %v10889_v3  ;;  %v5073_v37 = vsel %vm3574_vm3, %v4934_v59, 0.0  ;;  %v5077_v0 = vsel %vm3574_vm3, %v4936_v54, 0.0  ;;  %v3459_v47 = vmul.f32 %v15242_v63, %v15241_v22  ;;  %v15243_v10 = vunpack.c.h.bf16 %v9190_v52  ;;  %v15246_v54 = vld [vmem:[#allocation341_spill] sm:$0xff]  ;;  %v15249_v63 = vld [vmem:[#allocation428_spill] sm:$0xff] }
 0x36d   :  { %15230 = vst [vmem:[#allocation25_spill] sm:$0xff] %v10875_v55  ;;  %15235 = vst [vmem:[#allocation521_spill] sm:$0xff] %v10886_v6  ;;  %v3457_v44 = vmul.f32 %v15240_v51, %v15239_v9  ;;  %v15244_v2 = vunpack.c.h.bf16 %v9196_v17  ;;  %v3575_v45 = vsel %vm3574_vm3, %v3455_v8, 0.0  ;;  %v15245_v9 = vld [vmem:[#allocation345_spill] sm:$0xff]  ;;  %v2988_v51 = vsel %vm2913_vm2, %v15246_v54, %v2702_v7  ;;  %v15247_v55 = vld [vmem:[#allocation426_spill] sm:$0xff] }
 0x36e   :  { %15238 = vst [vmem:[#allocation301_spill] sm:$0xff] %v10892_v13  ;;  %v4940_v19 = vmul.f32 %v15243_v10, %v10886_v6  ;;  %v2989_v59 = vsel %vm2913_vm2, %v15245_v9, %v2704_v5  ;;  %v10914_v22 = vadd.f32 %v5073_v37, %v15247_v55  ;;  %v10917_v52 = vadd.f32 %v5077_v0, %v15249_v63  ;;  %v15251_v10 = vld [vmem:[#allocation202_spill] sm:$0xff]  ;;  %v15255_v6 = vld [vmem:[#allocation227_spill] sm:$0xff] }
 0x36f   :  { %v4938_v32 = vmul.f32 %v15244_v2, %v10889_v3  ;;  %v15252_v26 = vld [vmem:[#allocation206_spill] sm:$0xff]  ;;  %v15253_v2 = vld [vmem:[#allocation224_spill] sm:$0xff]  ;;  %v15254_v8 = vunpack.c.h.bf16 %v9593_v14  ;;  %v10928_v5 = vmax.f32 %v15255_v6, %v2989_v59  ;;  %v15257_v9 = vld [vmem:[#allocation223_spill] sm:$0xff]  ;;  %v3579_v0 = vsel %vm3574_vm3, %v3457_v44, 0.0 }
 0x370   :  { %15248 = vst [vmem:[#allocation326_spill] sm:$0xff] %v10914_v22  ;;  %15250 = vst [vmem:[#allocation196_spill] sm:$0xff] %v10917_v52  ;;  %v10922_v17 = vsel %vm2192_vm1, %v15252_v26, %v15251_v10  ;;  %v10931_v7 = vmax.f32 %v15257_v9, %v2988_v51  ;;  %v15259_v55 = vld [vmem:[#allocation498_spill] sm:$0xff]  ;;  %v5085_v63 = vsel %vm3574_vm3, %v4940_v19, 0.0  ;;  %v15260_v26 = vld [vmem:[#allocation236_spill] sm:$0xff]  ;;  %v15261_v52 = vunpack.c.h.bf16 %v9710_v25 }
 0x371   :  { %v3461_v31 = vmul.f32 %v15254_v8, %v15253_v2  ;;  %15256 = vst [vmem:[#allocation187_spill] sm:$0xff] %v10928_v5  ;;  %v3576_v37 = vadd.f32 %v3575_v45, %v15259_v55  ;;  %v5081_v54 = vsel %vm3574_vm3, %v4938_v32, 0.0  ;;  %v15262_v2 = vunpack.c.h.bf16 %v9239_v39  ;;  %v2708_v8 = vpop.permute.xlu1 %2707  ;;  %v2706_v45 = vpop.permute.xlu0 %2705  ;;  %v15264_v9 = vld [vmem:[#allocation353_spill] sm:$0xff]  ;;  %v15268_v39 = vld [vmem:[#allocation342_spill] sm:$0xff] }
 0x372   :  { %15258 = vst [vmem:[#allocation183_spill] sm:$0xff] %v10931_v7  ;;  %v3463_v22 = vmul.f32 %v15261_v52, %v15260_v26  ;;  %v15263_v59 = vunpack.c.h.bf16 %v9245_v43  ;;  %v3583_v44 = vsel %vm3574_vm3, %v3459_v47, 0.0  ;;  %v2991_v32 = vsel %vm2913_vm2, %v15264_v9, %v2708_v8  ;;  %v15265_v19 = vld [vmem:[#allocation349_spill] sm:$0xff]  ;;  %v15266_v52 = vld [vmem:[#allocation430_spill] sm:$0xff]  ;;  %v15274_v47 = vld [vmem:[#allocation499_spill] sm:$0xff] }
 0x373   :  { %v4944_v6 = vmul.f32 %v15262_v2, %v10928_v5  ;;  %v2990_v55 = vsel %vm2913_vm2, %v15265_v19, %v2706_v45  ;;  %3577 = vadd.xlane.f32.xlu0 %v3576_v37  ;;  %v10952_v26 = vadd.f32 %v5081_v54, %v15266_v52  ;;  %v10955_v2 = vadd.f32 %v5085_v63, %v15268_v39  ;;  %v15270_v5 = vld [vmem:[#allocation235_spill] sm:$0xff]  ;;  %v15275_v9 = vld [vmem:[#allocation232_spill] sm:$0xff]  ;;  %v15277_v19 = vld [vmem:[#allocation501_spill] sm:$0xff] }
 0x374   :  { %v4942_v51 = vmul.f32 %v15263_v59, %v10931_v7  ;;  %v10958_v43 = vmax.f32 %v15270_v5, %v2991_v32  ;;  %v15272_v59 = vld [vmem:[#allocation231_spill] sm:$0xff]  ;;  %v3580_v3 = vadd.f32 %v3579_v0, %v15274_v47  ;;  %v3587_v8 = vsel %vm3574_vm3, %v3461_v31, 0.0  ;;  %v15278_v39 = vld [vmem:[#allocation240_spill] sm:$0xff] }
 0x375   :  { %15267 = vst [vmem:[#allocation526_spill] sm:$0xff] %v10952_v26  ;;  %15269 = vst [vmem:[#allocation527_spill] sm:$0xff] %v10955_v2  ;;  %v10961_v7 = vmax.f32 %v15272_v59, %v2990_v55  ;;  %v15276_v45 = vunpack.c.h.bf16 %v9669_v48  ;;  %v3584_v54 = vadd.f32 %v3583_v44, %v15277_v19  ;;  %v5093_v63 = vsel %vm3574_vm3, %v4944_v6, 0.0  ;;  %v15281_v31 = vld [vmem:[#allocation16_spill] sm:$0xff]  ;;  %v2712_v2 = vpop.permute.xlu1 %2711  ;;  %v15284_v6 = vld [vmem:[#allocation357_spill] sm:$0xff] }
 0x376   :  { %15271 = vst [vmem:[#allocation110_spill] sm:$0xff] %v10958_v43  ;;  %v5089_v52 = vsel %vm3574_vm3, %v4942_v51, 0.0  ;;  %v15279_v5 = vunpack.c.h.bf16 %v9768_v33  ;;  %v15280_v55 = vunpack.c.h.bf16 %v9292_v62  ;;  %v15282_v59 = vunpack.c.h.bf16 %v15281_v31  ;;  %v15287_v62 = vld [vmem:[#allocation350_spill] sm:$0xff]  ;;  %3581 = vadd.xlane.f32.xlu1 %v3580_v3 }
 0x377   :  { %15273 = vst [vmem:[#allocation146_spill] sm:$0xff] %v10961_v7  ;;  %v3465_v37 = vmul.f32 %v15276_v45, %v15275_v9  ;;  %v2710_v9 = vpop.permute.xlu0 %2709  ;;  %v3591_v44 = vsel %vm3574_vm3, %v3463_v22, 0.0  ;;  %v15283_v45 = vld [vmem:[#allocation361_spill] sm:$0xff]  ;;  %3585 = vadd.xlane.f32.xlu0 %v3584_v54  ;;  %v15289_v26 = vld [vmem:[#allocation58_spill] sm:$0xff]  ;;  %v15290_v31 = vunpack.c.h.bf16 %v9762_v16  ;;  %v15293_v22 = vld [vmem:[#allocation239_spill] sm:$0xff] }
 0x378   :  { %v3467_v32 = vmul.f32 %v15279_v5, %v15278_v39  ;;  %v4948_v0 = vmul.f32 %v15280_v55, %v10958_v43  ;;  %v4946_v47 = vmul.f32 %v15282_v59, %v10961_v7  ;;  %v2993_v51 = vsel %vm2913_vm2, %v15283_v45, %v2712_v2  ;;  %v15285_v39 = vld [vmem:[#allocation440_spill] sm:$0xff]  ;;  %v15291_v43 = vld [vmem:[#allocation243_spill] sm:$0xff]  ;;  %v15295_v2 = vld [vmem:[#allocation74_spill] sm:$0xff] }
 0x379   :  { %v2992_v19 = vsel %vm2913_vm2, %v15284_v6, %v2710_v9  ;;  %v10986_v5 = vadd.f32 %v5089_v52, %v15285_v39  ;;  %v10989_v55 = vadd.f32 %v5093_v63, %v15287_v62  ;;  %v3469_v59 = vmul.f32 %v15290_v31, %v15289_v26  ;;  %v15296_v54 = vld [vmem:[#allocation509_spill] sm:$0xff]  ;;  %v15297_v39 = vld [vmem:[#allocation504_spill] sm:$0xff]  ;;  %v15301_v3 = vld [vmem:[#allocation374_spill] sm:$0xff] }
 0x37a   :  { %v10995_v7 = vmax.f32 %v15291_v43, %v2993_v51  ;;  %v10998_v33 = vmax.f32 %v15293_v22, %v2992_v19  ;;  %v3588_v9 = vadd.f32 %v3587_v8, %v15295_v2  ;;  %v3592_v45 = vadd.f32 %v3591_v44, %v15296_v54  ;;  %v15299_v43 = vld [vmem:[#allocation20_spill] sm:$0xff]  ;;  %v2716_v22 = vpop.permute.xlu1 %2715  ;;  %v15303_v2 = vld [vmem:[#allocation369_spill] sm:$0xff] }
 0x37b   :  { %15286 = vst [vmem:[#allocation313_spill] sm:$0xff] %v10986_v5  ;;  %15288 = vst [vmem:[#allocation309_spill] sm:$0xff] %v10989_v55  ;;  %v3595_v52 = vsel %vm3574_vm3, %v3465_v37, 0.0  ;;  %v5097_v63 = vsel %vm3574_vm3, %v4946_v47, 0.0  ;;  %v5101_v6 = vsel %vm3574_vm3, %v4948_v0, 0.0  ;;  %v15298_v26 = vunpack.c.h.bf16 %v9828_v28  ;;  %v2714_v44 = vpop.permute.xlu0 %2713  ;;  %v15304_v0 = vld [vmem:[#allocation365_spill] sm:$0xff] }
 0x37c   :  { %15292 = vst [vmem:[#allocation200_spill] sm:$0xff] %v10995_v7  ;;  %15294 = vst [vmem:[#allocation474_spill] sm:$0xff] %v10998_v33  ;;  %v15300_v51 = vunpack.c.h.bf16 %v15299_v43  ;;  %v15302_v31 = vunpack.c.h.bf16 %v15301_v3  ;;  %v3599_v37 = vsel %vm3574_vm3, %v3467_v32, 0.0  ;;  %v2995_v47 = vsel %vm2913_vm2, %v15303_v2, %v2716_v22  ;;  %3589 = vadd.xlane.f32.xlu0 %v3588_v9  ;;  %v15307_v43 = vld [vmem:[#allocation55_spill] sm:$0xff]  ;;  %3593 = vadd.xlane.f32.xlu1 %v3592_v45  ;;  %v15314_v2 = vld [vmem:[#allocation500_spill] sm:$0xff] }
 0x37d   :  { %v3471_v62 = vmul.f32 %v15298_v26, %v15297_v39  ;;  %v2994_v54 = vsel %vm2913_vm2, %v15304_v0, %v2714_v44  ;;  %v15305_v39 = vld [vmem:[#allocation54_spill] sm:$0xff]  ;;  %v15309_v55 = vld [vmem:[#allocation251_spill] sm:$0xff]  ;;  %v3603_v22 = vsel %vm3574_vm3, %v3469_v59, 0.0  ;;  %v15315_v9 = vunpack.c.h.bf16 %v9822_v40 }
 0x37e   :  { %v4952_v19 = vmul.f32 %v15300_v51, %v10995_v7  ;;  %v4950_v8 = vmul.f32 %v15302_v31, %v10998_v33  ;;  %v11020_v26 = vadd.f32 %v5097_v63, %v15305_v39  ;;  %v11023_v51 = vadd.f32 %v5101_v6, %v15307_v43  ;;  %v15311_v31 = vld [vmem:[#allocation247_spill] sm:$0xff]  ;;  %v15316_v63 = vld [vmem:[#allocation17_spill] sm:$0xff] }
 0x37f   :  { %v11026_v3 = vmax.f32 %v15309_v55, %v2995_v47  ;;  %v11029_v5 = vmax.f32 %v15311_v31, %v2994_v54  ;;  %v15313_v32 = vld [vmem:[#allocation511_spill] sm:$0xff]  ;;  %v3473_v44 = vmul.f32 %v15315_v9, %v15314_v2  ;;  %v3600_v0 = vadd.f32 %v3599_v37, %v15316_v63  ;;  %v15317_v55 = vld [vmem:[#allocation70_spill] sm:$0xff]  ;;  %v2720_v31 = vpop.permute.xlu1 %2719  ;;  %v15321_v2 = vld [vmem:[#allocation377_spill] sm:$0xff] }
 0x380   :  { %15306 = vst [vmem:[#allocation195_spill] sm:$0xff] %v11020_v26  ;;  %15308 = vst [vmem:[#allocation191_spill] sm:$0xff] %v11023_v51  ;;  %v3596_v7 = vadd.f32 %v3595_v52, %v15313_v32  ;;  %v5105_v6 = vsel %vm3574_vm3, %v4950_v8, 0.0  ;;  %v5109_v39 = vsel %vm3574_vm3, %v4952_v19, 0.0  ;;  %v15318_v47 = vunpack.c.h.bf16 %v9904_v20  ;;  %v2718_v32 = vpop.permute.xlu0 %2717  ;;  %v15322_v19 = vld [vmem:[#allocation373_spill] sm:$0xff]  ;;  %v15329_v51 = vld [vmem:[#allocation259_spill] sm:$0xff] }
 0x381   :  { %15310 = vst [vmem:[#allocation49_spill] sm:$0xff] %v11026_v3  ;;  %15312 = vst [vmem:[#allocation358_spill] sm:$0xff] %v11029_v5  ;;  %v15319_v45 = vunpack.c.h.bf16 %v9397_v18  ;;  %v15320_v59 = vunpack.c.h.bf16 %v9403_v21  ;;  %v3607_v37 = vsel %vm3574_vm3, %v3471_v62, 0.0  ;;  %v2997_v8 = vsel %vm2913_vm2, %v15321_v2, %v2720_v31  ;;  %v15323_v63 = vld [vmem:[#allocation9_spill] sm:$0xff]  ;;  %v15325_v18 = vld [vmem:[#allocation454_spill] sm:$0xff]  ;;  %3601 = vadd.xlane.f32.xlu1 %v3600_v0 }
 0x382   :  { %v3475_v54 = vmul.f32 %v15318_v47, %v15317_v55  ;;  %v2996_v9 = vsel %vm2913_vm2, %v15322_v19, %v2718_v32  ;;  %3597 = vadd.xlane.f32.xlu0 %v3596_v7  ;;  %v11054_v55 = vadd.f32 %v5105_v6, %v15323_v63  ;;  %v11057_v47 = vadd.f32 %v5109_v39, %v15325_v18  ;;  %v15331_v62 = vld [vmem:[#allocation255_spill] sm:$0xff]  ;;  %v15335_v63 = vld [vmem:[#allocation14_spill] sm:$0xff]  ;;  %v15336_v18 = vld [vmem:[#allocation65_spill] sm:$0xff] }
 0x383   :  { %v4956_v52 = vmul.f32 %v15319_v45, %v11026_v3  ;;  %v4954_v43 = vmul.f32 %v15320_v59, %v11029_v5  ;;  %v15327_v45 = vld [vmem:[#allocation73_spill] sm:$0xff]  ;;  %v15328_v21 = vunpack.c.h.bf16 %v9885_v58  ;;  %v11063_v26 = vmax.f32 %v15329_v51, %v2997_v8  ;;  %v15333_v31 = vld [vmem:[#allocation515_spill] sm:$0xff]  ;;  %v15340_v0 = vld [vmem:[#allocation28_spill] sm:$0xff] }
 0x384   :  { %15324 = vst [vmem:[#allocation321_spill] sm:$0xff] %v11054_v55  ;;  %15326 = vst [vmem:[#allocation317_spill] sm:$0xff] %v11057_v47  ;;  %v11066_v3 = vmax.f32 %v15331_v62, %v2996_v9  ;;  %v3604_v32 = vadd.f32 %v3603_v22, %v15333_v31  ;;  %v15334_v7 = vld [vmem:[#allocation23_spill] sm:$0xff]  ;;  %v3611_v6 = vsel %vm3574_vm3, %v3473_v44, 0.0  ;;  %v15338_v51 = vld [vmem:[#allocation29_spill] sm:$0xff]  ;;  %v15341_v62 = vunpack.c.h.bf16 %v15340_v0  ;;  %v2724_v31 = vpop.permute.xlu1 %2723 }
 0x385   :  { %v3477_v59 = vmul.f32 %v15328_v21, %v15327_v45  ;;  %15330 = vst [vmem:[#allocation204_spill] sm:$0xff] %v11063_v26  ;;  %v3608_v2 = vadd.f32 %v3607_v37, %v15334_v7  ;;  %v5113_v39 = vsel %vm3574_vm3, %v4954_v43, 0.0  ;;  %v5117_v19 = vsel %vm3574_vm3, %v4956_v52, 0.0  ;;  %v2722_v37 = vpop.permute.xlu0 %2721  ;;  %v15342_v7 = vld [vmem:[#allocation385_spill] sm:$0xff]  ;;  %v15348_v55 = vld [vmem:[#allocation267_spill] sm:$0xff] }
 0x386   :  { %15332 = vst [vmem:[#allocation216_spill] sm:$0xff] %v11066_v3  ;;  %v15337_v45 = vunpack.c.h.bf16 %v15336_v18  ;;  %v15339_v8 = vunpack.c.h.bf16 %v15338_v51  ;;  %v4958_v22 = vmul.f32 %v15341_v62, %v11066_v3  ;;  %v3615_v44 = vsel %vm3574_vm3, %v3475_v54, 0.0  ;;  %v15343_v52 = vld [vmem:[#allocation381_spill] sm:$0xff]  ;;  %3605 = vadd.xlane.f32.xlu0 %v3604_v32  ;;  %v15346_v51 = vld [vmem:[#allocation366_spill] sm:$0xff]  ;;  %v15350_v62 = vld [vmem:[#allocation263_spill] sm:$0xff] }
 0x387   :  { %v2999_v43 = vsel %vm2913_vm2, %v15342_v7, %v2724_v31  ;;  %v2998_v47 = vsel %vm2913_vm2, %v15343_v52, %v2722_v37  ;;  %3609 = vadd.xlane.f32.xlu1 %v3608_v2  ;;  %v15352_v54 = vld [vmem:[#allocation45_spill] sm:$0xff]  ;;  %v3619_v31 = vsel %vm3574_vm3, %v3477_v59, 0.0  ;;  %v15353_v7 = vld [vmem:[#allocation15_spill] sm:$0xff]  ;;  %v15362_v59 = vld [vmem:[#allocation30_spill] sm:$0xff] }
 0x388   :  { %v3479_v21 = vmul.f32 %v15337_v45, %v15335_v63  ;;  %v4960_v9 = vmul.f32 %v15339_v8, %v11063_v26  ;;  %v15344_v63 = vld [vmem:[#allocation13_spill] sm:$0xff]  ;;  %v11091_v8 = vadd.f32 %v5117_v19, %v15346_v51  ;;  %v11094_v0 = vmax.f32 %v15348_v55, %v2999_v43  ;;  %v15357_v55 = vld [vmem:[#allocation43_spill] sm:$0xff]  ;;  %v15358_v43 = vld [vmem:[#allocation304_spill] sm:$0xff]  ;;  %v2728_v5 = vpop.permute.xlu1 %2727 }
 0x389   :  { %v11088_v45 = vadd.f32 %v5113_v39, %v15344_v63  ;;  %v11097_v26 = vmax.f32 %v15350_v62, %v2998_v47  ;;  %v3612_v3 = vadd.f32 %v3611_v6, %v15352_v54  ;;  %v15354_v37 = vld [vmem:[#allocation173_spill] sm:$0xff]  ;;  %v15356_v39 = vld [vmem:[#allocation518_spill] sm:$0xff]  ;;  %v5121_v19 = vsel %vm3574_vm3, %v4958_v22, 0.0  ;;  %v15360_v2 = vld [vmem:[#allocation31_spill] sm:$0xff] }
 0x38a   :  { %15347 = vst [vmem:[#allocation203_spill] sm:$0xff] %v11091_v8  ;;  %15349 = vst [vmem:[#allocation199_spill] sm:$0xff] %v11094_v0  ;;  %v15355_v32 = vunpack.c.h.bf16 %v15354_v37  ;;  %v3616_v63 = vadd.f32 %v3615_v44, %v15356_v39  ;;  %v5125_v51 = vsel %vm3574_vm3, %v4960_v9, 0.0  ;;  %v15359_v8 = vunpack.c.h.bf16 %v15358_v43  ;;  %v15365_v9 = vld [vmem:[#allocation389_spill] sm:$0xff]  ;;  %v15373_v33 = vld [vmem:[#allocation275_spill] sm:$0xff] }
 0x38b   :  { %15345 = vst [vmem:[#allocation118_spill] sm:$0xff] %v11088_v45  ;;  %15351 = vst [vmem:[#allocation532_spill] sm:$0xff] %v11097_v26  ;;  %v15361_v62 = vunpack.c.h.bf16 %v15360_v2  ;;  %v15363_v54 = vunpack.c.h.bf16 %v15362_v59  ;;  %v3623_v44 = vsel %vm3574_vm3, %v3479_v21, 0.0  ;;  %3613 = vadd.xlane.f32.xlu0 %v3612_v3  ;;  %v15368_v2 = vld [vmem:[#allocation18_spill] sm:$0xff]  ;;  %v15371_v59 = vld [vmem:[#allocation193_spill] sm:$0xff] }
 0x38c   :  { %v3481_v52 = vmul.f32 %v15355_v32, %v15353_v7  ;;  %v3483_v47 = vmul.f32 %v15359_v8, %v15357_v55  ;;  %v2726_v7 = vpop.permute.xlu0 %2725  ;;  %v15364_v32 = vld [vmem:[#allocation393_spill] sm:$0xff]  ;;  %v15366_v8 = vld [vmem:[#allocation252_spill] sm:$0xff]  ;;  %v15375_v21 = vld [vmem:[#allocation271_spill] sm:$0xff]  ;;  %3617 = vadd.xlane.f32.xlu1 %v3616_v63 }
 0x38d   :  { %v4964_v6 = vmul.f32 %v15361_v62, %v11094_v0  ;;  %v4962_v45 = vmul.f32 %v15363_v54, %v11097_v26  ;;  %v3001_v22 = vsel %vm2913_vm2, %v15364_v32, %v2728_v5  ;;  %v3000_v39 = vsel %vm2913_vm2, %v15365_v9, %v2726_v7  ;;  %v15370_v0 = vld [vmem:[#allocation510_spill] sm:$0xff]  ;;  %v15384_v63 = vld [vmem:[#allocation33_spill] sm:$0xff] }
 0x38e   :  { %v11122_v55 = vadd.f32 %v5121_v19, %v15366_v8  ;;  %v11125_v62 = vadd.f32 %v5125_v51, %v15368_v2  ;;  %v15372_v54 = vunpack.c.h.bf16 %v15371_v59  ;;  %v11131_v43 = vmax.f32 %v15373_v33, %v3001_v22  ;;  %v15377_v5 = vld [vmem:[#allocation106_spill] sm:$0xff]  ;;  %v15380_v2 = vld [vmem:[#allocation205_spill] sm:$0xff]  ;;  %v15382_v33 = vld [vmem:[#allocation268_spill] sm:$0xff] }
 0x38f   :  { %v11134_v37 = vmax.f32 %v15375_v21, %v3000_v39  ;;  %v3620_v7 = vadd.f32 %v3619_v31, %v15377_v5  ;;  %v15378_v3 = vld [vmem:[#allocation114_spill] sm:$0xff]  ;;  %v3627_v19 = vsel %vm3574_vm3, %v3481_v52, 0.0  ;;  %v5129_v51 = vsel %vm3574_vm3, %v4962_v45, 0.0  ;;  %v2732_v5 = vpop.permute.xlu1 %2731 }
 0x390   :  { %15367 = vst [vmem:[#allocation533_spill] sm:$0xff] %v11122_v55  ;;  %15369 = vst [vmem:[#allocation524_spill] sm:$0xff] %v11125_v62  ;;  %v3485_v26 = vmul.f32 %v15372_v54, %v15370_v0  ;;  %v3624_v32 = vadd.f32 %v3623_v44, %v15378_v3  ;;  %v5133_v9 = vsel %vm3574_vm3, %v4964_v6, 0.0  ;;  %v15379_v8 = vld [vmem:[#allocation22_spill] sm:$0xff]  ;;  %v15381_v0 = vunpack.c.h.bf16 %v15380_v2  ;;  %v2730_v44 = vpop.permute.xlu0 %2729  ;;  %v15386_v3 = vld [vmem:[#allocation401_spill] sm:$0xff] }
 0x391   :  { %15374 = vst [vmem:[#allocation329_spill] sm:$0xff] %v11131_v43  ;;  %15376 = vst [vmem:[#allocation325_spill] sm:$0xff] %v11134_v37  ;;  %v15383_v22 = vunpack.c.h.bf16 %v15382_v33  ;;  %v15385_v21 = vunpack.c.h.bf16 %v15384_v63  ;;  %v3631_v52 = vsel %vm3574_vm3, %v3483_v47, 0.0  ;;  %v3003_v45 = vsel %vm2913_vm2, %v15386_v3, %v2732_v5  ;;  %v15387_v6 = vld [vmem:[#allocation397_spill] sm:$0xff]  ;;  %3621 = vadd.xlane.f32.xlu0 %v3620_v7  ;;  %v15390_v33 = vld [vmem:[#allocation51_spill] sm:$0xff] }
 0x392   :  { %v3487_v54 = vmul.f32 %v15381_v0, %v15379_v8  ;;  %v3002_v62 = vsel %vm2913_vm2, %v15387_v6, %v2730_v44  ;;  %v15388_v8 = vld [vmem:[#allocation90_spill] sm:$0xff]  ;;  %v15392_v55 = vld [vmem:[#allocation283_spill] sm:$0xff]  ;;  %3625 = vadd.xlane.f32.xlu1 %v3624_v32  ;;  %v3635_v5 = vsel %vm3574_vm3, %v3485_v26, 0.0  ;;  %v15397_v3 = vld [vmem:[#allocation21_spill] sm:$0xff] }
 0x393   :  { %v4968_v39 = vmul.f32 %v15383_v22, %v11131_v43  ;;  %v4966_v31 = vmul.f32 %v15385_v21, %v11134_v37  ;;  %v11156_v0 = vadd.f32 %v5129_v51, %v15388_v8  ;;  %v11159_v22 = vadd.f32 %v5133_v9, %v15390_v33  ;;  %v15394_v21 = vld [vmem:[#allocation279_spill] sm:$0xff]  ;;  %v15396_v47 = vld [vmem:[#allocation522_spill] sm:$0xff]  ;;  %v15398_v44 = vld [vmem:[#allocation316_spill] sm:$0xff] }
 0x394   :  { %v11162_v63 = vmax.f32 %v15392_v55, %v3003_v45  ;;  %v11165_v43 = vmax.f32 %v15394_v21, %v3002_v62  ;;  %v3628_v37 = vadd.f32 %v3627_v19, %v15396_v47  ;;  %v15399_v7 = vunpack.c.h.bf16 %v15398_v44  ;;  %v15400_v51 = vld [vmem:[#allocation122_spill] sm:$0xff]  ;;  %v15401_v55 = vld [vmem:[#allocation516_spill] sm:$0xff]  ;;  %v15404_v32 = vld [vmem:[#allocation63_spill] sm:$0xff]  ;;  %v2736_v44 = vpop.permute.xlu1 %2735 }
 0x395   :  { %15389 = vst [vmem:[#allocation338_spill] sm:$0xff] %v11156_v0  ;;  %15391 = vst [vmem:[#allocation478_spill] sm:$0xff] %v11159_v22  ;;  %v3632_v8 = vadd.f32 %v3631_v52, %v15400_v51  ;;  %v5137_v9 = vsel %vm3574_vm3, %v4966_v31, 0.0  ;;  %v5141_v33 = vsel %vm3574_vm3, %v4968_v39, 0.0  ;;  %v15402_v45 = vld [vmem:[#allocation332_spill] sm:$0xff]  ;;  %v15405_v21 = vunpack.c.h.bf16 %v15404_v32  ;;  %v15409_v39 = vld [vmem:[#allocation405_spill] sm:$0xff] }
 0x396   :  { %15393 = vst [vmem:[#allocation211_spill] sm:$0xff] %v11162_v63  ;;  %15395 = vst [vmem:[#allocation207_spill] sm:$0xff] %v11165_v43  ;;  %v3489_v6 = vmul.f32 %v15399_v7, %v15397_v3  ;;  %v15403_v22 = vunpack.c.h.bf16 %v15402_v45  ;;  %v15406_v26 = vld [vmem:[#allocation276_spill] sm:$0xff]  ;;  %v2734_v3 = vpop.permute.xlu0 %2733  ;;  %v3639_v52 = vsel %vm3574_vm3, %v3487_v54, 0.0  ;;  %v15408_v7 = vld [vmem:[#allocation407_spill] sm:$0xff]  ;;  %3629 = vadd.xlane.f32.xlu0 %v3628_v37 }
 0x397   :  { %v4972_v19 = vmul.f32 %v15405_v21, %v11162_v63  ;;  %v15407_v47 = vunpack.c.h.bf16 %v15406_v26  ;;  %v3005_v31 = vsel %vm2913_vm2, %v15408_v7, %v2736_v44  ;;  %v3004_v51 = vsel %vm2913_vm2, %v15409_v39, %v2734_v3  ;;  %v15412_v32 = vld [vmem:[#allocation519_spill] sm:$0xff]  ;;  %v15414_v63 = vld [vmem:[#allocation98_spill] sm:$0xff]  ;;  %v15415_v26 = vld [vmem:[#allocation320_spill] sm:$0xff]  ;;  %3633 = vadd.xlane.f32.xlu1 %v3632_v8 }
 0x398   :  { %v3491_v62 = vmul.f32 %v15403_v22, %v15401_v55  ;;  %v15410_v22 = vld [vmem:[#allocation264_spill] sm:$0xff]  ;;  %v11193_v21 = vadd.f32 %v5141_v33, %v15412_v32  ;;  %v15417_v45 = vld [vmem:[#allocation291_spill] sm:$0xff]  ;;  %v15421_v44 = vld [vmem:[#allocation53_spill] sm:$0xff] }
 0x399   :  { %v4970_v0 = vmul.f32 %v15407_v47, %v11165_v43  ;;  %v11190_v55 = vadd.f32 %v5137_v9, %v15410_v22  ;;  %v15416_v47 = vunpack.c.h.bf16 %v15415_v26  ;;  %v11199_v2 = vmax.f32 %v15417_v45, %v3005_v31  ;;  %v15419_v54 = vld [vmem:[#allocation287_spill] sm:$0xff]  ;;  %v15422_v37 = vld [vmem:[#allocation134_spill] sm:$0xff]  ;;  %v15423_v22 = vld [vmem:[#allocation101_spill] sm:$0xff] }
 0x39a   :  { %15413 = vst [vmem:[#allocation178_spill] sm:$0xff] %v11193_v21  ;;  %v11202_v59 = vmax.f32 %v15419_v54, %v3004_v51  ;;  %v3636_v3 = vadd.f32 %v3635_v5, %v15421_v44  ;;  %v3640_v7 = vadd.f32 %v3639_v52, %v15422_v37  ;;  %v3643_v9 = vsel %vm3574_vm3, %v3489_v6, 0.0  ;;  %v15424_v32 = vld [vmem:[#allocation103_spill] sm:$0xff]  ;;  %v15426_v45 = vld [vmem:[#allocation528_spill] sm:$0xff]  ;;  %v15428_v8 = vld [vmem:[#allocation530_spill] sm:$0xff]  ;;  %v2740_v44 = vpop.permute.xlu1 %2739  ;;  %v2738_v52 = vpop.permute.xlu0 %2737 }
 0x39b   :  { %15411 = vst [vmem:[#allocation174_spill] sm:$0xff] %v11190_v55  ;;  %v3493_v43 = vmul.f32 %v15416_v47, %v15414_v63  ;;  %15418 = vst [vmem:[#allocation190_spill] sm:$0xff] %v11199_v2  ;;  %v5145_v33 = vsel %vm3574_vm3, %v4970_v0, 0.0  ;;  %v5149_v39 = vsel %vm3574_vm3, %v4972_v19, 0.0  ;;  %v15425_v63 = vunpack.c.h.bf16 %v15424_v32  ;;  %v15430_v37 = vld [vmem:[#allocation411_spill] sm:$0xff]  ;;  %v15431_v19 = vld [vmem:[#allocation409_spill] sm:$0xff] }
 0x39c   :  { %15420 = vst [vmem:[#allocation535_spill] sm:$0xff] %v11202_v59  ;;  %v15427_v31 = vunpack.c.h.bf16 %v15426_v45  ;;  %v15429_v54 = vunpack.c.h.bf16 %v15428_v8  ;;  %v3647_v6 = vsel %vm3574_vm3, %v3491_v62, 0.0  ;;  %v3007_v0 = vsel %vm2913_vm2, %v15430_v37, %v2740_v44  ;;  %3637 = vadd.xlane.f32.xlu0 %v3636_v3  ;;  %v15434_v45 = vld [vmem:[#allocation138_spill] sm:$0xff]  ;;  %v15436_v55 = vld [vmem:[#allocation299_spill] sm:$0xff]  ;;  %3641 = vadd.xlane.f32.xlu1 %v3640_v7  ;;  %v15441_v37 = vld [vmem:[#allocation105_spill] sm:$0xff] }
 0x39d   :  { %v3495_v47 = vmul.f32 %v15425_v63, %v15423_v22  ;;  %v3006_v21 = vsel %vm2913_vm2, %v15431_v19, %v2738_v52  ;;  %v15432_v22 = vld [vmem:[#allocation394_spill] sm:$0xff]  ;;  %v11230_v8 = vmax.f32 %v15436_v55, %v3007_v0  ;;  %v3651_v44 = vsel %vm3574_vm3, %v3493_v43, 0.0  ;;  %v15446_v0 = vld [vmem:[#allocation457_spill] sm:$0xff]  ;;  %v15448_v7 = vld [vmem:[#allocation459_spill] sm:$0xff] }
 0x39e   :  { %v4976_v51 = vmul.f32 %v15427_v31, %v11199_v2  ;;  %v4974_v5 = vmul.f32 %v15429_v54, %v11202_v59  ;;  %v11224_v63 = vadd.f32 %v5145_v33, %v15432_v22  ;;  %v11227_v31 = vadd.f32 %v5149_v39, %v15434_v45  ;;  %v15438_v54 = vld [vmem:[#allocation295_spill] sm:$0xff]  ;;  %v15440_v62 = vld [vmem:[#allocation450_spill] sm:$0xff]  ;;  %v15444_v33 = vld [vmem:[#allocation60_spill] sm:$0xff] }
 0x39f   :  { %15437 = vst [vmem:[#allocation333_spill] sm:$0xff] %v11230_v8  ;;  %v11233_v2 = vmax.f32 %v15438_v54, %v3006_v21  ;;  %v3644_v59 = vadd.f32 %v3643_v9, %v15440_v62  ;;  %v15442_v52 = vld [vmem:[#allocation442_spill] sm:$0xff]  ;;  %v3648_v22 = vadd.f32 %v3647_v6, %v15444_v33  ;;  %v15449_v54 = vunpack.c.h.bf16 %v15448_v7  ;;  %v15450_v43 = vld [vmem:[#allocation69_spill] sm:$0xff] }
 0x3a0   :  { %15433 = vst [vmem:[#allocation434_spill] sm:$0xff] %v11224_v63  ;;  %15435 = vst [vmem:[#allocation337_spill] sm:$0xff] %v11227_v31  ;;  %v15443_v3 = vunpack.c.h.bf16 %v15442_v52  ;;  %v5153_v39 = vsel %vm3574_vm3, %v4974_v5, 0.0  ;;  %v5157_v45 = vsel %vm3574_vm3, %v4976_v51, 0.0  ;;  %v15445_v55 = vld [vmem:[#allocation466_spill] sm:$0xff]  ;;  %v15447_v31 = vunpack.c.h.bf16 %v15446_v0  ;;  %v2744_v52 = vpop.permute.xlu1 %2743  ;;  %v15453_v51 = vld [vmem:[#allocation413_spill] sm:$0xff] }
 0x3a1   :  { %15439 = vst [vmem:[#allocation418_spill] sm:$0xff] %v11233_v2  ;;  %v4980_v9 = vmul.f32 %v15449_v54, %v11230_v8  ;;  %v15451_v62 = vunpack.c.h.bf16 %v15450_v43  ;;  %v3655_v6 = vsel %vm3574_vm3, %v3495_v47, 0.0  ;;  %3645 = vadd.xlane.f32.xlu0 %v3644_v59  ;;  %v15456_v7 = vld [vmem:[#allocation149_spill] sm:$0xff]  ;;  %v15458_v8 = vld [vmem:[#allocation523_spill] sm:$0xff]  ;;  %3649 = vadd.xlane.f32.xlu1 %v3648_v22  ;;  %v15471_v22 = vld [vmem:[#allocation46_spill] sm:$0xff] }
 0x3a2   :  { %v3497_v19 = vmul.f32 %v15443_v3, %v15441_v37  ;;  %v3499_v21 = vmul.f32 %v15447_v31, %v15445_v55  ;;  %v2742_v37 = vpop.permute.xlu0 %2741  ;;  %v15452_v3 = vld [vmem:[#allocation415_spill] sm:$0xff]  ;;  %v15454_v31 = vld [vmem:[#allocation398_spill] sm:$0xff]  ;;  %v11261_v54 = vadd.f32 %v5157_v45, %v15456_v7 }
 0x3a3   :  { %v4978_v63 = vmul.f32 %v15451_v62, %v11233_v2  ;;  %v3009_v5 = vsel %vm2913_vm2, %v15452_v3, %v2744_v52  ;;  %v3008_v33 = vsel %vm2913_vm2, %v15453_v51, %v2742_v37  ;;  %v11258_v55 = vadd.f32 %v5153_v39, %v15454_v31  ;;  %v15459_v43 = vld [vmem:[#allocation111_spill] sm:$0xff]  ;;  %v15465_v52 = vld [vmem:[#allocation529_spill] sm:$0xff]  ;;  %v15467_v31 = vld [vmem:[#allocation126_spill] sm:$0xff] }
 0x3a4   :  { %15457 = vst [vmem:[#allocation57_spill] sm:$0xff] %v11261_v54  ;;  %v15460_v62 = vunpack.c.h.bf16 %v15459_v43  ;;  %v15461_v0 = vld [vmem:[#allocation307_spill] sm:$0xff]  ;;  %v3652_v37 = vadd.f32 %v3651_v44, %v15465_v52  ;;  %v3659_v39 = vsel %vm3574_vm3, %v3497_v19, 0.0  ;;  %v5165_v51 = vsel %vm3574_vm3, %v4980_v9, 0.0  ;;  %v15473_v52 = vld [vmem:[#allocation441_spill] sm:$0xff] }
 0x3a5   :  { %15455 = vst [vmem:[#allocation422_spill] sm:$0xff] %v11258_v55  ;;  %v11267_v32 = vmax.f32 %v15461_v0, %v3009_v5  ;;  %v15463_v47 = vld [vmem:[#allocation303_spill] sm:$0xff]  ;;  %v5161_v45 = vsel %vm3574_vm3, %v4978_v63, 0.0  ;;  %v15469_v0 = vld [vmem:[#allocation162_spill] sm:$0xff]  ;;  %v3663_v19 = vsel %vm3574_vm3, %v3499_v21, 0.0 }
 0x3a6   :  { %v3501_v2 = vmul.f32 %v15460_v62, %v15458_v8  ;;  %v11270_v26 = vmax.f32 %v15463_v47, %v3008_v33  ;;  %v15466_v59 = vld [vmem:[#allocation531_spill] sm:$0xff]  ;;  %v15468_v8 = vunpack.c.h.bf16 %v10466_v1  ;;  %v15470_v5 = vunpack.c.h.bf16 %v15469_v0  ;;  %v2748_v47 = vpop.permute.xlu1 %2747  ;;  %3653 = vadd.xlane.f32.xlu0 %v3652_v37  ;;  %v15477_v0 = vld [vmem:[#allocation177_spill] sm:$0xff]  ;;  %v15483_v21 = vld [vmem:[#allocation150_spill] sm:$0xff] }
 0x3a7   :  { %15462 = vst [vmem:[#allocation219_spill] sm:$0xff] %v11267_v32  ;;  %v3656_v3 = vadd.f32 %v3655_v6, %v15466_v59  ;;  %v15472_v62 = vunpack.c.h.bf16 %v15471_v22  ;;  %v2746_v6 = vpop.permute.xlu0 %2745  ;;  %v3011_v63 = vsel %vm2913_vm2, %v15473_v52, %v2748_v47  ;;  %v15474_v9 = vld [vmem:[#allocation423_spill] sm:$0xff]  ;;  %v15484_v52 = vld [vmem:[#allocation117_spill] sm:$0xff] }
 0x3a8   :  { %15464 = vst [vmem:[#allocation215_spill] sm:$0xff] %v11270_v26  ;;  %v3503_v7 = vmul.f32 %v15468_v8, %v15467_v31  ;;  %v4984_v33 = vmul.f32 %v15470_v5, %v11267_v32  ;;  %v3010_v59 = vsel %vm2913_vm2, %v15474_v9, %v2746_v6  ;;  %v15475_v31 = vld [vmem:[#allocation464_spill] sm:$0xff]  ;;  %v11295_v5 = vadd.f32 %v5165_v51, %v15477_v0  ;;  %v15479_v54 = vld [vmem:[#allocation315_spill] sm:$0xff] }
 0x3a9   :  { %v4982_v44 = vmul.f32 %v15472_v62, %v11270_v26  ;;  %v11292_v8 = vadd.f32 %v5161_v45, %v15475_v31  ;;  %v11298_v22 = vmax.f32 %v15479_v54, %v3011_v63  ;;  %v15481_v62 = vld [vmem:[#allocation311_spill] sm:$0xff]  ;;  %3657 = vadd.xlane.f32.xlu1 %v3656_v3  ;;  %v3660_v32 = vadd.f32 %v3659_v39, %v15483_v21  ;;  %v15487_v45 = vld [vmem:[#allocation66_spill] sm:$0xff]  ;;  %v15488_v54 = vld [vmem:[#allocation125_spill] sm:$0xff] }
 0x3aa   :  { %15478 = vst [vmem:[#allocation228_spill] sm:$0xff] %v11295_v5  ;;  %v11301_v55 = vmax.f32 %v15481_v62, %v3010_v59  ;;  %v3667_v47 = vsel %vm3574_vm3, %v3501_v2, 0.0  ;;  %v15485_v6 = vld [vmem:[#allocation119_spill] sm:$0xff]  ;;  %v3664_v31 = vadd.f32 %v3663_v19, %v15487_v45  ;;  %v5173_v0 = vsel %vm3574_vm3, %v4984_v33, 0.0  ;;  %v15491_v3 = vld [vmem:[#allocation76_spill] sm:$0xff]  ;;  %v2752_v26 = vpop.permute.xlu1 %2751 }
 0x3ab   :  { %15476 = vst [vmem:[#allocation346_spill] sm:$0xff] %v11292_v8  ;;  %15480 = vst [vmem:[#allocation345_spill] sm:$0xff] %v11298_v22  ;;  %v15486_v37 = vunpack.c.h.bf16 %v15485_v6  ;;  %v5169_v51 = vsel %vm3574_vm3, %v4982_v44, 0.0  ;;  %v15489_v63 = vld [vmem:[#allocation139_spill] sm:$0xff]  ;;  %v15492_v62 = vunpack.c.h.bf16 %v15491_v3  ;;  %v15493_v2 = vld [vmem:[#allocation288_spill] sm:$0xff]  ;;  %v3671_v19 = vsel %vm3574_vm3, %v3503_v7, 0.0  ;;  %3661 = vadd.xlane.f32.xlu0 %v3660_v32 }
 0x3ac   :  { %15482 = vst [vmem:[#allocation341_spill] sm:$0xff] %v11301_v55  ;;  %v15490_v5 = vunpack.c.h.bf16 %v15489_v63  ;;  %v15494_v21 = vunpack.c.h.bf16 %v15493_v2  ;;  %v15496_v33 = vld [vmem:[#allocation456_spill] sm:$0xff]  ;;  %v15504_v63 = vld [vmem:[#allocation323_spill] sm:$0xff]  ;;  %v15509_v32 = vld [vmem:[#allocation166_spill] sm:$0xff] }
 0x3ad   :  { %v3505_v9 = vmul.f32 %v15486_v37, %v15484_v52  ;;  %v4988_v39 = vmul.f32 %v15492_v62, %v11298_v22  ;;  %v2750_v52 = vpop.permute.xlu0 %2749  ;;  %v15495_v37 = vld [vmem:[#allocation469_spill] sm:$0xff]  ;;  %v15499_v3 = vld [vmem:[#allocation308_spill] sm:$0xff]  ;;  %v15506_v7 = vld [vmem:[#allocation319_spill] sm:$0xff]  ;;  %3665 = vadd.xlane.f32.xlu1 %v3664_v31 }
 0x3ae   :  { %v3507_v59 = vmul.f32 %v15490_v5, %v15488_v54  ;;  %v4986_v8 = vmul.f32 %v15494_v21, %v11301_v55  ;;  %v3013_v44 = vsel %vm2913_vm2, %v15495_v37, %v2752_v26  ;;  %v3012_v45 = vsel %vm2913_vm2, %v15496_v33, %v2750_v52  ;;  %v15497_v5 = vld [vmem:[#allocation412_spill] sm:$0xff]  ;;  %v15501_v22 = vld [vmem:[#allocation129_spill] sm:$0xff]  ;;  %v15508_v26 = vld [vmem:[#allocation462_spill] sm:$0xff] }
 0x3af   :  { %v11326_v54 = vadd.f32 %v5169_v51, %v15497_v5  ;;  %v11329_v62 = vadd.f32 %v5173_v0, %v15499_v3  ;;  %v15502_v2 = vld [vmem:[#allocation360_spill] sm:$0xff]  ;;  %v11335_v6 = vmax.f32 %v15504_v63, %v3013_v44  ;;  %v11338_v1 = vmax.f32 %v15506_v7, %v3012_v45  ;;  %v15510_v5 = vld [vmem:[#allocation133_spill] sm:$0xff]  ;;  %v2756_v7 = vpop.permute.xlu1 %2755 }
 0x3b0   :  { %v15503_v21 = vunpack.c.h.bf16 %v15502_v2  ;;  %v3668_v52 = vadd.f32 %v3667_v47, %v15508_v26  ;;  %v3672_v37 = vadd.f32 %v3671_v19, %v15509_v32  ;;  %v3675_v51 = vsel %vm3574_vm3, %v3505_v9, 0.0  ;;  %v15512_v63 = vld [vmem:[#allocation56_spill] sm:$0xff]  ;;  %v15516_v26 = vld [vmem:[#allocation490_spill] sm:$0xff] }
 0x3b1   :  { %15498 = vst [vmem:[#allocation426_spill] sm:$0xff] %v11326_v54  ;;  %15500 = vst [vmem:[#allocation428_spill] sm:$0xff] %v11329_v62  ;;  %v5177_v0 = vsel %vm3574_vm3, %v4986_v8, 0.0  ;;  %v5181_v33 = vsel %vm3574_vm3, %v4988_v39, 0.0  ;;  %v15513_v44 = vunpack.c.h.bf16 %v15512_v63  ;;  %v15514_v31 = vld [vmem:[#allocation52_spill] sm:$0xff]  ;;  %v2754_v19 = vpop.permute.xlu0 %2753  ;;  %v3679_v9 = vsel %vm3574_vm3, %v3507_v59, 0.0 }
 0x3b2   :  { %v3509_v55 = vmul.f32 %v15503_v21, %v15501_v22  ;;  %15505 = vst [vmem:[#allocation202_spill] sm:$0xff] %v11335_v6  ;;  %15507 = vst [vmem:[#allocation206_spill] sm:$0xff] %v11338_v1  ;;  %v15511_v22 = vunpack.c.h.bf16 %v10580_v46  ;;  %v15515_v21 = vunpack.c.h.bf16 %v15514_v31  ;;  %v3015_v8 = vsel %vm2913_vm2, %v15516_v26, %v2756_v7  ;;  %v15517_v39 = vld [vmem:[#allocation482_spill] sm:$0xff]  ;;  %3669 = vadd.xlane.f32.xlu0 %v3668_v52  ;;  %v15520_v63 = vld [vmem:[#allocation213_spill] sm:$0xff] }
 0x3b3   :  { %v4992_v45 = vmul.f32 %v15513_v44, %v11335_v6  ;;  %v3014_v32 = vsel %vm2913_vm2, %v15517_v39, %v2754_v19  ;;  %v11363_v44 = vadd.f32 %v5181_v33, %v15520_v63  ;;  %v15522_v62 = vld [vmem:[#allocation331_spill] sm:$0xff]  ;;  %3673 = vadd.xlane.f32.xlu1 %v3672_v37  ;;  %v15526_v59 = vld [vmem:[#allocation170_spill] sm:$0xff]  ;;  %v15527_v26 = vld [vmem:[#allocation137_spill] sm:$0xff] }
 0x3b4   :  { %v3511_v3 = vmul.f32 %v15511_v22, %v15510_v5  ;;  %v4990_v47 = vmul.f32 %v15515_v21, %v11338_v1  ;;  %v15518_v5 = vld [vmem:[#allocation324_spill] sm:$0xff]  ;;  %v11366_v31 = vmax.f32 %v15522_v62, %v3015_v8  ;;  %v15524_v21 = vld [vmem:[#allocation327_spill] sm:$0xff]  ;;  %v3676_v6 = vadd.f32 %v3675_v51, %v15526_v59  ;;  %v15531_v62 = vld [vmem:[#allocation145_spill] sm:$0xff] }
 0x3b5   :  { %v11360_v22 = vadd.f32 %v5177_v0, %v15518_v5  ;;  %15521 = vst [vmem:[#allocation227_spill] sm:$0xff] %v11363_v44  ;;  %v11369_v54 = vmax.f32 %v15524_v21, %v3014_v32  ;;  %v3683_v7 = vsel %vm3574_vm3, %v3509_v55, 0.0  ;;  %v15528_v19 = vld [vmem:[#allocation368_spill] sm:$0xff]  ;;  %v15530_v0 = vld [vmem:[#allocation534_spill] sm:$0xff]  ;;  %v5189_v63 = vsel %vm3574_vm3, %v4992_v45, 0.0  ;;  %v15533_v37 = vld [vmem:[#allocation59_spill] sm:$0xff] }
 0x3b6   :  { %15523 = vst [vmem:[#allocation223_spill] sm:$0xff] %v11366_v31  ;;  %v15529_v52 = vunpack.c.h.bf16 %v15528_v19  ;;  %v3680_v5 = vadd.f32 %v3679_v9, %v15530_v0  ;;  %v5185_v33 = vsel %vm3574_vm3, %v4990_v47, 0.0  ;;  %v15532_v8 = vunpack.c.h.bf16 %v10610_v38  ;;  %v15535_v55 = vld [vmem:[#allocation296_spill] sm:$0xff]  ;;  %3677 = vadd.xlane.f32.xlu0 %v3676_v6  ;;  %v15549_v6 = vld [vmem:[#allocation477_spill] sm:$0xff] }
 0x3b7   :  { %15519 = vst [vmem:[#allocation224_spill] sm:$0xff] %v11360_v22  ;;  %15525 = vst [vmem:[#allocation498_spill] sm:$0xff] %v11369_v54  ;;  %v15534_v21 = vunpack.c.h.bf16 %v15533_v37  ;;  %v15536_v59 = vunpack.c.h.bf16 %v15535_v55  ;;  %v2760_v22 = vpop.permute.xlu1 %2759  ;;  %v3687_v9 = vsel %vm3574_vm3, %v3511_v3, 0.0  ;;  %v15538_v45 = vld [vmem:[#allocation496_spill] sm:$0xff]  ;;  %v15541_v37 = vld [vmem:[#allocation506_spill] sm:$0xff]  ;;  %v15544_v55 = vunpack.c.h.bf16 %v10599_v27 }
 0x3b8   :  { %v3513_v39 = vmul.f32 %v15529_v52, %v15527_v26  ;;  %v3515_v32 = vmul.f32 %v15532_v8, %v15531_v62  ;;  %v2758_v26 = vpop.permute.xlu0 %2757  ;;  %v15537_v52 = vld [vmem:[#allocation507_spill] sm:$0xff]  ;;  %3681 = vadd.xlane.f32.xlu1 %v3680_v5  ;;  %v15554_v5 = vld [vmem:[#allocation198_spill] sm:$0xff] }
 0x3b9   :  { %v4996_v51 = vmul.f32 %v15534_v21, %v11366_v31  ;;  %v4994_v44 = vmul.f32 %v15536_v59, %v11369_v54  ;;  %v3017_v47 = vsel %vm2913_vm2, %v15537_v52, %v2760_v22  ;;  %v3016_v0 = vsel %vm2913_vm2, %v15538_v45, %v2758_v26  ;;  %v15539_v62 = vld [vmem:[#allocation107_spill] sm:$0xff]  ;;  %v15543_v31 = vld [vmem:[#allocation402_spill] sm:$0xff]  ;;  %v15548_v22 = vld [vmem:[#allocation473_spill] sm:$0xff] }
 0x3ba   :  { %v11394_v8 = vadd.f32 %v5185_v33, %v15539_v62  ;;  %v11397_v21 = vadd.f32 %v5189_v63, %v15541_v37  ;;  %v3517_v59 = vmul.f32 %v15544_v55, %v15543_v31  ;;  %v15545_v54 = vld [vmem:[#allocation339_spill] sm:$0xff]  ;;  %v3684_v26 = vadd.f32 %v3683_v7, %v15548_v22  ;;  %v15550_v62 = vld [vmem:[#allocation153_spill] sm:$0xff]  ;;  %v15556_v22 = vld [vmem:[#allocation102_spill] sm:$0xff] }
 0x3bb   :  { %v11403_v1 = vmax.f32 %v15545_v54, %v3017_v47  ;;  %v15547_v3 = vld [vmem:[#allocation335_spill] sm:$0xff]  ;;  %v3688_v52 = vadd.f32 %v3687_v9, %v15549_v6  ;;  %v3691_v33 = vsel %vm3574_vm3, %v3513_v39, 0.0  ;;  %v5193_v63 = vsel %vm3574_vm3, %v4994_v44, 0.0  ;;  %v15552_v54 = vld [vmem:[#allocation189_spill] sm:$0xff] }
 0x3bc   :  { %15540 = vst [vmem:[#allocation236_spill] sm:$0xff] %v11394_v8  ;;  %15542 = vst [vmem:[#allocation353_spill] sm:$0xff] %v11397_v21  ;;  %v11406_v38 = vmax.f32 %v15547_v3, %v3016_v0  ;;  %v5197_v45 = vsel %vm3574_vm3, %v4996_v51, 0.0  ;;  %v15551_v31 = vunpack.c.h.bf16 %v10654_v42  ;;  %v15553_v47 = vunpack.c.h.bf16 %v15552_v54  ;;  %v2764_v3 = vpop.permute.xlu1 %2763  ;;  %v2762_v9 = vpop.permute.xlu0 %2761  ;;  %v15557_v51 = vld [vmem:[#allocation513_spill] sm:$0xff]  ;;  %3685 = vadd.xlane.f32.xlu0 %v3684_v26  ;;  %v15560_v54 = vld [vmem:[#allocation552_spill] sm:$0xff] }
 0x3bd   :  { %15546 = vst [vmem:[#allocation349_spill] sm:$0xff] %v11403_v1  ;;  %v15555_v55 = vunpack.c.h.bf16 %v15554_v5  ;;  %v3695_v39 = vsel %vm3574_vm3, %v3515_v32, 0.0  ;;  %v3019_v44 = vsel %vm2913_vm2, %v15556_v22, %v2764_v3  ;;  %v3018_v6 = vsel %vm2913_vm2, %v15557_v51, %v2762_v9  ;;  %v15562_v21 = vld [vmem:[#allocation347_spill] sm:$0xff]  ;;  %3689 = vadd.xlane.f32.xlu1 %v3688_v52  ;;  %v15565_v32 = vld [vmem:[#allocation80_spill] sm:$0xff]  ;;  %v15571_v52 = vld [vmem:[#allocation197_spill] sm:$0xff] }
 0x3be   :  { %v3519_v37 = vmul.f32 %v15551_v31, %v15550_v62  ;;  %v5000_v0 = vmul.f32 %v15553_v47, %v11403_v1  ;;  %v15558_v62 = vld [vmem:[#allocation123_spill] sm:$0xff]  ;;  %v11431_v47 = vadd.f32 %v5197_v45, %v15560_v54  ;;  %v11434_v5 = vmax.f32 %v15562_v21, %v3019_v44  ;;  %v15566_v22 = vld [vmem:[#allocation284_spill] sm:$0xff]  ;;  %v15569_v21 = vld [vmem:[#allocation157_spill] sm:$0xff] }
 0x3bf   :  { %v4998_v7 = vmul.f32 %v15555_v55, %v11406_v38  ;;  %v11428_v31 = vadd.f32 %v5193_v63, %v15558_v62  ;;  %v15564_v55 = vld [vmem:[#allocation343_spill] sm:$0xff]  ;;  %v3692_v1 = vadd.f32 %v3691_v33, %v15565_v32  ;;  %v3699_v3 = vsel %vm3574_vm3, %v3517_v59, 0.0  ;;  %v15568_v63 = vld [vmem:[#allocation186_spill] sm:$0xff] }
 0x3c0   :  { %15561 = vst [vmem:[#allocation342_spill] sm:$0xff] %v11431_v47  ;;  %15563 = vst [vmem:[#allocation235_spill] sm:$0xff] %v11434_v5  ;;  %v11437_v8 = vmax.f32 %v15564_v55, %v3018_v6  ;;  %v15567_v26 = vunpack.c.h.bf16 %v10637_v56  ;;  %v3696_v51 = vadd.f32 %v3695_v39, %v15568_v63  ;;  %v5205_v62 = vsel %vm3574_vm3, %v5000_v0, 0.0  ;;  %v15573_v59 = vld [vmem:[#allocation218_spill] sm:$0xff]  ;;  %v2768_v47 = vpop.permute.xlu1 %2767 }
 0x3c1   :  { %15559 = vst [vmem:[#allocation430_spill] sm:$0xff] %v11428_v31  ;;  %v5201_v45 = vsel %vm3574_vm3, %v4998_v7, 0.0  ;;  %v15570_v44 = vunpack.c.h.bf16 %v10690_v36  ;;  %v15572_v54 = vunpack.c.h.bf16 %v15571_v52  ;;  %v15574_v55 = vunpack.c.h.bf16 %v15573_v59  ;;  %3693 = vadd.xlane.f32.xlu0 %v3692_v1  ;;  %v15579_v52 = vld [vmem:[#allocation281_spill] sm:$0xff]  ;;  %v15584_v1 = vld [vmem:[#allocation194_spill] sm:$0xff] }
 0x3c2   :  { %v3521_v9 = vmul.f32 %v15567_v26, %v15566_v22  ;;  %v2766_v22 = vpop.permute.xlu0 %2765  ;;  %v3703_v39 = vsel %vm3574_vm3, %v3519_v37, 0.0  ;;  %v3021_v7 = vsel %vm2913_vm2, %v15159_v53, %v2768_v47  ;;  %v15575_v26 = vld [vmem:[#allocation41_spill] sm:$0xff]  ;;  %v15582_v37 = vld [vmem:[#allocation351_spill] sm:$0xff]  ;;  %3697 = vadd.xlane.f32.xlu1 %v3696_v51  ;;  %v15583_v53 = vld [vmem:[#allocation536_spill] sm:$0xff] }
 0x3c3   :  { %v3523_v6 = vmul.f32 %v15570_v44, %v15569_v21  ;;  %v5004_v33 = vmul.f32 %v15572_v54, %v11434_v5  ;;  %v5002_v32 = vmul.f32 %v15574_v55, %v11437_v8  ;;  %v3020_v0 = vsel %vm2913_vm2, %v15143_v30, %v2766_v22  ;;  %v15578_v44 = vld [vmem:[#allocation161_spill] sm:$0xff]  ;;  %v15581_v55 = vld [vmem:[#allocation355_spill] sm:$0xff]  ;;  %v15589_v51 = vld [vmem:[#allocation544_spill] sm:$0xff] }
 0x3c4   :  { %v11462_v63 = vadd.f32 %v5201_v45, %v15575_v26  ;;  %v11465_v21 = vadd.f32 %v5205_v62, %v10632_v29  ;;  %v15580_v54 = vunpack.c.h.bf16 %v15579_v52  ;;  %v11471_v31 = vmax.f32 %v15581_v55, %v3021_v7  ;;  %v15585_v22 = vld [vmem:[#allocation165_spill] sm:$0xff]  ;;  %v15587_v7 = vld [vmem:[#allocation539_spill] sm:$0xff] }
 0x3c5   :  { %v11474_v5 = vmax.f32 %v15582_v37, %v3020_v0  ;;  %v3700_v30 = vadd.f32 %v3699_v3, %v15583_v53  ;;  %v3704_v47 = vadd.f32 %v3703_v39, %v15584_v1  ;;  %v3707_v45 = vsel %vm3574_vm3, %v3521_v9, 0.0  ;;  %v2772_v37 = vpop.permute.xlu1 %2771  ;;  %v15592_v1 = vld [vmem:[#allocation555_spill] sm:$0xff] }
 0x3c6   :  { %15576 = vst [vmem:[#allocation231_spill] sm:$0xff] %v11462_v63  ;;  %15577 = vst [vmem:[#allocation499_spill] sm:$0xff] %v11465_v21  ;;  %v3525_v59 = vmul.f32 %v15580_v54, %v15578_v44  ;;  %v5209_v29 = vsel %vm3574_vm3, %v5002_v32, 0.0  ;;  %v5213_v62 = vsel %vm3574_vm3, %v5004_v33, 0.0  ;;  %v15586_v26 = vunpack.c.h.bf16 %v10754_v11  ;;  %v2770_v39 = vpop.permute.xlu0 %2769  ;;  %v15591_v33 = vld [vmem:[#allocation142_spill] sm:$0xff] }
 0x3c7   :  { %v15588_v54 = vunpack.c.h.bf16 %v15587_v7  ;;  %v15590_v55 = vunpack.c.h.bf16 %v15589_v51  ;;  %v3711_v9 = vsel %vm3574_vm3, %v3523_v6, 0.0  ;;  %v3023_v32 = vsel %vm2913_vm2, %v15197_v49, %v2772_v37  ;;  %3701 = vadd.xlane.f32.xlu0 %v3700_v30  ;;  %3705 = vadd.xlane.f32.xlu1 %v3704_v47  ;;  %v15599_v6 = vld [vmem:[#allocation92_spill] sm:$0xff]  ;;  %v15600_v37 = vld [vmem:[#allocation169_spill] sm:$0xff]  ;;  %v15605_v47 = vld [vmem:[#allocation546_spill] sm:$0xff] }
 0x3c8   :  { %v3527_v44 = vmul.f32 %v15586_v26, %v15585_v22  ;;  %v3022_v53 = vsel %vm2913_vm2, %v15591_v33, %v2770_v39  ;;  %v11496_v22 = vadd.f32 %v5209_v29, %v15592_v1  ;;  %v15594_v26 = vld [vmem:[#allocation512_spill] sm:$0xff]  ;;  %v3708_v63 = vadd.f32 %v3707_v45, %v15599_v6  ;;  %v15602_v29 = vld [vmem:[#allocation210_spill] sm:$0xff] }
 0x3c9   :  { %v5008_v0 = vmul.f32 %v15588_v54, %v11471_v31  ;;  %v5006_v3 = vmul.f32 %v15590_v55, %v11474_v5  ;;  %v11499_v7 = vadd.f32 %v5213_v62, %v15594_v26  ;;  %v15596_v54 = vld [vmem:[#allocation363_spill] sm:$0xff]  ;;  %v3715_v49 = vsel %vm3574_vm3, %v3525_v59, 0.0  ;;  %v15607_v59 = vld [vmem:[#allocation226_spill] sm:$0xff] }
 0x3ca   :  { %15593 = vst [vmem:[#allocation232_spill] sm:$0xff] %v11496_v22  ;;  %v11502_v51 = vmax.f32 %v15596_v54, %v3023_v32  ;;  %v15598_v55 = vld [vmem:[#allocation359_spill] sm:$0xff]  ;;  %v15601_v30 = vunpack.c.h.bf16 %v10737_v23  ;;  %v3712_v33 = vadd.f32 %v3711_v9, %v15602_v29  ;;  %v15603_v32 = vld [vmem:[#allocation480_spill] sm:$0xff]  ;;  %v15604_v26 = vunpack.c.h.bf16 %v10792_v15 }
 0x3cb   :  { %15595 = vst [vmem:[#allocation501_spill] sm:$0xff] %v11499_v7  ;;  %v11505_v21 = vmax.f32 %v15598_v55, %v3022_v53  ;;  %v5217_v62 = vsel %vm3574_vm3, %v5006_v3, 0.0  ;;  %v5221_v1 = vsel %vm3574_vm3, %v5008_v0, 0.0  ;;  %v15606_v54 = vunpack.c.h.bf16 %v15605_v47  ;;  %v2776_v7 = vpop.permute.xlu1 %2775  ;;  %3709 = vadd.xlane.f32.xlu0 %v3708_v63  ;;  %v15613_v47 = vld [vmem:[#allocation371_spill] sm:$0xff]  ;;  %v15618_v63 = vld [vmem:[#allocation538_spill] sm:$0xff] }
 0x3cc   :  { %15597 = vst [vmem:[#allocation240_spill] sm:$0xff] %v11502_v51  ;;  %v3529_v39 = vmul.f32 %v15601_v30, %v15600_v37  ;;  %v3531_v53 = vmul.f32 %v15604_v26, %v15603_v32  ;;  %v15608_v55 = vunpack.c.h.bf16 %v15607_v59  ;;  %v2774_v37 = vpop.permute.xlu0 %2773  ;;  %v3719_v9 = vsel %vm3574_vm3, %v3527_v44, 0.0  ;;  %v15611_v32 = vld [vmem:[#allocation376_spill] sm:$0xff]  ;;  %v15615_v44 = vld [vmem:[#allocation367_spill] sm:$0xff]  ;;  %3713 = vadd.xlane.f32.xlu1 %v3712_v33  ;;  %v15623_v33 = vld [vmem:[#allocation221_spill] sm:$0xff] }
 0x3cd   :  { %v5012_v45 = vmul.f32 %v15606_v54, %v11502_v51  ;;  %v3025_v3 = vsel %vm2913_vm2, %v15219_v61, %v2776_v7  ;;  %v3024_v0 = vsel %vm2913_vm2, %v15217_v12, %v2774_v37  ;;  %v11530_v30 = vadd.f32 %v5217_v62, %v10749_v34  ;;  %v15617_v61 = vld [vmem:[#allocation214_spill] sm:$0xff]  ;;  %v15621_v37 = vld [vmem:[#allocation225_spill] sm:$0xff] }
 0x3ce   :  { %v5010_v6 = vmul.f32 %v15608_v55, %v11505_v21  ;;  %v11533_v29 = vadd.f32 %v5221_v1, %v10787_v50  ;;  %v11537_v26 = vmax.f32 %v15611_v32, %v10922_v17  ;;  %v11540_v54 = vmax.f32 %v15613_v47, %v3025_v3  ;;  %v15619_v1 = vld [vmem:[#allocation182_spill] sm:$0xff] }
 0x3cf   :  { %15609 = vst [vmem:[#allocation16_spill] sm:$0xff] %v11530_v30  ;;  %v11543_v59 = vmax.f32 %v15615_v44, %v3024_v0  ;;  %v3716_v12 = vadd.f32 %v3715_v49, %v15617_v61  ;;  %v3720_v7 = vadd.f32 %v3719_v9, %v15618_v63  ;;  %v3723_v34 = vsel %vm3574_vm3, %v3529_v39, 0.0  ;;  %v11563_v39 = vld [vmem:[%s12538_s1 + $0x160] sm:$0xff] }
 0x3d0   :  { %15610 = vst [vmem:[#allocation361_spill] sm:$0xff] %v11533_v29  ;;  %15612 = vst [vmem:[#allocation357_spill] sm:$0xff] %v11537_v26  ;;  %v5225_v50 = vsel %vm3574_vm3, %v5010_v6, 0.0  ;;  %v5229_v62 = vsel %vm3574_vm3, %v5012_v45, 0.0  ;;  %v15620_v17 = vunpack.c.h.bf16 %v10765_v60  ;;  %v15622_v3 = vunpack.c.h.bf16 %v15621_v37  ;;  %v2778_v47 = vpop.permute.xlu0 %2777  ;;  %v15625_v45 = vld [vmem:[#allocation487_spill] sm:$0xff]  ;;  %v15626_v6 = vld [vmem:[#allocation256_spill] sm:$0xff] }
 0x3d1   :  { %15614 = vst [vmem:[#allocation440_spill] sm:$0xff] %v11540_v54  ;;  %15616 = vst [vmem:[#allocation350_spill] sm:$0xff] %v11543_v59  ;;  %v15624_v32 = vunpack.c.h.bf16 %v15623_v33  ;;  %v3727_v9 = vsel %vm3574_vm3, %v3531_v53, 0.0  ;;  %v15627_v44 = vunpack.c.h.bf16 %v15626_v6  ;;  %v3026_v63 = vsel %vm2913_vm2, %v15251_v10, %v2778_v47  ;;  %3717 = vadd.xlane.f32.xlu0 %v3716_v12  ;;  %v15631_v53 = vld [vmem:[#allocation130_spill] sm:$0xff]  ;;  %3721 = vadd.xlane.f32.xlu1 %v3720_v7 }
 0x3d2   :  { %v3533_v55 = vmul.f32 %v15620_v17, %v15619_v1  ;;  %v5016_v0 = vmul.f32 %v15622_v3, %v11540_v54  ;;  %v15628_v1 = vld [vmem:[#allocation167_spill] sm:$0xff]  ;;  %v11574_v37 = vadd.f32 %v5229_v62, %v10880_v35  ;;  %v15632_v3 = vunpack.c.l.bf16 %v15631_v53  ;;  %v15637_v10 = vld [vmem:[#allocation154_spill] sm:$0xff]  ;;  %v15639_v35 = vld [vmem:[#allocation540_spill] sm:$0xff] }
 0x3d3   :  { %v5014_v49 = vmul.f32 %v15624_v32, %v11543_v59  ;;  %v3535_v61 = vmul.f32 %v15627_v44, %v15625_v45  ;;  %v11571_v17 = vadd.f32 %v5225_v50, %v15628_v1  ;;  %v15633_v32 = vld [vmem:[#allocation452_spill] sm:$0xff]  ;;  %v15635_v44 = vld [vmem:[#allocation375_spill] sm:$0xff]  ;;  %v15638_v12 = vunpack.c.l.bf16 %v15637_v10  ;;  %v15646_v10 = vld [vmem:[#allocation201_spill] sm:$0xff] }
 0x3d4   :  { %15630 = vst [vmem:[#allocation243_spill] sm:$0xff] %v11574_v37  ;;  %v5013_v33 = vmul.f32 %v15632_v3, %v10883_v57  ;;  %v15634_v29 = vunpack.c.l.bf16 %v15633_v32  ;;  %v11584_v22 = vmax.f32 %v15635_v44, %v3026_v63  ;;  %v3724_v62 = vadd.f32 %v3723_v34, %v15639_v35  ;;  %v15640_v53 = vld [vmem:[#allocation300_spill] sm:$0xff]  ;;  %v15641_v3 = vld [vmem:[#allocation27_spill] sm:$0xff]  ;;  %v15645_v44 = vld [vmem:[#allocation545_spill] sm:$0xff] }
 0x3d5   :  { %15629 = vst [vmem:[#allocation58_spill] sm:$0xff] %v11571_v17  ;;  %v5017_v50 = vmul.f32 %v15638_v12, %v11537_v26  ;;  %v5233_v47 = vsel %vm3574_vm3, %v5014_v49, 0.0  ;;  %v5237_v1 = vsel %vm3574_vm3, %v5016_v0, 0.0  ;;  %v15642_v32 = vunpack.c.h.bf16 %v15641_v3  ;;  %v15643_v45 = vld [vmem:[#allocation548_spill] sm:$0xff]  ;;  %v15685_v59 = vld [vmem:[#allocation250_spill] sm:$0xff] }
 0x3d6   :  { %v5015_v30 = vmul.f32 %v15634_v29, %v10892_v13  ;;  %15636 = vst [vmem:[#allocation239_spill] sm:$0xff] %v11584_v22  ;;  %v15644_v37 = vunpack.c.h.bf16 %v15643_v45  ;;  %v3728_v7 = vadd.f32 %v3727_v9, %v15645_v44  ;;  %v3731_v17 = vsel %vm3574_vm3, %v3533_v55, 0.0  ;;  %v15647_v12 = vld [vmem:[#allocation560_spill] sm:$0xff]  ;;  %3725 = vadd.xlane.f32.xlu0 %v3724_v62  ;;  %v15653_v9 = vld [vmem:[#allocation517_spill] sm:$0xff] }
 0x3d7   :  { %v3537_v29 = vmul.f32 %v15642_v32, %v15640_v53  ;;  %v15648_v26 = vunpack.c.h.bf16 %v15647_v12  ;;  %v3735_v49 = vsel %vm3574_vm3, %v3535_v61, 0.0  ;;  %v11604_v0 = vadd.f32 %v5233_v47, %v5013_v33  ;;  %v15651_v53 = vld [vmem:[#allocation100_spill] sm:$0xff]  ;;  %v15654_v61 = vld [vmem:[#allocation222_spill] sm:$0xff]  ;;  %v15669_v13 = vld [vmem:[#allocation549_spill] sm:$0xff] }
 0x3d8   :  { %v5018_v63 = vmul.f32 %v15644_v37, %v11584_v22  ;;  %v11606_v35 = vadd.f32 %v5237_v1, %v5015_v30  ;;  %v15652_v32 = vunpack.c.l.bf16 %v15626_v6  ;;  %3729 = vadd.xlane.f32.xlu1 %v3728_v7  ;;  %v3732_v33 = vadd.f32 %v3731_v17, %v15654_v61  ;;  %v11625_v62 = vld [vmem:[%s12538_s1 + $0x170] sm:$0xff]  ;;  %v15677_v22 = vld [vmem:[#allocation112_spill] sm:$0xff] }
 0x3d9   :  { %v3539_v34 = vmul.f32 %v15648_v26, %v15646_v10  ;;  %15649 = vst [vmem:[#allocation74_spill] sm:$0xff] %v11604_v0  ;;  %v11617_v26 = vld [vmem:[%s12538_s1 + $0x168] sm:$0xff]  ;;  %v15656_v47 = vld [vmem:[#allocation414_spill] sm:$0xff]  ;;  %v15657_v1 = vunpack.c.h.bf16 %v15653_v9  ;;  %v15659_v44 = vunpack.c.l.bf16 %v15641_v3  ;;  %v13391_v37 = vunpack.c.h.bf16 %v11625_v62 }
 0x3da   :  { %15650 = vst [vmem:[#allocation509_spill] sm:$0xff] %v11606_v35  ;;  %v3534_v45 = vmul.f32 %v15652_v32, %v15651_v53  ;;  %v5241_v55 = vsel %vm3574_vm3, %v5018_v63, 0.0  ;;  %v13390_v7 = vunpack.c.h.bf16 %v11617_v26  ;;  %v3739_v53 = vsel %vm3574_vm3, %v3537_v29, 0.0  ;;  %v15658_v32 = vld [vmem:[#allocation96_spill] sm:$0xff]  ;;  %3733 = vadd.xlane.f32.xlu0 %v3732_v33  ;;  %v15662_v35 = vld [vmem:[#allocation541_spill] sm:$0xff] }
 0x3db   :  { %v11620_v30 = vadd.f32 %v5241_v55, %v5017_v50  ;;  %v3541_v63 = vmul.f32 %v15657_v1, %v15656_v47  ;;  %v3536_v17 = vmul.f32 %v15659_v44, %v15658_v32  ;;  %v15660_v50 = vld [vmem:[#allocation416_spill] sm:$0xff]  ;;  %v15661_v55 = vunpack.c.h.bf16 %v11563_v39 }
 0x3dc   :  { %v3736_v10 = vadd.f32 %v3735_v49, %v3534_v45  ;;  %v15663_v47 = vunpack.c.l.bf16 %v15647_v12  ;;  %v11648_v45 = vld [vmem:[%s12538_s1 + $0x178] sm:$0xff]  ;;  %v11653_v33 = vld [vmem:[%s12538_s1 + $0x180] sm:$0xff]  ;;  %v15668_v49 = vld [vmem:[#allocation217_spill] sm:$0xff] }
 0x3dd   :  { %15655 = vst [vmem:[#allocation504_spill] sm:$0xff] %v11620_v30  ;;  %v3543_v61 = vmul.f32 %v15661_v55, %v15660_v50  ;;  %v3743_v30 = vsel %vm3574_vm3, %v3539_v34, 0.0  ;;  %v3740_v44 = vadd.f32 %v3739_v53, %v3536_v17  ;;  %15664 = vst [vmem:[#allocation20_spill] sm:$0xff] %v11653_v33  ;;  %v15665_v34 = vld [vmem:[#allocation312_spill] sm:$0xff]  ;;  %v13394_v32 = vunpack.c.h.bf16 %v11648_v45  ;;  %v15666_v55 = vld [vmem:[#allocation547_spill] sm:$0xff] }
 0x3de   :  { %v3538_v1 = vmul.f32 %v15663_v47, %v15662_v35  ;;  %3737 = vadd.xlane.f32.xlu1 %v3736_v10  ;;  %v3545_v35 = vmul.f32 %v13390_v7, %v15665_v34  ;;  %v3747_v50 = vsel %vm3574_vm3, %v3541_v63, 0.0  ;;  %v15667_v47 = vunpack.c.l.bf16 %v15653_v9 }
 0x3df   :  { %v3547_v53 = vmul.f32 %v13391_v37, %v15668_v49  ;;  %v13395_v17 = vunpack.c.h.bf16 %v11653_v33  ;;  %3741 = vadd.xlane.f32.xlu0 %v3740_v44  ;;  %v3751_v0 = vsel %vm3574_vm3, %v3543_v61, 0.0  ;;  %v15670_v34 = vunpack.c.l.bf16 %v11563_v39  ;;  %v11681_v44 = vld [vmem:[%s12538_s1 + $0x190] sm:$0xff] }
 0x3e0   :  { %v3744_v10 = vadd.f32 %v3743_v30, %v3538_v1  ;;  %v3540_v29 = vmul.f32 %v15667_v47, %v15666_v55  ;;  %v11676_v1 = vld [vmem:[%s12538_s1 + $0x188] sm:$0xff]  ;;  %15672 = vst [vmem:[#allocation369_spill] sm:$0xff] %v11681_v44  ;;  %v3755_v47 = vsel %vm3574_vm3, %v3545_v35, 0.0  ;;  %v15675_v37 = vunpack.c.l.bf16 %v11617_v26 }
 0x3e1   :  { %v3542_v7 = vmul.f32 %v15670_v34, %v15669_v13  ;;  %15671 = vst [vmem:[#allocation374_spill] sm:$0xff] %v11676_v1  ;;  %v15673_v61 = vld [vmem:[#allocation493_spill] sm:$0xff]  ;;  %v13398_v55 = vunpack.c.h.bf16 %v11676_v1  ;;  %v15674_v34 = vld [vmem:[#allocation550_spill] sm:$0xff]  ;;  %v15676_v30 = vld [vmem:[#allocation424_spill] sm:$0xff]  ;;  %v3759_v57 = vsel %vm3574_vm3, %v3547_v53, 0.0 }
 0x3e2   :  { %3745 = vadd.xlane.f32.xlu1 %v3744_v10  ;;  %v3748_v49 = vadd.f32 %v3747_v50, %v3540_v29  ;;  %v3549_v13 = vmul.f32 %v13394_v32, %v15673_v61  ;;  %v3544_v63 = vmul.f32 %v15675_v37, %v15674_v34  ;;  %v3551_v29 = vmul.f32 %v13395_v17, %v15676_v30  ;;  %v11704_v37 = vld [vmem:[%s12538_s1 + $0x198] sm:$0xff]  ;;  %v11709_v30 = vld [vmem:[%s12538_s1 + $0x1a0] sm:$0xff] }
 0x3e3   :  { %v3752_v10 = vadd.f32 %v3751_v0, %v3542_v7  ;;  %v13399_v50 = vunpack.c.h.bf16 %v11681_v44  ;;  %v15678_v61 = vunpack.c.l.bf16 %v11625_v62  ;;  %15679 = vst [vmem:[#allocation365_spill] sm:$0xff] %v11704_v37  ;;  %15680 = vst [vmem:[#allocation54_spill] sm:$0xff] %v11709_v30  ;;  %v15681_v53 = vld [vmem:[#allocation328_spill] sm:$0xff]  ;;  %v15683_v17 = vunpack.c.l.bf16 %v11648_v45 }
 0x3e4   :  { %3749 = vadd.xlane.f32.xlu0 %v3748_v49  ;;  %v3756_v35 = vadd.f32 %v3755_v47, %v3544_v63  ;;  %v13403_v49 = vunpack.c.h.bf16 %v11704_v37  ;;  %v3763_v34 = vsel %vm3574_vm3, %v3549_v13, 0.0  ;;  %v15684_v0 = vld [vmem:[#allocation336_spill] sm:$0xff]  ;;  %v13404_v47 = vunpack.c.h.bf16 %v11709_v30 }
 0x3e5   :  { %v3546_v32 = vmul.f32 %v15678_v61, %v15677_v22  ;;  %v3553_v22 = vmul.f32 %v13398_v55, %v15681_v53  ;;  %v15682_v61 = vld [vmem:[#allocation246_spill] sm:$0xff]  ;;  %v3555_v63 = vmul.f32 %v13399_v50, %v15684_v0  ;;  %v3767_v54 = vsel %vm3574_vm3, %v3551_v29, 0.0  ;;  %v15688_v29 = vld [vmem:[#allocation340_spill] sm:$0xff] }
 0x3e6   :  { %3753 = vadd.xlane.f32.xlu1 %v3752_v10  ;;  %v3548_v7 = vmul.f32 %v15683_v17, %v15682_v61  ;;  %v15686_v53 = vunpack.c.l.bf16 %v11653_v33  ;;  %v11732_v17 = vld [vmem:[%s12538_s1 + $0x1a8] sm:$0xff]  ;;  %v11737_v0 = vld [vmem:[%s12538_s1 + $0x1b0] sm:$0xff]  ;;  %v15690_v50 = vunpack.c.l.bf16 %v11676_v1 }
 0x3e7   :  { %v3760_v10 = vadd.f32 %v3759_v57, %v3546_v32  ;;  %15687 = vst [vmem:[#allocation55_spill] sm:$0xff] %v11737_v0  ;;  %v3771_v61 = vsel %vm3574_vm3, %v3553_v22, 0.0  ;;  %v15691_v57 = vld [vmem:[#allocation344_spill] sm:$0xff]  ;;  %v3775_v51 = vsel %vm3574_vm3, %v3555_v63, 0.0  ;;  %v15692_v33 = vld [vmem:[#allocation258_spill] sm:$0xff] }
 0x3e8   :  { %3757 = vadd.xlane.f32.xlu0 %v3756_v35  ;;  %v3550_v55 = vmul.f32 %v15686_v53, %v15685_v59  ;;  %v3764_v13 = vadd.f32 %v3763_v34, %v3548_v7  ;;  %v3557_v59 = vmul.f32 %v13403_v49, %v15688_v29  ;;  %v13409_v35 = vunpack.c.h.bf16 %v11732_v17  ;;  %v15689_v53 = vld [vmem:[#allocation254_spill] sm:$0xff]  ;;  %v15695_v63 = vld [vmem:[#allocation348_spill] sm:$0xff] }
 0x3e9   :  { %v3552_v32 = vmul.f32 %v15690_v50, %v15689_v53  ;;  %v3559_v7 = vmul.f32 %v13404_v47, %v15691_v57  ;;  %v13410_v34 = vunpack.c.h.bf16 %v11737_v0  ;;  %v15693_v29 = vunpack.c.l.bf16 %v11681_v44  ;;  %v11760_v50 = vld [vmem:[%s12538_s1 + $0x1b8] sm:$0xff]  ;;  %v11765_v57 = vld [vmem:[%s12538_s1 + $0x1c0] sm:$0xff] }
 0x3ea   :  { %3761 = vadd.xlane.f32.xlu1 %v3760_v10  ;;  %v3768_v10 = vadd.f32 %v3767_v54, %v3550_v55  ;;  %15694 = vst [vmem:[#allocation251_spill] sm:$0xff] %v11760_v50  ;;  %v3779_v53 = vsel %vm3574_vm3, %v3557_v59, 0.0  ;;  %v15697_v47 = vunpack.c.l.bf16 %v11704_v37  ;;  %v15698_v54 = vld [vmem:[#allocation352_spill] sm:$0xff]  ;;  %v15699_v1 = vld [vmem:[#allocation266_spill] sm:$0xff] }
 0x3eb   :  { %v3554_v49 = vmul.f32 %v15693_v29, %v15692_v33  ;;  %v3772_v22 = vadd.f32 %v3771_v61, %v3552_v32  ;;  %v3561_v33 = vmul.f32 %v13409_v35, %v15695_v63  ;;  %v15696_v29 = vld [vmem:[#allocation262_spill] sm:$0xff]  ;;  %v3563_v32 = vmul.f32 %v13410_v34, %v15698_v54  ;;  %v15706_v37 = vld [vmem:[#allocation132_spill] sm:$0xff] }
 0x3ec   :  { %3765 = vadd.xlane.f32.xlu0 %v3764_v13  ;;  %v13415_v13 = vunpack.c.h.bf16 %v11760_v50  ;;  %v3556_v55 = vmul.f32 %v15697_v47, %v15696_v29  ;;  %v13416_v61 = vunpack.c.h.bf16 %v11765_v57  ;;  %v3783_v44 = vsel %vm3574_vm3, %v3559_v7, 0.0  ;;  %v11788_v47 = vld [vmem:[%s12538_s1 + $0x1c8] sm:$0xff]  ;;  %v11793_v54 = vld [vmem:[%s12538_s1 + $0x1d0] sm:$0xff] }
 0x3ed   :  { %v15700_v63 = vunpack.c.l.bf16 %v11709_v30  ;;  %15701 = vst [vmem:[#allocation247_spill] sm:$0xff] %v11793_v54  ;;  %v15702_v7 = vld [vmem:[#allocation356_spill] sm:$0xff]  ;;  %v3787_v29 = vsel %vm3574_vm3, %v3561_v33, 0.0  ;;  %v15704_v34 = vunpack.c.l.bf16 %v11732_v17  ;;  %v3791_v30 = vsel %vm3574_vm3, %v3563_v32, 0.0  ;;  %v15709_v33 = vld [vmem:[#allocation131_spill] sm:$0xff] }
 0x3ee   :  { %3769 = vadd.xlane.f32.xlu1 %v3768_v10  ;;  %v3776_v10 = vadd.f32 %v3775_v51, %v3554_v49  ;;  %v3780_v59 = vadd.f32 %v3779_v53, %v3556_v55  ;;  %v15705_v51 = vld [vmem:[#allocation127_spill] sm:$0xff]  ;;  %v13422_v53 = vunpack.c.h.bf16 %v11793_v54 }
 0x3ef   :  { %v3558_v35 = vmul.f32 %v15700_v63, %v15699_v1  ;;  %v3565_v1 = vmul.f32 %v13415_v13, %v15702_v7  ;;  %v15703_v63 = vld [vmem:[#allocation128_spill] sm:$0xff]  ;;  %v3567_v55 = vmul.f32 %v13416_v61, %v15705_v51  ;;  %v15707_v7 = vunpack.c.l.bf16 %v11737_v0 }
 0x3f0   :  { %3773 = vadd.xlane.f32.xlu0 %v3772_v22  ;;  %v13419_v22 = vunpack.c.h.bf16 %v11788_v47  ;;  %v3560_v49 = vmul.f32 %v15704_v34, %v15703_v63  ;;  %v15710_v61 = vld [vmem:[#allocation136_spill] sm:$0xff] }
 0x3f1   :  { %v3562_v13 = vmul.f32 %v15707_v7, %v15706_v37  ;;  %v3795_v63 = vsel %vm3574_vm3, %v3565_v1, 0.0  ;;  %v15711_v37 = vunpack.c.l.bf16 %v11760_v50  ;;  %v15715_v1 = vld [vmem:[#allocation135_spill] sm:$0xff]  ;;  %v15716_v50 = vld [vmem:[#allocation140_spill] sm:$0xff] }
 0x3f2   :  { %3777 = vadd.xlane.f32.xlu1 %v3776_v10  ;;  %v3784_v10 = vadd.f32 %v3783_v44, %v3558_v35  ;;  %v11815_v35 = vld [vmem:[%s12538_s1 + $0x1d8] sm:$0xff]  ;;  %v3788_v34 = vadd.f32 %v3787_v29, %v3560_v49  ;;  %v3569_v51 = vmul.f32 %v13419_v22, %v15709_v33  ;;  %v15712_v44 = vld [vmem:[#allocation372_spill] sm:$0xff]  ;;  %v3799_v49 = vsel %vm3574_vm3, %v3567_v55, 0.0  ;;  %s5586_s1 = smov 1  }
 0x3f3   :  { %15708 = vst [vmem:[#allocation511_spill] sm:$0xff] %v11815_v35  ;;  %v3792_v32 = vadd.f32 %v3791_v30, %v3562_v13  ;;  %v3564_v7 = vmul.f32 %v15711_v37, %v15710_v61  ;;  %v3571_v0 = vmul.f32 %v13422_v53, %v15712_v44  ;;  %v15713_v29 = vld [vmem:[#allocation278_spill] sm:$0xff]  ;;  %v15714_v33 = vunpack.c.l.bf16 %v11765_v57  ;;  %v15718_v53 = vld [vmem:[#allocation19_spill] sm:$0xff] }
 0x3f4   :  { %3781 = vadd.xlane.f32.xlu0 %v3780_v59  ;;  %v13423_v59 = vunpack.c.h.bf16 %v11815_v35  ;;  %v13425_v30 = vunpack.c.l.bf16 %v11793_v54  ;;  %v15717_v44 = vunpack.c.l.bf16 %v11788_v47  ;;  %v13424_v55 = vunpack.c.l.bf16 %v11815_v35  ;;  %v15799_v35 = vld [vmem:[#allocation205_spill] sm:$0xff]  ;;  %v15810_v54 = vld [vmem:[#allocation474_spill] sm:$0xff] }
 0x3f5   :  { %v3566_v22 = vmul.f32 %v15714_v33, %v15713_v29  ;;  %v3796_v13 = vadd.f32 %v3795_v63, %v3564_v7  ;;  %v15719_v29 = vunpack.c.h.bf16 %v9552_v24  ;;  %v15720_v63 = vld [vmem:[#allocation156_spill] sm:$0xff] }
 0x3f6   :  { %3785 = vadd.xlane.f32.xlu1 %v3784_v10  ;;  %v3573_v61 = vmul.f32 %v13423_v59, %v15715_v1  ;;  %v3803_v10 = vsel %vm3574_vm3, %v3569_v51, 0.0  ;;  %v3570_v7 = vmul.f32 %v13425_v30, %v15720_v63  ;;  %v15721_v51 = vld [vmem:[#allocation554_spill] sm:$0xff]  ;;  %v11873_v30 = vpop.permute.xlu1 %2779 }
 0x3f7   :  { %v3800_v37 = vadd.f32 %v3799_v49, %v3566_v22  ;;  %v3881_v33 = vmul.f32 %v15719_v29, %v15718_v53  ;;  %v15722_v49 = vunpack.c.h.bf16 %v9533_v4  ;;  %v15723_v59 = vld [vmem:[#allocation298_spill] sm:$0xff]  ;;  %v15724_v53 = vld [vmem:[#allocation269_spill] sm:$0xff] }
 0x3f8   :  { %3789 = vadd.xlane.f32.xlu0 %v3788_v34  ;;  %v3568_v34 = vmul.f32 %v15717_v44, %v15716_v50  ;;  %v3811_v44 = vsel %vm3574_vm3, %v3573_v61, 0.0  ;;  %v3572_v24 = vmul.f32 %v13424_v55, %v15723_v59  ;;  %v15730_v61 = vunpack.c.h.bf16 %v9593_v14  ;;  %v15732_v55 = vld [vmem:[#allocation475_spill] sm:$0xff] }
 0x3f9   :  { %v3883_v1 = vmul.f32 %v15722_v49, %v15721_v51  ;;  %v4000_v29 = vsel %vm3574_vm3, %v3881_v33, 0.0  ;;  %v15731_v49 = vld [vmem:[#allocation168_spill] sm:$0xff]  ;;  %v15735_v33 = vunpack.c.h.bf16 %v9710_v25 }
 0x3fa   :  { %3793 = vadd.xlane.f32.xlu1 %v3792_v32  ;;  %v3807_v32 = vsel %vm3574_vm3, %v3571_v0, 0.0  ;;  %v3804_v22 = vadd.f32 %v3803_v10, %v3568_v34  ;;  %v15725_v0 = vunpack.c.h.bf16 %v9650_v41  ;;  %v15727_v10 = vld [vmem:[#allocation468_spill] sm:$0xff]  ;;  %v3812_v4 = vadd.f32 %v3811_v44, %v3572_v24  ;;  %v15736_v44 = vld [vmem:[#allocation302_spill] sm:$0xff]  ;;  %v15737_v24 = vld [vmem:[#allocation417_spill] sm:$0xff] }
 0x3fb   :  { %v3808_v50 = vadd.f32 %v3807_v32, %v3570_v7  ;;  %v15728_v34 = vunpack.c.l.bf16 %v15727_v10  ;;  %v15729_v32 = vld [vmem:[#allocation273_spill] sm:$0xff]  ;;  %v4004_v59 = vsel %vm3574_vm3, %v3883_v1, 0.0  ;;  %v15733_v41 = vunpack.c.l.bf16 %v15732_v55 }
 0x3fc   :  { %3797 = vadd.xlane.f32.xlu0 %v3796_v13  ;;  %v3885_v13 = vmul.f32 %v15725_v0, %v15724_v53  ;;  %v3887_v7 = vmul.f32 %v15730_v61, %v15729_v32  ;;  %v15738_v14 = vunpack.c.l.bf16 %v15737_v24  ;;  %v15739_v10 = vld [vmem:[#allocation277_spill] sm:$0xff]  ;;  %v15740_v55 = vunpack.c.h.bf16 %v9669_v48  ;;  %v15741_v32 = vld [vmem:[#allocation306_spill] sm:$0xff]  ;;  %v15742_v61 = vld [vmem:[#allocation419_spill] sm:$0xff]  ;;  %v11895_v48 = vpop.permute.xlu1 %2783 }
 0x3fd   :  { %v3882_v53 = vmul.f32 %v15733_v41, %v15731_v49  ;;  %v15745_v41 = vld [vmem:[#allocation40_spill] sm:$0xff] }
 0x3fe   :  { %3801 = vadd.xlane.f32.xlu1 %v3800_v37  ;;  %v15726_v37 = vld [vmem:[#allocation164_spill] sm:$0xff]  ;;  %v4012_v25 = vsel %vm3574_vm3, %v3887_v7, 0.0  ;;  %v15750_v7 = vld [vmem:[#allocation94_spill] sm:$0xff] }
 0x3ff   :  { %v3880_v63 = vmul.f32 %v15728_v34, %v15726_v37  ;;  %v3884_v37 = vmul.f32 %v15738_v14, %v15736_v44  ;;  %v4005_v1 = vadd.f32 %v4004_v59, %v3882_v53  ;;  %v3891_v34 = vmul.f32 %v15740_v55, %v15739_v10  ;;  %v15748_v59 = vld [vmem:[#allocation421_spill] sm:$0xff] }
 0x400   :  { %3805 = vadd.xlane.f32.xlu0 %v3804_v22  ;;  %v15734_v22 = vld [vmem:[#allocation282_spill] sm:$0xff]  ;;  %v15749_v53 = vunpack.c.l.bf16 %v15748_v59  ;;  %v15751_v14 = vunpack.c.h.bf16 %v9762_v16 }
 0x401   :  { %v4001_v51 = vadd.f32 %v4000_v29, %v3880_v63  ;;  %v3889_v0 = vmul.f32 %v15735_v33, %v15734_v22  ;;  %v11879_v29 = vpop.permute.xlu0 %2781  ;;  %v15746_v22 = vunpack.c.h.bf16 %v15745_v41  ;;  %v15756_v41 = vunpack.c.h.bf16 %v9828_v28 }
 0x402   :  { %3809 = vadd.xlane.f32.xlu1 %v3808_v50  ;;  %v4008_v50 = vsel %vm3574_vm3, %v3885_v13, 0.0  ;;  %v15744_v13 = vld [vmem:[#allocation514_spill] sm:$0xff] }
 0x403   :  { %v4009_v63 = vadd.f32 %v4008_v50, %v3884_v37  ;;  %v3893_v33 = vmul.f32 %v15746_v22, %v15744_v13  ;;  %v4016_v44 = vsel %vm3574_vm3, %v3889_v0, 0.0  ;;  %v3895_v37 = vmul.f32 %v15751_v14, %v15750_v7  ;;  %v15755_v13 = vld [vmem:[#allocation171_spill] sm:$0xff]  ;;  %v15762_v14 = vld [vmem:[#allocation180_spill] sm:$0xff] }
 0x404   :  { %3813 = vadd.xlane.f32.xlu0 %v3812_v4  ;;  %v15743_v4 = vunpack.c.l.bf16 %v15742_v61  ;;  %v15753_v61 = vld [vmem:[#allocation425_spill] sm:$0xff]  ;;  %v15758_v22 = vld [vmem:[#allocation427_spill] sm:$0xff] }
 0x405   :  { %v11900_v10 = vpop.permute.xlu0 %2785  ;;  %v15754_v0 = vunpack.c.l.bf16 %v15753_v61  ;;  %v15759_v16 = vunpack.c.l.bf16 %v15758_v22  ;;  %v4028_v7 = vsel %vm3574_vm3, %v3895_v37, 0.0  ;;  %v15771_v22 = vunpack.c.h.bf16 %v9885_v58 }
 0x406   :  { %4002 = vadd.xlane.f32.xlu1 %v4001_v51  ;;  %v3886_v49 = vmul.f32 %v15743_v4, %v15741_v32  ;;  %v15747_v51 = vld [vmem:[#allocation310_spill] sm:$0xff]  ;;  %v4020_v32 = vsel %vm3574_vm3, %v3891_v34, 0.0  ;;  %v15761_v34 = vunpack.c.h.bf16 %v9822_v40 }
 0x407   :  { %v3888_v24 = vmul.f32 %v15749_v53, %v15747_v51 }
 0x408   :  { %4006 = vadd.xlane.f32.xlu0 %v4005_v1  ;;  %v4013_v50 = vadd.f32 %v4012_v25, %v3886_v49  ;;  %v15752_v1 = vld [vmem:[#allocation172_spill] sm:$0xff]  ;;  %v4024_v25 = vsel %vm3574_vm3, %v3893_v33, 0.0  ;;  %v15766_v33 = vunpack.c.h.bf16 %v9904_v20 }
 0x409   :  { %v4017_v55 = vadd.f32 %v4016_v44, %v3888_v24  ;;  %v3890_v4 = vmul.f32 %v15754_v0, %v15752_v1  ;;  %v15757_v49 = vld [vmem:[#allocation176_spill] sm:$0xff]  ;;  %v15760_v44 = vld [vmem:[#allocation558_spill] sm:$0xff]  ;;  %v15763_v1 = vld [vmem:[#allocation429_spill] sm:$0xff] }
 0x40a   :  { %4010 = vadd.xlane.f32.xlu1 %v4009_v63  ;;  %v3897_v63 = vmul.f32 %v15756_v41, %v15755_v13  ;;  %v3892_v51 = vmul.f32 %v15759_v16, %v15757_v49  ;;  %v3899_v53 = vmul.f32 %v15761_v34, %v15760_v44  ;;  %v15764_v28 = vunpack.c.l.bf16 %v15763_v1  ;;  %v11923_v13 = vpop.permute.xlu1 %2787  ;;  %v15770_v49 = vld [vmem:[#allocation47_spill] sm:$0xff]  ;;  %v15772_v44 = vld [vmem:[#allocation330_spill] sm:$0xff]  ;;  %v15773_v34 = vld [vmem:[#allocation433_spill] sm:$0xff] }
 0x40b   :  { %v4021_v59 = vadd.f32 %v4020_v32, %v3890_v4  ;;  %v15767_v32 = vld [vmem:[#allocation322_spill] sm:$0xff]  ;;  %v15768_v4 = vld [vmem:[#allocation431_spill] sm:$0xff]  ;;  %v3903_v16 = vmul.f32 %v15771_v22, %v15770_v49  ;;  %v15776_v1 = vunpack.c.h.bf16 %v15336_v18  ;;  %v15783_v22 = vld [vmem:[#allocation188_spill] sm:$0xff] }
 0x40c   :  { %4014 = vadd.xlane.f32.xlu0 %v4013_v50  ;;  %v4025_v24 = vadd.f32 %v4024_v25, %v3892_v51  ;;  %v3894_v61 = vmul.f32 %v15764_v28, %v15762_v14  ;;  %v15765_v50 = vld [vmem:[#allocation179_spill] sm:$0xff]  ;;  %v15769_v40 = vunpack.c.l.bf16 %v15768_v4  ;;  %v11929_v25 = vpop.permute.xlu0 %2789  ;;  %v4036_v20 = vsel %vm3574_vm3, %v3899_v53, 0.0  ;;  %v15781_v4 = vld [vmem:[#allocation173_spill] sm:$0xff] }
 0x40d   :  { %v3901_v0 = vmul.f32 %v15766_v33, %v15765_v50  ;;  %v4044_v18 = vsel %vm3574_vm3, %v3903_v16, 0.0  ;;  %v15792_v16 = vld [vmem:[#allocation187_spill] sm:$0xff] }
 0x40e   :  { %4018 = vadd.xlane.f32.xlu1 %v4017_v55  ;;  %v4032_v55 = vsel %vm3574_vm3, %v3897_v63, 0.0  ;;  %v3896_v41 = vmul.f32 %v15769_v40, %v15767_v32  ;;  %v4029_v37 = vadd.f32 %v4028_v7, %v3894_v61  ;;  %v15775_v63 = vld [vmem:[#allocation305_spill] sm:$0xff]  ;;  %v15778_v7 = vld [vmem:[#allocation435_spill] sm:$0xff]  ;;  %v15782_v40 = vunpack.c.h.bf16 %v15781_v4 }
 0x40f   :  { %v3905_v28 = vmul.f32 %v15776_v1, %v15775_v63  ;;  %v4040_v50 = vsel %vm3574_vm3, %v3901_v0, 0.0  ;;  %v15779_v61 = vunpack.c.l.bf16 %v15778_v7  ;;  %v15780_v32 = vld [vmem:[#allocation521_spill] sm:$0xff] }
 0x410   :  { %4022 = vadd.xlane.f32.xlu0 %v4021_v59  ;;  %v4033_v51 = vadd.f32 %v4032_v55, %v3896_v41  ;;  %v15774_v59 = vunpack.c.l.bf16 %v15773_v34  ;;  %v3578_v58 = vpop.xlane.xlu0 %3577  ;;  %v11945_v55 = vpop.permute.xlu1 %2791  ;;  %v3907_v41 = vmul.f32 %v15782_v40, %v15780_v32  ;;  %v15786_v34 = vld [vmem:[#allocation183_spill] sm:$0xff]  ;;  %v15793_v32 = vld [vmem:[#allocation193_spill] sm:$0xff] }
 0x411   :  { %v15794_v4 = vunpack.c.h.bf16 %v15793_v32 }
 0x412   :  { %4026 = vadd.xlane.f32.xlu1 %v4025_v24  ;;  %v3898_v14 = vmul.f32 %v15774_v59, %v15772_v44  ;;  %v15777_v24 = vld [vmem:[#allocation334_spill] sm:$0xff]  ;;  %v15787_v59 = vld [vmem:[#allocation304_spill] sm:$0xff] }
 0x413   :  { %v3900_v33 = vmul.f32 %v15779_v61, %v15777_v24  ;;  %v15788_v63 = vunpack.c.h.bf16 %v15787_v59  ;;  %v15789_v24 = vld [vmem:[#allocation192_spill] sm:$0xff]  ;;  %v3911_v40 = vmul.f32 %v15794_v4, %v15792_v16 }
 0x414   :  { %4030 = vadd.xlane.f32.xlu0 %v4029_v37  ;;  %v4037_v53 = vadd.f32 %v4036_v20, %v3898_v14  ;;  %v15784_v37 = vld [vmem:[#allocation437_spill] sm:$0xff]  ;;  %v15790_v20 = vld [vmem:[#allocation439_spill] sm:$0xff]  ;;  %v3586_v61 = vpop.xlane.xlu0 %3585 }
 0x415   :  { %v4041_v49 = vadd.f32 %v4040_v50, %v3900_v33  ;;  %v15785_v44 = vunpack.c.l.bf16 %v15784_v37  ;;  %v3909_v1 = vmul.f32 %v15788_v63, %v15786_v34  ;;  %v15791_v14 = vunpack.c.l.bf16 %v15790_v20  ;;  %v3582_v50 = vpop.xlane.xlu1 %3581  ;;  %v15795_v34 = vld [vmem:[#allocation420_spill] sm:$0xff]  ;;  %v15798_v63 = vld [vmem:[#allocation146_spill] sm:$0xff] }
 0x416   :  { %4034 = vadd.xlane.f32.xlu1 %v4033_v51  ;;  %v4048_v51 = vsel %vm3574_vm3, %v3905_v28, 0.0  ;;  %v15800_v20 = vunpack.c.h.bf16 %v15799_v35  ;;  %v4060_v35 = vsel %vm3574_vm3, %v3911_v40, 0.0 }
 0x417   :  { %v3902_v0 = vmul.f32 %v15785_v44, %v15783_v22  ;;  %v3904_v7 = vmul.f32 %v15791_v14, %v15789_v24  ;;  %v3815_v22 = vadd.f32 %v3582_v50, %v3578_v58  ;;  %v4052_v44 = vsel %vm3574_vm3, %v3907_v41, 0.0  ;;  %v15805_v50 = vld [vmem:[#allocation316_spill] sm:$0xff] }
 0x418   :  { %4038 = vadd.xlane.f32.xlu0 %v4037_v53  ;;  %v15796_v53 = vld [vmem:[#allocation443_spill] sm:$0xff]  ;;  %v3913_v24 = vmul.f32 %v15800_v20, %v15798_v63  ;;  %v3590_v58 = vpop.xlane.xlu0 %3589  ;;  %v15806_v4 = vunpack.c.h.bf16 %v15805_v50 }
 0x419   :  { %v4045_v33 = vadd.f32 %v4044_v18, %v3902_v0  ;;  %v4049_v37 = vadd.f32 %v4048_v51, %v3904_v7  ;;  %v15797_v59 = vunpack.c.l.bf16 %v15796_v53  ;;  %v15801_v18 = vld [vmem:[#allocation432_spill] sm:$0xff]  ;;  %v15802_v0 = vld [vmem:[#allocation445_spill] sm:$0xff]  ;;  %v3816_v16 = vadd.f32 %v3815_v22, %v3586_v61  ;;  %v3594_v51 = vpop.xlane.xlu1 %3593  ;;  %v15804_v7 = vld [vmem:[#allocation110_spill] sm:$0xff] }
 0x41a   :  { %4042 = vadd.xlane.f32.xlu1 %v4041_v49  ;;  %v4056_v49 = vsel %vm3574_vm3, %v3909_v1, 0.0  ;;  %v15803_v14 = vunpack.c.l.bf16 %v15802_v0  ;;  %v15808_v63 = vld [vmem:[#allocation447_spill] sm:$0xff]  ;;  %v15811_v0 = vld [vmem:[#allocation332_spill] sm:$0xff]  ;;  %v4064_v22 = vsel %vm3574_vm3, %v3913_v24, 0.0 }
 0x41b   :  { %v3906_v28 = vmul.f32 %v15797_v59, %v15795_v34  ;;  %v3915_v34 = vmul.f32 %v15806_v4, %v15804_v7  ;;  %v3817_v53 = vadd.f32 %v3816_v16, %v3590_v58  ;;  %v15809_v1 = vunpack.c.l.bf16 %v15808_v63  ;;  %v15816_v16 = vld [vmem:[#allocation200_spill] sm:$0xff] }
 0x41c   :  { %4046 = vadd.xlane.f32.xlu0 %v4045_v33  ;;  %v3908_v32 = vmul.f32 %v15803_v14, %v15801_v18  ;;  %v15807_v33 = vld [vmem:[#allocation220_spill] sm:$0xff]  ;;  %v15812_v18 = vunpack.c.h.bf16 %v15811_v0 }
 0x41d   :  { %v4053_v41 = vadd.f32 %v4052_v44, %v3906_v28  ;;  %v3910_v20 = vmul.f32 %v15809_v1, %v15807_v33  ;;  %v15814_v44 = vld [vmem:[#allocation449_spill] sm:$0xff]  ;;  %v3818_v7 = vadd.f32 %v3817_v53, %v3594_v51  ;;  %v15817_v58 = vld [vmem:[#allocation320_spill] sm:$0xff]  ;;  %v15820_v1 = vld [vmem:[#allocation451_spill] sm:$0xff] }
 0x41e   :  { %4050 = vadd.xlane.f32.xlu1 %v4049_v37  ;;  %v4057_v59 = vadd.f32 %v4056_v49, %v3908_v32  ;;  %v3917_v61 = vmul.f32 %v15812_v18, %v15810_v54  ;;  %v15813_v37 = vld [vmem:[#allocation436_spill] sm:$0xff]  ;;  %v15815_v28 = vunpack.c.l.bf16 %v15814_v44  ;;  %v3598_v49 = vpop.xlane.xlu0 %3597  ;;  %v3602_v32 = vpop.xlane.xlu1 %3601  ;;  %v15818_v50 = vunpack.c.h.bf16 %v15817_v58  ;;  %v15822_v18 = vld [vmem:[#allocation358_spill] sm:$0xff]  ;;  %v15823_v44 = vld [vmem:[#allocation103_spill] sm:$0xff] }
 0x41f   :  { %v4061_v40 = vadd.f32 %v4060_v35, %v3910_v20  ;;  %v3819_v33 = vadd.f32 %v3818_v7, %v3598_v49  ;;  %v4068_v54 = vsel %vm3574_vm3, %v3915_v34, 0.0  ;;  %v15821_v24 = vunpack.c.l.bf16 %v15820_v1  ;;  %v15826_v35 = vld [vmem:[#allocation453_spill] sm:$0xff]  ;;  %v15829_v49 = vld [vmem:[#allocation442_spill] sm:$0xff] }
 0x420   :  { %4054 = vadd.xlane.f32.xlu0 %v4053_v41  ;;  %v3912_v14 = vmul.f32 %v15815_v28, %v15813_v37  ;;  %v3919_v4 = vmul.f32 %v15818_v50, %v15816_v16  ;;  %v15819_v41 = vld [vmem:[#allocation438_spill] sm:$0xff]  ;;  %v15824_v37 = vunpack.c.h.bf16 %v15823_v44  ;;  %v4072_v53 = vsel %vm3574_vm3, %v3917_v61, 0.0  ;;  %v15828_v7 = vld [vmem:[#allocation49_spill] sm:$0xff] }
 0x421   :  { %v3914_v0 = vmul.f32 %v15821_v24, %v15819_v41  ;;  %v15827_v20 = vunpack.c.l.bf16 %v15826_v35  ;;  %v3820_v16 = vadd.f32 %v3819_v33, %v3602_v32  ;;  %v15830_v58 = vunpack.c.h.bf16 %v15829_v49  ;;  %v15835_v35 = vld [vmem:[#allocation457_spill] sm:$0xff] }
 0x422   :  { %4058 = vadd.xlane.f32.xlu1 %v4057_v59  ;;  %v4065_v63 = vadd.f32 %v4064_v22, %v3912_v14  ;;  %v3921_v51 = vmul.f32 %v15824_v37, %v15822_v18  ;;  %v15825_v59 = vld [vmem:[#allocation354_spill] sm:$0xff]  ;;  %v3606_v22 = vpop.xlane.xlu0 %3605  ;;  %v3610_v14 = vpop.xlane.xlu1 %3609  ;;  %v4076_v24 = vsel %vm3574_vm3, %v3919_v4, 0.0  ;;  %v15832_v18 = vld [vmem:[#allocation455_spill] sm:$0xff]  ;;  %v15834_v37 = vld [vmem:[#allocation216_spill] sm:$0xff] }
 0x423   :  { %v3916_v28 = vmul.f32 %v15827_v20, %v15825_v59  ;;  %v4069_v34 = vadd.f32 %v4068_v54, %v3914_v0  ;;  %v3923_v50 = vmul.f32 %v15830_v58, %v15828_v7  ;;  %v3821_v41 = vadd.f32 %v3820_v16, %v3606_v22  ;;  %v15838_v54 = vld [vmem:[#allocation458_spill] sm:$0xff]  ;;  %v15840_v16 = vld [vmem:[#allocation204_spill] sm:$0xff] }
 0x424   :  { %4062 = vadd.xlane.f32.xlu0 %v4061_v40  ;;  %v15831_v40 = vld [vmem:[#allocation61_spill] sm:$0xff]  ;;  %v15833_v61 = vunpack.c.l.bf16 %v15832_v18  ;;  %v15836_v59 = vunpack.c.h.bf16 %v15835_v35  ;;  %v4080_v33 = vsel %vm3574_vm3, %v3921_v51, 0.0  ;;  %v15839_v0 = vunpack.c.l.bf16 %v15838_v54  ;;  %v15845_v35 = vld [vmem:[#allocation532_spill] sm:$0xff] }
 0x425   :  { %v4073_v1 = vadd.f32 %v4072_v53, %v3916_v28  ;;  %v3822_v7 = vadd.f32 %v3821_v41, %v3610_v14  ;;  %v15841_v22 = vunpack.c.h.bf16 %v15459_v43  ;;  %v4084_v18 = vsel %vm3574_vm3, %v3923_v50, 0.0 }
 0x426   :  { %4066 = vadd.xlane.f32.xlu1 %v4065_v63  ;;  %v3918_v44 = vmul.f32 %v15833_v61, %v15831_v40  ;;  %v3925_v32 = vmul.f32 %v15836_v59, %v15834_v37  ;;  %v15837_v63 = vld [vmem:[#allocation11_spill] sm:$0xff]  ;;  %v3614_v53 = vpop.xlane.xlu0 %3613  ;;  %v3618_v28 = vpop.xlane.xlu1 %3617  ;;  %v15843_v61 = vld [vmem:[#allocation460_spill] sm:$0xff]  ;;  %v15846_v59 = vld [vmem:[#allocation82_spill] sm:$0xff] }
 0x427   :  { %v3920_v20 = vmul.f32 %v15839_v0, %v15837_v63  ;;  %v3927_v49 = vmul.f32 %v15841_v22, %v15840_v16  ;;  %v3823_v58 = vadd.f32 %v3822_v7, %v3614_v53  ;;  %v15844_v51 = vunpack.c.l.bf16 %v15843_v61  ;;  %v15852_v7 = vld [vmem:[#allocation119_spill] sm:$0xff] }
 0x428   :  { %4070 = vadd.xlane.f32.xlu0 %v4069_v34  ;;  %v4077_v4 = vadd.f32 %v4076_v24, %v3918_v44  ;;  %v15842_v34 = vld [vmem:[#allocation64_spill] sm:$0xff]  ;;  %v15847_v63 = vunpack.c.h.bf16 %v15846_v59  ;;  %v4088_v41 = vsel %vm3574_vm3, %v3925_v32, 0.0  ;;  %v15849_v24 = vld [vmem:[#allocation461_spill] sm:$0xff]  ;;  %v15853_v53 = vunpack.c.h.bf16 %v15852_v7 }
 0x429   :  { %v4081_v40 = vadd.f32 %v4080_v33, %v3920_v20  ;;  %v3922_v37 = vmul.f32 %v15844_v51, %v15842_v34  ;;  %v15850_v44 = vunpack.c.l.bf16 %v15849_v24  ;;  %v3824_v54 = vadd.f32 %v3823_v58, %v3618_v28  ;;  %v15851_v20 = vld [vmem:[#allocation199_spill] sm:$0xff]  ;;  %v15857_v59 = vld [vmem:[#allocation325_spill] sm:$0xff] }
 0x42a   :  { %4074 = vadd.xlane.f32.xlu1 %v4073_v1  ;;  %v3929_v14 = vmul.f32 %v15847_v63, %v15845_v35  ;;  %v15848_v1 = vld [vmem:[#allocation244_spill] sm:$0xff]  ;;  %v3622_v33 = vpop.xlane.xlu0 %3621  ;;  %v3626_v0 = vpop.xlane.xlu1 %3625  ;;  %v3931_v16 = vmul.f32 %v15853_v53, %v15851_v20  ;;  %v4092_v61 = vsel %vm3574_vm3, %v3927_v49, 0.0  ;;  %v15855_v51 = vld [vmem:[#allocation463_spill] sm:$0xff] }
 0x42b   :  { %v3924_v43 = vmul.f32 %v15850_v44, %v15848_v1  ;;  %v4085_v50 = vadd.f32 %v4084_v18, %v3922_v37  ;;  %v3825_v22 = vadd.f32 %v3824_v54, %v3622_v33  ;;  %v15856_v32 = vunpack.c.l.bf16 %v15855_v51  ;;  %v15858_v63 = vld [vmem:[#allocation139_spill] sm:$0xff]  ;;  %v15861_v18 = vld [vmem:[#allocation465_spill] sm:$0xff] }
 0x42c   :  { %4078 = vadd.xlane.f32.xlu0 %v4077_v4  ;;  %v15854_v4 = vld [vmem:[#allocation248_spill] sm:$0xff]  ;;  %v15859_v1 = vunpack.c.h.bf16 %v15858_v63  ;;  %v4096_v58 = vsel %vm3574_vm3, %v3929_v14, 0.0  ;;  %v15862_v37 = vunpack.c.l.bf16 %v15861_v18  ;;  %v15863_v54 = vld [vmem:[#allocation329_spill] sm:$0xff]  ;;  %v15864_v33 = vunpack.c.h.bf16 %v15502_v2  ;;  %v15866_v51 = vld [vmem:[#allocation467_spill] sm:$0xff] }
 0x42d   :  { %v4089_v34 = vadd.f32 %v4088_v41, %v3924_v43  ;;  %v3926_v35 = vmul.f32 %v15856_v32, %v15854_v4  ;;  %v3826_v44 = vadd.f32 %v3825_v22, %v3626_v0  ;;  %v4100_v4 = vsel %vm3574_vm3, %v3931_v16, 0.0  ;;  %v15873_v18 = vld [vmem:[#allocation211_spill] sm:$0xff] }
 0x42e   :  { %4082 = vadd.xlane.f32.xlu1 %v4081_v40  ;;  %v3933_v28 = vmul.f32 %v15859_v1, %v15857_v59  ;;  %v15860_v40 = vld [vmem:[#allocation77_spill] sm:$0xff]  ;;  %v3630_v41 = vpop.xlane.xlu0 %3629  ;;  %v3634_v43 = vpop.xlane.xlu1 %3633  ;;  %v3935_v20 = vmul.f32 %v15864_v33, %v15863_v54  ;;  %v15867_v14 = vunpack.c.l.bf16 %v15866_v51  ;;  %v15868_v59 = vld [vmem:[#allocation207_spill] sm:$0xff]  ;;  %v15869_v63 = vunpack.c.h.bf16 %v10580_v46  ;;  %v15876_v54 = vld [vmem:[#allocation476_spill] sm:$0xff] }
 0x42f   :  { %v3928_v24 = vmul.f32 %v15862_v37, %v15860_v40  ;;  %v4093_v49 = vadd.f32 %v4092_v61, %v3926_v35  ;;  %v3827_v7 = vadd.f32 %v3826_v44, %v3630_v41  ;;  %v15871_v61 = vld [vmem:[#allocation472_spill] sm:$0xff]  ;;  %v15874_v37 = vunpack.c.h.bf16 %v15528_v19  ;;  %v15879_v51 = vld [vmem:[#allocation143_spill] sm:$0xff] }
 0x430   :  { %4086 = vadd.xlane.f32.xlu0 %v4085_v50  ;;  %v15865_v50 = vld [vmem:[#allocation93_spill] sm:$0xff]  ;;  %v3937_v0 = vmul.f32 %v15869_v63, %v15868_v59  ;;  %v4104_v22 = vsel %vm3574_vm3, %v3933_v28, 0.0  ;;  %v15872_v35 = vunpack.c.l.bf16 %v15871_v61  ;;  %v4108_v46 = vsel %vm3574_vm3, %v3935_v20, 0.0 }
 0x431   :  { %v4097_v53 = vadd.f32 %v4096_v58, %v3928_v24  ;;  %v3930_v32 = vmul.f32 %v15867_v14, %v15865_v50  ;;  %v3828_v1 = vadd.f32 %v3827_v7, %v3634_v43  ;;  %v3939_v24 = vmul.f32 %v15874_v37, %v15873_v18  ;;  %v15878_v50 = vld [vmem:[#allocation535_spill] sm:$0xff]  ;;  %v15887_v18 = vld [vmem:[#allocation481_spill] sm:$0xff] }
 0x432   :  { %4090 = vadd.xlane.f32.xlu1 %v4089_v34  ;;  %v15870_v34 = vld [vmem:[#allocation26_spill] sm:$0xff]  ;;  %v3638_v58 = vpop.xlane.xlu0 %3637  ;;  %v3642_v40 = vpop.xlane.xlu1 %3641  ;;  %v15877_v28 = vunpack.c.l.bf16 %v15876_v54  ;;  %v15880_v14 = vunpack.c.h.bf16 %v15879_v51  ;;  %v4112_v7 = vsel %vm3574_vm3, %v3937_v0, 0.0  ;;  %v15885_v61 = vunpack.c.h.bf16 %v10599_v27 }
 0x433   :  { %v3932_v2 = vmul.f32 %v15872_v35, %v15870_v34  ;;  %v4101_v16 = vadd.f32 %v4100_v4, %v3930_v32  ;;  %v3829_v44 = vadd.f32 %v3828_v1, %v3638_v58  ;;  %v15882_v4 = vld [vmem:[#allocation479_spill] sm:$0xff]  ;;  %v15884_v34 = vld [vmem:[#allocation190_spill] sm:$0xff]  ;;  %v4116_v58 = vsel %vm3574_vm3, %v3939_v24, 0.0 }
 0x434   :  { %4094 = vadd.xlane.f32.xlu0 %v4093_v49  ;;  %v15875_v49 = vld [vmem:[#allocation382_spill] sm:$0xff]  ;;  %v3941_v43 = vmul.f32 %v15880_v14, %v15878_v50  ;;  %v15883_v32 = vunpack.c.l.bf16 %v15882_v4  ;;  %v3943_v35 = vmul.f32 %v15885_v61, %v15884_v34  ;;  %v15888_v0 = vunpack.c.l.bf16 %v15887_v18  ;;  %v15894_v14 = vld [vmem:[#allocation333_spill] sm:$0xff] }
 0x435   :  { %v4105_v41 = vadd.f32 %v4104_v22, %v3932_v2  ;;  %v3934_v33 = vmul.f32 %v15877_v28, %v15875_v49  ;;  %v3830_v59 = vadd.f32 %v3829_v44, %v3642_v40  ;;  %v15889_v49 = vld [vmem:[#allocation418_spill] sm:$0xff]  ;;  %v15890_v54 = vunpack.c.h.bf16 %v10654_v42 }
 0x436   :  { %4098 = vadd.xlane.f32.xlu1 %v4097_v53  ;;  %v15881_v53 = vld [vmem:[#allocation121_spill] sm:$0xff]  ;;  %v3646_v63 = vpop.xlane.xlu0 %3645  ;;  %v3650_v22 = vpop.xlane.xlu1 %3649  ;;  %v4120_v44 = vsel %vm3574_vm3, %v3941_v43, 0.0  ;;  %v4124_v42 = vsel %vm3574_vm3, %v3943_v35, 0.0  ;;  %v15900_v34 = vunpack.c.h.bf16 %v10690_v36 }
 0x437   :  { %v3936_v19 = vmul.f32 %v15883_v32, %v15881_v53  ;;  %v4109_v20 = vadd.f32 %v4108_v46, %v3934_v33  ;;  %v3831_v2 = vadd.f32 %v3830_v59, %v3646_v63  ;;  %v3945_v40 = vmul.f32 %v15890_v54, %v15889_v49  ;;  %v15892_v46 = vld [vmem:[#allocation484_spill] sm:$0xff]  ;;  %v15897_v59 = vld [vmem:[#allocation485_spill] sm:$0xff] }
 0x438   :  { %4102 = vadd.xlane.f32.xlu0 %v4101_v16  ;;  %v15886_v16 = vld [vmem:[#allocation525_spill] sm:$0xff]  ;;  %v15893_v28 = vunpack.c.l.bf16 %v15892_v46  ;;  %v15898_v43 = vunpack.c.l.bf16 %v15897_v59  ;;  %v15905_v49 = vunpack.c.h.bf16 %v15579_v52  ;;  %v15906_v46 = vld [vmem:[#allocation408_spill] sm:$0xff] }
 0x439   :  { %v4113_v1 = vadd.f32 %v4112_v7, %v3936_v19  ;;  %v3938_v37 = vmul.f32 %v15888_v0, %v15886_v16  ;;  %v3832_v33 = vadd.f32 %v3831_v2, %v3650_v22  ;;  %v15895_v7 = vunpack.c.h.bf16 %v10637_v56  ;;  %v15896_v19 = vld [vmem:[#allocation141_spill] sm:$0xff]  ;;  %v15901_v2 = vld [vmem:[#allocation158_spill] sm:$0xff] }
 0x43a   :  { %4106 = vadd.xlane.f32.xlu1 %v4105_v41  ;;  %v15891_v41 = vld [vmem:[#allocation471_spill] sm:$0xff]  ;;  %v3654_v50 = vpop.xlane.xlu0 %3653  ;;  %v3658_v51 = vpop.xlane.xlu1 %3657  ;;  %v3942_v63 = vmul.f32 %v15898_v43, %v15896_v19  ;;  %v4128_v61 = vsel %vm3574_vm3, %v3945_v40, 0.0  ;;  %v15914_v59 = vld [vmem:[#allocation345_spill] sm:$0xff]  ;;  %v15915_v43 = vunpack.c.h.bf16 %v10737_v23 }
 0x43b   :  { %v3940_v27 = vmul.f32 %v15893_v28, %v15891_v41  ;;  %v4117_v24 = vadd.f32 %v4116_v58, %v3938_v37  ;;  %v3947_v53 = vmul.f32 %v15895_v7, %v15894_v14  ;;  %v3833_v4 = vadd.f32 %v3832_v33, %v3654_v50  ;;  %v15904_v37 = vld [vmem:[#allocation219_spill] sm:$0xff]  ;;  %v15907_v28 = vld [vmem:[#allocation488_spill] sm:$0xff]  ;;  %v15909_v33 = vld [vmem:[#allocation341_spill] sm:$0xff] }
 0x43c   :  { %4110 = vadd.xlane.f32.xlu0 %v4109_v20  ;;  %v15899_v20 = vld [vmem:[#allocation215_spill] sm:$0xff]  ;;  %v4125_v35 = vadd.f32 %v4124_v42, %v3942_v63  ;;  %v3951_v54 = vmul.f32 %v15905_v49, %v15904_v37  ;;  %v15908_v40 = vunpack.c.l.bf16 %v15907_v28  ;;  %v15910_v50 = vunpack.c.h.bf16 %v10754_v11  ;;  %v15911_v14 = vld [vmem:[#allocation62_spill] sm:$0xff]  ;;  %v15912_v7 = vld [vmem:[#allocation492_spill] sm:$0xff] }
 0x43d   :  { %v4121_v32 = vadd.f32 %v4120_v44, %v3940_v27  ;;  %v3949_v22 = vmul.f32 %v15900_v34, %v15899_v20  ;;  %v3834_v16 = vadd.f32 %v3833_v4, %v3658_v51  ;;  %v4132_v36 = vsel %vm3574_vm3, %v3947_v53, 0.0 }
 0x43e   :  { %4114 = vadd.xlane.f32.xlu1 %v4113_v1  ;;  %v15902_v1 = vld [vmem:[#allocation486_spill] sm:$0xff]  ;;  %v3662_v18 = vpop.xlane.xlu0 %3661  ;;  %v3666_v0 = vpop.xlane.xlu1 %3665  ;;  %v3946_v27 = vmul.f32 %v15908_v40, %v15906_v46  ;;  %v3953_v51 = vmul.f32 %v15910_v50, %v15909_v33  ;;  %v15913_v4 = vunpack.c.l.bf16 %v15912_v7  ;;  %v3955_v63 = vmul.f32 %v15915_v43, %v15914_v59  ;;  %v15926_v33 = vld [vmem:[#allocation209_spill] sm:$0xff] }
 0x43f   :  { %v15903_v58 = vunpack.c.l.bf16 %v15902_v1  ;;  %v3835_v44 = vadd.f32 %v3834_v16, %v3662_v18  ;;  %v4140_v11 = vsel %vm3574_vm3, %v3951_v54, 0.0  ;;  %v15925_v46 = vunpack.c.h.bf16 %v10765_v60  ;;  %v15927_v50 = vld [vmem:[#allocation37_spill] sm:$0xff] }
 0x440   :  { %4118 = vadd.xlane.f32.xlu0 %v4117_v24  ;;  %v4136_v24 = vsel %vm3574_vm3, %v3949_v22, 0.0  ;;  %v3948_v52 = vmul.f32 %v15913_v4, %v15911_v14  ;;  %v4133_v53 = vadd.f32 %v4132_v36, %v3946_v27  ;;  %v4144_v18 = vsel %vm3574_vm3, %v3953_v51, 0.0  ;;  %v15924_v36 = vld [vmem:[#allocation202_spill] sm:$0xff] }
 0x441   :  { %v3944_v56 = vmul.f32 %v15903_v58, %v15901_v2  ;;  %v15917_v2 = vld [vmem:[#allocation494_spill] sm:$0xff]  ;;  %v3959_v28 = vmul.f32 %v15925_v46, %v15924_v36  ;;  %v15928_v51 = vunpack.c.l.bf16 %v15927_v50  ;;  %v15930_v7 = vunpack.c.h.bf16 %v15626_v6  ;;  %v15942_v46 = vld [vmem:[#allocation349_spill] sm:$0xff] }
 0x442   :  { %4122 = vadd.xlane.f32.xlu1 %v4121_v32  ;;  %v3836_v32 = vadd.f32 %v3835_v44, %v3666_v0  ;;  %v3670_v42 = vpop.xlane.xlu0 %3669  ;;  %v3674_v19 = vpop.xlane.xlu1 %3673  ;;  %v4137_v34 = vadd.f32 %v4136_v24, %v3948_v52  ;;  %v15918_v22 = vunpack.c.l.bf16 %v15917_v2  ;;  %v15919_v58 = vld [vmem:[#allocation206_spill] sm:$0xff]  ;;  %v15921_v0 = vld [vmem:[#allocation79_spill] sm:$0xff]  ;;  %v15945_v50 = vunpack.c.l.bf16 %v15641_v3 }
 0x443   :  { %v4129_v41 = vadd.f32 %v4128_v61, %v3944_v56  ;;  %v15916_v61 = vld [vmem:[#allocation68_spill] sm:$0xff]  ;;  %v15920_v56 = vunpack.c.h.bf16 %v10792_v15  ;;  %v4148_v15 = vsel %vm3574_vm3, %v3955_v63, 0.0  ;;  %v3954_v24 = vmul.f32 %v15928_v51, %v15926_v33  ;;  %v15929_v14 = vld [vmem:[#allocation498_spill] sm:$0xff] }
 0x444   :  { %4126 = vadd.xlane.f32.xlu0 %v4125_v35  ;;  %v3837_v20 = vadd.f32 %v3836_v32, %v3670_v42  ;;  %v3950_v1 = vmul.f32 %v15918_v22, %v15916_v61  ;;  %v15922_v35 = vld [vmem:[#allocation502_spill] sm:$0xff]  ;;  %v3961_v4 = vmul.f32 %v15930_v7, %v15929_v14  ;;  %v15931_v32 = vld [vmem:[#allocation95_spill] sm:$0xff]  ;;  %v4156_v22 = vsel %vm3574_vm3, %v3959_v28, 0.0  ;;  %v15944_v33 = vld [vmem:[#allocation148_spill] sm:$0xff] }
 0x445   :  { %v3957_v16 = vmul.f32 %v15920_v56, %v15919_v58  ;;  %v15923_v37 = vunpack.c.l.bf16 %v15922_v35  ;;  %v15932_v42 = vld [vmem:[#allocation78_spill] sm:$0xff]  ;;  %v4149_v63 = vadd.f32 %v4148_v15, %v3954_v24  ;;  %v15943_v28 = vunpack.c.h.bf16 %v15653_v9  ;;  %v15947_v7 = vld [vmem:[#allocation364_spill] sm:$0xff] }
 0x446   :  { %4130 = vadd.xlane.f32.xlu1 %v4129_v41  ;;  %v3838_v49 = vadd.f32 %v3837_v20, %v3674_v19  ;;  %v3678_v44 = vpop.xlane.xlu0 %3677  ;;  %v3682_v41 = vpop.xlane.xlu1 %3681  ;;  %v4141_v54 = vadd.f32 %v4140_v11, %v3950_v1  ;;  %v15933_v19 = vunpack.c.l.bf16 %v15932_v42  ;;  %v15934_v20 = vld [vmem:[#allocation223_spill] sm:$0xff]  ;;  %v15936_v1 = vld [vmem:[#allocation233_spill] sm:$0xff]  ;;  %v15937_v58 = vld [vmem:[#allocation86_spill] sm:$0xff]  ;;  %v4160_v35 = vsel %vm3574_vm3, %v3961_v4, 0.0 }
 0x447   :  { %v3952_v23 = vmul.f32 %v15923_v37, %v15921_v0  ;;  %v4152_v52 = vsel %vm3574_vm3, %v3957_v16, 0.0  ;;  %v15938_v56 = vunpack.c.l.bf16 %v15937_v58  ;;  %v15940_v37 = vld [vmem:[#allocation115_spill] sm:$0xff]  ;;  %v3962_v51 = vmul.f32 %v15945_v50, %v15944_v33  ;;  %v15963_v50 = vld [vmem:[#allocation240_spill] sm:$0xff] }
 0x448   :  { %4134 = vadd.xlane.f32.xlu0 %v4133_v53  ;;  %v3839_v40 = vadd.f32 %v3838_v49, %v3678_v44  ;;  %v3956_v60 = vmul.f32 %v15933_v19, %v15931_v32  ;;  %v15948_v4 = vunpack.c.l.bf16 %v15647_v12 }
 0x449   :  { %v4145_v27 = vadd.f32 %v4144_v18, %v3952_v23  ;;  %v3958_v16 = vmul.f32 %v15938_v56, %v15936_v1  ;;  %v15939_v18 = vunpack.c.h.bf16 %v15647_v12  ;;  %v15941_v23 = vunpack.c.l.bf16 %v15626_v6 }
 0x44a   :  { %4138 = vadd.xlane.f32.xlu1 %v4137_v34  ;;  %v3840_v53 = vadd.f32 %v3839_v40, %v3682_v41  ;;  %v3686_v59 = vpop.xlane.xlu0 %3685  ;;  %v3690_v43 = vpop.xlane.xlu1 %3689  ;;  %v15935_v34 = vunpack.c.h.bf16 %v15641_v3  ;;  %v4153_v2 = vadd.f32 %v4152_v52, %v3956_v60  ;;  %v3967_v40 = vmul.f32 %v15943_v28, %v15942_v46  ;;  %v15961_v28 = vld [vmem:[#allocation286_spill] sm:$0xff] }
 0x44b   :  { %v3965_v0 = vmul.f32 %v15939_v18, %v11406_v38  ;;  %v3960_v49 = vmul.f32 %v15941_v23, %v15940_v37  ;;  %v4157_v36 = vadd.f32 %v4156_v22, %v3958_v16  ;;  %v15946_v6 = vunpack.c.h.bf16 %v11563_v39  ;;  %v15954_v22 = vld [vmem:[#allocation147_spill] sm:$0xff] }
 0x44c   :  { %4142 = vadd.xlane.f32.xlu0 %v4141_v54  ;;  %v3963_v11 = vmul.f32 %v15935_v34, %v15934_v20  ;;  %v3841_v61 = vadd.f32 %v3840_v53, %v3686_v59  ;;  %v3964_v52 = vmul.f32 %v15948_v4, %v15947_v7  ;;  %v15949_v53 = vld [vmem:[#allocation235_spill] sm:$0xff]  ;;  %v15950_v3 = vunpack.c.h.bf16 %v11617_v26  ;;  %v15951_v20 = vld [vmem:[#allocation553_spill] sm:$0xff]  ;;  %v15966_v7 = vld [vmem:[#allocation508_spill] sm:$0xff] }
 0x44d   :  { %v4161_v15 = vadd.f32 %v4160_v35, %v3960_v49  ;;  %v3969_v24 = vmul.f32 %v15946_v6, %v11437_v8  ;;  %v4168_v14 = vsel %vm3574_vm3, %v3965_v0, 0.0  ;;  %v4172_v8 = vsel %vm3574_vm3, %v3967_v40, 0.0  ;;  %v15957_v49 = vld [vmem:[#allocation556_spill] sm:$0xff] }
 0x44e   :  { %4146 = vadd.xlane.f32.xlu1 %v4145_v27  ;;  %v3842_v44 = vadd.f32 %v3841_v61, %v3690_v43  ;;  %v3694_v41 = vpop.xlane.xlu0 %3693  ;;  %v3698_v54 = vpop.xlane.xlu1 %3697  ;;  %v4164_v38 = vsel %vm3574_vm3, %v3963_v11, 0.0  ;;  %v3971_v59 = vmul.f32 %v15950_v3, %v15949_v53  ;;  %v15952_v34 = vunpack.c.l.bf16 %v15653_v9  ;;  %v15971_v53 = vld [vmem:[#allocation289_spill] sm:$0xff] }
 0x44f   :  { %v4165_v60 = vadd.f32 %v4164_v38, %v3962_v51  ;;  %v15953_v12 = vunpack.c.h.bf16 %v11625_v62  ;;  %v15955_v1 = vunpack.c.l.bf16 %v11563_v39  ;;  %v15956_v9 = vunpack.c.h.bf16 %v11648_v45  ;;  %v15959_v39 = vld [vmem:[#allocation20_spill] sm:$0xff]  ;;  %v15964_v51 = vld [vmem:[#allocation374_spill] sm:$0xff] }
 0x450   :  { %4150 = vadd.xlane.f32.xlu0 %v4149_v63  ;;  %v3843_v27 = vadd.f32 %v3842_v44, %v3694_v41  ;;  %v4169_v63 = vadd.f32 %v4168_v14, %v3964_v52  ;;  %v3966_v11 = vmul.f32 %v15952_v34, %v15951_v20  ;;  %v15958_v44 = vunpack.c.l.bf16 %v11617_v26  ;;  %v15973_v34 = vld [vmem:[#allocation440_spill] sm:$0xff] }
 0x451   :  { %v3973_v61 = vmul.f32 %v15953_v12, %v11474_v5  ;;  %v3968_v58 = vmul.f32 %v15955_v1, %v15954_v22  ;;  %v3975_v35 = vmul.f32 %v15956_v9, %v11471_v31  ;;  %v4180_v5 = vsel %vm3574_vm3, %v3971_v59, 0.0  ;;  %v15976_v1 = vld [vmem:[#allocation184_spill] sm:$0xff] }
 0x452   :  { %4154 = vadd.xlane.f32.xlu1 %v4153_v2  ;;  %v3844_v32 = vadd.f32 %v3843_v27, %v3698_v54  ;;  %v3702_v42 = vpop.xlane.xlu0 %3701  ;;  %v3706_v19 = vpop.xlane.xlu1 %3705  ;;  %v4176_v2 = vsel %vm3574_vm3, %v3969_v24, 0.0  ;;  %v4173_v0 = vadd.f32 %v4172_v8, %v3966_v11  ;;  %v3970_v41 = vmul.f32 %v15958_v44, %v15957_v49  ;;  %v15974_v11 = vld [vmem:[#allocation365_spill] sm:$0xff] }
 0x453   :  { %v4177_v23 = vadd.f32 %v4176_v2, %v3968_v58  ;;  %v15960_v54 = vunpack.c.h.bf16 %v15959_v39  ;;  %v4184_v46 = vsel %vm3574_vm3, %v3973_v61, 0.0  ;;  %v15962_v40 = vunpack.c.l.bf16 %v11625_v62  ;;  %v15969_v62 = vld [vmem:[#allocation369_spill] sm:$0xff] }
 0x454   :  { %4158 = vadd.xlane.f32.xlu0 %v4157_v36  ;;  %v3845_v43 = vadd.f32 %v3844_v32, %v3702_v42  ;;  %v4181_v33 = vadd.f32 %v4180_v5, %v3970_v41  ;;  %v15965_v26 = vunpack.c.h.bf16 %v15964_v51  ;;  %v15967_v4 = vunpack.c.l.bf16 %v11648_v45  ;;  %v15968_v32 = vld [vmem:[#allocation350_spill] sm:$0xff] }
 0x455   :  { %v3977_v36 = vmul.f32 %v15960_v54, %v11505_v21  ;;  %v3972_v27 = vmul.f32 %v15962_v40, %v15961_v28  ;;  %v4188_v21 = vsel %vm3574_vm3, %v3975_v35, 0.0  ;;  %v15970_v42 = vunpack.c.h.bf16 %v15969_v62  ;;  %v15983_v28 = vld [vmem:[#allocation301_spill] sm:$0xff] }
 0x456   :  { %4162 = vadd.xlane.f32.xlu1 %v4161_v15  ;;  %v3846_v56 = vadd.f32 %v3845_v43, %v3706_v19  ;;  %v3710_v16 = vpop.xlane.xlu0 %3709  ;;  %v3714_v18 = vpop.xlane.xlu1 %3713  ;;  %v3979_v6 = vmul.f32 %v15965_v26, %v15963_v50  ;;  %v3974_v52 = vmul.f32 %v15967_v4, %v15966_v7  ;;  %v15972_v3 = vunpack.c.l.bf16 %v15959_v39 }
 0x457   :  { %v4185_v14 = vadd.f32 %v4184_v46, %v3972_v27  ;;  %v3981_v19 = vmul.f32 %v15970_v42, %v15968_v32  ;;  %v15975_v45 = vunpack.c.h.bf16 %v15974_v11  ;;  %v15977_v58 = vunpack.c.l.bf16 %v15964_v51  ;;  %v15987_v32 = vld [vmem:[#allocation444_spill] sm:$0xff] }
 0x458   :  { %4166 = vadd.xlane.f32.xlu0 %v4165_v60  ;;  %v3847_v37 = vadd.f32 %v3846_v56, %v3710_v16  ;;  %v4192_v60 = vsel %vm3574_vm3, %v3977_v36, 0.0  ;;  %v3976_v59 = vmul.f32 %v15972_v3, %v15971_v53  ;;  %v4189_v20 = vadd.f32 %v4188_v21, %v3974_v52  ;;  %v15978_v16 = vld [vmem:[#allocation239_spill] sm:$0xff]  ;;  %v15988_v42 = vld [vmem:[#allocation8_spill] sm:$0xff] }
 0x459   :  { %v3983_v12 = vmul.f32 %v15975_v45, %v15973_v34  ;;  %v4196_v22 = vsel %vm3574_vm3, %v3979_v6, 0.0  ;;  %v3978_v56 = vmul.f32 %v15977_v58, %v15976_v1  ;;  %v4200_v35 = vsel %vm3574_vm3, %v3981_v19, 0.0  ;;  %v15989_v3 = vld [vmem:[#allocation155_spill] sm:$0xff]  ;;  %v15991_v34 = vld [vmem:[#allocation446_spill] sm:$0xff] }
 0x45a   :  { %4170 = vadd.xlane.f32.xlu1 %v4169_v63  ;;  %v3848_v31 = vadd.f32 %v3847_v37, %v3714_v18  ;;  %v3718_v15 = vpop.xlane.xlu0 %3717  ;;  %v3722_v38 = vpop.xlane.xlu1 %3721  ;;  %v4193_v2 = vadd.f32 %v4192_v60, %v3976_v59  ;;  %v15979_v18 = vld [vmem:[#allocation54_spill] sm:$0xff]  ;;  %v15981_v37 = vld [vmem:[#allocation520_spill] sm:$0xff]  ;;  %v15984_v40 = vunpack.c.l.bf16 %v15974_v11  ;;  %v15992_v45 = vld [vmem:[#allocation163_spill] sm:$0xff] }
 0x45b   :  { %v4197_v39 = vadd.f32 %v4196_v22, %v3978_v56  ;;  %v4204_v46 = vsel %vm3574_vm3, %v3983_v12, 0.0  ;;  %v15993_v22 = vld [vmem:[#allocation448_spill] sm:$0xff]  ;;  %v15994_v58 = vld [vmem:[#allocation159_spill] sm:$0xff] }
 0x45c   :  { %4174 = vadd.xlane.f32.xlu0 %v4173_v0  ;;  %v3849_v24 = vadd.f32 %v3848_v31, %v3718_v15  ;;  %v15980_v0 = vunpack.c.h.bf16 %v15979_v18  ;;  %v3982_v27 = vmul.f32 %v15984_v40, %v15983_v28  ;;  %v15985_v15 = vld [vmem:[#allocation357_spill] sm:$0xff] }
 0x45d   :  { %v16000_v40 = vld [vmem:[#allocation297_spill] sm:$0xff] }
 0x45e   :  { %4178 = vadd.xlane.f32.xlu1 %v4177_v23  ;;  %v3850_v43 = vadd.f32 %v3849_v24, %v3722_v38  ;;  %v3985_v9 = vmul.f32 %v15980_v0, %v15978_v16  ;;  %v15982_v23 = vunpack.c.l.bf16 %v15969_v62  ;;  %v15986_v38 = vunpack.c.l.bf16 %v15979_v18  ;;  %v15995_v0 = vld [vmem:[#allocation10_spill] sm:$0xff] }
 0x45f   :  { %v3726_v63 = vpop.xlane.xlu0 %3725  ;;  %v4205_v6 = vadd.f32 %v4204_v46, %v3982_v27  ;;  %v15999_v46 = vld [vmem:[#allocation12_spill] sm:$0xff] }
 0x460   :  { %4182 = vadd.xlane.f32.xlu0 %v4181_v33  ;;  %v3851_v61 = vadd.f32 %v3850_v43, %v3726_v63  ;;  %v3980_v5 = vmul.f32 %v15982_v23, %v15981_v37  ;;  %v4208_v31 = vsel %vm3574_vm3, %v3985_v9, 0.0  ;;  %v3984_v33 = vmul.f32 %v15986_v38, %v15985_v15  ;;  %v15990_v43 = vld [vmem:[#allocation151_spill] sm:$0xff]  ;;  %v16001_v38 = vld [vmem:[#allocation362_spill] sm:$0xff] }
 0x461   :  { %v3730_v8 = vpop.xlane.xlu1 %3729 }
 0x462   :  { %4186 = vadd.xlane.f32.xlu1 %v4185_v14  ;;  %v3852_v49 = vadd.f32 %v3851_v61, %v3730_v8  ;;  %v4201_v36 = vadd.f32 %v4200_v35, %v3980_v5  ;;  %v4209_v14 = vadd.f32 %v4208_v31, %v3984_v33  ;;  %v15996_v35 = vld [vmem:[#allocation285_spill] sm:$0xff] }
 0x463   :  { %v3734_v44 = vpop.xlane.xlu0 %3733 }
 0x464   :  { %4190 = vadd.xlane.f32.xlu0 %v4189_v20  ;;  %v3853_v54 = vadd.f32 %v3852_v49, %v3734_v44  ;;  %v15997_v49 = vld [vmem:[#allocation67_spill] sm:$0xff] }
 0x466   :  { %4194 = vadd.xlane.f32.xlu1 %v4193_v2 }
 0x467   :  { %v3738_v41 = vpop.xlane.xlu1 %3737 }
 0x468   :  { %4198 = vadd.xlane.f32.xlu0 %v4197_v39  ;;  %v3854_v50 = vadd.f32 %v3853_v54, %v3738_v41  ;;  %v3742_v51 = vpop.xlane.xlu0 %3741  ;;  %v15998_v41 = vld [vmem:[#allocation557_spill] sm:$0xff] }
 0x46a   :  { %4202 = vadd.xlane.f32.xlu1 %v4201_v36  ;;  %v3855_v24 = vadd.f32 %v3854_v50, %v3742_v51  ;;  %v16002_v50 = vld [vmem:[#allocation293_spill] sm:$0xff] }
 0x46b   :  { %v3746_v26 = vpop.xlane.xlu1 %3745 }
 0x46c   :  { %4206 = vadd.xlane.f32.xlu0 %v4205_v6  ;;  %v3856_v21 = vadd.f32 %v3855_v24, %v3746_v26  ;;  %v16003_v24 = vld [vmem:[#allocation505_spill] sm:$0xff] }
 0x46d   :  { %v3750_v7 = vpop.xlane.xlu0 %3749 }
 0x46e   :  { %4210 = vadd.xlane.f32.xlu1 %v4209_v14  ;;  %v3857_v52 = vadd.f32 %v3856_v21, %v3750_v7  ;;  %v16004_v14 = vld [vmem:[#allocation175_spill] sm:$0xff] }
 0x46f   :  { %v3754_v4 = vpop.xlane.xlu1 %3753 }
 0x470   :  { %4610 = vadd.xlane.f32.xlu0 %v15987_v32  ;;  %v3858_v62 = vadd.f32 %v3857_v52, %v3754_v4  ;;  %v16005_v32 = vld [vmem:[#allocation39_spill] sm:$0xff] }
 0x471   :  { %v3758_v19 = vpop.xlane.xlu0 %3757 }
 0x472   :  { %4614 = vadd.xlane.f32.xlu1 %v15988_v42  ;;  %v3859_v53 = vadd.f32 %v3858_v62, %v3758_v19  ;;  %v16006_v62 = vld [vmem:[#allocation25_spill] sm:$0xff] }
 0x473   :  { %v3762_v60 = vpop.xlane.xlu1 %3761 }
 0x474   :  { %5035 = vadd.xlane.f32.xlu0 %v15989_v3  ;;  %v3860_v59 = vadd.f32 %v3859_v53, %v3762_v60  ;;  %v16007_v3 = vld [vmem:[#allocation370_spill] sm:$0xff] }
 0x475   :  { %v3766_v63 = vpop.xlane.xlu0 %3765 }
 0x476   :  { %5039 = vadd.xlane.f32.xlu1 %v15990_v43  ;;  %v3861_v20 = vadd.f32 %v3860_v59, %v3766_v63  ;;  %v16008_v59 = vld [vmem:[#allocation326_spill] sm:$0xff] }
 0x477   :  { %v3770_v8 = vpop.xlane.xlu1 %3769 }
 0x478   :  { %4618 = vadd.xlane.f32.xlu0 %v15991_v34  ;;  %v3862_v11 = vadd.f32 %v3861_v20, %v3770_v8  ;;  %v16009_v34 = vld [vmem:[#allocation81_spill] sm:$0xff] }
 0x479   :  { %v3774_v12 = vpop.xlane.xlu0 %3773 }
 0x47a   :  { %5043 = vadd.xlane.f32.xlu1 %v15992_v45  ;;  %v3863_v2 = vadd.f32 %v3862_v11, %v3774_v12  ;;  %v16010_v11 = vld [vmem:[#allocation196_spill] sm:$0xff] }
 0x47b   :  { %v3778_v61 = vpop.xlane.xlu1 %3777 }
 0x47c   :  { %4622 = vadd.xlane.f32.xlu0 %v15993_v22  ;;  %v3864_v1 = vadd.f32 %v3863_v2, %v3778_v61  ;;  %v16011_v22 = vld [vmem:[#allocation89_spill] sm:$0xff] }
 0x47d   :  { %v3782_v56 = vpop.xlane.xlu0 %3781 }
 0x47e   :  { %5047 = vadd.xlane.f32.xlu1 %v15994_v58  ;;  %v3865_v18 = vadd.f32 %v3864_v1, %v3782_v56  ;;  %v16012_v1 = vld [vmem:[#allocation526_spill] sm:$0xff] }
 0x47f   :  { %v3786_v16 = vpop.xlane.xlu1 %3785 }
 0x480   :  { %4626 = vadd.xlane.f32.xlu0 %v15995_v0  ;;  %v3866_v9 = vadd.f32 %v3865_v18, %v3786_v16  ;;  %v16013_v0 = vld [vmem:[#allocation85_spill] sm:$0xff] }
 0x481   :  { %v3790_v37 = vpop.xlane.xlu0 %3789 }
 0x482   :  { %5051 = vadd.xlane.f32.xlu1 %v15996_v35  ;;  %v3867_v5 = vadd.f32 %v3866_v9, %v3790_v37  ;;  %v16014_v9 = vld [vmem:[#allocation527_spill] sm:$0xff] }
 0x483   :  { %v3794_v23 = vpop.xlane.xlu1 %3793 }
 0x484   :  { %4630 = vadd.xlane.f32.xlu0 %v15997_v49  ;;  %v3868_v44 = vadd.f32 %v3867_v5, %v3794_v23  ;;  %v16015_v49 = vld [vmem:[#allocation378_spill] sm:$0xff] }
 0x485   :  { %v3798_v39 = vpop.xlane.xlu0 %3797 }
 0x486   :  { %5055 = vadd.xlane.f32.xlu1 %v15998_v41  ;;  %v3869_v36 = vadd.f32 %v3868_v44, %v3798_v39  ;;  %v16016_v44 = vld [vmem:[#allocation313_spill] sm:$0xff] }
 0x487   :  { %v3802_v54 = vpop.xlane.xlu1 %3801 }
 0x488   :  { %4634 = vadd.xlane.f32.xlu0 %v15999_v46  ;;  %v3870_v28 = vadd.f32 %v3869_v36, %v3802_v54  ;;  %v16017_v46 = vld [vmem:[#allocation97_spill] sm:$0xff] }
 0x489   :  { %v3806_v27 = vpop.xlane.xlu0 %3805 }
 0x48a   :  { %5059 = vadd.xlane.f32.xlu1 %v16000_v40  ;;  %v3871_v15 = vadd.f32 %v3870_v28, %v3806_v27  ;;  %v16018_v28 = vld [vmem:[#allocation309_spill] sm:$0xff] }
 0x48b   :  { %v3810_v31 = vpop.xlane.xlu1 %3809 }
 0x48c   :  { %4638 = vadd.xlane.f32.xlu0 %v16001_v38  ;;  %v3872_v33 = vadd.f32 %v3871_v15, %v3810_v31  ;;  %v16019_v38 = vld [vmem:[#allocation24_spill] sm:$0xff] }
 0x48d   :  { %v3814_v51 = vpop.xlane.xlu0 %3813 }
 0x48e   :  { %5063 = vadd.xlane.f32.xlu1 %v16002_v50  ;;  %v12251_v6 = vadd.f32 %v3872_v33, %v3814_v51  ;;  %v16020_v33 = vld [vmem:[#allocation195_spill] sm:$0xff] }
 0x48f   :  { %v4003_v26 = vpop.xlane.xlu1 %4002 }
 0x490   :  { %4642 = vadd.xlane.f32.xlu0 %v16003_v24 }
 0x491   :  { %v4007_v21 = vpop.xlane.xlu0 %4006 }
 0x492   :  { %5067 = vadd.xlane.f32.xlu1 %v16004_v14  ;;  %v4240_v7 = vadd.f32 %v4007_v21, %v4003_v26  ;;  %v16021_v14 = vld [vmem:[#allocation260_spill] sm:$0xff]  ;;  %v16022_v21 = vld [vmem:[#allocation191_spill] sm:$0xff] }
 0x493   :  { %v4011_v4 = vpop.xlane.xlu1 %4010 }
 0x494   :  { %v4241_v52 = vadd.f32 %v4240_v7, %v4011_v4  ;;  %4646 = vadd.xlane.f32.xlu0 %v16005_v32 }
 0x495   :  { %v4015_v42 = vpop.xlane.xlu0 %4014 }
 0x496   :  { %5071 = vadd.xlane.f32.xlu1 %v16006_v62  ;;  %v4242_v19 = vadd.f32 %v4241_v52, %v4015_v42  ;;  %v16023_v62 = vld [vmem:[#allocation113_spill] sm:$0xff] }
 0x497   :  { %v4019_v60 = vpop.xlane.xlu1 %4018  ;;  %v16024_v42 = vld [vmem:[#allocation321_spill] sm:$0xff] }
 0x498   :  { %v4243_v53 = vadd.f32 %v4242_v19, %v4019_v60  ;;  %4650 = vadd.xlane.f32.xlu0 %v16007_v3 }
 0x499   :  { %v4023_v43 = vpop.xlane.xlu0 %4022 }
 0x49a   :  { %5075 = vadd.xlane.f32.xlu1 %v16008_v59  ;;  %v4244_v63 = vadd.f32 %v4243_v53, %v4023_v43  ;;  %v16025_v59 = vld [vmem:[#allocation109_spill] sm:$0xff] }
 0x49b   :  { %v4027_v8 = vpop.xlane.xlu1 %4026  ;;  %v16026_v43 = vld [vmem:[#allocation317_spill] sm:$0xff] }
 0x49c   :  { %v4245_v20 = vadd.f32 %v4244_v63, %v4027_v8  ;;  %4654 = vadd.xlane.f32.xlu0 %v16009_v34 }
 0x49d   :  { %v4031_v45 = vpop.xlane.xlu0 %4030 }
 0x49e   :  { %5079 = vadd.xlane.f32.xlu1 %v16010_v11  ;;  %v4246_v12 = vadd.f32 %v4245_v20, %v4031_v45  ;;  %v16027_v11 = vld [vmem:[#allocation386_spill] sm:$0xff] }
 0x49f   :  { %v4035_v61 = vpop.xlane.xlu1 %4034  ;;  %v16028_v45 = vld [vmem:[#allocation118_spill] sm:$0xff] }
 0x4a0   :  { %v4247_v2 = vadd.f32 %v4246_v12, %v4035_v61  ;;  %4658 = vadd.xlane.f32.xlu0 %v16011_v22 }
 0x4a1   :  { %v4039_v58 = vpop.xlane.xlu0 %4038 }
 0x4a2   :  { %5083 = vadd.xlane.f32.xlu1 %v16012_v1  ;;  %v4248_v56 = vadd.f32 %v4247_v2, %v4039_v58  ;;  %v16029_v1 = vld [vmem:[#allocation390_spill] sm:$0xff]  ;;  %v16030_v58 = vld [vmem:[#allocation203_spill] sm:$0xff] }
 0x4a3   :  { %v4043_v16 = vpop.xlane.xlu1 %4042 }
 0x4a4   :  { %v4249_v18 = vadd.f32 %v4248_v56, %v4043_v16  ;;  %4662 = vadd.xlane.f32.xlu0 %v16013_v0 }
 0x4a5   :  { %v4047_v35 = vpop.xlane.xlu0 %4046 }
 0x4a6   :  { %5087 = vadd.xlane.f32.xlu1 %v16014_v9  ;;  %v4250_v37 = vadd.f32 %v4249_v18, %v4047_v35  ;;  %v16031_v9 = vld [vmem:[#allocation32_spill] sm:$0xff]  ;;  %v16032_v35 = vld [vmem:[#allocation533_spill] sm:$0xff] }
 0x4a7   :  { %v4051_v23 = vpop.xlane.xlu1 %4050 }
 0x4a8   :  { %v4251_v5 = vadd.f32 %v4250_v37, %v4051_v23  ;;  %4666 = vadd.xlane.f32.xlu0 %v16015_v49 }
 0x4a9   :  { %v4055_v41 = vpop.xlane.xlu0 %4054 }
 0x4aa   :  { %5091 = vadd.xlane.f32.xlu1 %v16016_v44  ;;  %v4252_v39 = vadd.f32 %v4251_v5, %v4055_v41  ;;  %v16033_v44 = vld [vmem:[#allocation272_spill] sm:$0xff] }
 0x4ab   :  { %v4059_v54 = vpop.xlane.xlu1 %4058  ;;  %v16034_v41 = vld [vmem:[#allocation524_spill] sm:$0xff] }
 0x4ac   :  { %v4253_v36 = vadd.f32 %v4252_v39, %v4059_v54  ;;  %4670 = vadd.xlane.f32.xlu0 %v16017_v46 }
 0x4ad   :  { %v4063_v40 = vpop.xlane.xlu0 %4062 }
 0x4ae   :  { %5095 = vadd.xlane.f32.xlu1 %v16018_v28  ;;  %v4254_v27 = vadd.f32 %v4253_v36, %v4063_v40  ;;  %v16035_v28 = vld [vmem:[#allocation35_spill] sm:$0xff]  ;;  %v16036_v40 = vld [vmem:[#allocation338_spill] sm:$0xff] }
 0x4af   :  { %v4067_v31 = vpop.xlane.xlu1 %4066 }
 0x4b0   :  { %v4255_v15 = vadd.f32 %v4254_v27, %v4067_v31  ;;  %4674 = vadd.xlane.f32.xlu0 %v16019_v38 }
 0x4b1   :  { %v4071_v50 = vpop.xlane.xlu0 %4070 }
 0x4b2   :  { %5099 = vadd.xlane.f32.xlu1 %v16020_v33  ;;  %v4256_v51 = vadd.f32 %v4255_v15, %v4071_v50  ;;  %v16037_v33 = vld [vmem:[#allocation34_spill] sm:$0xff] }
 0x4b3   :  { %v4075_v26 = vpop.xlane.xlu1 %4074  ;;  %v16038_v50 = vld [vmem:[#allocation478_spill] sm:$0xff] }
 0x4b4   :  { %v4257_v24 = vadd.f32 %v4256_v51, %v4075_v26  ;;  %4678 = vadd.xlane.f32.xlu0 %v16021_v14 }
 0x4b5   :  { %v4079_v7 = vpop.xlane.xlu0 %4078 }
 0x4b6   :  { %5103 = vadd.xlane.f32.xlu1 %v16022_v21  ;;  %v4258_v4 = vadd.f32 %v4257_v24, %v4079_v7  ;;  %v16039_v21 = vld [vmem:[#allocation38_spill] sm:$0xff] }
 0x4b7   :  { %v4083_v52 = vpop.xlane.xlu1 %4082  ;;  %v16040_v7 = vld [vmem:[#allocation174_spill] sm:$0xff] }
 0x4b8   :  { %v4259_v32 = vadd.f32 %v4258_v4, %v4083_v52  ;;  %4682 = vadd.xlane.f32.xlu0 %v16023_v62 }
 0x4b9   :  { %v4087_v19 = vpop.xlane.xlu0 %4086 }
 0x4ba   :  { %5107 = vadd.xlane.f32.xlu1 %v16024_v42  ;;  %v4260_v60 = vadd.f32 %v4259_v32, %v4087_v19  ;;  %v16041_v42 = vld [vmem:[#allocation36_spill] sm:$0xff]  ;;  %v16042_v19 = vld [vmem:[#allocation178_spill] sm:$0xff] }
 0x4bb   :  { %v4091_v53 = vpop.xlane.xlu1 %4090 }
 0x4bc   :  { %v4261_v3 = vadd.f32 %v4260_v60, %v4091_v53  ;;  %4686 = vadd.xlane.f32.xlu0 %v16025_v59 }
 0x4bd   :  { %v4095_v63 = vpop.xlane.xlu0 %4094 }
 0x4be   :  { %5111 = vadd.xlane.f32.xlu1 %v16026_v43  ;;  %v4262_v8 = vadd.f32 %v4261_v3, %v4095_v63  ;;  %v16043_v43 = vld [vmem:[#allocation280_spill] sm:$0xff]  ;;  %v16044_v63 = vld [vmem:[#allocation434_spill] sm:$0xff] }
 0x4bf   :  { %v4099_v20 = vpop.xlane.xlu1 %4098 }
 0x4c0   :  { %v4263_v34 = vadd.f32 %v4262_v8, %v4099_v20  ;;  %4690 = vadd.xlane.f32.xlu0 %v16027_v11 }
 0x4c1   :  { %v4103_v12 = vpop.xlane.xlu0 %4102 }
 0x4c2   :  { %5115 = vadd.xlane.f32.xlu1 %v16028_v45  ;;  %v4264_v61 = vadd.f32 %v4263_v34, %v4103_v12  ;;  %v16045_v45 = vld [vmem:[#allocation42_spill] sm:$0xff]  ;;  %v16046_v12 = vld [vmem:[#allocation337_spill] sm:$0xff] }
 0x4c3   :  { %v4107_v2 = vpop.xlane.xlu1 %4106 }
 0x4c4   :  { %v4265_v22 = vadd.f32 %v4264_v61, %v4107_v2  ;;  %4694 = vadd.xlane.f32.xlu0 %v16029_v1 }
 0x4c5   :  { %v4111_v56 = vpop.xlane.xlu0 %4110 }
 0x4c6   :  { %5119 = vadd.xlane.f32.xlu1 %v16030_v58  ;;  %v4266_v16 = vadd.f32 %v4265_v22, %v4111_v56  ;;  %v16047_v58 = vld [vmem:[#allocation44_spill] sm:$0xff]  ;;  %v16048_v56 = vld [vmem:[#allocation422_spill] sm:$0xff] }
 0x4c7   :  { %v4115_v18 = vpop.xlane.xlu1 %4114 }
 0x4c8   :  { %v4267_v0 = vadd.f32 %v4266_v16, %v4115_v18  ;;  %4698 = vadd.xlane.f32.xlu0 %v16031_v9 }
 0x4c9   :  { %v4119_v37 = vpop.xlane.xlu0 %4118 }
 0x4ca   :  { %5123 = vadd.xlane.f32.xlu1 %v16032_v35  ;;  %v4268_v23 = vadd.f32 %v4267_v0, %v4119_v37  ;;  %v16049_v35 = vld [vmem:[#allocation406_spill] sm:$0xff]  ;;  %v16050_v37 = vld [vmem:[#allocation57_spill] sm:$0xff] }
 0x4cb   :  { %v4123_v5 = vpop.xlane.xlu1 %4122 }
 0x4cc   :  { %v4269_v49 = vadd.f32 %v4268_v23, %v4123_v5  ;;  %4702 = vadd.xlane.f32.xlu0 %v16033_v44 }
 0x4cd   :  { %v4127_v39 = vpop.xlane.xlu0 %4126 }
 0x4ce   :  { %5127 = vadd.xlane.f32.xlu1 %v16034_v41  ;;  %v4270_v54 = vadd.f32 %v4269_v49, %v4127_v39  ;;  %v16051_v41 = vld [vmem:[#allocation50_spill] sm:$0xff] }
 0x4cf   :  { %v4131_v36 = vpop.xlane.xlu1 %4130  ;;  %v16052_v39 = vld [vmem:[#allocation346_spill] sm:$0xff] }
 0x4d0   :  { %v4271_v46 = vadd.f32 %v4270_v54, %v4131_v36  ;;  %4706 = vadd.xlane.f32.xlu0 %v16035_v28 }
 0x4d1   :  { %v4135_v27 = vpop.xlane.xlu0 %4134 }
 0x4d2   :  { %5131 = vadd.xlane.f32.xlu1 %v16036_v40  ;;  %v4272_v31 = vadd.f32 %v4271_v46, %v4135_v27  ;;  %v16053_v40 = vld [vmem:[#allocation48_spill] sm:$0xff] }
 0x4d3   :  { %v4139_v15 = vpop.xlane.xlu1 %4138  ;;  %v16054_v27 = vld [vmem:[#allocation228_spill] sm:$0xff] }
 0x4d4   :  { %v4273_v38 = vadd.f32 %v4272_v31, %v4139_v15  ;;  %4710 = vadd.xlane.f32.xlu0 %v16037_v33 }
 0x4d5   :  { %v4143_v51 = vpop.xlane.xlu0 %4142 }
 0x4d6   :  { %5135 = vadd.xlane.f32.xlu1 %v16038_v50  ;;  %v4274_v26 = vadd.f32 %v4273_v38, %v4143_v51  ;;  %v16055_v50 = vld [vmem:[#allocation292_spill] sm:$0xff]  ;;  %v16056_v51 = vld [vmem:[#allocation426_spill] sm:$0xff] }
 0x4d7   :  { %v4147_v24 = vpop.xlane.xlu1 %4146 }
 0x4d8   :  { %v4275_v14 = vadd.f32 %v4274_v26, %v4147_v24  ;;  %4714 = vadd.xlane.f32.xlu0 %v16039_v21  ;;  %v16057_v21 = vld [vmem:[#allocation410_spill] sm:$0xff] }
 0x4d9   :  { %v4151_v4 = vpop.xlane.xlu0 %4150 }
 0x4da   :  { %5139 = vadd.xlane.f32.xlu1 %v16040_v7  ;;  %v4276_v52 = vadd.f32 %v4275_v14, %v4151_v4  ;;  %v16058_v7 = vld [vmem:[#allocation428_spill] sm:$0xff] }
 0x4db   :  { %v4155_v32 = vpop.xlane.xlu1 %4154 }
 0x4dc   :  { %v4277_v62 = vadd.f32 %v4276_v52, %v4155_v32  ;;  %4718 = vadd.xlane.f32.xlu0 %v16041_v42  ;;  %v16060_v42 = vld [vmem:[#allocation224_spill] sm:$0xff] }
 0x4dd   :  { %v4159_v60 = vpop.xlane.xlu0 %4158 }
 0x4de   :  { %5143 = vadd.xlane.f32.xlu1 %v16042_v19  ;;  %v4278_v53 = vadd.f32 %v4277_v62, %v4159_v60  ;;  %v16059_v62 = vld [vmem:[#allocation185_spill] sm:$0xff] }
 0x4df   :  { %v4163_v3 = vpop.xlane.xlu1 %4162 }
 0x4e0   :  { %v4279_v59 = vadd.f32 %v4278_v53, %v4163_v3  ;;  %4722 = vadd.xlane.f32.xlu0 %v16043_v43  ;;  %v16062_v43 = vld [vmem:[#allocation227_spill] sm:$0xff] }
 0x4e1   :  { %v4167_v8 = vpop.xlane.xlu0 %4166 }
 0x4e2   :  { %5147 = vadd.xlane.f32.xlu1 %v16044_v63  ;;  %v4280_v20 = vadd.f32 %v4279_v59, %v4167_v8  ;;  %v16061_v59 = vld [vmem:[#allocation181_spill] sm:$0xff] }
 0x4e3   :  { %v4171_v34 = vpop.xlane.xlu1 %4170 }
 0x4e4   :  { %v4281_v11 = vadd.f32 %v4280_v20, %v4171_v34  ;;  %4726 = vadd.xlane.f32.xlu0 %v16045_v45  ;;  %v16064_v45 = vld [vmem:[#allocation236_spill] sm:$0xff] }
 0x4e5   :  { %v4175_v61 = vpop.xlane.xlu0 %4174 }
 0x4e6   :  { %5151 = vadd.xlane.f32.xlu1 %v16046_v12  ;;  %v4282_v2 = vadd.f32 %v4281_v11, %v4175_v61  ;;  %v16063_v11 = vld [vmem:[#allocation75_spill] sm:$0xff] }
 0x4e7   :  { %v4179_v22 = vpop.xlane.xlu1 %4178 }
 0x4e8   :  { %v4283_v1 = vadd.f32 %v4282_v2, %v4179_v22  ;;  %4730 = vadd.xlane.f32.xlu0 %v16047_v58  ;;  %v16066_v58 = vld [vmem:[#allocation353_spill] sm:$0xff] }
 0x4e9   :  { %v4183_v16 = vpop.xlane.xlu0 %4182 }
 0x4ea   :  { %5155 = vadd.xlane.f32.xlu1 %v16048_v56  ;;  %v4284_v18 = vadd.f32 %v4283_v1, %v4183_v16  ;;  %v16065_v1 = vld [vmem:[#allocation71_spill] sm:$0xff] }
 0x4eb   :  { %v4187_v0 = vpop.xlane.xlu1 %4186 }
 0x4ec   :  { %v4285_v9 = vadd.f32 %v4284_v18, %v4187_v0  ;;  %4734 = vadd.xlane.f32.xlu0 %v16049_v35  ;;  %v16068_v35 = vld [vmem:[#allocation430_spill] sm:$0xff] }
 0x4ed   :  { %v4191_v23 = vpop.xlane.xlu0 %4190 }
 0x4ee   :  { %5159 = vadd.xlane.f32.xlu1 %v16050_v37  ;;  %v4286_v5 = vadd.f32 %v4285_v9, %v4191_v23  ;;  %v16067_v9 = vld [vmem:[#allocation489_spill] sm:$0xff] }
 0x4ef   :  { %v4195_v49 = vpop.xlane.xlu1 %4194 }
 0x4f0   :  { %v4287_v44 = vadd.f32 %v4286_v5, %v4195_v49  ;;  %4738 = vadd.xlane.f32.xlu0 %v16051_v41  ;;  %v16070_v41 = vld [vmem:[#allocation342_spill] sm:$0xff] }
 0x4f1   :  { %v4199_v54 = vpop.xlane.xlu0 %4198 }
 0x4f2   :  { %5163 = vadd.xlane.f32.xlu1 %v16052_v39  ;;  %v4288_v36 = vadd.f32 %v4287_v44, %v4199_v54  ;;  %v16069_v44 = vld [vmem:[#allocation83_spill] sm:$0xff] }
 0x4f3   :  { %v4203_v46 = vpop.xlane.xlu1 %4202 }
 0x4f4   :  { %v4289_v28 = vadd.f32 %v4288_v36, %v4203_v46  ;;  %4742 = vadd.xlane.f32.xlu0 %v16053_v40  ;;  %v16072_v40 = vld [vmem:[#allocation231_spill] sm:$0xff] }
 0x4f5   :  { %v4207_v31 = vpop.xlane.xlu0 %4206 }
 0x4f6   :  { %5167 = vadd.xlane.f32.xlu1 %v16054_v27  ;;  %v4290_v15 = vadd.f32 %v4289_v28, %v4207_v31  ;;  %v16071_v28 = vld [vmem:[#allocation91_spill] sm:$0xff] }
 0x4f7   :  { %v4211_v38 = vpop.xlane.xlu1 %4210 }
 0x4f8   :  { %v12305_v33 = vadd.f32 %v4290_v15, %v4211_v38  ;;  %4746 = vadd.xlane.f32.xlu0 %v16055_v50  ;;  %v16073_v50 = vld [vmem:[#allocation87_spill] sm:$0xff] }
 0x4f9   :  { %v4611_v26 = vpop.xlane.xlu0 %4610 }
 0x4fa   :  { %5171 = vadd.xlane.f32.xlu1 %v16056_v51  ;;  %v16074_v51 = vld [vmem:[#allocation499_spill] sm:$0xff] }
 0x4fb   :  { %v4615_v24 = vpop.xlane.xlu1 %4614 }
 0x4fc   :  { %v4848_v14 = vadd.f32 %v4615_v24, %v4611_v26  ;;  %4750 = vadd.xlane.f32.xlu0 %v16057_v21 }
 0x4fd   :  { %v5036_v4 = vpop.xlane.xlu0 %5035 }
 0x4fe   :  { %5175 = vadd.xlane.f32.xlu1 %v16058_v7  ;;  %v16075_v7 = vld [vmem:[#allocation495_spill] sm:$0xff] }
 0x4ff   :  { %v5040_v52 = vpop.xlane.xlu1 %5039 }
 0x500   :  { %v5273_v32 = vadd.f32 %v5040_v52, %v5036_v4  ;;  %4754 = vadd.xlane.f32.xlu0 %v16059_v62  ;;  %v16076_v4 = vld [vmem:[#allocation232_spill] sm:$0xff] }
 0x501   :  { %v4619_v19 = vpop.xlane.xlu0 %4618 }
 0x502   :  { %5179 = vadd.xlane.f32.xlu1 %v16060_v42  ;;  %v4849_v60 = vadd.f32 %v4848_v14, %v4619_v19  ;;  %v16077_v19 = vld [vmem:[#allocation99_spill] sm:$0xff] }
 0x503   :  { %v5044_v53 = vpop.xlane.xlu1 %5043 }
 0x504   :  { %v5274_v3 = vadd.f32 %v5273_v32, %v5044_v53  ;;  %4758 = vadd.xlane.f32.xlu0 %v16061_v59 }
 0x505   :  { %v4623_v63 = vpop.xlane.xlu0 %4622 }
 0x506   :  { %5183 = vadd.xlane.f32.xlu1 %v16062_v43  ;;  %v4850_v8 = vadd.f32 %v4849_v60, %v4623_v63  ;;  %v16078_v60 = vld [vmem:[#allocation501_spill] sm:$0xff]  ;;  %v16079_v63 = vld [vmem:[#allocation230_spill] sm:$0xff] }
 0x507   :  { %v5048_v20 = vpop.xlane.xlu1 %5047 }
 0x508   :  { %v5275_v34 = vadd.f32 %v5274_v3, %v5048_v20  ;;  %4762 = vadd.xlane.f32.xlu0 %v16063_v11 }
 0x509   :  { %v4627_v12 = vpop.xlane.xlu0 %4626 }
 0x50a   :  { %5187 = vadd.xlane.f32.xlu1 %v16064_v45  ;;  %v4851_v61 = vadd.f32 %v4850_v8, %v4627_v12  ;;  %v16080_v8 = vld [vmem:[#allocation16_spill] sm:$0xff] }
 0x50b   :  { %v5052_v2 = vpop.xlane.xlu1 %5051  ;;  %v16081_v12 = vld [vmem:[#allocation108_spill] sm:$0xff] }
 0x50c   :  { %v5276_v22 = vadd.f32 %v5275_v34, %v5052_v2  ;;  %4766 = vadd.xlane.f32.xlu0 %v16065_v1 }
 0x50d   :  { %v4631_v56 = vpop.xlane.xlu0 %4630 }
 0x50e   :  { %5191 = vadd.xlane.f32.xlu1 %v16066_v58  ;;  %v4852_v16 = vadd.f32 %v4851_v61, %v4631_v56  ;;  %v16082_v61 = vld [vmem:[#allocation361_spill] sm:$0xff]  ;;  %v16083_v56 = vld [vmem:[#allocation242_spill] sm:$0xff] }
 0x50f   :  { %v5056_v18 = vpop.xlane.xlu1 %5055 }
 0x510   :  { %v5277_v0 = vadd.f32 %v5276_v22, %v5056_v18  ;;  %4770 = vadd.xlane.f32.xlu0 %v16067_v9 }
 0x511   :  { %v4635_v37 = vpop.xlane.xlu0 %4634 }
 0x512   :  { %5195 = vadd.xlane.f32.xlu1 %v16068_v35  ;;  %v4853_v23 = vadd.f32 %v4852_v16, %v4635_v37  ;;  %v16084_v16 = vld [vmem:[#allocation58_spill] sm:$0xff]  ;;  %v16085_v35 = vld [vmem:[#allocation503_spill] sm:$0xff] }
 0x513   :  { %v5060_v5 = vpop.xlane.xlu1 %5059  ;;  %v16086_v37 = vld [vmem:[#allocation542_spill] sm:$0xff] }
 0x514   :  { %v5278_v49 = vadd.f32 %v5277_v0, %v5060_v5  ;;  %4774 = vadd.xlane.f32.xlu0 %v16069_v44 }
 0x515   :  { %v4639_v39 = vpop.xlane.xlu0 %4638 }
 0x516   :  { %5199 = vadd.xlane.f32.xlu1 %v16070_v41  ;;  %v4854_v54 = vadd.f32 %v4853_v23, %v4639_v39  ;;  %v3027_v23 = vsel %vm2913_vm2, %v16086_v37, %v11873_v30  ;;  %v16092_v30 = vld [vmem:[#allocation543_spill] sm:$0xff] }
 0x517   :  { %v5064_v36 = vpop.xlane.xlu1 %5063 }
 0x518   :  { %v5279_v46 = vadd.f32 %v5278_v49, %v5064_v36  ;;  %4778 = vadd.xlane.f32.xlu0 %v16071_v28  ;;  %v16087_v49 = vld [vmem:[#allocation243_spill] sm:$0xff]  ;;  %v16089_v28 = vld [vmem:[#allocation270_spill] sm:$0xff] }
 0x519   :  { %v4643_v27 = vpop.xlane.xlu0 %4642  ;;  %v16088_v36 = vld [vmem:[#allocation379_spill] sm:$0xff] }
 0x51a   :  { %5203 = vadd.xlane.f32.xlu1 %v16072_v40  ;;  %v4855_v31 = vadd.f32 %v4854_v54, %v4643_v27  ;;  %v16090_v40 = vld [vmem:[#allocation234_spill] sm:$0xff] }
 0x51b   :  { %v5068_v15 = vpop.xlane.xlu1 %5067  ;;  %v3028_v27 = vsel %vm2913_vm2, %v16090_v40, %v11879_v29  ;;  %v16097_v29 = vld [vmem:[#allocation380_spill] sm:$0xff] }
 0x51c   :  { %v5280_v38 = vadd.f32 %v5279_v46, %v5068_v15  ;;  %4782 = vadd.xlane.f32.xlu0 %v16073_v50  ;;  %v12343_v46 = vmax.f32 %v16088_v36, %v3027_v23 }
 0x51d   :  { %v4647_v26 = vpop.xlane.xlu0 %4646 }
 0x51e   :  { %5207 = vadd.xlane.f32.xlu1 %v16074_v51  ;;  %v4856_v24 = vadd.f32 %v4855_v31, %v4647_v26  ;;  %v16091_v31 = vld [vmem:[#allocation74_spill] sm:$0xff] }
 0x51f   :  { %v5072_v14 = vpop.xlane.xlu1 %5071 }
 0x520   :  { %v5281_v21 = vadd.f32 %v5280_v38, %v5072_v14  ;;  %4786 = vadd.xlane.f32.xlu0 %v16075_v7  ;;  %v2306_v38 = vsel %vm2192_vm1, %v16092_v30, %v16086_v37  ;;  %v16095_v7 = vld [vmem:[#allocation383_spill] sm:$0xff] }
 0x521   :  { %v4651_v52 = vpop.xlane.xlu0 %4650 }
 0x522   :  { %5211 = vadd.xlane.f32.xlu1 %v16076_v4  ;;  %v4857_v32 = vadd.f32 %v4856_v24, %v4651_v52  ;;  %v16093_v24 = vld [vmem:[#allocation229_spill] sm:$0xff]  ;;  %v12357_v4 = vmax.f32 %v16095_v7, %v3028_v27  ;;  %v16096_v52 = vld [vmem:[#allocation274_spill] sm:$0xff] }
 0x523   :  { %v5076_v62 = vpop.xlane.xlu1 %5075  ;;  %v16094_v14 = vunpack.c.h.bf16 %v16093_v24 }
 0x524   :  { %v5282_v42 = vadd.f32 %v5281_v21, %v5076_v62  ;;  %4790 = vadd.xlane.f32.xlu0 %v16077_v19  ;;  %v16098_v62 = vld [vmem:[#allocation120_spill] sm:$0xff]  ;;  %v16099_v19 = vld [vmem:[#allocation509_spill] sm:$0xff] }
 0x525   :  { %v4655_v53 = vpop.xlane.xlu0 %4654  ;;  %v5020_v21 = vmul.f32 %v16094_v14, %v12343_v46 }
 0x526   :  { %5215 = vadd.xlane.f32.xlu1 %v16078_v60  ;;  %v4858_v3 = vadd.f32 %v4857_v32, %v4655_v53  ;;  %v12361_v32 = vmax.f32 %v16097_v29, %v2306_v38  ;;  %v16100_v53 = vld [vmem:[#allocation238_spill] sm:$0xff]  ;;  %v16120_v29 = vld [vmem:[#allocation395_spill] sm:$0xff] }
 0x527   :  { %v5080_v59 = vpop.xlane.xlu1 %5079  ;;  %v16118_v38 = vld [vmem:[#allocation290_spill] sm:$0xff] }
 0x528   :  { %v5283_v43 = vadd.f32 %v5282_v42, %v5080_v59  ;;  %4794 = vadd.xlane.f32.xlu0 %v16079_v63  ;;  %v3029_v42 = vsel %vm2913_vm2, %v16098_v62, %v11895_v48  ;;  %v5245_v48 = vsel %vm3574_vm3, %v5020_v21, 0.0 }
 0x529   :  { %v4659_v20 = vpop.xlane.xlu0 %4658 }
 0x52a   :  { %5219 = vadd.xlane.f32.xlu1 %v16080_v8  ;;  %v4859_v34 = vadd.f32 %v4858_v3, %v4659_v20  ;;  %v2307_v3 = vsel %vm2192_vm1, %v16100_v53, %v16090_v40  ;;  %v16101_v8 = vld [vmem:[#allocation387_spill] sm:$0xff]  ;;  %v16115_v40 = vld [vmem:[#allocation84_spill] sm:$0xff]  ;;  %v16123_v53 = vld [vmem:[#allocation253_spill] sm:$0xff] }
 0x52b   :  { %v5084_v11 = vpop.xlane.xlu1 %5083  ;;  %v12371_v20 = vmax.f32 %v16101_v8, %v3029_v42  ;;  %v16116_v27 = vunpack.c.l.bf16 %v16115_v40  ;;  %v16121_v42 = vld [vmem:[#allocation249_spill] sm:$0xff] }
 0x52c   :  { %v5284_v45 = vadd.f32 %v5283_v43, %v5084_v11  ;;  %4798 = vadd.xlane.f32.xlu0 %v16081_v12  ;;  %v16104_v12 = vld [vmem:[#allocation245_spill] sm:$0xff] }
 0x52d   :  { %v4663_v2 = vpop.xlane.xlu0 %4662 }
 0x52e   :  { %5223 = vadd.xlane.f32.xlu1 %v16082_v61  ;;  %v4860_v22 = vadd.f32 %v4859_v34, %v4663_v2  ;;  %v16102_v34 = vld [vmem:[#allocation237_spill] sm:$0xff]  ;;  %v16105_v61 = vld [vmem:[#allocation72_spill] sm:$0xff] }
 0x52f   :  { %v5088_v1 = vpop.xlane.xlu1 %5087  ;;  %v16103_v11 = vunpack.c.h.bf16 %v16102_v34  ;;  %v16106_v2 = vunpack.c.l.bf16 %v16105_v61  ;;  %v16127_v34 = vld [vmem:[#allocation314_spill] sm:$0xff] }
 0x530   :  { %v5285_v58 = vadd.f32 %v5284_v45, %v5088_v1  ;;  %4802 = vadd.xlane.f32.xlu0 %v16083_v56  ;;  %v16107_v1 = vld [vmem:[#allocation384_spill] sm:$0xff] }
 0x531   :  { %v4667_v18 = vpop.xlane.xlu0 %4666  ;;  %v5022_v45 = vmul.f32 %v16103_v11, %v12357_v4  ;;  %v16108_v56 = vld [vmem:[#allocation160_spill] sm:$0xff]  ;;  %v3032_v11 = vsel %vm2913_vm2, %v16127_v34, %v11929_v25 }
 0x532   :  { %5227 = vadd.xlane.f32.xlu1 %v16084_v16  ;;  %v4861_v0 = vadd.f32 %v4860_v22, %v4667_v18  ;;  %v5019_v22 = vmul.f32 %v16106_v2, %v12361_v32  ;;  %v3030_v16 = vsel %vm2913_vm2, %v16108_v56, %v11900_v10  ;;  %v16109_v18 = vld [vmem:[#allocation504_spill] sm:$0xff] }
 0x533   :  { %v5092_v9 = vpop.xlane.xlu1 %5091  ;;  %v5249_v10 = vsel %vm3574_vm3, %v5022_v45, 0.0 }
 0x534   :  { %4806 = vadd.xlane.f32.xlu0 %v16085_v35  ;;  %v5286_v5 = vadd.f32 %v5285_v58, %v5092_v9  ;;  %v12382_v58 = vmax.f32 %v16107_v1, %v2307_v3  ;;  %v16110_v9 = vld [vmem:[#allocation124_spill] sm:$0xff] }
 0x535   :  { %v4671_v44 = vpop.xlane.xlu0 %4670  ;;  %v2308_v35 = vsel %vm2192_vm1, %v16110_v9, %v16098_v62  ;;  %v16124_v3 = vld [vmem:[#allocation88_spill] sm:$0xff] }
 0x536   :  { %5231 = vadd.xlane.f32.xlu1 %v16087_v49  ;;  %v4862_v41 = vadd.f32 %v4861_v0, %v4671_v44  ;;  %v5246_v49 = vadd.f32 %v5245_v48, %v5019_v22  ;;  %v16111_v44 = vld [vmem:[#allocation241_spill] sm:$0xff] }
 0x537   :  { %v5096_v39 = vpop.xlane.xlu1 %5095 }
 0x538   :  { %v5287_v54 = vadd.f32 %v5286_v5, %v5096_v39  ;;  %4810 = vadd.xlane.f32.xlu0 %v16089_v28  ;;  %v16114_v28 = vld [vmem:[#allocation144_spill] sm:$0xff] }
 0x539   :  { %v4675_v15 = vpop.xlane.xlu0 %4674 }
 0x53a   :  { %5235 = vadd.xlane.f32.xlu1 %v16091_v31  ;;  %v4863_v50 = vadd.f32 %v4862_v41, %v4675_v15  ;;  %v16112_v41 = vunpack.c.h.bf16 %v16111_v44  ;;  %v5021_v31 = vmul.f32 %v16116_v27, %v12382_v58  ;;  %v16117_v15 = vld [vmem:[#allocation388_spill] sm:$0xff] }
 0x53b   :  { %v5100_v51 = vpop.xlane.xlu1 %5099  ;;  %v12403_v30 = vmax.f32 %v16117_v15, %v2308_v35  ;;  %v16132_v35 = vld [vmem:[#allocation152_spill] sm:$0xff] }
 0x53c   :  { %v5288_v26 = vadd.f32 %v5287_v54, %v5100_v51  ;;  %4814 = vadd.xlane.f32.xlu0 %v16096_v52  ;;  %v5024_v39 = vmul.f32 %v16112_v41, %v12371_v20  ;;  %v16113_v54 = vld [vmem:[#allocation391_spill] sm:$0xff]  ;;  %v5250_v52 = vadd.f32 %v5249_v10, %v5021_v31  ;;  %v16136_v41 = vld [vmem:[#allocation208_spill] sm:$0xff] }
 0x53d   :  { %v4679_v60 = vpop.xlane.xlu0 %4678  ;;  %v12395_v36 = vmax.f32 %v16113_v54, %v3030_v16 }
 0x53e   :  { %5239 = vadd.xlane.f32.xlu1 %v16099_v19  ;;  %v4864_v59 = vadd.f32 %v4863_v50, %v4679_v60  ;;  %v3031_v50 = vsel %vm2913_vm2, %v16118_v38, %v11923_v13  ;;  %v16122_v19 = vunpack.c.h.bf16 %v16121_v42  ;;  %v5253_v13 = vsel %vm3574_vm3, %v5024_v39, 0.0 }
 0x53f   :  { %v5104_v43 = vpop.xlane.xlu1 %5103  ;;  %v12412_v62 = vmax.f32 %v16120_v29, %v3031_v50  ;;  %v3033_v39 = vsel %vm2913_vm2, %v16136_v41, %v11945_v55  ;;  %v16144_v29 = vld [vmem:[#allocation400_spill] sm:$0xff] }
 0x540   :  { %v5289_v63 = vadd.f32 %v5288_v26, %v5104_v43  ;;  %4818 = vadd.xlane.f32.xlu0 %v16104_v12  ;;  %v16119_v26 = vld [vmem:[#allocation551_spill] sm:$0xff]  ;;  %v5026_v60 = vmul.f32 %v16122_v19, %v12395_v36  ;;  %v16128_v12 = vld [vmem:[#allocation294_spill] sm:$0xff] }
 0x541   :  { %v4683_v0 = vpop.xlane.xlu0 %4682  ;;  %v2309_v24 = vsel %vm2192_vm1, %v16119_v26, %v16108_v56  ;;  %v2310_v48 = vsel %vm2192_vm1, %v16128_v12, %v16118_v38  ;;  %v16129_v56 = vld [vmem:[#allocation470_spill] sm:$0xff]  ;;  %v16138_v38 = vld [vmem:[#allocation403_spill] sm:$0xff] }
 0x542   :  { %5243 = vadd.xlane.f32.xlu1 %v16109_v18  ;;  %v4865_v37 = vadd.f32 %v4864_v59, %v4683_v0  ;;  %v16125_v59 = vunpack.c.l.bf16 %v16124_v3  ;;  %v16130_v16 = vunpack.c.h.bf16 %v16129_v56  ;;  %v16131_v0 = vld [vmem:[#allocation399_spill] sm:$0xff]  ;;  %v5257_v25 = vsel %vm3574_vm3, %v5026_v60, 0.0  ;;  %v16145_v60 = vld [vmem:[#allocation212_spill] sm:$0xff] }
 0x543   :  { %v5108_v23 = vpop.xlane.xlu1 %5107  ;;  %v12435_v9 = vmax.f32 %v16131_v0, %v3032_v11  ;;  %v3273_v50 = vmax.f32 %v16138_v38, %v3033_v39  ;;  %v16152_v0 = vunpack.c.h.bf16 %v11732_v17 }
 0x544   :  { %v5290_v5 = vadd.f32 %v5289_v63, %v5108_v23  ;;  %4822 = vadd.xlane.f32.xlu0 %v16114_v28  ;;  %v5023_v43 = vmul.f32 %v16125_v59, %v12403_v30  ;;  %v16126_v63 = vld [vmem:[#allocation392_spill] sm:$0xff]  ;;  %v5028_v18 = vmul.f32 %v16130_v16, %v12412_v62  ;;  %v16137_v28 = vld [vmem:[#allocation318_spill] sm:$0xff] }
 0x545   :  { %v4687_v51 = vpop.xlane.xlu0 %4686  ;;  %v12423_v8 = vmax.f32 %v16126_v63, %v2309_v24  ;;  %v2311_v10 = vsel %vm2192_vm1, %v16137_v28, %v16127_v34  ;;  %v16146_v63 = vld [vmem:[#allocation483_spill] sm:$0xff] }
 0x546   :  { %5247 = vadd.xlane.f32.xlu1 %v5246_v49  ;;  %v4866_v14 = vadd.f32 %v4865_v37, %v4687_v51  ;;  %v5254_v1 = vadd.f32 %v5253_v13, %v5023_v43  ;;  %v16133_v37 = vld [vmem:[#allocation537_spill] sm:$0xff]  ;;  %v16135_v49 = vld [vmem:[#allocation396_spill] sm:$0xff]  ;;  %v5261_v55 = vsel %vm3574_vm3, %v5028_v18, 0.0  ;;  %v12461_v42 = vmax.f32 %v16144_v29, %v2311_v10 }
 0x547   :  { %v5112_v21 = vpop.xlane.xlu1 %5111  ;;  %v16134_v23 = vunpack.c.l.bf16 %v16133_v37  ;;  %v12443_v44 = vmax.f32 %v16135_v49, %v2310_v48  ;;  %v16139_v51 = vld [vmem:[#allocation257_spill] sm:$0xff]  ;;  %v16147_v34 = vunpack.c.h.bf16 %v16146_v63  ;;  %v16149_v48 = vld [vmem:[#allocation116_spill] sm:$0xff] }
 0x548   :  { %v5291_v7 = vadd.f32 %v5290_v5, %v5112_v21  ;;  %4826 = vadd.xlane.f32.xlu0 %v16123_v53  ;;  %v16140_v26 = vunpack.c.h.bf16 %v16139_v51  ;;  %v16142_v21 = vld [vmem:[#allocation104_spill] sm:$0xff]  ;;  %v2312_v53 = vsel %vm2192_vm1, %v16145_v60, %v16136_v41  ;;  %v16155_v41 = vld [vmem:[#allocation491_spill] sm:$0xff] }
 0x549   :  { %v4691_v45 = vpop.xlane.xlu0 %4690  ;;  %v5025_v5 = vmul.f32 %v16134_v23, %v12423_v8  ;;  %v5032_v11 = vmul.f32 %v16147_v34, %v3273_v50  ;;  %v16153_v23 = vld [vmem:[#allocation55_spill] sm:$0xff] }
 0x54a   :  { %5251 = vadd.xlane.f32.xlu1 %v5250_v52  ;;  %v4867_v61 = vadd.f32 %v4866_v14, %v4691_v45  ;;  %v5030_v24 = vmul.f32 %v16140_v26, %v12435_v9  ;;  %v16141_v14 = vld [vmem:[#allocation265_spill] sm:$0xff]  ;;  %v16163_v29 = vunpack.c.l.bf16 %v16153_v23  ;;  %v16166_v34 = vld [vmem:[#allocation247_spill] sm:$0xff] }
 0x54b   :  { %v5116_v2 = vpop.xlane.xlu1 %5115  ;;  %v5258_v15 = vadd.f32 %v5257_v25, %v5025_v5  ;;  %v16148_v45 = vld [vmem:[#allocation261_spill] sm:$0xff]  ;;  %v16154_v5 = vunpack.c.h.bf16 %v16153_v23  ;;  %v5269_v39 = vsel %vm3574_vm3, %v5032_v11, 0.0 }
 0x54c   :  { %v5292_v22 = vadd.f32 %v5291_v7, %v5116_v2  ;;  %4830 = vadd.xlane.f32.xlu0 %v16132_v35  ;;  %v16143_v7 = vunpack.c.l.bf16 %v16142_v21  ;;  %v5265_v12 = vsel %vm3574_vm3, %v5030_v24, 0.0  ;;  %v3987_v35 = vmul.f32 %v16152_v0, %v12343_v46 }
 0x54d   :  { %v4695_v54 = vpop.xlane.xlu0 %4694  ;;  %v3989_v49 = vmul.f32 %v16154_v5, %v12357_v4  ;;  %v16160_v4 = vunpack.c.l.bf16 %v11732_v17  ;;  %v16164_v17 = vunpack.c.h.bf16 %v11788_v47 }
 0x54e   :  { %5255 = vadd.xlane.f32.xlu1 %v5254_v1  ;;  %v4868_v40 = vadd.f32 %v4867_v61, %v4695_v54  ;;  %v5027_v52 = vmul.f32 %v16143_v7, %v12443_v44  ;;  %v16150_v61 = vunpack.c.l.bf16 %v16149_v48  ;;  %v16156_v54 = vld [vmem:[#allocation559_spill] sm:$0xff]  ;;  %v4212_v24 = vsel %vm3574_vm3, %v3987_v35, 0.0  ;;  %v16162_v7 = vld [vmem:[#allocation497_spill] sm:$0xff] }
 0x54f   :  { %v5120_v27 = vpop.xlane.xlu1 %5119  ;;  %v16157_v28 = vunpack.c.l.bf16 %v16156_v54 }
 0x550   :  { %v5293_v31 = vadd.f32 %v5292_v22, %v5120_v27  ;;  %4834 = vadd.xlane.f32.xlu0 %v16141_v14  ;;  %v5262_v43 = vadd.f32 %v5261_v55, %v5027_v52  ;;  %v5029_v2 = vmul.f32 %v16150_v61, %v12461_v42  ;;  %v16151_v22 = vld [vmem:[#allocation404_spill] sm:$0xff]  ;;  %v3986_v14 = vmul.f32 %v16160_v4, %v12361_v32 }
 0x551   :  { %v4699_v19 = vpop.xlane.xlu0 %4698  ;;  %v3272_v1 = vmax.f32 %v16151_v22, %v2312_v53  ;;  %v16161_v55 = vunpack.c.h.bf16 %v11765_v57  ;;  %v4216_v52 = vsel %vm3574_vm3, %v3989_v49, 0.0  ;;  %v3995_v32 = vmul.f32 %v16164_v17, %v12412_v62 }
 0x552   :  { %5259 = vadd.xlane.f32.xlu1 %v5258_v15  ;;  %v4869_v13 = vadd.f32 %v4868_v40, %v4699_v19  ;;  %v5266_v37 = vadd.f32 %v5265_v12, %v5029_v2  ;;  %v16158_v15 = vld [vmem:[#allocation251_spill] sm:$0xff]  ;;  %v16168_v12 = vunpack.c.l.bf16 %v11765_v57 }
 0x553   :  { %v5124_v3 = vpop.xlane.xlu1 %5123  ;;  %v5031_v10 = vmul.f32 %v16157_v28, %v3272_v1  ;;  %v16159_v46 = vunpack.c.h.bf16 %v16158_v15  ;;  %v3993_v21 = vmul.f32 %v16161_v55, %v12395_v36  ;;  %v4228_v35 = vsel %vm3574_vm3, %v3995_v32, 0.0 }
 0x554   :  { %v5294_v59 = vadd.f32 %v5293_v31, %v5124_v3  ;;  %4838 = vadd.xlane.f32.xlu0 %v16148_v45  ;;  %v3992_v48 = vmul.f32 %v16168_v12, %v12423_v8  ;;  %v16172_v8 = vunpack.c.l.bf16 %v16166_v34 }
 0x555   :  { %v4703_v56 = vpop.xlane.xlu0 %4702  ;;  %v3991_v38 = vmul.f32 %v16159_v46, %v12371_v20  ;;  %v5270_v26 = vadd.f32 %v5269_v39, %v5031_v10  ;;  %v3988_v20 = vmul.f32 %v16163_v29, %v12382_v58  ;;  %v16167_v58 = vunpack.c.h.bf16 %v16166_v34 }
 0x556   :  { %5263 = vadd.xlane.f32.xlu1 %v5262_v43  ;;  %v4870_v16 = vadd.f32 %v4869_v13, %v4703_v56  ;;  %v4213_v13 = vadd.f32 %v4212_v24, %v3986_v14  ;;  %v16165_v43 = vunpack.c.l.bf16 %v16158_v15  ;;  %v4224_v45 = vsel %vm3574_vm3, %v3993_v21, 0.0  ;;  %v16169_v56 = vld [vmem:[#allocation511_spill] sm:$0xff] }
 0x557   :  { %v5128_v18 = vpop.xlane.xlu1 %5127  ;;  %v4220_v36 = vsel %vm3574_vm3, %v3991_v38, 0.0  ;;  %v3997_v11 = vmul.f32 %v16167_v58, %v12435_v9  ;;  %v4225_v0 = vadd.f32 %v4224_v45, %v3992_v48  ;;  %v16171_v9 = vunpack.c.l.bf16 %v11788_v47 }
 0x558   :  { %v5295_v25 = vadd.f32 %v5294_v59, %v5128_v18  ;;  %4842 = vadd.xlane.f32.xlu0 %v16155_v41  ;;  %v4217_v59 = vadd.f32 %v4216_v52, %v3988_v20  ;;  %v3990_v63 = vmul.f32 %v16165_v43, %v12403_v30  ;;  %v16173_v28 = vunpack.c.l.bf16 %v16169_v56 }
 0x559   :  { %v4707_v40 = vpop.xlane.xlu0 %4706  ;;  %v4232_v57 = vsel %vm3574_vm3, %v3997_v11, 0.0 }
 0x55a   :  { %5267 = vadd.xlane.f32.xlu1 %v5266_v37  ;;  %v4871_v27 = vadd.f32 %v4870_v16, %v4707_v40  ;;  %v4221_v22 = vadd.f32 %v4220_v36, %v3990_v63  ;;  %v16170_v16 = vunpack.c.h.bf16 %v16169_v56  ;;  %v3996_v37 = vmul.f32 %v16172_v8, %v12461_v42 }
 0x55b   :  { %v5132_v31 = vpop.xlane.xlu1 %5131  ;;  %v3998_v47 = vmul.f32 %v16173_v28, %v3272_v1 }
 0x55c   :  { %v5296_v51 = vadd.f32 %v5295_v25, %v5132_v31  ;;  %4846 = vadd.xlane.f32.xlu0 %v16162_v7  ;;  %v3999_v18 = vmul.f32 %v16170_v16, %v3273_v50  ;;  %v3994_v25 = vmul.f32 %v16171_v9, %v12443_v44  ;;  %v4233_v39 = vadd.f32 %v4232_v57, %v3996_v37 }
 0x55d   :  { %v4711_v19 = vpop.xlane.xlu0 %4710 }
 0x55e   :  { %5271 = vadd.xlane.f32.xlu1 %v5270_v26  ;;  %v4872_v60 = vadd.f32 %v4871_v27, %v4711_v19  ;;  %v4229_v50 = vadd.f32 %v4228_v35, %v3994_v25  ;;  %v4236_v54 = vsel %vm3574_vm3, %v3999_v18, 0.0 }
 0x55f   :  { %v5136_v53 = vpop.xlane.xlu1 %5135  ;;  %v4237_v40 = vadd.f32 %v4236_v54, %v3998_v47 }
 0x560   :  { %v5297_v3 = vadd.f32 %v5296_v51, %v5136_v53  ;;  %4214 = vadd.xlane.f32.xlu0 %v4213_v13 }
 0x561   :  { %v4715_v62 = vpop.xlane.xlu0 %4714 }
 0x562   :  { %4218 = vadd.xlane.f32.xlu1 %v4217_v59  ;;  %v4873_v61 = vadd.f32 %v4872_v60, %v4715_v62 }
 0x563   :  { %v5140_v2 = vpop.xlane.xlu1 %5139 }
 0x564   :  { %v5298_v30 = vadd.f32 %v5297_v3, %v5140_v2  ;;  %4222 = vadd.xlane.f32.xlu0 %v4221_v22 }
 0x565   :  { %v4719_v23 = vpop.xlane.xlu0 %4718 }
 0x566   :  { %4226 = vadd.xlane.f32.xlu1 %v4225_v0  ;;  %v4874_v5 = vadd.f32 %v4873_v61, %v4719_v23 }
 0x567   :  { %v5144_v49 = vpop.xlane.xlu1 %5143 }
 0x568   :  { %v5299_v41 = vadd.f32 %v5298_v30, %v5144_v49  ;;  %4230 = vadd.xlane.f32.xlu0 %v4229_v50 }
 0x569   :  { %v4723_v44 = vpop.xlane.xlu0 %4722 }
 0x56a   :  { %4234 = vadd.xlane.f32.xlu1 %v4233_v39  ;;  %v4875_v58 = vadd.f32 %v4874_v5, %v4723_v44 }
 0x56b   :  { %v5148_v10 = vpop.xlane.xlu1 %5147 }
 0x56c   :  { %4238 = vadd.xlane.f32.xlu0 %v4237_v40  ;;  %v5300_v11 = vadd.f32 %v5299_v41, %v5148_v10 }
 0x56d   :  { %v4727_v27 = vpop.xlane.xlu0 %4726 }
 0x56e   :  { %v4876_v12 = vadd.f32 %v4875_v58, %v4727_v27 }
 0x56f   :  { %v5152_v42 = vpop.xlane.xlu1 %5151 }
 0x570   :  { %v5301_v62 = vadd.f32 %v5300_v11, %v5152_v42 }
 0x571   :  { %v4731_v31 = vpop.xlane.xlu0 %4730 }
 0x572   :  { %v4877_v61 = vadd.f32 %v4876_v12, %v4731_v31 }
 0x573   :  { %v5156_v15 = vpop.xlane.xlu1 %5155 }
 0x574   :  { %v5302_v2 = vadd.f32 %v5301_v62, %v5156_v15 }
 0x575   :  { %v4735_v46 = vpop.xlane.xlu0 %4734 }
 0x576   :  { %v4878_v56 = vadd.f32 %v4877_v61, %v4735_v46 }
 0x577   :  { %v5160_v38 = vpop.xlane.xlu1 %5159 }
 0x578   :  { %v5303_v18 = vadd.f32 %v5302_v2, %v5160_v38 }
 0x579   :  { %v4739_v51 = vpop.xlane.xlu0 %4738 }
 0x57a   :  { %v4879_v30 = vadd.f32 %v4878_v56, %v4739_v51 }
 0x57b   :  { %v5164_v26 = vpop.xlane.xlu1 %5163 }
 0x57c   :  { %v5304_v0 = vadd.f32 %v5303_v18, %v5164_v26 }
 0x57d   :  { %v4743_v24 = vpop.xlane.xlu0 %4742 }
 0x57e   :  { %v4880_v9 = vadd.f32 %v4879_v30, %v4743_v24 }
 0x57f   :  { %v5168_v4 = vpop.xlane.xlu1 %5167 }
 0x580   :  { %v5305_v57 = vadd.f32 %v5304_v0, %v5168_v4 }
 0x581   :  { %v4747_v14 = vpop.xlane.xlu0 %4746 }
 0x582   :  { %v4881_v8 = vadd.f32 %v4880_v9, %v4747_v14 }
 0x583   :  { %v5172_v55 = vpop.xlane.xlu1 %5171 }
 0x584   :  { %v5306_v37 = vadd.f32 %v5305_v57, %v5172_v55 }
 0x585   :  { %v4751_v21 = vpop.xlane.xlu0 %4750 }
 0x586   :  { %v4882_v5 = vadd.f32 %v4881_v8, %v4751_v21 }
 0x587   :  { %v5176_v1 = vpop.xlane.xlu1 %5175 }
 0x588   :  { %v5307_v50 = vadd.f32 %v5306_v37, %v5176_v1 }
 0x589   :  { %v4755_v7 = vpop.xlane.xlu0 %4754 }
 0x58a   :  { %v4883_v41 = vadd.f32 %v4882_v5, %v4755_v7 }
 0x58b   :  { %v5180_v52 = vpop.xlane.xlu1 %5179 }
 0x58c   :  { %v5308_v39 = vadd.f32 %v5307_v50, %v5180_v52 }
 0x58d   :  { %v4759_v29 = vpop.xlane.xlu0 %4758 }
 0x58e   :  { %v4884_v28 = vadd.f32 %v4883_v41, %v4759_v29 }
 0x58f   :  { %v5184_v20 = vpop.xlane.xlu1 %5183 }
 0x590   :  { %v5309_v44 = vadd.f32 %v5308_v39, %v5184_v20 }
 0x591   :  { %v4763_v19 = vpop.xlane.xlu0 %4762 }
 0x592   :  { %v4885_v10 = vadd.f32 %v4884_v28, %v4763_v19 }
 0x593   :  { %v5188_v60 = vpop.xlane.xlu1 %5187 }
 0x594   :  { %v5310_v40 = vadd.f32 %v5309_v44, %v5188_v60 }
 0x595   :  { %v4767_v53 = vpop.xlane.xlu0 %4766 }
 0x596   :  { %v4886_v42 = vadd.f32 %v4885_v10, %v4767_v53 }
 0x597   :  { %v5192_v13 = vpop.xlane.xlu1 %5191 }
 0x598   :  { %v5311_v15 = vadd.f32 %v5310_v40, %v5192_v13 }
 0x599   :  { %v4771_v17 = vpop.xlane.xlu0 %4770 }
 0x59a   :  { %v4887_v46 = vadd.f32 %v4886_v42, %v4771_v17 }
 0x59b   :  { %v5196_v32 = vpop.xlane.xlu1 %5195 }
 0x59c   :  { %v5312_v38 = vadd.f32 %v5311_v15, %v5196_v32 }
 0x59d   :  { %v4775_v3 = vpop.xlane.xlu0 %4774 }
 0x59e   :  { %v4888_v26 = vadd.f32 %v4887_v46, %v4775_v3 }
 0x59f   :  { %v5200_v59 = vpop.xlane.xlu1 %5199 }
 0x5a0   :  { %v5313_v4 = vadd.f32 %v5312_v38, %v5200_v59 }
 0x5a1   :  { %v4779_v36 = vpop.xlane.xlu0 %4778 }
 0x5a2   :  { %v4889_v14 = vadd.f32 %v4888_v26, %v4779_v36 }
 0x5a3   :  { %v5204_v43 = vpop.xlane.xlu1 %5203 }
 0x5a4   :  { %v5314_v55 = vadd.f32 %v5313_v4, %v5204_v43 }
 0x5a5   :  { %v4783_v63 = vpop.xlane.xlu0 %4782 }
 0x5a6   :  { %v4890_v1 = vadd.f32 %v4889_v14, %v4783_v63 }
 0x5a7   :  { %v5208_v34 = vpop.xlane.xlu1 %5207 }
 0x5a8   :  { %v5315_v52 = vadd.f32 %v5314_v55, %v5208_v34 }
 0x5a9   :  { %v4787_v45 = vpop.xlane.xlu0 %4786 }
 0x5aa   :  { %v4891_v29 = vadd.f32 %v4890_v1, %v4787_v45  ;;  %v3874_v1 = vrot.slane %v12251_v6, 4 }
 0x5ab   :  { %v5212_v48 = vpop.xlane.xlu1 %5211 }
 0x5ac   :  { %v5316_v20 = vadd.f32 %v5315_v52, %v5212_v48 }
 0x5ad   :  { %v4791_v22 = vpop.xlane.xlu0 %4790 }
 0x5ae   :  { %v4892_v60 = vadd.f32 %v4891_v29, %v4791_v22 }
 0x5af   :  { %v5216_v16 = vpop.xlane.xlu1 %5215 }
 0x5b0   :  { %v5317_v53 = vadd.f32 %v5316_v20, %v5216_v16 }
 0x5b1   :  { %v4795_v35 = vpop.xlane.xlu0 %4794 }
 0x5b2   :  { %v4893_v11 = vadd.f32 %v4892_v60, %v4795_v35 }
 0x5b3   :  { %v5220_v25 = vpop.xlane.xlu1 %5219 }
 0x5b4   :  { %v5318_v13 = vadd.f32 %v5317_v53, %v5220_v25 }
 0x5b5   :  { %v4799_v23 = vpop.xlane.xlu0 %4798 }
 0x5b6   :  { %v4894_v32 = vadd.f32 %v4893_v11, %v4799_v23  ;;  %v3875_v11 = vadd.f32 %v3874_v1, %v12251_v6 }
 0x5b7   :  { %v5224_v49 = vpop.xlane.xlu1 %5223 }
 0x5b8   :  { %v5319_v3 = vadd.f32 %v5318_v13, %v5224_v49 }
 0x5b9   :  { %v4803_v54 = vpop.xlane.xlu0 %4802 }
 0x5ba   :  { %v4895_v62 = vadd.f32 %v4894_v32, %v4803_v54 }
 0x5bb   :  { %v5228_v47 = vpop.xlane.xlu1 %5227 }
 0x5bc   :  { %v5320_v59 = vadd.f32 %v5319_v3, %v5228_v47 }
 0x5bd   :  { %v4807_v27 = vpop.xlane.xlu0 %4806 }
 0x5be   :  { %v4896_v43 = vadd.f32 %v4895_v62, %v4807_v27 }
 0x5bf   :  { %v5232_v31 = vpop.xlane.xlu1 %5231 }
 0x5c0   :  { %v5321_v63 = vadd.f32 %v5320_v59, %v5232_v31  ;;  %v3876_v59 = vrot.slane %v3875_v11, 2 }
 0x5c1   :  { %v4811_v51 = vpop.xlane.xlu0 %4810 }
 0x5c2   :  { %v4897_v2 = vadd.f32 %v4896_v43, %v4811_v51 }
 0x5c3   :  { %v5236_v24 = vpop.xlane.xlu1 %5235 }
 0x5c4   :  { %v5322_v34 = vadd.f32 %v5321_v63, %v5236_v24 }
 0x5c5   :  { %v4815_v21 = vpop.xlane.xlu0 %4814 }
 0x5c6   :  { %v4898_v48 = vadd.f32 %v4897_v2, %v4815_v21 }
 0x5c7   :  { %v5240_v7 = vpop.xlane.xlu1 %5239 }
 0x5c8   :  { %v5323_v22 = vadd.f32 %v5322_v34, %v5240_v7 }
 0x5c9   :  { %v4819_v19 = vpop.xlane.xlu0 %4818 }
 0x5ca   :  { %v4899_v18 = vadd.f32 %v4898_v48, %v4819_v19 }
 0x5cb   :  { %v5244_v58 = vpop.xlane.xlu1 %5243 }
 0x5cc   :  { %v5324_v16 = vadd.f32 %v5323_v22, %v5244_v58 }
 0x5cd   :  { %v4823_v17 = vpop.xlane.xlu0 %4822 }
 0x5ce   :  { %v4900_v0 = vadd.f32 %v4899_v18, %v4823_v17  ;;  %v5431_v18 = vld [vmem:[%s12539_s2] ss:$0 sm:$0xff] }
 0x5cf   :  { %v5248_v12 = vpop.xlane.xlu1 %5247 }
 0x5d0   :  { %v5325_v9 = vadd.f32 %v5324_v16, %v5248_v12 }
 0x5d1   :  { %v4827_v36 = vpop.xlane.xlu0 %4826 }
 0x5d2   :  { %v4901_v25 = vadd.f32 %v4900_v0, %v4827_v36 }
 0x5d3   :  { %v5252_v61 = vpop.xlane.xlu1 %5251 }
 0x5d4   :  { %v5326_v57 = vadd.f32 %v5325_v9, %v5252_v61  ;;  %v3877_v61 = vadd.f32 %v3876_v59, %v3875_v11 }
 0x5d5   :  { %v4831_v45 = vpop.xlane.xlu0 %4830 }
 0x5d6   :  { %v4902_v37 = vadd.f32 %v4901_v25, %v4831_v45  ;;  %v3878_v34 = vrot.slane %v3877_v61, 1 }
 0x5d7   :  { %v5256_v56 = vpop.xlane.xlu1 %5255 }
 0x5d8   :  { %v5327_v5 = vadd.f32 %v5326_v57, %v5256_v56  ;;  %v3879_v48 = vadd.f32 %v3878_v34, %v3877_v61 }
 0x5d9   :  { %v4835_v30 = vpop.xlane.xlu0 %4834 }
 0x5da   :  { %v4903_v49 = vadd.f32 %v4902_v37, %v4835_v30 }
 0x5db   :  { %v5260_v35 = vpop.xlane.xlu1 %5259 }
 0x5dc   :  { %v5328_v50 = vadd.f32 %v5327_v5, %v5260_v35 }
 0x5dd   :  { %v4839_v8 = vpop.xlane.xlu0 %4838 }
 0x5de   :  { %v4904_v39 = vadd.f32 %v4903_v49, %v4839_v8 }
 0x5df   :  { %v5264_v23 = vpop.xlane.xlu1 %5263 }
 0x5e0   :  { %v5329_v28 = vadd.f32 %v5328_v50, %v5264_v23 }
 0x5e1   :  { %v4843_v41 = vpop.xlane.xlu0 %4842 }
 0x5e2   :  { %v4905_v47 = vadd.f32 %v4904_v39, %v4843_v41 }
 0x5e3   :  { %v5268_v54 = vpop.xlane.xlu1 %5267 }
 0x5e4   :  { %v5330_v44 = vadd.f32 %v5329_v28, %v5268_v54 }
 0x5e5   :  { %v4847_v10 = vpop.xlane.xlu0 %4846 }
 0x5e6   :  { %v4906_v40 = vadd.f32 %v4905_v47, %v4847_v10 }
 0x5e7   :  { %v5272_v27 = vpop.xlane.xlu1 %5271 }
 0x5e8   :  { %v5331_v42 = vadd.f32 %v5330_v44, %v5272_v27  ;;  %v4907_v31 = vrot.slane %v4906_v40, 4 }
 0x5e9   :  { %v4215_v46 = vpop.xlane.xlu0 %4214 }
 0x5ea   :  { %v5332_v15 = vrot.slane %v5331_v42, 4  ;;  %v4908_v38 = vadd.f32 %v4907_v31, %v4906_v40  ;;  %v4292_v51 = vadd.f32 %v12305_v33, %v4215_v46 }
 0x5eb   :  { %v4219_v26 = vpop.xlane.xlu1 %4218 }
 0x5ec   :  { %v5333_v24 = vadd.f32 %v5332_v15, %v5331_v42  ;;  %v4909_v4 = vrot.slane %v4908_v38, 2  ;;  %v4293_v14 = vadd.f32 %v4292_v51, %v4219_v26 }
 0x5ed   :  { %v4223_v21 = vpop.xlane.xlu0 %4222 }
 0x5ee   :  { %v5334_v55 = vrot.slane %v5333_v24, 2  ;;  %v4910_v7 = vadd.f32 %v4909_v4, %v4908_v38  ;;  %v4294_v52 = vadd.f32 %v4293_v14, %v4223_v21 }
 0x5ef   :  { %v4227_v29 = vpop.xlane.xlu1 %4226 }
 0x5f0   :  { %v5335_v20 = vadd.f32 %v5334_v55, %v5333_v24  ;;  %v4911_v19 = vrot.slane %v4910_v7, 1  ;;  %v4295_v60 = vadd.f32 %v4294_v52, %v4227_v29 }
 0x5f1   :  { %v4231_v53 = vpop.xlane.xlu0 %4230 }
 0x5f2   :  { %v5336_v58 = vrot.slane %v5335_v20, 1  ;;  %v4912_v13 = vadd.f32 %v4911_v19, %v4910_v7  ;;  %v4296_v33 = vadd.f32 %v4295_v60, %v4231_v53 }
 0x5f3   :  { %v4235_v17 = vpop.xlane.xlu1 %4234 }
 0x5f4   :  { %v5337_v32 = vadd.f32 %v5336_v58, %v5335_v20  ;;  %v4297_v12 = vadd.f32 %v4296_v33, %v4235_v17 }
 0x5f5   :  { %v4239_v3 = vpop.xlane.xlu0 %4238 }
 0x5f6   :  { %v5338_v62 = vsel %vm4305_vm4, %v4912_v13, %v5337_v32  ;;  %v4298_v36 = vadd.f32 %v4297_v12, %v4239_v3 }
 0x5f7   :  { %5340 = vrot.lane.b32.xlu1 %v5338_v62, %s5586_s1 }
 0x5f8   :  { %v4299_v43 = vrot.slane %v4298_v36, 4 }
 0x5fa   :  { %v4300_v63 = vadd.f32 %v4299_v43, %v4298_v36 }
 0x5fc   :  { %v4301_v2 = vrot.slane %v4300_v63, 2 }
 0x5fe   :  { %v4302_v45 = vadd.f32 %v4301_v2, %v4300_v63 }
 0x600   :  { %v4303_v6 = vrot.slane %v4302_v45, 1 }
 0x602   :  { %v4304_v56 = vadd.f32 %v4303_v6, %v4302_v45 }
 0x604   :  { %v4306_v22 = vsel %vm4305_vm4, %v3879_v48, %v4304_v56 }
 0x669   :  { %v5341_v16 = vpop.permute.xlu1 %5340 }
 0x66a   :  { %v5344_v30 = vsel %vm5343_vm5, %v4306_v22, %v5341_v16 }
 0x66b   :  { %v5352_v0 = vadd.f32 %v5431_v18, %v5344_v30 }
 0x66d   :  { %v5353_v35 = vmax.f32 %v5352_v0, 0.0 }
 0x66f   :  { %5355 = vst.msk [vmem:[#allocation5] sm:$0x3] %vm5354_vm6, %v5353_v35 }
 0x670   :  { %5568 = shalt.err (!%p5565_p9)
}
 0x671   :  { %5365 = dma.vmem_to_hbm [thread:$0]  %s5363_s19, 32, %s12540_s3, [#allocation4]  }
 0x672   :  { %5579 = dma.done.wait [#allocation4], 32  }
 0x673   :  { %5580 = vsyncadd [#allocation4], 4294967264 }
 0x674   :  { %5369 = vsyncpa [#allocation3], 1 }
 0x675   :  { %5370 = vsyncpa [#allocation4], 1 }

</bundles_post_ra>
